<compile_context>
chip_gen: v7x
topology: tpu7x:2x2x1
jax: 0.10.0
libtpu: 0.0.40
codegen_flags: <defaults>
</compile_context>

<pallas_src>
import math
import functools

import jax
import jax.numpy as jnp
from jax.experimental import pallas as pl
from jax.experimental.pallas import tpu as pltpu


# ---------------------------- in-kernel helpers ----------------------------

def _layer_norm(x, gamma, beta, eps=1e-5):
    mu = jnp.mean(x, axis=-1, keepdims=True)
    var = jnp.mean(jnp.square(x - mu), axis=-1, keepdims=True)
    return (x - mu) * jax.lax.rsqrt(var + eps) * gamma + beta


def _gelu(x):
    # exact (erf) GELU, matching torch.nn.functional.gelu default
    return 0.5 * x * (1.0 + jax.lax.erf(x * (1.0 / math.sqrt(2.0))))


# ---------------------------- fused forward kernel ----------------------------

def _fe_forward_kernel(
    xcat_ref, pe_ref, cls_ref, tokw_ref,
    wqkv_ref, bqkv_ref, wo_ref, bo_ref,
    g1_ref, be1_ref, g2_ref, be2_ref,
    w1_ref, b1_ref, w2_ref, b2_ref,
    gf_ref, bf_ref, wp_ref, bp_ref,
    cls_out_ref, enc_out_ref,
    h_scratch, attn_scratch,
    *, B, L, C, D, H, S, S_pad, n_layers):

    E = D // H
    scale = 1.0 / math.sqrt(E)
    BS = B * S_pad

    # ---- DataEmbedding: circular Conv1d(k=3, bias=False) as matmul + positional emb ----
    xcat = xcat_ref[...]                                                 # (B, L, 3C)
    tok = jnp.dot(xcat.reshape(B * L, 3 * C), tokw_ref[...],
                  preferred_element_type=jnp.float32)                    # (B*L, D)
    emb = tok.reshape(B, L, D) + pe_ref[...][None, :, :]                 # (B, L, D)

    # assemble [cls ; tokens ; zero-pad] per batch into the sublane-aligned sequence
    h_scratch[:, 0:1, :] = jnp.broadcast_to(cls_ref[...][None, :, :], (B, 1, D))
    h_scratch[:, 1:1 + L, :] = emb
    if S_pad > S:
        h_scratch[:, S:S_pad, :] = jnp.zeros((B, S_pad - S, D), jnp.float32)

    hf = h_scratch[...].reshape(BS, D)                                   # (B*S_pad, D)

    # additive mask so padded key columns never contaminate real queries
    col = jax.lax.broadcasted_iota(jnp.int32, (1, 1, S_pad), 2)
    key_mask = jnp.where(col < S, 0.0, -1e30).astype(jnp.float32)

    # ---- encoder: n_layers x (attention + pointwise-conv FFN), gelu, no causal mask ----
    for l in range(n_layers):
        # fused Q/K/V projection: one (D, 3D) matmul
        qkv = jnp.dot(hf, wqkv_ref[l],
                      preferred_element_type=jnp.float32) + bqkv_ref[l]  # (BS, 3D)
        q = qkv[:, 0:D].reshape(B, S_pad, D)
        k = qkv[:, D:2 * D].reshape(B, S_pad, D)
        v = qkv[:, 2 * D:3 * D].reshape(B, S_pad, D)

        # all heads in one grid step; heads sliced on the lane axis (no (B,H,S,E) transposes)
        for hh in range(H):
            sl = slice(hh * E, (hh + 1) * E)
            qh, kh, vh = q[:, :, sl], k[:, :, sl], v[:, :, sl]           # (B, S_pad, E)
            s = jnp.einsum('bqe,bke->bqk', qh, kh,
                           preferred_element_type=jnp.float32) * scale + key_mask
            m = jnp.max(s, axis=-1, keepdims=True)
            p = jnp.exp(s - m)
            p = p * pl.reciprocal(jnp.sum(p, axis=-1, keepdims=True), approx=True)
            attn_scratch[:, :, sl] = jnp.einsum('bqk,bke->bqe', p, vh,
                                                preferred_element_type=jnp.float32)

        # output projection (still in VMEM) + fused residual-add + LayerNorm1
        new_x = jnp.dot(attn_scratch[...].reshape(BS, D), wo_ref[l],
                        preferred_element_type=jnp.float32) + bo_ref[l]
        x1 = _layer_norm(hf + new_x, g1_ref[l], be1_ref[l])

        # fused FFN: conv1(k=1) + GELU + conv2(k=1)
        y = jnp.dot(x1, w1_ref[l], preferred_element_type=jnp.float32) + b1_ref[l]
        y = _gelu(y)
        y = jnp.dot(y, w2_ref[l], preferred_element_type=jnp.float32) + b2_ref[l]

        # fused residual-add + LayerNorm2
        hf = _layer_norm(x1 + y, g2_ref[l], be2_ref[l])

    # ---- encoder-final LayerNorm, cls output, token projection ----
    hf = _layer_norm(hf, gf_ref[...], bf_ref[...])                       # (BS, D)
    h3 = hf.reshape(B, S_pad, D)
    cls_out_ref[...] = h3[:, 0, :]                                       # (B, D)
    # TODO(synk): for production c_out, write the projection as a >=128-lane slab and
    # slice in the wrapper to avoid masked stores; at C=4 this is a single vreg store.
    proj = jnp.dot(hf, wp_ref[...],
                   preferred_element_type=jnp.float32) + bp_ref[...]     # (BS, C)
    enc_out_ref[...] = proj.reshape(B, S_pad, C)[:, 1:1 + L, :]          # (B, L, C)


# ---------------------------- wrapper ----------------------------

def _full_spec(shape):
    nd = len(shape)
    return pl.BlockSpec(shape, lambda i, _nd=nd: (0,) * _nd)


def fe_model_forward(params, x):
    """x: (B, L, C_in) -> (cls_out: (B, d_model), enc_out: (B, L, C_in))."""
    B, L, C = x.shape
    D = params["d_model"]
    H = params["n_heads"]
    n_layers = params["wqkv"].shape[0]
    S = L + 1
    S_pad = ((S + 7) // 8) * 8         # sublane-aligned sequence length (9 -> 16)

    # circular Conv1d(k=3, pad=1, circular) unfolded as [x_{t-1}, x_t, x_{t+1}]
    # TODO(synk): at large L fold these taps into the kernel with pltpu.roll instead.
    x_cat = jnp.concatenate(
        [jnp.roll(x, 1, axis=1), x, jnp.roll(x, -1, axis=1)], axis=-1)   # (B, L, 3C)

    operands = (
        x_cat, params["pe"][:L], params["cls_token"], params["tok_w"],
        params["wqkv"], params["bqkv"], params["wo"], params["bo"],
        params["g1"], params["be1"], params["g2"], params["be2"],
        params["w1"], params["b1"], params["w2"], params["b2"],
        params["gf"], params["bf"], params["wp"], params["bp"],
    )

    kern = functools.partial(_fe_forward_kernel, B=B, L=L, C=C, D=D, H=H,
                             S=S, S_pad=S_pad, n_layers=n_layers)

    cls_out, enc_out = pl.pallas_call(
        kern,
        out_shape=(jax.ShapeDtypeStruct((B, D), jnp.float32),
                   jax.ShapeDtypeStruct((B, L, C), jnp.float32)),
        grid=(1,),
        in_specs=[_full_spec(op.shape) for op in operands],
        out_specs=(_full_spec((B, D)), _full_spec((B, L, C))),
        scratch_shapes=[pltpu.VMEM((B, S_pad, D), jnp.float32),   # hidden assembly
                        pltpu.VMEM((B, S_pad, D), jnp.float32)],  # attention output
        compiler_params=pltpu.CompilerParams(
            dimension_semantics=("arbitrary",)),
    )(*operands)
    return cls_out, enc_out


# ---------------------------- parameters ----------------------------

def make_pe(max_len, d_model):
    position = jnp.arange(max_len, dtype=jnp.float32)[:, None]
    div_term = jnp.exp(jnp.arange(0, d_model, 2, dtype=jnp.float32)
                       * -(math.log(10000.0) / d_model))
    ang = position * div_term
    pe = jnp.zeros((max_len, d_model), jnp.float32)
    pe = pe.at[:, 0::2].set(jnp.sin(ang))
    pe = pe.at[:, 1::2].set(jnp.cos(ang))
    return pe


def make_params(key, input_ch, d_model, n_heads=8, e_layers=3, d_ff=512, max_len=5000):
    keys = jax.random.split(key, 3 + e_layers)

    def dense(k, fan_in, fan_out):
        return 0.05 * jax.random.normal(k, (fan_in, fan_out), jnp.float32)

    p = {"d_model": d_model, "n_heads": n_heads}
    p["pe"] = make_pe(max_len, d_model)
    # circular Conv1d(c_in, d_model, k=3, bias=False) as a (3*c_in, d_model) matmul
    p["tok_w"] = dense(keys[0], 3 * input_ch, d_model)
    p["cls_token"] = jax.random.normal(keys[1], (1, d_model), jnp.float32)
    p["wp"] = dense(keys[2], d_model, input_ch)                    # final Linear(d_model, c_out)
    p["bp"] = jnp.zeros((1, input_ch), jnp.float32)
    p["gf"] = jnp.ones((1, d_model), jnp.float32)                  # encoder-final LayerNorm
    p["bf"] = jnp.zeros((1, d_model), jnp.float32)

    wqkv, wo, w1, w2 = [], [], [], []
    for l in range(e_layers):
        lk = jax.random.split(keys[3 + l], 6)
        # fused QKV weight: [Wq | Wk | Wv] along the output dim
        wqkv.append(jnp.concatenate([dense(lk[0], d_model, d_model),
                                     dense(lk[1], d_model, d_model),
                                     dense(lk[2], d_model, d_model)], axis=1))
        wo.append(dense(lk[3], d_model, d_model))
        w1.append(dense(lk[4], d_model, d_ff))
        w2.append(dense(lk[5], d_ff, d_model))
    p["wqkv"] = jnp.stack(wqkv)                                           # (nl, D, 3D)
    p["bqkv"] = jnp.zeros((e_layers, 1, 3 * d_model), jnp.float32)
    p["wo"] = jnp.stack(wo)
    p["bo"] = jnp.zeros((e_layers, 1, d_model), jnp.float32)
    p["w1"] = jnp.stack(w1)
    p["b1"] = jnp.zeros((e_layers, 1, d_ff), jnp.float32)
    p["w2"] = jnp.stack(w2)
    p["b2"] = jnp.zeros((e_layers, 1, d_model), jnp.float32)
    p["g1"] = jnp.ones((e_layers, 1, d_model), jnp.float32)
    p["be1"] = jnp.zeros((e_layers, 1, d_model), jnp.float32)
    p["g2"] = jnp.ones((e_layers, 1, d_model), jnp.float32)
    p["be2"] = jnp.zeros((e_layers, 1, d_model), jnp.float32)
    return p


if __name__ == "__main__":
    B, L, C_IN, D_MODEL = 2, 8, 4, 32      # d_model divisible by n_heads=8 (head dim E=4)
    key = jax.random.PRNGKey(0)
    pkey, xkey = jax.random.split(key)

    params = make_params(pkey, C_IN, D_MODEL)
    x = jax.random.normal(xkey, (B, L, C_IN), jnp.float32)

    fwd = jax.jit(lambda xx: fe_model_forward(params, xx))
    cls_out, enc_out = fwd(x)
    jax.block_until_ready((cls_out, enc_out))

    assert cls_out.shape == (B, D_MODEL)
    assert enc_out.shape == (B, L, C_IN)
    assert jnp.isfinite(cls_out).all() and jnp.isfinite(enc_out).all()
    print("KERNEL_OK")
</pallas_src>

<mosaic_0001>
module attributes {stable_mosaic.version = 11 : i64} {
  func.func @_fe_forward_kernel(%arg0: i32, %arg1: memref<2x8x12xf32, #tpu.memory_space<vmem>>, %arg2: memref<8x32xf32, #tpu.memory_space<vmem>>, %arg3: memref<1x32xf32, #tpu.memory_space<vmem>>, %arg4: memref<12x32xf32, #tpu.memory_space<vmem>>, %arg5: memref<3x32x96xf32, #tpu.memory_space<vmem>>, %arg6: memref<3x1x96xf32, #tpu.memory_space<vmem>>, %arg7: memref<3x32x32xf32, #tpu.memory_space<vmem>>, %arg8: memref<3x1x32xf32, #tpu.memory_space<vmem>>, %arg9: memref<3x1x32xf32, #tpu.memory_space<vmem>>, %arg10: memref<3x1x32xf32, #tpu.memory_space<vmem>>, %arg11: memref<3x1x32xf32, #tpu.memory_space<vmem>>, %arg12: memref<3x1x32xf32, #tpu.memory_space<vmem>>, %arg13: memref<3x32x512xf32, #tpu.memory_space<vmem>>, %arg14: memref<3x1x512xf32, #tpu.memory_space<vmem>>, %arg15: memref<3x512x32xf32, #tpu.memory_space<vmem>>, %arg16: memref<3x1x32xf32, #tpu.memory_space<vmem>>, %arg17: memref<1x32xf32, #tpu.memory_space<vmem>>, %arg18: memref<1x32xf32, #tpu.memory_space<vmem>>, %arg19: memref<32x4xf32, #tpu.memory_space<vmem>>, %arg20: memref<1x4xf32, #tpu.memory_space<vmem>>, %arg21: memref<2x32xf32, #tpu.memory_space<vmem>>, %arg22: memref<2x8x4xf32, #tpu.memory_space<vmem>>, %arg23: memref<2x16x32xf32, #tpu.memory_space<vmem>>, %arg24: memref<2x16x32xf32, #tpu.memory_space<vmem>>) attributes {dimension_semantics = [#tpu.dimension_semantics<arbitrary>], iteration_bounds = array<i64: 1>, scalar_prefetch = 0 : i64, scratch_operands = 2 : i64, tpu.core_type = #tpu.core_type<tc>, window_params = [{pipeline_mode = #tpu.pipeline_mode<synchronous>, transform_indices = @transform_0, window_bounds = array<i64: 2, 8, 12>}, {pipeline_mode = #tpu.pipeline_mode<synchronous>, transform_indices = @transform_1, window_bounds = array<i64: 8, 32>}, {pipeline_mode = #tpu.pipeline_mode<synchronous>, transform_indices = @transform_2, window_bounds = array<i64: 1, 32>}, {pipeline_mode = #tpu.pipeline_mode<synchronous>, transform_indices = @transform_3, window_bounds = array<i64: 12, 32>}, {pipeline_mode = #tpu.pipeline_mode<synchronous>, transform_indices = @transform_4, window_bounds = array<i64: 3, 32, 96>}, {pipeline_mode = #tpu.pipeline_mode<synchronous>, transform_indices = @transform_5, window_bounds = array<i64: 3, 1, 96>}, {pipeline_mode = #tpu.pipeline_mode<synchronous>, transform_indices = @transform_6, window_bounds = array<i64: 3, 32, 32>}, {pipeline_mode = #tpu.pipeline_mode<synchronous>, transform_indices = @transform_7, window_bounds = array<i64: 3, 1, 32>}, {pipeline_mode = #tpu.pipeline_mode<synchronous>, transform_indices = @transform_8, window_bounds = array<i64: 3, 1, 32>}, {pipeline_mode = #tpu.pipeline_mode<synchronous>, transform_indices = @transform_9, window_bounds = array<i64: 3, 1, 32>}, {pipeline_mode = #tpu.pipeline_mode<synchronous>, transform_indices = @transform_10, window_bounds = array<i64: 3, 1, 32>}, {pipeline_mode = #tpu.pipeline_mode<synchronous>, transform_indices = @transform_11, window_bounds = array<i64: 3, 1, 32>}, {pipeline_mode = #tpu.pipeline_mode<synchronous>, transform_indices = @transform_12, window_bounds = array<i64: 3, 32, 512>}, {pipeline_mode = #tpu.pipeline_mode<synchronous>, transform_indices = @transform_13, window_bounds = array<i64: 3, 1, 512>}, {pipeline_mode = #tpu.pipeline_mode<synchronous>, transform_indices = @transform_14, window_bounds = array<i64: 3, 512, 32>}, {pipeline_mode = #tpu.pipeline_mode<synchronous>, transform_indices = @transform_15, window_bounds = array<i64: 3, 1, 32>}, {pipeline_mode = #tpu.pipeline_mode<synchronous>, transform_indices = @transform_16, window_bounds = array<i64: 1, 32>}, {pipeline_mode = #tpu.pipeline_mode<synchronous>, transform_indices = @transform_17, window_bounds = array<i64: 1, 32>}, {pipeline_mode = #tpu.pipeline_mode<synchronous>, transform_indices = @transform_18, window_bounds = array<i64: 32, 4>}, {pipeline_mode = #tpu.pipeline_mode<synchronous>, transform_indices = @transform_19, window_bounds = array<i64: 1, 4>}, {pipeline_mode = #tpu.pipeline_mode<synchronous>, transform_indices = @transform_20, window_bounds = array<i64: 2, 32>}, {pipeline_mode = #tpu.pipeline_mode<synchronous>, transform_indices = @transform_21, window_bounds = array<i64: 2, 8, 4>}]} {
    %c0 = arith.constant 0 : index
    %c0_0 = arith.constant 0 : index
    %c0_1 = arith.constant 0 : index
    %0 = vector.load %arg1[%c0, %c0_0, %c0_1] : memref<2x8x12xf32, #tpu.memory_space<vmem>>, vector<2x8x12xf32>
    %1 = vector.shape_cast %0 : vector<2x8x12xf32> to vector<16x12xf32>
    %c0_2 = arith.constant 0 : index
    %c0_3 = arith.constant 0 : index
    %2 = vector.load %arg4[%c0_2, %c0_3] : memref<12x32xf32, #tpu.memory_space<vmem>>, vector<12x32xf32>
    %cst = arith.constant dense<0.000000e+00> : vector<16x32xf32>
    %3 = tpu.matmul %1, %2, %cst {dimension_numbers = #tpu.dot_dimension_numbers<[1], [0], [0], [1], [0, 0, 1, 1], [], []>} : vector<16x12xf32>, vector<12x32xf32>, vector<16x32xf32> -> vector<16x32xf32>
    %4 = vector.shape_cast %3 : vector<16x32xf32> to vector<2x8x32xf32>
    %c0_4 = arith.constant 0 : index
    %c0_5 = arith.constant 0 : index
    %5 = vector.load %arg2[%c0_4, %c0_5] : memref<8x32xf32, #tpu.memory_space<vmem>>, vector<8x32xf32>
    %6 = vector.shape_cast %5 : vector<8x32xf32> to vector<1x8x32xf32>
    %7 = vector.broadcast %6 : vector<1x8x32xf32> to vector<2x8x32xf32>
    %8 = arith.addf %4, %7 : vector<2x8x32xf32>
    %c0_6 = arith.constant 0 : index
    %c0_7 = arith.constant 0 : index
    %9 = vector.load %arg3[%c0_6, %c0_7] : memref<1x32xf32, #tpu.memory_space<vmem>>, vector<1x32xf32>
    %10 = vector.shape_cast %9 : vector<1x32xf32> to vector<1x1x32xf32>
    %11 = vector.shape_cast %10 : vector<1x1x32xf32> to vector<1x1x32xf32>
    %12 = vector.broadcast %11 : vector<1x1x32xf32> to vector<2x1x32xf32>
    %c0_8 = arith.constant 0 : index
    %c0_9 = arith.constant 0 : index
    %c0_10 = arith.constant 0 : index
    %13 = vector.load %arg23[%c0_8, %c0_9, %c0_10] : memref<2x16x32xf32, #tpu.memory_space<vmem>>, vector<2x1x32xf32>
    tpu.vector_store %arg23[%c0_8, %c0_9, %c0_10], %12 {strides = array<i32>} : memref<2x16x32xf32, #tpu.memory_space<vmem>>, vector<2x1x32xf32>,
    %c0_11 = arith.constant 0 : index
    %c1 = arith.constant 1 : index
    %c0_12 = arith.constant 0 : index
    %14 = vector.load %arg23[%c0_11, %c1, %c0_12] : memref<2x16x32xf32, #tpu.memory_space<vmem>>, vector<2x8x32xf32>
    tpu.vector_store %arg23[%c0_11, %c1, %c0_12], %8 {strides = array<i32>} : memref<2x16x32xf32, #tpu.memory_space<vmem>>, vector<2x8x32xf32>,
    %cst_13 = arith.constant 0.000000e+00 : f32
    %15 = vector.broadcast %cst_13 : f32 to vector<2x7x32xf32>
    %c0_14 = arith.constant 0 : index
    %c9 = arith.constant 9 : index
    %c0_15 = arith.constant 0 : index
    %16 = vector.load %arg23[%c0_14, %c9, %c0_15] : memref<2x16x32xf32, #tpu.memory_space<vmem>>, vector<2x7x32xf32>
    tpu.vector_store %arg23[%c0_14, %c9, %c0_15], %15 {strides = array<i32>} : memref<2x16x32xf32, #tpu.memory_space<vmem>>, vector<2x7x32xf32>,
    %c0_16 = arith.constant 0 : index
    %c0_17 = arith.constant 0 : index
    %c0_18 = arith.constant 0 : index
    %17 = vector.load %arg23[%c0_16, %c0_17, %c0_18] : memref<2x16x32xf32, #tpu.memory_space<vmem>>, vector<2x16x32xf32>
    %18 = vector.shape_cast %17 : vector<2x16x32xf32> to vector<32x32xf32>
    %19 = tpu.iota {dimensions = array<i32: 2>} : vector<1x1x16xi32>
    %c9_i32 = arith.constant 9 : i32
    %20 = vector.broadcast %c9_i32 : i32 to vector<1x1x16xi32>
    %21 = arith.cmpi slt, %19, %20 : vector<1x1x16xi32>
    %cst_19 = arith.constant 0.000000e+00 : f32
    %cst_20 = arith.constant -1.000000e+30 : f32
    %22 = vector.broadcast %cst_19 : f32 to vector<1x1x16xf32>
    %23 = vector.broadcast %cst_20 : f32 to vector<1x1x16xf32>
    %24 = arith.select %21, %22, %23 : vector<1x1x16xi1>, vector<1x1x16xf32>
    %c0_21 = arith.constant 0 : index
    %c0_22 = arith.constant 0 : index
    %c0_23 = arith.constant 0 : index
    %25 = vector.load %arg5[%c0_21, %c0_22, %c0_23] : memref<3x32x96xf32, #tpu.memory_space<vmem>>, vector<1x32x96xf32>
    %26 = vector.shape_cast %25 : vector<1x32x96xf32> to vector<32x96xf32>
    %cst_24 = arith.constant dense<0.000000e+00> : vector<32x96xf32>
    %27 = tpu.matmul %18, %26, %cst_24 {dimension_numbers = #tpu.dot_dimension_numbers<[1], [0], [0], [1], [0, 0, 1, 1], [], []>} : vector<32x32xf32>, vector<32x96xf32>, vector<32x96xf32> -> vector<32x96xf32>
    %c0_25 = arith.constant 0 : index
    %c0_26 = arith.constant 0 : index
    %c0_27 = arith.constant 0 : index
    %28 = vector.load %arg6[%c0_25, %c0_26, %c0_27] : memref<3x1x96xf32, #tpu.memory_space<vmem>>, vector<1x1x96xf32>
    %29 = vector.shape_cast %28 : vector<1x1x96xf32> to vector<1x96xf32>
    %30 = vector.broadcast %29 : vector<1x96xf32> to vector<32x96xf32>
    %31 = arith.addf %27, %30 : vector<32x96xf32>
    %32 = vector.extract_strided_slice %31 {offsets = [0, 0], sizes = [32, 32], strides = [1, 1]} : vector<32x96xf32> to vector<32x32xf32>
    %33 = vector.shape_cast %32 : vector<32x32xf32> to vector<2x16x32xf32>
    %34 = vector.extract_strided_slice %31 {offsets = [0, 32], sizes = [32, 32], strides = [1, 1]} : vector<32x96xf32> to vector<32x32xf32>
    %35 = vector.shape_cast %34 : vector<32x32xf32> to vector<2x16x32xf32>
    %36 = vector.extract_strided_slice %31 {offsets = [0, 64], sizes = [32, 32], strides = [1, 1]} : vector<32x96xf32> to vector<32x32xf32>
    %37 = vector.shape_cast %36 : vector<32x32xf32> to vector<2x16x32xf32>
    %38 = vector.extract_strided_slice %33 {offsets = [0, 0, 0], sizes = [2, 16, 4], strides = [1, 1, 1]} : vector<2x16x32xf32> to vector<2x16x4xf32>
    %39 = vector.extract_strided_slice %35 {offsets = [0, 0, 0], sizes = [2, 16, 4], strides = [1, 1, 1]} : vector<2x16x32xf32> to vector<2x16x4xf32>
    %40 = vector.extract_strided_slice %37 {offsets = [0, 0, 0], sizes = [2, 16, 4], strides = [1, 1, 1]} : vector<2x16x32xf32> to vector<2x16x4xf32>
    "tpu.trace_start"() <{level = 10 : i32, message = "bqe,bke->bqk"}> : () -> ()
    %cst_28 = arith.constant dense<0.000000e+00> : vector<2x16x16xf32>
    %41 = tpu.matmul %38, %39, %cst_28 {dimension_numbers = #tpu.dot_dimension_numbers<[2], [2], [1], [1], [0, 0, 0, 1, 1, 1], [0], [0]>} : vector<2x16x4xf32>, vector<2x16x4xf32>, vector<2x16x16xf32> -> vector<2x16x16xf32>
    "tpu.trace_stop"() : () -> ()
    %cst_29 = arith.constant 5.000000e-01 : f32
    %42 = vector.broadcast %cst_29 : f32 to vector<2x16x16xf32>
    %43 = arith.mulf %41, %42 : vector<2x16x16xf32>
    %44 = vector.broadcast %24 : vector<1x1x16xf32> to vector<2x16x16xf32>
    %45 = arith.addf %43, %44 : vector<2x16x16xf32>
    %cst_30 = arith.constant dense<0xFF800000> : vector<2x16xf32>
    %46 = vector.multi_reduction <maximumf>, %45, %cst_30 [2] : vector<2x16x16xf32> to vector<2x16xf32>
    %47 = vector.shape_cast %46 : vector<2x16xf32> to vector<2x16x1xf32>
    %48 = vector.broadcast %47 : vector<2x16x1xf32> to vector<2x16x16xf32>
    %49 = arith.subf %45, %48 : vector<2x16x16xf32>
    %50 = math.exp %49 : vector<2x16x16xf32>
    %cst_31 = arith.constant dense<0.000000e+00> : vector<2x16xf32>
    %51 = vector.multi_reduction <add>, %50, %cst_31 [2] : vector<2x16x16xf32> to vector<2x16xf32>
    %52 = vector.shape_cast %51 : vector<2x16xf32> to vector<2x16x1xf32>
    %53 = tpu.reciprocal %52 {approx = true} : vector<2x16x1xf32> -> vector<2x16x1xf32>
    %54 = vector.broadcast %53 : vector<2x16x1xf32> to vector<2x16x16xf32>
    %55 = arith.mulf %50, %54 : vector<2x16x16xf32>
    "tpu.trace_start"() <{level = 10 : i32, message = "bqk,bke->bqe"}> : () -> ()
    %cst_32 = arith.constant dense<0.000000e+00> : vector<2x16x4xf32>
    %56 = tpu.matmul %55, %40, %cst_32 {dimension_numbers = #tpu.dot_dimension_numbers<[2], [1], [1], [2], [0, 0, 0, 1, 1, 2], [0], [0]>} : vector<2x16x16xf32>, vector<2x16x4xf32>, vector<2x16x4xf32> -> vector<2x16x4xf32>
    "tpu.trace_stop"() : () -> ()
    %c0_33 = arith.constant 0 : index
    %c0_34 = arith.constant 0 : index
    %c0_35 = arith.constant 0 : index
    %57 = vector.load %arg24[%c0_33, %c0_34, %c0_35] : memref<2x16x32xf32, #tpu.memory_space<vmem>>, vector<2x16x4xf32>
    tpu.vector_store %arg24[%c0_33, %c0_34, %c0_35], %56 {strides = array<i32>} : memref<2x16x32xf32, #tpu.memory_space<vmem>>, vector<2x16x4xf32>,
    %58 = vector.extract_strided_slice %33 {offsets = [0, 0, 4], sizes = [2, 16, 4], strides = [1, 1, 1]} : vector<2x16x32xf32> to vector<2x16x4xf32>
    %59 = vector.extract_strided_slice %35 {offsets = [0, 0, 4], sizes = [2, 16, 4], strides = [1, 1, 1]} : vector<2x16x32xf32> to vector<2x16x4xf32>
    %60 = vector.extract_strided_slice %37 {offsets = [0, 0, 4], sizes = [2, 16, 4], strides = [1, 1, 1]} : vector<2x16x32xf32> to vector<2x16x4xf32>
    "tpu.trace_start"() <{level = 10 : i32, message = "bqe,bke->bqk"}> : () -> ()
    %cst_36 = arith.constant dense<0.000000e+00> : vector<2x16x16xf32>
    %61 = tpu.matmul %58, %59, %cst_36 {dimension_numbers = #tpu.dot_dimension_numbers<[2], [2], [1], [1], [0, 0, 0, 1, 1, 1], [0], [0]>} : vector<2x16x4xf32>, vector<2x16x4xf32>, vector<2x16x16xf32> -> vector<2x16x16xf32>
    "tpu.trace_stop"() : () -> ()
    %cst_37 = arith.constant 5.000000e-01 : f32
    %62 = vector.broadcast %cst_37 : f32 to vector<2x16x16xf32>
    %63 = arith.mulf %61, %62 : vector<2x16x16xf32>
    %64 = vector.broadcast %24 : vector<1x1x16xf32> to vector<2x16x16xf32>
    %65 = arith.addf %63, %64 : vector<2x16x16xf32>
    %cst_38 = arith.constant dense<0xFF800000> : vector<2x16xf32>
    %66 = vector.multi_reduction <maximumf>, %65, %cst_38 [2] : vector<2x16x16xf32> to vector<2x16xf32>
    %67 = vector.shape_cast %66 : vector<2x16xf32> to vector<2x16x1xf32>
    %68 = vector.broadcast %67 : vector<2x16x1xf32> to vector<2x16x16xf32>
    %69 = arith.subf %65, %68 : vector<2x16x16xf32>
    %70 = math.exp %69 : vector<2x16x16xf32>
    %cst_39 = arith.constant dense<0.000000e+00> : vector<2x16xf32>
    %71 = vector.multi_reduction <add>, %70, %cst_39 [2] : vector<2x16x16xf32> to vector<2x16xf32>
    %72 = vector.shape_cast %71 : vector<2x16xf32> to vector<2x16x1xf32>
    %73 = tpu.reciprocal %72 {approx = true} : vector<2x16x1xf32> -> vector<2x16x1xf32>
    %74 = vector.broadcast %73 : vector<2x16x1xf32> to vector<2x16x16xf32>
    %75 = arith.mulf %70, %74 : vector<2x16x16xf32>
    "tpu.trace_start"() <{level = 10 : i32, message = "bqk,bke->bqe"}> : () -> ()
    %cst_40 = arith.constant dense<0.000000e+00> : vector<2x16x4xf32>
    %76 = tpu.matmul %75, %60, %cst_40 {dimension_numbers = #tpu.dot_dimension_numbers<[2], [1], [1], [2], [0, 0, 0, 1, 1, 2], [0], [0]>} : vector<2x16x16xf32>, vector<2x16x4xf32>, vector<2x16x4xf32> -> vector<2x16x4xf32>
    "tpu.trace_stop"() : () -> ()
    %c0_41 = arith.constant 0 : index
    %c0_42 = arith.constant 0 : index
    %c4 = arith.constant 4 : index
    %77 = vector.load %arg24[%c0_41, %c0_42, %c4] : memref<2x16x32xf32, #tpu.memory_space<vmem>>, vector<2x16x4xf32>
    tpu.vector_store %arg24[%c0_41, %c0_42, %c4], %76 {strides = array<i32>} : memref<2x16x32xf32, #tpu.memory_space<vmem>>, vector<2x16x4xf32>,
    %78 = vector.extract_strided_slice %33 {offsets = [0, 0, 8], sizes = [2, 16, 4], strides = [1, 1, 1]} : vector<2x16x32xf32> to vector<2x16x4xf32>
    %79 = vector.extract_strided_slice %35 {offsets = [0, 0, 8], sizes = [2, 16, 4], strides = [1, 1, 1]} : vector<2x16x32xf32> to vector<2x16x4xf32>
    %80 = vector.extract_strided_slice %37 {offsets = [0, 0, 8], sizes = [2, 16, 4], strides = [1, 1, 1]} : vector<2x16x32xf32> to vector<2x16x4xf32>
    "tpu.trace_start"() <{level = 10 : i32, message = "bqe,bke->bqk"}> : () -> ()
    %cst_43 = arith.constant dense<0.000000e+00> : vector<2x16x16xf32>
    %81 = tpu.matmul %78, %79, %cst_43 {dimension_numbers = #tpu.dot_dimension_numbers<[2], [2], [1], [1], [0, 0, 0, 1, 1, 1], [0], [0]>} : vector<2x16x4xf32>, vector<2x16x4xf32>, vector<2x16x16xf32> -> vector<2x16x16xf32>
    "tpu.trace_stop"() : () -> ()
    %cst_44 = arith.constant 5.000000e-01 : f32
    %82 = vector.broadcast %cst_44 : f32 to vector<2x16x16xf32>
    %83 = arith.mulf %81, %82 : vector<2x16x16xf32>
    %84 = vector.broadcast %24 : vector<1x1x16xf32> to vector<2x16x16xf32>
    %85 = arith.addf %83, %84 : vector<2x16x16xf32>
    %cst_45 = arith.constant dense<0xFF800000> : vector<2x16xf32>
    %86 = vector.multi_reduction <maximumf>, %85, %cst_45 [2] : vector<2x16x16xf32> to vector<2x16xf32>
    %87 = vector.shape_cast %86 : vector<2x16xf32> to vector<2x16x1xf32>
    %88 = vector.broadcast %87 : vector<2x16x1xf32> to vector<2x16x16xf32>
    %89 = arith.subf %85, %88 : vector<2x16x16xf32>
    %90 = math.exp %89 : vector<2x16x16xf32>
    %cst_46 = arith.constant dense<0.000000e+00> : vector<2x16xf32>
    %91 = vector.multi_reduction <add>, %90, %cst_46 [2] : vector<2x16x16xf32> to vector<2x16xf32>
    %92 = vector.shape_cast %91 : vector<2x16xf32> to vector<2x16x1xf32>
    %93 = tpu.reciprocal %92 {approx = true} : vector<2x16x1xf32> -> vector<2x16x1xf32>
    %94 = vector.broadcast %93 : vector<2x16x1xf32> to vector<2x16x16xf32>
    %95 = arith.mulf %90, %94 : vector<2x16x16xf32>
    "tpu.trace_start"() <{level = 10 : i32, message = "bqk,bke->bqe"}> : () -> ()
    %cst_47 = arith.constant dense<0.000000e+00> : vector<2x16x4xf32>
    %96 = tpu.matmul %95, %80, %cst_47 {dimension_numbers = #tpu.dot_dimension_numbers<[2], [1], [1], [2], [0, 0, 0, 1, 1, 2], [0], [0]>} : vector<2x16x16xf32>, vector<2x16x4xf32>, vector<2x16x4xf32> -> vector<2x16x4xf32>
    "tpu.trace_stop"() : () -> ()
    %c0_48 = arith.constant 0 : index
    %c0_49 = arith.constant 0 : index
    %c8 = arith.constant 8 : index
    %97 = vector.load %arg24[%c0_48, %c0_49, %c8] : memref<2x16x32xf32, #tpu.memory_space<vmem>>, vector<2x16x4xf32>
    tpu.vector_store %arg24[%c0_48, %c0_49, %c8], %96 {strides = array<i32>} : memref<2x16x32xf32, #tpu.memory_space<vmem>>, vector<2x16x4xf32>,
    %98 = vector.extract_strided_slice %33 {offsets = [0, 0, 12], sizes = [2, 16, 4], strides = [1, 1, 1]} : vector<2x16x32xf32> to vector<2x16x4xf32>
    %99 = vector.extract_strided_slice %35 {offsets = [0, 0, 12], sizes = [2, 16, 4], strides = [1, 1, 1]} : vector<2x16x32xf32> to vector<2x16x4xf32>
    %100 = vector.extract_strided_slice %37 {offsets = [0, 0, 12], sizes = [2, 16, 4], strides = [1, 1, 1]} : vector<2x16x32xf32> to vector<2x16x4xf32>
    "tpu.trace_start"() <{level = 10 : i32, message = "bqe,bke->bqk"}> : () -> ()
    %cst_50 = arith.constant dense<0.000000e+00> : vector<2x16x16xf32>
    %101 = tpu.matmul %98, %99, %cst_50 {dimension_numbers = #tpu.dot_dimension_numbers<[2], [2], [1], [1], [0, 0, 0, 1, 1, 1], [0], [0]>} : vector<2x16x4xf32>, vector<2x16x4xf32>, vector<2x16x16xf32> -> vector<2x16x16xf32>
    "tpu.trace_stop"() : () -> ()
    %cst_51 = arith.constant 5.000000e-01 : f32
    %102 = vector.broadcast %cst_51 : f32 to vector<2x16x16xf32>
    %103 = arith.mulf %101, %102 : vector<2x16x16xf32>
    %104 = vector.broadcast %24 : vector<1x1x16xf32> to vector<2x16x16xf32>
    %105 = arith.addf %103, %104 : vector<2x16x16xf32>
    %cst_52 = arith.constant dense<0xFF800000> : vector<2x16xf32>
    %106 = vector.multi_reduction <maximumf>, %105, %cst_52 [2] : vector<2x16x16xf32> to vector<2x16xf32>
    %107 = vector.shape_cast %106 : vector<2x16xf32> to vector<2x16x1xf32>
    %108 = vector.broadcast %107 : vector<2x16x1xf32> to vector<2x16x16xf32>
    %109 = arith.subf %105, %108 : vector<2x16x16xf32>
    %110 = math.exp %109 : vector<2x16x16xf32>
    %cst_53 = arith.constant dense<0.000000e+00> : vector<2x16xf32>
    %111 = vector.multi_reduction <add>, %110, %cst_53 [2] : vector<2x16x16xf32> to vector<2x16xf32>
    %112 = vector.shape_cast %111 : vector<2x16xf32> to vector<2x16x1xf32>
    %113 = tpu.reciprocal %112 {approx = true} : vector<2x16x1xf32> -> vector<2x16x1xf32>
    %114 = vector.broadcast %113 : vector<2x16x1xf32> to vector<2x16x16xf32>
    %115 = arith.mulf %110, %114 : vector<2x16x16xf32>
    "tpu.trace_start"() <{level = 10 : i32, message = "bqk,bke->bqe"}> : () -> ()
    %cst_54 = arith.constant dense<0.000000e+00> : vector<2x16x4xf32>
    %116 = tpu.matmul %115, %100, %cst_54 {dimension_numbers = #tpu.dot_dimension_numbers<[2], [1], [1], [2], [0, 0, 0, 1, 1, 2], [0], [0]>} : vector<2x16x16xf32>, vector<2x16x4xf32>, vector<2x16x4xf32> -> vector<2x16x4xf32>
    "tpu.trace_stop"() : () -> ()
    %c0_55 = arith.constant 0 : index
    %c0_56 = arith.constant 0 : index
    %c12 = arith.constant 12 : index
    %117 = vector.load %arg24[%c0_55, %c0_56, %c12] : memref<2x16x32xf32, #tpu.memory_space<vmem>>, vector<2x16x4xf32>
    tpu.vector_store %arg24[%c0_55, %c0_56, %c12], %116 {strides = array<i32>} : memref<2x16x32xf32, #tpu.memory_space<vmem>>, vector<2x16x4xf32>,
    %118 = vector.extract_strided_slice %33 {offsets = [0, 0, 16], sizes = [2, 16, 4], strides = [1, 1, 1]} : vector<2x16x32xf32> to vector<2x16x4xf32>
    %119 = vector.extract_strided_slice %35 {offsets = [0, 0, 16], sizes = [2, 16, 4], strides = [1, 1, 1]} : vector<2x16x32xf32> to vector<2x16x4xf32>
    %120 = vector.extract_strided_slice %37 {offsets = [0, 0, 16], sizes = [2, 16, 4], strides = [1, 1, 1]} : vector<2x16x32xf32> to vector<2x16x4xf32>
    "tpu.trace_start"() <{level = 10 : i32, message = "bqe,bke->bqk"}> : () -> ()
    %cst_57 = arith.constant dense<0.000000e+00> : vector<2x16x16xf32>
    %121 = tpu.matmul %118, %119, %cst_57 {dimension_numbers = #tpu.dot_dimension_numbers<[2], [2], [1], [1], [0, 0, 0, 1, 1, 1], [0], [0]>} : vector<2x16x4xf32>, vector<2x16x4xf32>, vector<2x16x16xf32> -> vector<2x16x16xf32>
    "tpu.trace_stop"() : () -> ()
    %cst_58 = arith.constant 5.000000e-01 : f32
    %122 = vector.broadcast %cst_58 : f32 to vector<2x16x16xf32>
    %123 = arith.mulf %121, %122 : vector<2x16x16xf32>
    %124 = vector.broadcast %24 : vector<1x1x16xf32> to vector<2x16x16xf32>
    %125 = arith.addf %123, %124 : vector<2x16x16xf32>
    %cst_59 = arith.constant dense<0xFF800000> : vector<2x16xf32>
    %126 = vector.multi_reduction <maximumf>, %125, %cst_59 [2] : vector<2x16x16xf32> to vector<2x16xf32>
    %127 = vector.shape_cast %126 : vector<2x16xf32> to vector<2x16x1xf32>
    %128 = vector.broadcast %127 : vector<2x16x1xf32> to vector<2x16x16xf32>
    %129 = arith.subf %125, %128 : vector<2x16x16xf32>
    %130 = math.exp %129 : vector<2x16x16xf32>
    %cst_60 = arith.constant dense<0.000000e+00> : vector<2x16xf32>
    %131 = vector.multi_reduction <add>, %130, %cst_60 [2] : vector<2x16x16xf32> to vector<2x16xf32>
    %132 = vector.shape_cast %131 : vector<2x16xf32> to vector<2x16x1xf32>
    %133 = tpu.reciprocal %132 {approx = true} : vector<2x16x1xf32> -> vector<2x16x1xf32>
    %134 = vector.broadcast %133 : vector<2x16x1xf32> to vector<2x16x16xf32>
    %135 = arith.mulf %130, %134 : vector<2x16x16xf32>
    "tpu.trace_start"() <{level = 10 : i32, message = "bqk,bke->bqe"}> : () -> ()
    %cst_61 = arith.constant dense<0.000000e+00> : vector<2x16x4xf32>
    %136 = tpu.matmul %135, %120, %cst_61 {dimension_numbers = #tpu.dot_dimension_numbers<[2], [1], [1], [2], [0, 0, 0, 1, 1, 2], [0], [0]>} : vector<2x16x16xf32>, vector<2x16x4xf32>, vector<2x16x4xf32> -> vector<2x16x4xf32>
    "tpu.trace_stop"() : () -> ()
    %c0_62 = arith.constant 0 : index
    %c0_63 = arith.constant 0 : index
    %c16 = arith.constant 16 : index
    %137 = vector.load %arg24[%c0_62, %c0_63, %c16] : memref<2x16x32xf32, #tpu.memory_space<vmem>>, vector<2x16x4xf32>
    tpu.vector_store %arg24[%c0_62, %c0_63, %c16], %136 {strides = array<i32>} : memref<2x16x32xf32, #tpu.memory_space<vmem>>, vector<2x16x4xf32>,
    %138 = vector.extract_strided_slice %33 {offsets = [0, 0, 20], sizes = [2, 16, 4], strides = [1, 1, 1]} : vector<2x16x32xf32> to vector<2x16x4xf32>
    %139 = vector.extract_strided_slice %35 {offsets = [0, 0, 20], sizes = [2, 16, 4], strides = [1, 1, 1]} : vector<2x16x32xf32> to vector<2x16x4xf32>
    %140 = vector.extract_strided_slice %37 {offsets = [0, 0, 20], sizes = [2, 16, 4], strides = [1, 1, 1]} : vector<2x16x32xf32> to vector<2x16x4xf32>
    "tpu.trace_start"() <{level = 10 : i32, message = "bqe,bke->bqk"}> : () -> ()
    %cst_64 = arith.constant dense<0.000000e+00> : vector<2x16x16xf32>
    %141 = tpu.matmul %138, %139, %cst_64 {dimension_numbers = #tpu.dot_dimension_numbers<[2], [2], [1], [1], [0, 0, 0, 1, 1, 1], [0], [0]>} : vector<2x16x4xf32>, vector<2x16x4xf32>, vector<2x16x16xf32> -> vector<2x16x16xf32>
    "tpu.trace_stop"() : () -> ()
    %cst_65 = arith.constant 5.000000e-01 : f32
    %142 = vector.broadcast %cst_65 : f32 to vector<2x16x16xf32>
    %143 = arith.mulf %141, %142 : vector<2x16x16xf32>
    %144 = vector.broadcast %24 : vector<1x1x16xf32> to vector<2x16x16xf32>
    %145 = arith.addf %143, %144 : vector<2x16x16xf32>
    %cst_66 = arith.constant dense<0xFF800000> : vector<2x16xf32>
    %146 = vector.multi_reduction <maximumf>, %145, %cst_66 [2] : vector<2x16x16xf32> to vector<2x16xf32>
    %147 = vector.shape_cast %146 : vector<2x16xf32> to vector<2x16x1xf32>
    %148 = vector.broadcast %147 : vector<2x16x1xf32> to vector<2x16x16xf32>
    %149 = arith.subf %145, %148 : vector<2x16x16xf32>
    %150 = math.exp %149 : vector<2x16x16xf32>
    %cst_67 = arith.constant dense<0.000000e+00> : vector<2x16xf32>
    %151 = vector.multi_reduction <add>, %150, %cst_67 [2] : vector<2x16x16xf32> to vector<2x16xf32>
    %152 = vector.shape_cast %151 : vector<2x16xf32> to vector<2x16x1xf32>
    %153 = tpu.reciprocal %152 {approx = true} : vector<2x16x1xf32> -> vector<2x16x1xf32>
    %154 = vector.broadcast %153 : vector<2x16x1xf32> to vector<2x16x16xf32>
    %155 = arith.mulf %150, %154 : vector<2x16x16xf32>
    "tpu.trace_start"() <{level = 10 : i32, message = "bqk,bke->bqe"}> : () -> ()
    %cst_68 = arith.constant dense<0.000000e+00> : vector<2x16x4xf32>
    %156 = tpu.matmul %155, %140, %cst_68 {dimension_numbers = #tpu.dot_dimension_numbers<[2], [1], [1], [2], [0, 0, 0, 1, 1, 2], [0], [0]>} : vector<2x16x16xf32>, vector<2x16x4xf32>, vector<2x16x4xf32> -> vector<2x16x4xf32>
    "tpu.trace_stop"() : () -> ()
    %c0_69 = arith.constant 0 : index
    %c0_70 = arith.constant 0 : index
    %c20 = arith.constant 20 : index
    %157 = vector.load %arg24[%c0_69, %c0_70, %c20] : memref<2x16x32xf32, #tpu.memory_space<vmem>>, vector<2x16x4xf32>
    tpu.vector_store %arg24[%c0_69, %c0_70, %c20], %156 {strides = array<i32>} : memref<2x16x32xf32, #tpu.memory_space<vmem>>, vector<2x16x4xf32>,
    %158 = vector.extract_strided_slice %33 {offsets = [0, 0, 24], sizes = [2, 16, 4], strides = [1, 1, 1]} : vector<2x16x32xf32> to vector<2x16x4xf32>
    %159 = vector.extract_strided_slice %35 {offsets = [0, 0, 24], sizes = [2, 16, 4], strides = [1, 1, 1]} : vector<2x16x32xf32> to vector<2x16x4xf32>
    %160 = vector.extract_strided_slice %37 {offsets = [0, 0, 24], sizes = [2, 16, 4], strides = [1, 1, 1]} : vector<2x16x32xf32> to vector<2x16x4xf32>
    "tpu.trace_start"() <{level = 10 : i32, message = "bqe,bke->bqk"}> : () -> ()
    %cst_71 = arith.constant dense<0.000000e+00> : vector<2x16x16xf32>
    %161 = tpu.matmul %158, %159, %cst_71 {dimension_numbers = #tpu.dot_dimension_numbers<[2], [2], [1], [1], [0, 0, 0, 1, 1, 1], [0], [0]>} : vector<2x16x4xf32>, vector<2x16x4xf32>, vector<2x16x16xf32> -> vector<2x16x16xf32>
    "tpu.trace_stop"() : () -> ()
    %cst_72 = arith.constant 5.000000e-01 : f32
    %162 = vector.broadcast %cst_72 : f32 to vector<2x16x16xf32>
    %163 = arith.mulf %161, %162 : vector<2x16x16xf32>
    %164 = vector.broadcast %24 : vector<1x1x16xf32> to vector<2x16x16xf32>
    %165 = arith.addf %163, %164 : vector<2x16x16xf32>
    %cst_73 = arith.constant dense<0xFF800000> : vector<2x16xf32>
    %166 = vector.multi_reduction <maximumf>, %165, %cst_73 [2] : vector<2x16x16xf32> to vector<2x16xf32>
    %167 = vector.shape_cast %166 : vector<2x16xf32> to vector<2x16x1xf32>
    %168 = vector.broadcast %167 : vector<2x16x1xf32> to vector<2x16x16xf32>
    %169 = arith.subf %165, %168 : vector<2x16x16xf32>
    %170 = math.exp %169 : vector<2x16x16xf32>
    %cst_74 = arith.constant dense<0.000000e+00> : vector<2x16xf32>
    %171 = vector.multi_reduction <add>, %170, %cst_74 [2] : vector<2x16x16xf32> to vector<2x16xf32>
    %172 = vector.shape_cast %171 : vector<2x16xf32> to vector<2x16x1xf32>
    %173 = tpu.reciprocal %172 {approx = true} : vector<2x16x1xf32> -> vector<2x16x1xf32>
    %174 = vector.broadcast %173 : vector<2x16x1xf32> to vector<2x16x16xf32>
    %175 = arith.mulf %170, %174 : vector<2x16x16xf32>
    "tpu.trace_start"() <{level = 10 : i32, message = "bqk,bke->bqe"}> : () -> ()
    %cst_75 = arith.constant dense<0.000000e+00> : vector<2x16x4xf32>
    %176 = tpu.matmul %175, %160, %cst_75 {dimension_numbers = #tpu.dot_dimension_numbers<[2], [1], [1], [2], [0, 0, 0, 1, 1, 2], [0], [0]>} : vector<2x16x16xf32>, vector<2x16x4xf32>, vector<2x16x4xf32> -> vector<2x16x4xf32>
    "tpu.trace_stop"() : () -> ()
    %c0_76 = arith.constant 0 : index
    %c0_77 = arith.constant 0 : index
    %c24 = arith.constant 24 : index
    %177 = vector.load %arg24[%c0_76, %c0_77, %c24] : memref<2x16x32xf32, #tpu.memory_space<vmem>>, vector<2x16x4xf32>
    tpu.vector_store %arg24[%c0_76, %c0_77, %c24], %176 {strides = array<i32>} : memref<2x16x32xf32, #tpu.memory_space<vmem>>, vector<2x16x4xf32>,
    %178 = vector.extract_strided_slice %33 {offsets = [0, 0, 28], sizes = [2, 16, 4], strides = [1, 1, 1]} : vector<2x16x32xf32> to vector<2x16x4xf32>
    %179 = vector.extract_strided_slice %35 {offsets = [0, 0, 28], sizes = [2, 16, 4], strides = [1, 1, 1]} : vector<2x16x32xf32> to vector<2x16x4xf32>
    %180 = vector.extract_strided_slice %37 {offsets = [0, 0, 28], sizes = [2, 16, 4], strides = [1, 1, 1]} : vector<2x16x32xf32> to vector<2x16x4xf32>
    "tpu.trace_start"() <{level = 10 : i32, message = "bqe,bke->bqk"}> : () -> ()
    %cst_78 = arith.constant dense<0.000000e+00> : vector<2x16x16xf32>
    %181 = tpu.matmul %178, %179, %cst_78 {dimension_numbers = #tpu.dot_dimension_numbers<[2], [2], [1], [1], [0, 0, 0, 1, 1, 1], [0], [0]>} : vector<2x16x4xf32>, vector<2x16x4xf32>, vector<2x16x16xf32> -> vector<2x16x16xf32>
    "tpu.trace_stop"() : () -> ()
    %cst_79 = arith.constant 5.000000e-01 : f32
    %182 = vector.broadcast %cst_79 : f32 to vector<2x16x16xf32>
    %183 = arith.mulf %181, %182 : vector<2x16x16xf32>
    %184 = vector.broadcast %24 : vector<1x1x16xf32> to vector<2x16x16xf32>
    %185 = arith.addf %183, %184 : vector<2x16x16xf32>
    %cst_80 = arith.constant dense<0xFF800000> : vector<2x16xf32>
    %186 = vector.multi_reduction <maximumf>, %185, %cst_80 [2] : vector<2x16x16xf32> to vector<2x16xf32>
    %187 = vector.shape_cast %186 : vector<2x16xf32> to vector<2x16x1xf32>
    %188 = vector.broadcast %187 : vector<2x16x1xf32> to vector<2x16x16xf32>
    %189 = arith.subf %185, %188 : vector<2x16x16xf32>
    %190 = math.exp %189 : vector<2x16x16xf32>
    %cst_81 = arith.constant dense<0.000000e+00> : vector<2x16xf32>
    %191 = vector.multi_reduction <add>, %190, %cst_81 [2] : vector<2x16x16xf32> to vector<2x16xf32>
    %192 = vector.shape_cast %191 : vector<2x16xf32> to vector<2x16x1xf32>
    %193 = tpu.reciprocal %192 {approx = true} : vector<2x16x1xf32> -> vector<2x16x1xf32>
    %194 = vector.broadcast %193 : vector<2x16x1xf32> to vector<2x16x16xf32>
    %195 = arith.mulf %190, %194 : vector<2x16x16xf32>
    "tpu.trace_start"() <{level = 10 : i32, message = "bqk,bke->bqe"}> : () -> ()
    %cst_82 = arith.constant dense<0.000000e+00> : vector<2x16x4xf32>
    %196 = tpu.matmul %195, %180, %cst_82 {dimension_numbers = #tpu.dot_dimension_numbers<[2], [1], [1], [2], [0, 0, 0, 1, 1, 2], [0], [0]>} : vector<2x16x16xf32>, vector<2x16x4xf32>, vector<2x16x4xf32> -> vector<2x16x4xf32>
    "tpu.trace_stop"() : () -> ()
    %c0_83 = arith.constant 0 : index
    %c0_84 = arith.constant 0 : index
    %c28 = arith.constant 28 : index
    %197 = vector.load %arg24[%c0_83, %c0_84, %c28] : memref<2x16x32xf32, #tpu.memory_space<vmem>>, vector<2x16x4xf32>
    tpu.vector_store %arg24[%c0_83, %c0_84, %c28], %196 {strides = array<i32>} : memref<2x16x32xf32, #tpu.memory_space<vmem>>, vector<2x16x4xf32>,
    %c0_85 = arith.constant 0 : index
    %c0_86 = arith.constant 0 : index
    %c0_87 = arith.constant 0 : index
    %198 = vector.load %arg24[%c0_85, %c0_86, %c0_87] : memref<2x16x32xf32, #tpu.memory_space<vmem>>, vector<2x16x32xf32>
    %199 = vector.shape_cast %198 : vector<2x16x32xf32> to vector<32x32xf32>
    %c0_88 = arith.constant 0 : index
    %c0_89 = arith.constant 0 : index
    %c0_90 = arith.constant 0 : index
    %200 = vector.load %arg7[%c0_88, %c0_89, %c0_90] : memref<3x32x32xf32, #tpu.memory_space<vmem>>, vector<1x32x32xf32>
    %201 = vector.shape_cast %200 : vector<1x32x32xf32> to vector<32x32xf32>
    %cst_91 = arith.constant dense<0.000000e+00> : vector<32x32xf32>
    %202 = tpu.matmul %199, %201, %cst_91 {dimension_numbers = #tpu.dot_dimension_numbers<[1], [0], [0], [1], [0, 0, 1, 1], [], []>} : vector<32x32xf32>, vector<32x32xf32>, vector<32x32xf32> -> vector<32x32xf32>
    %c0_92 = arith.constant 0 : index
    %c0_93 = arith.constant 0 : index
    %c0_94 = arith.constant 0 : index
    %203 = vector.load %arg8[%c0_92, %c0_93, %c0_94] : memref<3x1x32xf32, #tpu.memory_space<vmem>>, vector<1x1x32xf32>
    %204 = vector.shape_cast %203 : vector<1x1x32xf32> to vector<1x32xf32>
    %205 = vector.broadcast %204 : vector<1x32xf32> to vector<32x32xf32>
    %206 = arith.addf %202, %205 : vector<32x32xf32>
    %207 = arith.addf %18, %206 : vector<32x32xf32>
    %c0_95 = arith.constant 0 : index
    %c0_96 = arith.constant 0 : index
    %c0_97 = arith.constant 0 : index
    %208 = vector.load %arg9[%c0_95, %c0_96, %c0_97] : memref<3x1x32xf32, #tpu.memory_space<vmem>>, vector<1x1x32xf32>
    %209 = vector.shape_cast %208 : vector<1x1x32xf32> to vector<1x32xf32>
    %c0_98 = arith.constant 0 : index
    %c0_99 = arith.constant 0 : index
    %c0_100 = arith.constant 0 : index
    %210 = vector.load %arg10[%c0_98, %c0_99, %c0_100] : memref<3x1x32xf32, #tpu.memory_space<vmem>>, vector<1x1x32xf32>
    %211 = vector.shape_cast %210 : vector<1x1x32xf32> to vector<1x32xf32>
    %cst_101 = arith.constant dense<0.000000e+00> : vector<32xf32>
    %212 = vector.multi_reduction <add>, %207, %cst_101 [1] : vector<32x32xf32> to vector<32xf32>
    %213 = vector.shape_cast %212 : vector<32xf32> to vector<32x1xf32>
    %cst_102 = arith.constant 3.200000e+01 : f32
    %214 = vector.broadcast %cst_102 : f32 to vector<32x1xf32>
    %215 = arith.divf %213, %214 : vector<32x1xf32>
    %216 = vector.broadcast %215 : vector<32x1xf32> to vector<32x32xf32>
    %217 = arith.subf %207, %216 : vector<32x32xf32>
    %218 = arith.mulf %217, %217 : vector<32x32xf32>
    %cst_103 = arith.constant dense<0.000000e+00> : vector<32xf32>
    %219 = vector.multi_reduction <add>, %218, %cst_103 [1] : vector<32x32xf32> to vector<32xf32>
    %220 = vector.shape_cast %219 : vector<32xf32> to vector<32x1xf32>
    %cst_104 = arith.constant 3.200000e+01 : f32
    %221 = vector.broadcast %cst_104 : f32 to vector<32x1xf32>
    %222 = arith.divf %220, %221 : vector<32x1xf32>
    %223 = vector.broadcast %215 : vector<32x1xf32> to vector<32x32xf32>
    %224 = arith.subf %207, %223 : vector<32x32xf32>
    %cst_105 = arith.constant 9.99999974E-6 : f32
    %225 = vector.broadcast %cst_105 : f32 to vector<32x1xf32>
    %226 = arith.addf %222, %225 : vector<32x1xf32>
    %227 = math.rsqrt %226 : vector<32x1xf32>
    %228 = vector.broadcast %227 : vector<32x1xf32> to vector<32x32xf32>
    %229 = arith.mulf %224, %228 : vector<32x32xf32>
    %230 = vector.broadcast %209 : vector<1x32xf32> to vector<32x32xf32>
    %231 = arith.mulf %229, %230 : vector<32x32xf32>
    %232 = vector.broadcast %211 : vector<1x32xf32> to vector<32x32xf32>
    %233 = arith.addf %231, %232 : vector<32x32xf32>
    %c0_106 = arith.constant 0 : index
    %c0_107 = arith.constant 0 : index
    %c0_108 = arith.constant 0 : index
    %234 = vector.load %arg13[%c0_106, %c0_107, %c0_108] : memref<3x32x512xf32, #tpu.memory_space<vmem>>, vector<1x32x512xf32>
    %235 = vector.shape_cast %234 : vector<1x32x512xf32> to vector<32x512xf32>
    %cst_109 = arith.constant dense<0.000000e+00> : vector<32x512xf32>
    %236 = tpu.matmul %233, %235, %cst_109 {dimension_numbers = #tpu.dot_dimension_numbers<[1], [0], [0], [1], [0, 0, 1, 1], [], []>} : vector<32x32xf32>, vector<32x512xf32>, vector<32x512xf32> -> vector<32x512xf32>
    %c0_110 = arith.constant 0 : index
    %c0_111 = arith.constant 0 : index
    %c0_112 = arith.constant 0 : index
    %237 = vector.load %arg14[%c0_110, %c0_111, %c0_112] : memref<3x1x512xf32, #tpu.memory_space<vmem>>, vector<1x1x512xf32>
    %238 = vector.shape_cast %237 : vector<1x1x512xf32> to vector<1x512xf32>
    %239 = vector.broadcast %238 : vector<1x512xf32> to vector<32x512xf32>
    %240 = arith.addf %236, %239 : vector<32x512xf32>
    %cst_113 = arith.constant 5.000000e-01 : f32
    %241 = vector.broadcast %cst_113 : f32 to vector<32x512xf32>
    %242 = arith.mulf %241, %240 : vector<32x512xf32>
    %cst_114 = arith.constant 0.707106769 : f32
    %243 = vector.broadcast %cst_114 : f32 to vector<32x512xf32>
    %244 = arith.mulf %240, %243 : vector<32x512xf32>
    %245 = math.erf %244 : vector<32x512xf32>
    %cst_115 = arith.constant 1.000000e+00 : f32
    %246 = vector.broadcast %cst_115 : f32 to vector<32x512xf32>
    %247 = arith.addf %246, %245 : vector<32x512xf32>
    %248 = arith.mulf %242, %247 : vector<32x512xf32>
    %c0_116 = arith.constant 0 : index
    %c0_117 = arith.constant 0 : index
    %c0_118 = arith.constant 0 : index
    %249 = vector.load %arg15[%c0_116, %c0_117, %c0_118] : memref<3x512x32xf32, #tpu.memory_space<vmem>>, vector<1x512x32xf32>
    %250 = vector.shape_cast %249 : vector<1x512x32xf32> to vector<512x32xf32>
    %cst_119 = arith.constant dense<0.000000e+00> : vector<32x32xf32>
    %251 = tpu.matmul %248, %250, %cst_119 {dimension_numbers = #tpu.dot_dimension_numbers<[1], [0], [0], [1], [0, 0, 1, 1], [], []>} : vector<32x512xf32>, vector<512x32xf32>, vector<32x32xf32> -> vector<32x32xf32>
    %c0_120 = arith.constant 0 : index
    %c0_121 = arith.constant 0 : index
    %c0_122 = arith.constant 0 : index
    %252 = vector.load %arg16[%c0_120, %c0_121, %c0_122] : memref<3x1x32xf32, #tpu.memory_space<vmem>>, vector<1x1x32xf32>
    %253 = vector.shape_cast %252 : vector<1x1x32xf32> to vector<1x32xf32>
    %254 = vector.broadcast %253 : vector<1x32xf32> to vector<32x32xf32>
    %255 = arith.addf %251, %254 : vector<32x32xf32>
    %256 = arith.addf %233, %255 : vector<32x32xf32>
    %c0_123 = arith.constant 0 : index
    %c0_124 = arith.constant 0 : index
    %c0_125 = arith.constant 0 : index
    %257 = vector.load %arg11[%c0_123, %c0_124, %c0_125] : memref<3x1x32xf32, #tpu.memory_space<vmem>>, vector<1x1x32xf32>
    %258 = vector.shape_cast %257 : vector<1x1x32xf32> to vector<1x32xf32>
    %c0_126 = arith.constant 0 : index
    %c0_127 = arith.constant 0 : index
    %c0_128 = arith.constant 0 : index
    %259 = vector.load %arg12[%c0_126, %c0_127, %c0_128] : memref<3x1x32xf32, #tpu.memory_space<vmem>>, vector<1x1x32xf32>
    %260 = vector.shape_cast %259 : vector<1x1x32xf32> to vector<1x32xf32>
    %cst_129 = arith.constant dense<0.000000e+00> : vector<32xf32>
    %261 = vector.multi_reduction <add>, %256, %cst_129 [1] : vector<32x32xf32> to vector<32xf32>
    %262 = vector.shape_cast %261 : vector<32xf32> to vector<32x1xf32>
    %cst_130 = arith.constant 3.200000e+01 : f32
    %263 = vector.broadcast %cst_130 : f32 to vector<32x1xf32>
    %264 = arith.divf %262, %263 : vector<32x1xf32>
    %265 = vector.broadcast %264 : vector<32x1xf32> to vector<32x32xf32>
    %266 = arith.subf %256, %265 : vector<32x32xf32>
    %267 = arith.mulf %266, %266 : vector<32x32xf32>
    %cst_131 = arith.constant dense<0.000000e+00> : vector<32xf32>
    %268 = vector.multi_reduction <add>, %267, %cst_131 [1] : vector<32x32xf32> to vector<32xf32>
    %269 = vector.shape_cast %268 : vector<32xf32> to vector<32x1xf32>
    %cst_132 = arith.constant 3.200000e+01 : f32
    %270 = vector.broadcast %cst_132 : f32 to vector<32x1xf32>
    %271 = arith.divf %269, %270 : vector<32x1xf32>
    %272 = vector.broadcast %264 : vector<32x1xf32> to vector<32x32xf32>
    %273 = arith.subf %256, %272 : vector<32x32xf32>
    %cst_133 = arith.constant 9.99999974E-6 : f32
    %274 = vector.broadcast %cst_133 : f32 to vector<32x1xf32>
    %275 = arith.addf %271, %274 : vector<32x1xf32>
    %276 = math.rsqrt %275 : vector<32x1xf32>
    %277 = vector.broadcast %276 : vector<32x1xf32> to vector<32x32xf32>
    %278 = arith.mulf %273, %277 : vector<32x32xf32>
    %279 = vector.broadcast %258 : vector<1x32xf32> to vector<32x32xf32>
    %280 = arith.mulf %278, %279 : vector<32x32xf32>
    %281 = vector.broadcast %260 : vector<1x32xf32> to vector<32x32xf32>
    %282 = arith.addf %280, %281 : vector<32x32xf32>
    %c1_134 = arith.constant 1 : index
    %c0_135 = arith.constant 0 : index
    %c0_136 = arith.constant 0 : index
    %283 = vector.load %arg5[%c1_134, %c0_135, %c0_136] : memref<3x32x96xf32, #tpu.memory_space<vmem>>, vector<1x32x96xf32>
    %284 = vector.shape_cast %283 : vector<1x32x96xf32> to vector<32x96xf32>
    %cst_137 = arith.constant dense<0.000000e+00> : vector<32x96xf32>
    %285 = tpu.matmul %282, %284, %cst_137 {dimension_numbers = #tpu.dot_dimension_numbers<[1], [0], [0], [1], [0, 0, 1, 1], [], []>} : vector<32x32xf32>, vector<32x96xf32>, vector<32x96xf32> -> vector<32x96xf32>
    %c1_138 = arith.constant 1 : index
    %c0_139 = arith.constant 0 : index
    %c0_140 = arith.constant 0 : index
    %286 = vector.load %arg6[%c1_138, %c0_139, %c0_140] : memref<3x1x96xf32, #tpu.memory_space<vmem>>, vector<1x1x96xf32>
    %287 = vector.shape_cast %286 : vector<1x1x96xf32> to vector<1x96xf32>
    %288 = vector.broadcast %287 : vector<1x96xf32> to vector<32x96xf32>
    %289 = arith.addf %285, %288 : vector<32x96xf32>
    %290 = vector.extract_strided_slice %289 {offsets = [0, 0], sizes = [32, 32], strides = [1, 1]} : vector<32x96xf32> to vector<32x32xf32>
    %291 = vector.shape_cast %290 : vector<32x32xf32> to vector<2x16x32xf32>
    %292 = vector.extract_strided_slice %289 {offsets = [0, 32], sizes = [32, 32], strides = [1, 1]} : vector<32x96xf32> to vector<32x32xf32>
    %293 = vector.shape_cast %292 : vector<32x32xf32> to vector<2x16x32xf32>
    %294 = vector.extract_strided_slice %289 {offsets = [0, 64], sizes = [32, 32], strides = [1, 1]} : vector<32x96xf32> to vector<32x32xf32>
    %295 = vector.shape_cast %294 : vector<32x32xf32> to vector<2x16x32xf32>
    %296 = vector.extract_strided_slice %291 {offsets = [0, 0, 0], sizes = [2, 16, 4], strides = [1, 1, 1]} : vector<2x16x32xf32> to vector<2x16x4xf32>
    %297 = vector.extract_strided_slice %293 {offsets = [0, 0, 0], sizes = [2, 16, 4], strides = [1, 1, 1]} : vector<2x16x32xf32> to vector<2x16x4xf32>
    %298 = vector.extract_strided_slice %295 {offsets = [0, 0, 0], sizes = [2, 16, 4], strides = [1, 1, 1]} : vector<2x16x32xf32> to vector<2x16x4xf32>
    "tpu.trace_start"() <{level = 10 : i32, message = "bqe,bke->bqk"}> : () -> ()
    %cst_141 = arith.constant dense<0.000000e+00> : vector<2x16x16xf32>
    %299 = tpu.matmul %296, %297, %cst_141 {dimension_numbers = #tpu.dot_dimension_numbers<[2], [2], [1], [1], [0, 0, 0, 1, 1, 1], [0], [0]>} : vector<2x16x4xf32>, vector<2x16x4xf32>, vector<2x16x16xf32> -> vector<2x16x16xf32>
    "tpu.trace_stop"() : () -> ()
    %cst_142 = arith.constant 5.000000e-01 : f32
    %300 = vector.broadcast %cst_142 : f32 to vector<2x16x16xf32>
    %301 = arith.mulf %299, %300 : vector<2x16x16xf32>
    %302 = vector.broadcast %24 : vector<1x1x16xf32> to vector<2x16x16xf32>
    %303 = arith.addf %301, %302 : vector<2x16x16xf32>
    %cst_143 = arith.constant dense<0xFF800000> : vector<2x16xf32>
    %304 = vector.multi_reduction <maximumf>, %303, %cst_143 [2] : vector<2x16x16xf32> to vector<2x16xf32>
    %305 = vector.shape_cast %304 : vector<2x16xf32> to vector<2x16x1xf32>
    %306 = vector.broadcast %305 : vector<2x16x1xf32> to vector<2x16x16xf32>
    %307 = arith.subf %303, %306 : vector<2x16x16xf32>
    %308 = math.exp %307 : vector<2x16x16xf32>
    %cst_144 = arith.constant dense<0.000000e+00> : vector<2x16xf32>
    %309 = vector.multi_reduction <add>, %308, %cst_144 [2] : vector<2x16x16xf32> to vector<2x16xf32>
    %310 = vector.shape_cast %309 : vector<2x16xf32> to vector<2x16x1xf32>
    %311 = tpu.reciprocal %310 {approx = true} : vector<2x16x1xf32> -> vector<2x16x1xf32>
    %312 = vector.broadcast %311 : vector<2x16x1xf32> to vector<2x16x16xf32>
    %313 = arith.mulf %308, %312 : vector<2x16x16xf32>
    "tpu.trace_start"() <{level = 10 : i32, message = "bqk,bke->bqe"}> : () -> ()
    %cst_145 = arith.constant dense<0.000000e+00> : vector<2x16x4xf32>
    %314 = tpu.matmul %313, %298, %cst_145 {dimension_numbers = #tpu.dot_dimension_numbers<[2], [1], [1], [2], [0, 0, 0, 1, 1, 2], [0], [0]>} : vector<2x16x16xf32>, vector<2x16x4xf32>, vector<2x16x4xf32> -> vector<2x16x4xf32>
    "tpu.trace_stop"() : () -> ()
    %c0_146 = arith.constant 0 : index
    %c0_147 = arith.constant 0 : index
    %c0_148 = arith.constant 0 : index
    %315 = vector.load %arg24[%c0_146, %c0_147, %c0_148] : memref<2x16x32xf32, #tpu.memory_space<vmem>>, vector<2x16x4xf32>
    tpu.vector_store %arg24[%c0_146, %c0_147, %c0_148], %314 {strides = array<i32>} : memref<2x16x32xf32, #tpu.memory_space<vmem>>, vector<2x16x4xf32>,
    %316 = vector.extract_strided_slice %291 {offsets = [0, 0, 4], sizes = [2, 16, 4], strides = [1, 1, 1]} : vector<2x16x32xf32> to vector<2x16x4xf32>
    %317 = vector.extract_strided_slice %293 {offsets = [0, 0, 4], sizes = [2, 16, 4], strides = [1, 1, 1]} : vector<2x16x32xf32> to vector<2x16x4xf32>
    %318 = vector.extract_strided_slice %295 {offsets = [0, 0, 4], sizes = [2, 16, 4], strides = [1, 1, 1]} : vector<2x16x32xf32> to vector<2x16x4xf32>
    "tpu.trace_start"() <{level = 10 : i32, message = "bqe,bke->bqk"}> : () -> ()
    %cst_149 = arith.constant dense<0.000000e+00> : vector<2x16x16xf32>
    %319 = tpu.matmul %316, %317, %cst_149 {dimension_numbers = #tpu.dot_dimension_numbers<[2], [2], [1], [1], [0, 0, 0, 1, 1, 1], [0], [0]>} : vector<2x16x4xf32>, vector<2x16x4xf32>, vector<2x16x16xf32> -> vector<2x16x16xf32>
    "tpu.trace_stop"() : () -> ()
    %cst_150 = arith.constant 5.000000e-01 : f32
    %320 = vector.broadcast %cst_150 : f32 to vector<2x16x16xf32>
    %321 = arith.mulf %319, %320 : vector<2x16x16xf32>
    %322 = vector.broadcast %24 : vector<1x1x16xf32> to vector<2x16x16xf32>
    %323 = arith.addf %321, %322 : vector<2x16x16xf32>
    %cst_151 = arith.constant dense<0xFF800000> : vector<2x16xf32>
    %324 = vector.multi_reduction <maximumf>, %323, %cst_151 [2] : vector<2x16x16xf32> to vector<2x16xf32>
    %325 = vector.shape_cast %324 : vector<2x16xf32> to vector<2x16x1xf32>
    %326 = vector.broadcast %325 : vector<2x16x1xf32> to vector<2x16x16xf32>
    %327 = arith.subf %323, %326 : vector<2x16x16xf32>
    %328 = math.exp %327 : vector<2x16x16xf32>
    %cst_152 = arith.constant dense<0.000000e+00> : vector<2x16xf32>
    %329 = vector.multi_reduction <add>, %328, %cst_152 [2] : vector<2x16x16xf32> to vector<2x16xf32>
    %330 = vector.shape_cast %329 : vector<2x16xf32> to vector<2x16x1xf32>
    %331 = tpu.reciprocal %330 {approx = true} : vector<2x16x1xf32> -> vector<2x16x1xf32>
    %332 = vector.broadcast %331 : vector<2x16x1xf32> to vector<2x16x16xf32>
    %333 = arith.mulf %328, %332 : vector<2x16x16xf32>
    "tpu.trace_start"() <{level = 10 : i32, message = "bqk,bke->bqe"}> : () -> ()
    %cst_153 = arith.constant dense<0.000000e+00> : vector<2x16x4xf32>
    %334 = tpu.matmul %333, %318, %cst_153 {dimension_numbers = #tpu.dot_dimension_numbers<[2], [1], [1], [2], [0, 0, 0, 1, 1, 2], [0], [0]>} : vector<2x16x16xf32>, vector<2x16x4xf32>, vector<2x16x4xf32> -> vector<2x16x4xf32>
    "tpu.trace_stop"() : () -> ()
    %c0_154 = arith.constant 0 : index
    %c0_155 = arith.constant 0 : index
    %c4_156 = arith.constant 4 : index
    %335 = vector.load %arg24[%c0_154, %c0_155, %c4_156] : memref<2x16x32xf32, #tpu.memory_space<vmem>>, vector<2x16x4xf32>
    tpu.vector_store %arg24[%c0_154, %c0_155, %c4_156], %334 {strides = array<i32>} : memref<2x16x32xf32, #tpu.memory_space<vmem>>, vector<2x16x4xf32>,
    %336 = vector.extract_strided_slice %291 {offsets = [0, 0, 8], sizes = [2, 16, 4], strides = [1, 1, 1]} : vector<2x16x32xf32> to vector<2x16x4xf32>
    %337 = vector.extract_strided_slice %293 {offsets = [0, 0, 8], sizes = [2, 16, 4], strides = [1, 1, 1]} : vector<2x16x32xf32> to vector<2x16x4xf32>
    %338 = vector.extract_strided_slice %295 {offsets = [0, 0, 8], sizes = [2, 16, 4], strides = [1, 1, 1]} : vector<2x16x32xf32> to vector<2x16x4xf32>
    "tpu.trace_start"() <{level = 10 : i32, message = "bqe,bke->bqk"}> : () -> ()
    %cst_157 = arith.constant dense<0.000000e+00> : vector<2x16x16xf32>
    %339 = tpu.matmul %336, %337, %cst_157 {dimension_numbers = #tpu.dot_dimension_numbers<[2], [2], [1], [1], [0, 0, 0, 1, 1, 1], [0], [0]>} : vector<2x16x4xf32>, vector<2x16x4xf32>, vector<2x16x16xf32> -> vector<2x16x16xf32>
    "tpu.trace_stop"() : () -> ()
    %cst_158 = arith.constant 5.000000e-01 : f32
    %340 = vector.broadcast %cst_158 : f32 to vector<2x16x16xf32>
    %341 = arith.mulf %339, %340 : vector<2x16x16xf32>
    %342 = vector.broadcast %24 : vector<1x1x16xf32> to vector<2x16x16xf32>
    %343 = arith.addf %341, %342 : vector<2x16x16xf32>
    %cst_159 = arith.constant dense<0xFF800000> : vector<2x16xf32>
    %344 = vector.multi_reduction <maximumf>, %343, %cst_159 [2] : vector<2x16x16xf32> to vector<2x16xf32>
    %345 = vector.shape_cast %344 : vector<2x16xf32> to vector<2x16x1xf32>
    %346 = vector.broadcast %345 : vector<2x16x1xf32> to vector<2x16x16xf32>
    %347 = arith.subf %343, %346 : vector<2x16x16xf32>
    %348 = math.exp %347 : vector<2x16x16xf32>
    %cst_160 = arith.constant dense<0.000000e+00> : vector<2x16xf32>
    %349 = vector.multi_reduction <add>, %348, %cst_160 [2] : vector<2x16x16xf32> to vector<2x16xf32>
    %350 = vector.shape_cast %349 : vector<2x16xf32> to vector<2x16x1xf32>
    %351 = tpu.reciprocal %350 {approx = true} : vector<2x16x1xf32> -> vector<2x16x1xf32>
    %352 = vector.broadcast %351 : vector<2x16x1xf32> to vector<2x16x16xf32>
    %353 = arith.mulf %348, %352 : vector<2x16x16xf32>
    "tpu.trace_start"() <{level = 10 : i32, message = "bqk,bke->bqe"}> : () -> ()
    %cst_161 = arith.constant dense<0.000000e+00> : vector<2x16x4xf32>
    %354 = tpu.matmul %353, %338, %cst_161 {dimension_numbers = #tpu.dot_dimension_numbers<[2], [1], [1], [2], [0, 0, 0, 1, 1, 2], [0], [0]>} : vector<2x16x16xf32>, vector<2x16x4xf32>, vector<2x16x4xf32> -> vector<2x16x4xf32>
    "tpu.trace_stop"() : () -> ()
    %c0_162 = arith.constant 0 : index
    %c0_163 = arith.constant 0 : index
    %c8_164 = arith.constant 8 : index
    %355 = vector.load %arg24[%c0_162, %c0_163, %c8_164] : memref<2x16x32xf32, #tpu.memory_space<vmem>>, vector<2x16x4xf32>
    tpu.vector_store %arg24[%c0_162, %c0_163, %c8_164], %354 {strides = array<i32>} : memref<2x16x32xf32, #tpu.memory_space<vmem>>, vector<2x16x4xf32>,
    %356 = vector.extract_strided_slice %291 {offsets = [0, 0, 12], sizes = [2, 16, 4], strides = [1, 1, 1]} : vector<2x16x32xf32> to vector<2x16x4xf32>
    %357 = vector.extract_strided_slice %293 {offsets = [0, 0, 12], sizes = [2, 16, 4], strides = [1, 1, 1]} : vector<2x16x32xf32> to vector<2x16x4xf32>
    %358 = vector.extract_strided_slice %295 {offsets = [0, 0, 12], sizes = [2, 16, 4], strides = [1, 1, 1]} : vector<2x16x32xf32> to vector<2x16x4xf32>
    "tpu.trace_start"() <{level = 10 : i32, message = "bqe,bke->bqk"}> : () -> ()
    %cst_165 = arith.constant dense<0.000000e+00> : vector<2x16x16xf32>
    %359 = tpu.matmul %356, %357, %cst_165 {dimension_numbers = #tpu.dot_dimension_numbers<[2], [2], [1], [1], [0, 0, 0, 1, 1, 1], [0], [0]>} : vector<2x16x4xf32>, vector<2x16x4xf32>, vector<2x16x16xf32> -> vector<2x16x16xf32>
    "tpu.trace_stop"() : () -> ()
    %cst_166 = arith.constant 5.000000e-01 : f32
    %360 = vector.broadcast %cst_166 : f32 to vector<2x16x16xf32>
    %361 = arith.mulf %359, %360 : vector<2x16x16xf32>
    %362 = vector.broadcast %24 : vector<1x1x16xf32> to vector<2x16x16xf32>
    %363 = arith.addf %361, %362 : vector<2x16x16xf32>
    %cst_167 = arith.constant dense<0xFF800000> : vector<2x16xf32>
    %364 = vector.multi_reduction <maximumf>, %363, %cst_167 [2] : vector<2x16x16xf32> to vector<2x16xf32>
    %365 = vector.shape_cast %364 : vector<2x16xf32> to vector<2x16x1xf32>
    %366 = vector.broadcast %365 : vector<2x16x1xf32> to vector<2x16x16xf32>
    %367 = arith.subf %363, %366 : vector<2x16x16xf32>
    %368 = math.exp %367 : vector<2x16x16xf32>
    %cst_168 = arith.constant dense<0.000000e+00> : vector<2x16xf32>
    %369 = vector.multi_reduction <add>, %368, %cst_168 [2] : vector<2x16x16xf32> to vector<2x16xf32>
    %370 = vector.shape_cast %369 : vector<2x16xf32> to vector<2x16x1xf32>
    %371 = tpu.reciprocal %370 {approx = true} : vector<2x16x1xf32> -> vector<2x16x1xf32>
    %372 = vector.broadcast %371 : vector<2x16x1xf32> to vector<2x16x16xf32>
    %373 = arith.mulf %368, %372 : vector<2x16x16xf32>
    "tpu.trace_start"() <{level = 10 : i32, message = "bqk,bke->bqe"}> : () -> ()
    %cst_169 = arith.constant dense<0.000000e+00> : vector<2x16x4xf32>
    %374 = tpu.matmul %373, %358, %cst_169 {dimension_numbers = #tpu.dot_dimension_numbers<[2], [1], [1], [2], [0, 0, 0, 1, 1, 2], [0], [0]>} : vector<2x16x16xf32>, vector<2x16x4xf32>, vector<2x16x4xf32> -> vector<2x16x4xf32>
    "tpu.trace_stop"() : () -> ()
    %c0_170 = arith.constant 0 : index
    %c0_171 = arith.constant 0 : index
    %c12_172 = arith.constant 12 : index
    %375 = vector.load %arg24[%c0_170, %c0_171, %c12_172] : memref<2x16x32xf32, #tpu.memory_space<vmem>>, vector<2x16x4xf32>
    tpu.vector_store %arg24[%c0_170, %c0_171, %c12_172], %374 {strides = array<i32>} : memref<2x16x32xf32, #tpu.memory_space<vmem>>, vector<2x16x4xf32>,
    %376 = vector.extract_strided_slice %291 {offsets = [0, 0, 16], sizes = [2, 16, 4], strides = [1, 1, 1]} : vector<2x16x32xf32> to vector<2x16x4xf32>
    %377 = vector.extract_strided_slice %293 {offsets = [0, 0, 16], sizes = [2, 16, 4], strides = [1, 1, 1]} : vector<2x16x32xf32> to vector<2x16x4xf32>
    %378 = vector.extract_strided_slice %295 {offsets = [0, 0, 16], sizes = [2, 16, 4], strides = [1, 1, 1]} : vector<2x16x32xf32> to vector<2x16x4xf32>
    "tpu.trace_start"() <{level = 10 : i32, message = "bqe,bke->bqk"}> : () -> ()
    %cst_173 = arith.constant dense<0.000000e+00> : vector<2x16x16xf32>
    %379 = tpu.matmul %376, %377, %cst_173 {dimension_numbers = #tpu.dot_dimension_numbers<[2], [2], [1], [1], [0, 0, 0, 1, 1, 1], [0], [0]>} : vector<2x16x4xf32>, vector<2x16x4xf32>, vector<2x16x16xf32> -> vector<2x16x16xf32>
    "tpu.trace_stop"() : () -> ()
    %cst_174 = arith.constant 5.000000e-01 : f32
    %380 = vector.broadcast %cst_174 : f32 to vector<2x16x16xf32>
    %381 = arith.mulf %379, %380 : vector<2x16x16xf32>
    %382 = vector.broadcast %24 : vector<1x1x16xf32> to vector<2x16x16xf32>
    %383 = arith.addf %381, %382 : vector<2x16x16xf32>
    %cst_175 = arith.constant dense<0xFF800000> : vector<2x16xf32>
    %384 = vector.multi_reduction <maximumf>, %383, %cst_175 [2] : vector<2x16x16xf32> to vector<2x16xf32>
    %385 = vector.shape_cast %384 : vector<2x16xf32> to vector<2x16x1xf32>
    %386 = vector.broadcast %385 : vector<2x16x1xf32> to vector<2x16x16xf32>
    %387 = arith.subf %383, %386 : vector<2x16x16xf32>
    %388 = math.exp %387 : vector<2x16x16xf32>
    %cst_176 = arith.constant dense<0.000000e+00> : vector<2x16xf32>
    %389 = vector.multi_reduction <add>, %388, %cst_176 [2] : vector<2x16x16xf32> to vector<2x16xf32>
    %390 = vector.shape_cast %389 : vector<2x16xf32> to vector<2x16x1xf32>
    %391 = tpu.reciprocal %390 {approx = true} : vector<2x16x1xf32> -> vector<2x16x1xf32>
    %392 = vector.broadcast %391 : vector<2x16x1xf32> to vector<2x16x16xf32>
    %393 = arith.mulf %388, %392 : vector<2x16x16xf32>
    "tpu.trace_start"() <{level = 10 : i32, message = "bqk,bke->bqe"}> : () -> ()
    %cst_177 = arith.constant dense<0.000000e+00> : vector<2x16x4xf32>
    %394 = tpu.matmul %393, %378, %cst_177 {dimension_numbers = #tpu.dot_dimension_numbers<[2], [1], [1], [2], [0, 0, 0, 1, 1, 2], [0], [0]>} : vector<2x16x16xf32>, vector<2x16x4xf32>, vector<2x16x4xf32> -> vector<2x16x4xf32>
    "tpu.trace_stop"() : () -> ()
    %c0_178 = arith.constant 0 : index
    %c0_179 = arith.constant 0 : index
    %c16_180 = arith.constant 16 : index
    %395 = vector.load %arg24[%c0_178, %c0_179, %c16_180] : memref<2x16x32xf32, #tpu.memory_space<vmem>>, vector<2x16x4xf32>
    tpu.vector_store %arg24[%c0_178, %c0_179, %c16_180], %394 {strides = array<i32>} : memref<2x16x32xf32, #tpu.memory_space<vmem>>, vector<2x16x4xf32>,
    %396 = vector.extract_strided_slice %291 {offsets = [0, 0, 20], sizes = [2, 16, 4], strides = [1, 1, 1]} : vector<2x16x32xf32> to vector<2x16x4xf32>
    %397 = vector.extract_strided_slice %293 {offsets = [0, 0, 20], sizes = [2, 16, 4], strides = [1, 1, 1]} : vector<2x16x32xf32> to vector<2x16x4xf32>
    %398 = vector.extract_strided_slice %295 {offsets = [0, 0, 20], sizes = [2, 16, 4], strides = [1, 1, 1]} : vector<2x16x32xf32> to vector<2x16x4xf32>
    "tpu.trace_start"() <{level = 10 : i32, message = "bqe,bke->bqk"}> : () -> ()
    %cst_181 = arith.constant dense<0.000000e+00> : vector<2x16x16xf32>
    %399 = tpu.matmul %396, %397, %cst_181 {dimension_numbers = #tpu.dot_dimension_numbers<[2], [2], [1], [1], [0, 0, 0, 1, 1, 1], [0], [0]>} : vector<2x16x4xf32>, vector<2x16x4xf32>, vector<2x16x16xf32> -> vector<2x16x16xf32>
    "tpu.trace_stop"() : () -> ()
    %cst_182 = arith.constant 5.000000e-01 : f32
    %400 = vector.broadcast %cst_182 : f32 to vector<2x16x16xf32>
    %401 = arith.mulf %399, %400 : vector<2x16x16xf32>
    %402 = vector.broadcast %24 : vector<1x1x16xf32> to vector<2x16x16xf32>
    %403 = arith.addf %401, %402 : vector<2x16x16xf32>
    %cst_183 = arith.constant dense<0xFF800000> : vector<2x16xf32>
    %404 = vector.multi_reduction <maximumf>, %403, %cst_183 [2] : vector<2x16x16xf32> to vector<2x16xf32>
    %405 = vector.shape_cast %404 : vector<2x16xf32> to vector<2x16x1xf32>
    %406 = vector.broadcast %405 : vector<2x16x1xf32> to vector<2x16x16xf32>
    %407 = arith.subf %403, %406 : vector<2x16x16xf32>
    %408 = math.exp %407 : vector<2x16x16xf32>
    %cst_184 = arith.constant dense<0.000000e+00> : vector<2x16xf32>
    %409 = vector.multi_reduction <add>, %408, %cst_184 [2] : vector<2x16x16xf32> to vector<2x16xf32>
    %410 = vector.shape_cast %409 : vector<2x16xf32> to vector<2x16x1xf32>
    %411 = tpu.reciprocal %410 {approx = true} : vector<2x16x1xf32> -> vector<2x16x1xf32>
    %412 = vector.broadcast %411 : vector<2x16x1xf32> to vector<2x16x16xf32>
    %413 = arith.mulf %408, %412 : vector<2x16x16xf32>
    "tpu.trace_start"() <{level = 10 : i32, message = "bqk,bke->bqe"}> : () -> ()
    %cst_185 = arith.constant dense<0.000000e+00> : vector<2x16x4xf32>
    %414 = tpu.matmul %413, %398, %cst_185 {dimension_numbers = #tpu.dot_dimension_numbers<[2], [1], [1], [2], [0, 0, 0, 1, 1, 2], [0], [0]>} : vector<2x16x16xf32>, vector<2x16x4xf32>, vector<2x16x4xf32> -> vector<2x16x4xf32>
    "tpu.trace_stop"() : () -> ()
    %c0_186 = arith.constant 0 : index
    %c0_187 = arith.constant 0 : index
    %c20_188 = arith.constant 20 : index
    %415 = vector.load %arg24[%c0_186, %c0_187, %c20_188] : memref<2x16x32xf32, #tpu.memory_space<vmem>>, vector<2x16x4xf32>
    tpu.vector_store %arg24[%c0_186, %c0_187, %c20_188], %414 {strides = array<i32>} : memref<2x16x32xf32, #tpu.memory_space<vmem>>, vector<2x16x4xf32>,
    %416 = vector.extract_strided_slice %291 {offsets = [0, 0, 24], sizes = [2, 16, 4], strides = [1, 1, 1]} : vector<2x16x32xf32> to vector<2x16x4xf32>
    %417 = vector.extract_strided_slice %293 {offsets = [0, 0, 24], sizes = [2, 16, 4], strides = [1, 1, 1]} : vector<2x16x32xf32> to vector<2x16x4xf32>
    %418 = vector.extract_strided_slice %295 {offsets = [0, 0, 24], sizes = [2, 16, 4], strides = [1, 1, 1]} : vector<2x16x32xf32> to vector<2x16x4xf32>
    "tpu.trace_start"() <{level = 10 : i32, message = "bqe,bke->bqk"}> : () -> ()
    %cst_189 = arith.constant dense<0.000000e+00> : vector<2x16x16xf32>
    %419 = tpu.matmul %416, %417, %cst_189 {dimension_numbers = #tpu.dot_dimension_numbers<[2], [2], [1], [1], [0, 0, 0, 1, 1, 1], [0], [0]>} : vector<2x16x4xf32>, vector<2x16x4xf32>, vector<2x16x16xf32> -> vector<2x16x16xf32>
    "tpu.trace_stop"() : () -> ()
    %cst_190 = arith.constant 5.000000e-01 : f32
    %420 = vector.broadcast %cst_190 : f32 to vector<2x16x16xf32>
    %421 = arith.mulf %419, %420 : vector<2x16x16xf32>
    %422 = vector.broadcast %24 : vector<1x1x16xf32> to vector<2x16x16xf32>
    %423 = arith.addf %421, %422 : vector<2x16x16xf32>
    %cst_191 = arith.constant dense<0xFF800000> : vector<2x16xf32>
    %424 = vector.multi_reduction <maximumf>, %423, %cst_191 [2] : vector<2x16x16xf32> to vector<2x16xf32>
    %425 = vector.shape_cast %424 : vector<2x16xf32> to vector<2x16x1xf32>
    %426 = vector.broadcast %425 : vector<2x16x1xf32> to vector<2x16x16xf32>
    %427 = arith.subf %423, %426 : vector<2x16x16xf32>
    %428 = math.exp %427 : vector<2x16x16xf32>
    %cst_192 = arith.constant dense<0.000000e+00> : vector<2x16xf32>
    %429 = vector.multi_reduction <add>, %428, %cst_192 [2] : vector<2x16x16xf32> to vector<2x16xf32>
    %430 = vector.shape_cast %429 : vector<2x16xf32> to vector<2x16x1xf32>
    %431 = tpu.reciprocal %430 {approx = true} : vector<2x16x1xf32> -> vector<2x16x1xf32>
    %432 = vector.broadcast %431 : vector<2x16x1xf32> to vector<2x16x16xf32>
    %433 = arith.mulf %428, %432 : vector<2x16x16xf32>
    "tpu.trace_start"() <{level = 10 : i32, message = "bqk,bke->bqe"}> : () -> ()
    %cst_193 = arith.constant dense<0.000000e+00> : vector<2x16x4xf32>
    %434 = tpu.matmul %433, %418, %cst_193 {dimension_numbers = #tpu.dot_dimension_numbers<[2], [1], [1], [2], [0, 0, 0, 1, 1, 2], [0], [0]>} : vector<2x16x16xf32>, vector<2x16x4xf32>, vector<2x16x4xf32> -> vector<2x16x4xf32>
    "tpu.trace_stop"() : () -> ()
    %c0_194 = arith.constant 0 : index
    %c0_195 = arith.constant 0 : index
    %c24_196 = arith.constant 24 : index
    %435 = vector.load %arg24[%c0_194, %c0_195, %c24_196] : memref<2x16x32xf32, #tpu.memory_space<vmem>>, vector<2x16x4xf32>
    tpu.vector_store %arg24[%c0_194, %c0_195, %c24_196], %434 {strides = array<i32>} : memref<2x16x32xf32, #tpu.memory_space<vmem>>, vector<2x16x4xf32>,
    %436 = vector.extract_strided_slice %291 {offsets = [0, 0, 28], sizes = [2, 16, 4], strides = [1, 1, 1]} : vector<2x16x32xf32> to vector<2x16x4xf32>
    %437 = vector.extract_strided_slice %293 {offsets = [0, 0, 28], sizes = [2, 16, 4], strides = [1, 1, 1]} : vector<2x16x32xf32> to vector<2x16x4xf32>
    %438 = vector.extract_strided_slice %295 {offsets = [0, 0, 28], sizes = [2, 16, 4], strides = [1, 1, 1]} : vector<2x16x32xf32> to vector<2x16x4xf32>
    "tpu.trace_start"() <{level = 10 : i32, message = "bqe,bke->bqk"}> : () -> ()
    %cst_197 = arith.constant dense<0.000000e+00> : vector<2x16x16xf32>
    %439 = tpu.matmul %436, %437, %cst_197 {dimension_numbers = #tpu.dot_dimension_numbers<[2], [2], [1], [1], [0, 0, 0, 1, 1, 1], [0], [0]>} : vector<2x16x4xf32>, vector<2x16x4xf32>, vector<2x16x16xf32> -> vector<2x16x16xf32>
    "tpu.trace_stop"() : () -> ()
    %cst_198 = arith.constant 5.000000e-01 : f32
    %440 = vector.broadcast %cst_198 : f32 to vector<2x16x16xf32>
    %441 = arith.mulf %439, %440 : vector<2x16x16xf32>
    %442 = vector.broadcast %24 : vector<1x1x16xf32> to vector<2x16x16xf32>
    %443 = arith.addf %441, %442 : vector<2x16x16xf32>
    %cst_199 = arith.constant dense<0xFF800000> : vector<2x16xf32>
    %444 = vector.multi_reduction <maximumf>, %443, %cst_199 [2] : vector<2x16x16xf32> to vector<2x16xf32>
    %445 = vector.shape_cast %444 : vector<2x16xf32> to vector<2x16x1xf32>
    %446 = vector.broadcast %445 : vector<2x16x1xf32> to vector<2x16x16xf32>
    %447 = arith.subf %443, %446 : vector<2x16x16xf32>
    %448 = math.exp %447 : vector<2x16x16xf32>
    %cst_200 = arith.constant dense<0.000000e+00> : vector<2x16xf32>
    %449 = vector.multi_reduction <add>, %448, %cst_200 [2] : vector<2x16x16xf32> to vector<2x16xf32>
    %450 = vector.shape_cast %449 : vector<2x16xf32> to vector<2x16x1xf32>
    %451 = tpu.reciprocal %450 {approx = true} : vector<2x16x1xf32> -> vector<2x16x1xf32>
    %452 = vector.broadcast %451 : vector<2x16x1xf32> to vector<2x16x16xf32>
    %453 = arith.mulf %448, %452 : vector<2x16x16xf32>
    "tpu.trace_start"() <{level = 10 : i32, message = "bqk,bke->bqe"}> : () -> ()
    %cst_201 = arith.constant dense<0.000000e+00> : vector<2x16x4xf32>
    %454 = tpu.matmul %453, %438, %cst_201 {dimension_numbers = #tpu.dot_dimension_numbers<[2], [1], [1], [2], [0, 0, 0, 1, 1, 2], [0], [0]>} : vector<2x16x16xf32>, vector<2x16x4xf32>, vector<2x16x4xf32> -> vector<2x16x4xf32>
    "tpu.trace_stop"() : () -> ()
    %c0_202 = arith.constant 0 : index
    %c0_203 = arith.constant 0 : index
    %c28_204 = arith.constant 28 : index
    %455 = vector.load %arg24[%c0_202, %c0_203, %c28_204] : memref<2x16x32xf32, #tpu.memory_space<vmem>>, vector<2x16x4xf32>
    tpu.vector_store %arg24[%c0_202, %c0_203, %c28_204], %454 {strides = array<i32>} : memref<2x16x32xf32, #tpu.memory_space<vmem>>, vector<2x16x4xf32>,
    %c0_205 = arith.constant 0 : index
    %c0_206 = arith.constant 0 : index
    %c0_207 = arith.constant 0 : index
    %456 = vector.load %arg24[%c0_205, %c0_206, %c0_207] : memref<2x16x32xf32, #tpu.memory_space<vmem>>, vector<2x16x32xf32>
    %457 = vector.shape_cast %456 : vector<2x16x32xf32> to vector<32x32xf32>
    %c1_208 = arith.constant 1 : index
    %c0_209 = arith.constant 0 : index
    %c0_210 = arith.constant 0 : index
    %458 = vector.load %arg7[%c1_208, %c0_209, %c0_210] : memref<3x32x32xf32, #tpu.memory_space<vmem>>, vector<1x32x32xf32>
    %459 = vector.shape_cast %458 : vector<1x32x32xf32> to vector<32x32xf32>
    %cst_211 = arith.constant dense<0.000000e+00> : vector<32x32xf32>
    %460 = tpu.matmul %457, %459, %cst_211 {dimension_numbers = #tpu.dot_dimension_numbers<[1], [0], [0], [1], [0, 0, 1, 1], [], []>} : vector<32x32xf32>, vector<32x32xf32>, vector<32x32xf32> -> vector<32x32xf32>
    %c1_212 = arith.constant 1 : index
    %c0_213 = arith.constant 0 : index
    %c0_214 = arith.constant 0 : index
    %461 = vector.load %arg8[%c1_212, %c0_213, %c0_214] : memref<3x1x32xf32, #tpu.memory_space<vmem>>, vector<1x1x32xf32>
    %462 = vector.shape_cast %461 : vector<1x1x32xf32> to vector<1x32xf32>
    %463 = vector.broadcast %462 : vector<1x32xf32> to vector<32x32xf32>
    %464 = arith.addf %460, %463 : vector<32x32xf32>
    %465 = arith.addf %282, %464 : vector<32x32xf32>
    %c1_215 = arith.constant 1 : index
    %c0_216 = arith.constant 0 : index
    %c0_217 = arith.constant 0 : index
    %466 = vector.load %arg9[%c1_215, %c0_216, %c0_217] : memref<3x1x32xf32, #tpu.memory_space<vmem>>, vector<1x1x32xf32>
    %467 = vector.shape_cast %466 : vector<1x1x32xf32> to vector<1x32xf32>
    %c1_218 = arith.constant 1 : index
    %c0_219 = arith.constant 0 : index
    %c0_220 = arith.constant 0 : index
    %468 = vector.load %arg10[%c1_218, %c0_219, %c0_220] : memref<3x1x32xf32, #tpu.memory_space<vmem>>, vector<1x1x32xf32>
    %469 = vector.shape_cast %468 : vector<1x1x32xf32> to vector<1x32xf32>
    %cst_221 = arith.constant dense<0.000000e+00> : vector<32xf32>
    %470 = vector.multi_reduction <add>, %465, %cst_221 [1] : vector<32x32xf32> to vector<32xf32>
    %471 = vector.shape_cast %470 : vector<32xf32> to vector<32x1xf32>
    %cst_222 = arith.constant 3.200000e+01 : f32
    %472 = vector.broadcast %cst_222 : f32 to vector<32x1xf32>
    %473 = arith.divf %471, %472 : vector<32x1xf32>
    %474 = vector.broadcast %473 : vector<32x1xf32> to vector<32x32xf32>
    %475 = arith.subf %465, %474 : vector<32x32xf32>
    %476 = arith.mulf %475, %475 : vector<32x32xf32>
    %cst_223 = arith.constant dense<0.000000e+00> : vector<32xf32>
    %477 = vector.multi_reduction <add>, %476, %cst_223 [1] : vector<32x32xf32> to vector<32xf32>
    %478 = vector.shape_cast %477 : vector<32xf32> to vector<32x1xf32>
    %cst_224 = arith.constant 3.200000e+01 : f32
    %479 = vector.broadcast %cst_224 : f32 to vector<32x1xf32>
    %480 = arith.divf %478, %479 : vector<32x1xf32>
    %481 = vector.broadcast %473 : vector<32x1xf32> to vector<32x32xf32>
    %482 = arith.subf %465, %481 : vector<32x32xf32>
    %cst_225 = arith.constant 9.99999974E-6 : f32
    %483 = vector.broadcast %cst_225 : f32 to vector<32x1xf32>
    %484 = arith.addf %480, %483 : vector<32x1xf32>
    %485 = math.rsqrt %484 : vector<32x1xf32>
    %486 = vector.broadcast %485 : vector<32x1xf32> to vector<32x32xf32>
    %487 = arith.mulf %482, %486 : vector<32x32xf32>
    %488 = vector.broadcast %467 : vector<1x32xf32> to vector<32x32xf32>
    %489 = arith.mulf %487, %488 : vector<32x32xf32>
    %490 = vector.broadcast %469 : vector<1x32xf32> to vector<32x32xf32>
    %491 = arith.addf %489, %490 : vector<32x32xf32>
    %c1_226 = arith.constant 1 : index
    %c0_227 = arith.constant 0 : index
    %c0_228 = arith.constant 0 : index
    %492 = vector.load %arg13[%c1_226, %c0_227, %c0_228] : memref<3x32x512xf32, #tpu.memory_space<vmem>>, vector<1x32x512xf32>
    %493 = vector.shape_cast %492 : vector<1x32x512xf32> to vector<32x512xf32>
    %cst_229 = arith.constant dense<0.000000e+00> : vector<32x512xf32>
    %494 = tpu.matmul %491, %493, %cst_229 {dimension_numbers = #tpu.dot_dimension_numbers<[1], [0], [0], [1], [0, 0, 1, 1], [], []>} : vector<32x32xf32>, vector<32x512xf32>, vector<32x512xf32> -> vector<32x512xf32>
    %c1_230 = arith.constant 1 : index
    %c0_231 = arith.constant 0 : index
    %c0_232 = arith.constant 0 : index
    %495 = vector.load %arg14[%c1_230, %c0_231, %c0_232] : memref<3x1x512xf32, #tpu.memory_space<vmem>>, vector<1x1x512xf32>
    %496 = vector.shape_cast %495 : vector<1x1x512xf32> to vector<1x512xf32>
    %497 = vector.broadcast %496 : vector<1x512xf32> to vector<32x512xf32>
    %498 = arith.addf %494, %497 : vector<32x512xf32>
    %cst_233 = arith.constant 5.000000e-01 : f32
    %499 = vector.broadcast %cst_233 : f32 to vector<32x512xf32>
    %500 = arith.mulf %499, %498 : vector<32x512xf32>
    %cst_234 = arith.constant 0.707106769 : f32
    %501 = vector.broadcast %cst_234 : f32 to vector<32x512xf32>
    %502 = arith.mulf %498, %501 : vector<32x512xf32>
    %503 = math.erf %502 : vector<32x512xf32>
    %cst_235 = arith.constant 1.000000e+00 : f32
    %504 = vector.broadcast %cst_235 : f32 to vector<32x512xf32>
    %505 = arith.addf %504, %503 : vector<32x512xf32>
    %506 = arith.mulf %500, %505 : vector<32x512xf32>
    %c1_236 = arith.constant 1 : index
    %c0_237 = arith.constant 0 : index
    %c0_238 = arith.constant 0 : index
    %507 = vector.load %arg15[%c1_236, %c0_237, %c0_238] : memref<3x512x32xf32, #tpu.memory_space<vmem>>, vector<1x512x32xf32>
    %508 = vector.shape_cast %507 : vector<1x512x32xf32> to vector<512x32xf32>
    %cst_239 = arith.constant dense<0.000000e+00> : vector<32x32xf32>
    %509 = tpu.matmul %506, %508, %cst_239 {dimension_numbers = #tpu.dot_dimension_numbers<[1], [0], [0], [1], [0, 0, 1, 1], [], []>} : vector<32x512xf32>, vector<512x32xf32>, vector<32x32xf32> -> vector<32x32xf32>
    %c1_240 = arith.constant 1 : index
    %c0_241 = arith.constant 0 : index
    %c0_242 = arith.constant 0 : index
    %510 = vector.load %arg16[%c1_240, %c0_241, %c0_242] : memref<3x1x32xf32, #tpu.memory_space<vmem>>, vector<1x1x32xf32>
    %511 = vector.shape_cast %510 : vector<1x1x32xf32> to vector<1x32xf32>
    %512 = vector.broadcast %511 : vector<1x32xf32> to vector<32x32xf32>
    %513 = arith.addf %509, %512 : vector<32x32xf32>
    %514 = arith.addf %491, %513 : vector<32x32xf32>
    %c1_243 = arith.constant 1 : index
    %c0_244 = arith.constant 0 : index
    %c0_245 = arith.constant 0 : index
    %515 = vector.load %arg11[%c1_243, %c0_244, %c0_245] : memref<3x1x32xf32, #tpu.memory_space<vmem>>, vector<1x1x32xf32>
    %516 = vector.shape_cast %515 : vector<1x1x32xf32> to vector<1x32xf32>
    %c1_246 = arith.constant 1 : index
    %c0_247 = arith.constant 0 : index
    %c0_248 = arith.constant 0 : index
    %517 = vector.load %arg12[%c1_246, %c0_247, %c0_248] : memref<3x1x32xf32, #tpu.memory_space<vmem>>, vector<1x1x32xf32>
    %518 = vector.shape_cast %517 : vector<1x1x32xf32> to vector<1x32xf32>
    %cst_249 = arith.constant dense<0.000000e+00> : vector<32xf32>
    %519 = vector.multi_reduction <add>, %514, %cst_249 [1] : vector<32x32xf32> to vector<32xf32>
    %520 = vector.shape_cast %519 : vector<32xf32> to vector<32x1xf32>
    %cst_250 = arith.constant 3.200000e+01 : f32
    %521 = vector.broadcast %cst_250 : f32 to vector<32x1xf32>
    %522 = arith.divf %520, %521 : vector<32x1xf32>
    %523 = vector.broadcast %522 : vector<32x1xf32> to vector<32x32xf32>
    %524 = arith.subf %514, %523 : vector<32x32xf32>
    %525 = arith.mulf %524, %524 : vector<32x32xf32>
    %cst_251 = arith.constant dense<0.000000e+00> : vector<32xf32>
    %526 = vector.multi_reduction <add>, %525, %cst_251 [1] : vector<32x32xf32> to vector<32xf32>
    %527 = vector.shape_cast %526 : vector<32xf32> to vector<32x1xf32>
    %cst_252 = arith.constant 3.200000e+01 : f32
    %528 = vector.broadcast %cst_252 : f32 to vector<32x1xf32>
    %529 = arith.divf %527, %528 : vector<32x1xf32>
    %530 = vector.broadcast %522 : vector<32x1xf32> to vector<32x32xf32>
    %531 = arith.subf %514, %530 : vector<32x32xf32>
    %cst_253 = arith.constant 9.99999974E-6 : f32
    %532 = vector.broadcast %cst_253 : f32 to vector<32x1xf32>
    %533 = arith.addf %529, %532 : vector<32x1xf32>
    %534 = math.rsqrt %533 : vector<32x1xf32>
    %535 = vector.broadcast %534 : vector<32x1xf32> to vector<32x32xf32>
    %536 = arith.mulf %531, %535 : vector<32x32xf32>
    %537 = vector.broadcast %516 : vector<1x32xf32> to vector<32x32xf32>
    %538 = arith.mulf %536, %537 : vector<32x32xf32>
    %539 = vector.broadcast %518 : vector<1x32xf32> to vector<32x32xf32>
    %540 = arith.addf %538, %539 : vector<32x32xf32>
    %c2 = arith.constant 2 : index
    %c0_254 = arith.constant 0 : index
    %c0_255 = arith.constant 0 : index
    %541 = vector.load %arg5[%c2, %c0_254, %c0_255] : memref<3x32x96xf32, #tpu.memory_space<vmem>>, vector<1x32x96xf32>
    %542 = vector.shape_cast %541 : vector<1x32x96xf32> to vector<32x96xf32>
    %cst_256 = arith.constant dense<0.000000e+00> : vector<32x96xf32>
    %543 = tpu.matmul %540, %542, %cst_256 {dimension_numbers = #tpu.dot_dimension_numbers<[1], [0], [0], [1], [0, 0, 1, 1], [], []>} : vector<32x32xf32>, vector<32x96xf32>, vector<32x96xf32> -> vector<32x96xf32>
    %c2_257 = arith.constant 2 : index
    %c0_258 = arith.constant 0 : index
    %c0_259 = arith.constant 0 : index
    %544 = vector.load %arg6[%c2_257, %c0_258, %c0_259] : memref<3x1x96xf32, #tpu.memory_space<vmem>>, vector<1x1x96xf32>
    %545 = vector.shape_cast %544 : vector<1x1x96xf32> to vector<1x96xf32>
    %546 = vector.broadcast %545 : vector<1x96xf32> to vector<32x96xf32>
    %547 = arith.addf %543, %546 : vector<32x96xf32>
    %548 = vector.extract_strided_slice %547 {offsets = [0, 0], sizes = [32, 32], strides = [1, 1]} : vector<32x96xf32> to vector<32x32xf32>
    %549 = vector.shape_cast %548 : vector<32x32xf32> to vector<2x16x32xf32>
    %550 = vector.extract_strided_slice %547 {offsets = [0, 32], sizes = [32, 32], strides = [1, 1]} : vector<32x96xf32> to vector<32x32xf32>
    %551 = vector.shape_cast %550 : vector<32x32xf32> to vector<2x16x32xf32>
    %552 = vector.extract_strided_slice %547 {offsets = [0, 64], sizes = [32, 32], strides = [1, 1]} : vector<32x96xf32> to vector<32x32xf32>
    %553 = vector.shape_cast %552 : vector<32x32xf32> to vector<2x16x32xf32>
    %554 = vector.extract_strided_slice %549 {offsets = [0, 0, 0], sizes = [2, 16, 4], strides = [1, 1, 1]} : vector<2x16x32xf32> to vector<2x16x4xf32>
    %555 = vector.extract_strided_slice %551 {offsets = [0, 0, 0], sizes = [2, 16, 4], strides = [1, 1, 1]} : vector<2x16x32xf32> to vector<2x16x4xf32>
    %556 = vector.extract_strided_slice %553 {offsets = [0, 0, 0], sizes = [2, 16, 4], strides = [1, 1, 1]} : vector<2x16x32xf32> to vector<2x16x4xf32>
    "tpu.trace_start"() <{level = 10 : i32, message = "bqe,bke->bqk"}> : () -> ()
    %cst_260 = arith.constant dense<0.000000e+00> : vector<2x16x16xf32>
    %557 = tpu.matmul %554, %555, %cst_260 {dimension_numbers = #tpu.dot_dimension_numbers<[2], [2], [1], [1], [0, 0, 0, 1, 1, 1], [0], [0]>} : vector<2x16x4xf32>, vector<2x16x4xf32>, vector<2x16x16xf32> -> vector<2x16x16xf32>
    "tpu.trace_stop"() : () -> ()
    %cst_261 = arith.constant 5.000000e-01 : f32
    %558 = vector.broadcast %cst_261 : f32 to vector<2x16x16xf32>
    %559 = arith.mulf %557, %558 : vector<2x16x16xf32>
    %560 = vector.broadcast %24 : vector<1x1x16xf32> to vector<2x16x16xf32>
    %561 = arith.addf %559, %560 : vector<2x16x16xf32>
    %cst_262 = arith.constant dense<0xFF800000> : vector<2x16xf32>
    %562 = vector.multi_reduction <maximumf>, %561, %cst_262 [2] : vector<2x16x16xf32> to vector<2x16xf32>
    %563 = vector.shape_cast %562 : vector<2x16xf32> to vector<2x16x1xf32>
    %564 = vector.broadcast %563 : vector<2x16x1xf32> to vector<2x16x16xf32>
    %565 = arith.subf %561, %564 : vector<2x16x16xf32>
    %566 = math.exp %565 : vector<2x16x16xf32>
    %cst_263 = arith.constant dense<0.000000e+00> : vector<2x16xf32>
    %567 = vector.multi_reduction <add>, %566, %cst_263 [2] : vector<2x16x16xf32> to vector<2x16xf32>
    %568 = vector.shape_cast %567 : vector<2x16xf32> to vector<2x16x1xf32>
    %569 = tpu.reciprocal %568 {approx = true} : vector<2x16x1xf32> -> vector<2x16x1xf32>
    %570 = vector.broadcast %569 : vector<2x16x1xf32> to vector<2x16x16xf32>
    %571 = arith.mulf %566, %570 : vector<2x16x16xf32>
    "tpu.trace_start"() <{level = 10 : i32, message = "bqk,bke->bqe"}> : () -> ()
    %cst_264 = arith.constant dense<0.000000e+00> : vector<2x16x4xf32>
    %572 = tpu.matmul %571, %556, %cst_264 {dimension_numbers = #tpu.dot_dimension_numbers<[2], [1], [1], [2], [0, 0, 0, 1, 1, 2], [0], [0]>} : vector<2x16x16xf32>, vector<2x16x4xf32>, vector<2x16x4xf32> -> vector<2x16x4xf32>
    "tpu.trace_stop"() : () -> ()
    %c0_265 = arith.constant 0 : index
    %c0_266 = arith.constant 0 : index
    %c0_267 = arith.constant 0 : index
    %573 = vector.load %arg24[%c0_265, %c0_266, %c0_267] : memref<2x16x32xf32, #tpu.memory_space<vmem>>, vector<2x16x4xf32>
    tpu.vector_store %arg24[%c0_265, %c0_266, %c0_267], %572 {strides = array<i32>} : memref<2x16x32xf32, #tpu.memory_space<vmem>>, vector<2x16x4xf32>,
    %574 = vector.extract_strided_slice %549 {offsets = [0, 0, 4], sizes = [2, 16, 4], strides = [1, 1, 1]} : vector<2x16x32xf32> to vector<2x16x4xf32>
    %575 = vector.extract_strided_slice %551 {offsets = [0, 0, 4], sizes = [2, 16, 4], strides = [1, 1, 1]} : vector<2x16x32xf32> to vector<2x16x4xf32>
    %576 = vector.extract_strided_slice %553 {offsets = [0, 0, 4], sizes = [2, 16, 4], strides = [1, 1, 1]} : vector<2x16x32xf32> to vector<2x16x4xf32>
    "tpu.trace_start"() <{level = 10 : i32, message = "bqe,bke->bqk"}> : () -> ()
    %cst_268 = arith.constant dense<0.000000e+00> : vector<2x16x16xf32>
    %577 = tpu.matmul %574, %575, %cst_268 {dimension_numbers = #tpu.dot_dimension_numbers<[2], [2], [1], [1], [0, 0, 0, 1, 1, 1], [0], [0]>} : vector<2x16x4xf32>, vector<2x16x4xf32>, vector<2x16x16xf32> -> vector<2x16x16xf32>
    "tpu.trace_stop"() : () -> ()
    %cst_269 = arith.constant 5.000000e-01 : f32
    %578 = vector.broadcast %cst_269 : f32 to vector<2x16x16xf32>
    %579 = arith.mulf %577, %578 : vector<2x16x16xf32>
    %580 = vector.broadcast %24 : vector<1x1x16xf32> to vector<2x16x16xf32>
    %581 = arith.addf %579, %580 : vector<2x16x16xf32>
    %cst_270 = arith.constant dense<0xFF800000> : vector<2x16xf32>
    %582 = vector.multi_reduction <maximumf>, %581, %cst_270 [2] : vector<2x16x16xf32> to vector<2x16xf32>
    %583 = vector.shape_cast %582 : vector<2x16xf32> to vector<2x16x1xf32>
    %584 = vector.broadcast %583 : vector<2x16x1xf32> to vector<2x16x16xf32>
    %585 = arith.subf %581, %584 : vector<2x16x16xf32>
    %586 = math.exp %585 : vector<2x16x16xf32>
    %cst_271 = arith.constant dense<0.000000e+00> : vector<2x16xf32>
    %587 = vector.multi_reduction <add>, %586, %cst_271 [2] : vector<2x16x16xf32> to vector<2x16xf32>
    %588 = vector.shape_cast %587 : vector<2x16xf32> to vector<2x16x1xf32>
    %589 = tpu.reciprocal %588 {approx = true} : vector<2x16x1xf32> -> vector<2x16x1xf32>
    %590 = vector.broadcast %589 : vector<2x16x1xf32> to vector<2x16x16xf32>
    %591 = arith.mulf %586, %590 : vector<2x16x16xf32>
    "tpu.trace_start"() <{level = 10 : i32, message = "bqk,bke->bqe"}> : () -> ()
    %cst_272 = arith.constant dense<0.000000e+00> : vector<2x16x4xf32>
    %592 = tpu.matmul %591, %576, %cst_272 {dimension_numbers = #tpu.dot_dimension_numbers<[2], [1], [1], [2], [0, 0, 0, 1, 1, 2], [0], [0]>} : vector<2x16x16xf32>, vector<2x16x4xf32>, vector<2x16x4xf32> -> vector<2x16x4xf32>
    "tpu.trace_stop"() : () -> ()
    %c0_273 = arith.constant 0 : index
    %c0_274 = arith.constant 0 : index
    %c4_275 = arith.constant 4 : index
    %593 = vector.load %arg24[%c0_273, %c0_274, %c4_275] : memref<2x16x32xf32, #tpu.memory_space<vmem>>, vector<2x16x4xf32>
    tpu.vector_store %arg24[%c0_273, %c0_274, %c4_275], %592 {strides = array<i32>} : memref<2x16x32xf32, #tpu.memory_space<vmem>>, vector<2x16x4xf32>,
    %594 = vector.extract_strided_slice %549 {offsets = [0, 0, 8], sizes = [2, 16, 4], strides = [1, 1, 1]} : vector<2x16x32xf32> to vector<2x16x4xf32>
    %595 = vector.extract_strided_slice %551 {offsets = [0, 0, 8], sizes = [2, 16, 4], strides = [1, 1, 1]} : vector<2x16x32xf32> to vector<2x16x4xf32>
    %596 = vector.extract_strided_slice %553 {offsets = [0, 0, 8], sizes = [2, 16, 4], strides = [1, 1, 1]} : vector<2x16x32xf32> to vector<2x16x4xf32>
    "tpu.trace_start"() <{level = 10 : i32, message = "bqe,bke->bqk"}> : () -> ()
    %cst_276 = arith.constant dense<0.000000e+00> : vector<2x16x16xf32>
    %597 = tpu.matmul %594, %595, %cst_276 {dimension_numbers = #tpu.dot_dimension_numbers<[2], [2], [1], [1], [0, 0, 0, 1, 1, 1], [0], [0]>} : vector<2x16x4xf32>, vector<2x16x4xf32>, vector<2x16x16xf32> -> vector<2x16x16xf32>
    "tpu.trace_stop"() : () -> ()
    %cst_277 = arith.constant 5.000000e-01 : f32
    %598 = vector.broadcast %cst_277 : f32 to vector<2x16x16xf32>
    %599 = arith.mulf %597, %598 : vector<2x16x16xf32>
    %600 = vector.broadcast %24 : vector<1x1x16xf32> to vector<2x16x16xf32>
    %601 = arith.addf %599, %600 : vector<2x16x16xf32>
    %cst_278 = arith.constant dense<0xFF800000> : vector<2x16xf32>
    %602 = vector.multi_reduction <maximumf>, %601, %cst_278 [2] : vector<2x16x16xf32> to vector<2x16xf32>
    %603 = vector.shape_cast %602 : vector<2x16xf32> to vector<2x16x1xf32>
    %604 = vector.broadcast %603 : vector<2x16x1xf32> to vector<2x16x16xf32>
    %605 = arith.subf %601, %604 : vector<2x16x16xf32>
    %606 = math.exp %605 : vector<2x16x16xf32>
    %cst_279 = arith.constant dense<0.000000e+00> : vector<2x16xf32>
    %607 = vector.multi_reduction <add>, %606, %cst_279 [2] : vector<2x16x16xf32> to vector<2x16xf32>
    %608 = vector.shape_cast %607 : vector<2x16xf32> to vector<2x16x1xf32>
    %609 = tpu.reciprocal %608 {approx = true} : vector<2x16x1xf32> -> vector<2x16x1xf32>
    %610 = vector.broadcast %609 : vector<2x16x1xf32> to vector<2x16x16xf32>
    %611 = arith.mulf %606, %610 : vector<2x16x16xf32>
    "tpu.trace_start"() <{level = 10 : i32, message = "bqk,bke->bqe"}> : () -> ()
    %cst_280 = arith.constant dense<0.000000e+00> : vector<2x16x4xf32>
    %612 = tpu.matmul %611, %596, %cst_280 {dimension_numbers = #tpu.dot_dimension_numbers<[2], [1], [1], [2], [0, 0, 0, 1, 1, 2], [0], [0]>} : vector<2x16x16xf32>, vector<2x16x4xf32>, vector<2x16x4xf32> -> vector<2x16x4xf32>
    "tpu.trace_stop"() : () -> ()
    %c0_281 = arith.constant 0 : index
    %c0_282 = arith.constant 0 : index
    %c8_283 = arith.constant 8 : index
    %613 = vector.load %arg24[%c0_281, %c0_282, %c8_283] : memref<2x16x32xf32, #tpu.memory_space<vmem>>, vector<2x16x4xf32>
    tpu.vector_store %arg24[%c0_281, %c0_282, %c8_283], %612 {strides = array<i32>} : memref<2x16x32xf32, #tpu.memory_space<vmem>>, vector<2x16x4xf32>,
    %614 = vector.extract_strided_slice %549 {offsets = [0, 0, 12], sizes = [2, 16, 4], strides = [1, 1, 1]} : vector<2x16x32xf32> to vector<2x16x4xf32>
    %615 = vector.extract_strided_slice %551 {offsets = [0, 0, 12], sizes = [2, 16, 4], strides = [1, 1, 1]} : vector<2x16x32xf32> to vector<2x16x4xf32>
    %616 = vector.extract_strided_slice %553 {offsets = [0, 0, 12], sizes = [2, 16, 4], strides = [1, 1, 1]} : vector<2x16x32xf32> to vector<2x16x4xf32>
    "tpu.trace_start"() <{level = 10 : i32, message = "bqe,bke->bqk"}> : () -> ()
    %cst_284 = arith.constant dense<0.000000e+00> : vector<2x16x16xf32>
    %617 = tpu.matmul %614, %615, %cst_284 {dimension_numbers = #tpu.dot_dimension_numbers<[2], [2], [1], [1], [0, 0, 0, 1, 1, 1], [0], [0]>} : vector<2x16x4xf32>, vector<2x16x4xf32>, vector<2x16x16xf32> -> vector<2x16x16xf32>
    "tpu.trace_stop"() : () -> ()
    %cst_285 = arith.constant 5.000000e-01 : f32
    %618 = vector.broadcast %cst_285 : f32 to vector<2x16x16xf32>
    %619 = arith.mulf %617, %618 : vector<2x16x16xf32>
    %620 = vector.broadcast %24 : vector<1x1x16xf32> to vector<2x16x16xf32>
    %621 = arith.addf %619, %620 : vector<2x16x16xf32>
    %cst_286 = arith.constant dense<0xFF800000> : vector<2x16xf32>
    %622 = vector.multi_reduction <maximumf>, %621, %cst_286 [2] : vector<2x16x16xf32> to vector<2x16xf32>
    %623 = vector.shape_cast %622 : vector<2x16xf32> to vector<2x16x1xf32>
    %624 = vector.broadcast %623 : vector<2x16x1xf32> to vector<2x16x16xf32>
    %625 = arith.subf %621, %624 : vector<2x16x16xf32>
    %626 = math.exp %625 : vector<2x16x16xf32>
    %cst_287 = arith.constant dense<0.000000e+00> : vector<2x16xf32>
    %627 = vector.multi_reduction <add>, %626, %cst_287 [2] : vector<2x16x16xf32> to vector<2x16xf32>
    %628 = vector.shape_cast %627 : vector<2x16xf32> to vector<2x16x1xf32>
    %629 = tpu.reciprocal %628 {approx = true} : vector<2x16x1xf32> -> vector<2x16x1xf32>
    %630 = vector.broadcast %629 : vector<2x16x1xf32> to vector<2x16x16xf32>
    %631 = arith.mulf %626, %630 : vector<2x16x16xf32>
    "tpu.trace_start"() <{level = 10 : i32, message = "bqk,bke->bqe"}> : () -> ()
    %cst_288 = arith.constant dense<0.000000e+00> : vector<2x16x4xf32>
    %632 = tpu.matmul %631, %616, %cst_288 {dimension_numbers = #tpu.dot_dimension_numbers<[2], [1], [1], [2], [0, 0, 0, 1, 1, 2], [0], [0]>} : vector<2x16x16xf32>, vector<2x16x4xf32>, vector<2x16x4xf32> -> vector<2x16x4xf32>
    "tpu.trace_stop"() : () -> ()
    %c0_289 = arith.constant 0 : index
    %c0_290 = arith.constant 0 : index
    %c12_291 = arith.constant 12 : index
    %633 = vector.load %arg24[%c0_289, %c0_290, %c12_291] : memref<2x16x32xf32, #tpu.memory_space<vmem>>, vector<2x16x4xf32>
    tpu.vector_store %arg24[%c0_289, %c0_290, %c12_291], %632 {strides = array<i32>} : memref<2x16x32xf32, #tpu.memory_space<vmem>>, vector<2x16x4xf32>,
    %634 = vector.extract_strided_slice %549 {offsets = [0, 0, 16], sizes = [2, 16, 4], strides = [1, 1, 1]} : vector<2x16x32xf32> to vector<2x16x4xf32>
    %635 = vector.extract_strided_slice %551 {offsets = [0, 0, 16], sizes = [2, 16, 4], strides = [1, 1, 1]} : vector<2x16x32xf32> to vector<2x16x4xf32>
    %636 = vector.extract_strided_slice %553 {offsets = [0, 0, 16], sizes = [2, 16, 4], strides = [1, 1, 1]} : vector<2x16x32xf32> to vector<2x16x4xf32>
    "tpu.trace_start"() <{level = 10 : i32, message = "bqe,bke->bqk"}> : () -> ()
    %cst_292 = arith.constant dense<0.000000e+00> : vector<2x16x16xf32>
    %637 = tpu.matmul %634, %635, %cst_292 {dimension_numbers = #tpu.dot_dimension_numbers<[2], [2], [1], [1], [0, 0, 0, 1, 1, 1], [0], [0]>} : vector<2x16x4xf32>, vector<2x16x4xf32>, vector<2x16x16xf32> -> vector<2x16x16xf32>
    "tpu.trace_stop"() : () -> ()
    %cst_293 = arith.constant 5.000000e-01 : f32
    %638 = vector.broadcast %cst_293 : f32 to vector<2x16x16xf32>
    %639 = arith.mulf %637, %638 : vector<2x16x16xf32>
    %640 = vector.broadcast %24 : vector<1x1x16xf32> to vector<2x16x16xf32>
    %641 = arith.addf %639, %640 : vector<2x16x16xf32>
    %cst_294 = arith.constant dense<0xFF800000> : vector<2x16xf32>
    %642 = vector.multi_reduction <maximumf>, %641, %cst_294 [2] : vector<2x16x16xf32> to vector<2x16xf32>
    %643 = vector.shape_cast %642 : vector<2x16xf32> to vector<2x16x1xf32>
    %644 = vector.broadcast %643 : vector<2x16x1xf32> to vector<2x16x16xf32>
    %645 = arith.subf %641, %644 : vector<2x16x16xf32>
    %646 = math.exp %645 : vector<2x16x16xf32>
    %cst_295 = arith.constant dense<0.000000e+00> : vector<2x16xf32>
    %647 = vector.multi_reduction <add>, %646, %cst_295 [2] : vector<2x16x16xf32> to vector<2x16xf32>
    %648 = vector.shape_cast %647 : vector<2x16xf32> to vector<2x16x1xf32>
    %649 = tpu.reciprocal %648 {approx = true} : vector<2x16x1xf32> -> vector<2x16x1xf32>
    %650 = vector.broadcast %649 : vector<2x16x1xf32> to vector<2x16x16xf32>
    %651 = arith.mulf %646, %650 : vector<2x16x16xf32>
    "tpu.trace_start"() <{level = 10 : i32, message = "bqk,bke->bqe"}> : () -> ()
    %cst_296 = arith.constant dense<0.000000e+00> : vector<2x16x4xf32>
    %652 = tpu.matmul %651, %636, %cst_296 {dimension_numbers = #tpu.dot_dimension_numbers<[2], [1], [1], [2], [0, 0, 0, 1, 1, 2], [0], [0]>} : vector<2x16x16xf32>, vector<2x16x4xf32>, vector<2x16x4xf32> -> vector<2x16x4xf32>
    "tpu.trace_stop"() : () -> ()
    %c0_297 = arith.constant 0 : index
    %c0_298 = arith.constant 0 : index
    %c16_299 = arith.constant 16 : index
    %653 = vector.load %arg24[%c0_297, %c0_298, %c16_299] : memref<2x16x32xf32, #tpu.memory_space<vmem>>, vector<2x16x4xf32>
    tpu.vector_store %arg24[%c0_297, %c0_298, %c16_299], %652 {strides = array<i32>} : memref<2x16x32xf32, #tpu.memory_space<vmem>>, vector<2x16x4xf32>,
    %654 = vector.extract_strided_slice %549 {offsets = [0, 0, 20], sizes = [2, 16, 4], strides = [1, 1, 1]} : vector<2x16x32xf32> to vector<2x16x4xf32>
    %655 = vector.extract_strided_slice %551 {offsets = [0, 0, 20], sizes = [2, 16, 4], strides = [1, 1, 1]} : vector<2x16x32xf32> to vector<2x16x4xf32>
    %656 = vector.extract_strided_slice %553 {offsets = [0, 0, 20], sizes = [2, 16, 4], strides = [1, 1, 1]} : vector<2x16x32xf32> to vector<2x16x4xf32>
    "tpu.trace_start"() <{level = 10 : i32, message = "bqe,bke->bqk"}> : () -> ()
    %cst_300 = arith.constant dense<0.000000e+00> : vector<2x16x16xf32>
    %657 = tpu.matmul %654, %655, %cst_300 {dimension_numbers = #tpu.dot_dimension_numbers<[2], [2], [1], [1], [0, 0, 0, 1, 1, 1], [0], [0]>} : vector<2x16x4xf32>, vector<2x16x4xf32>, vector<2x16x16xf32> -> vector<2x16x16xf32>
    "tpu.trace_stop"() : () -> ()
    %cst_301 = arith.constant 5.000000e-01 : f32
    %658 = vector.broadcast %cst_301 : f32 to vector<2x16x16xf32>
    %659 = arith.mulf %657, %658 : vector<2x16x16xf32>
    %660 = vector.broadcast %24 : vector<1x1x16xf32> to vector<2x16x16xf32>
    %661 = arith.addf %659, %660 : vector<2x16x16xf32>
    %cst_302 = arith.constant dense<0xFF800000> : vector<2x16xf32>
    %662 = vector.multi_reduction <maximumf>, %661, %cst_302 [2] : vector<2x16x16xf32> to vector<2x16xf32>
    %663 = vector.shape_cast %662 : vector<2x16xf32> to vector<2x16x1xf32>
    %664 = vector.broadcast %663 : vector<2x16x1xf32> to vector<2x16x16xf32>
    %665 = arith.subf %661, %664 : vector<2x16x16xf32>
    %666 = math.exp %665 : vector<2x16x16xf32>
    %cst_303 = arith.constant dense<0.000000e+00> : vector<2x16xf32>
    %667 = vector.multi_reduction <add>, %666, %cst_303 [2] : vector<2x16x16xf32> to vector<2x16xf32>
    %668 = vector.shape_cast %667 : vector<2x16xf32> to vector<2x16x1xf32>
    %669 = tpu.reciprocal %668 {approx = true} : vector<2x16x1xf32> -> vector<2x16x1xf32>
    %670 = vector.broadcast %669 : vector<2x16x1xf32> to vector<2x16x16xf32>
    %671 = arith.mulf %666, %670 : vector<2x16x16xf32>
    "tpu.trace_start"() <{level = 10 : i32, message = "bqk,bke->bqe"}> : () -> ()
    %cst_304 = arith.constant dense<0.000000e+00> : vector<2x16x4xf32>
    %672 = tpu.matmul %671, %656, %cst_304 {dimension_numbers = #tpu.dot_dimension_numbers<[2], [1], [1], [2], [0, 0, 0, 1, 1, 2], [0], [0]>} : vector<2x16x16xf32>, vector<2x16x4xf32>, vector<2x16x4xf32> -> vector<2x16x4xf32>
    "tpu.trace_stop"() : () -> ()
    %c0_305 = arith.constant 0 : index
    %c0_306 = arith.constant 0 : index
    %c20_307 = arith.constant 20 : index
    %673 = vector.load %arg24[%c0_305, %c0_306, %c20_307] : memref<2x16x32xf32, #tpu.memory_space<vmem>>, vector<2x16x4xf32>
    tpu.vector_store %arg24[%c0_305, %c0_306, %c20_307], %672 {strides = array<i32>} : memref<2x16x32xf32, #tpu.memory_space<vmem>>, vector<2x16x4xf32>,
    %674 = vector.extract_strided_slice %549 {offsets = [0, 0, 24], sizes = [2, 16, 4], strides = [1, 1, 1]} : vector<2x16x32xf32> to vector<2x16x4xf32>
    %675 = vector.extract_strided_slice %551 {offsets = [0, 0, 24], sizes = [2, 16, 4], strides = [1, 1, 1]} : vector<2x16x32xf32> to vector<2x16x4xf32>
    %676 = vector.extract_strided_slice %553 {offsets = [0, 0, 24], sizes = [2, 16, 4], strides = [1, 1, 1]} : vector<2x16x32xf32> to vector<2x16x4xf32>
    "tpu.trace_start"() <{level = 10 : i32, message = "bqe,bke->bqk"}> : () -> ()
    %cst_308 = arith.constant dense<0.000000e+00> : vector<2x16x16xf32>
    %677 = tpu.matmul %674, %675, %cst_308 {dimension_numbers = #tpu.dot_dimension_numbers<[2], [2], [1], [1], [0, 0, 0, 1, 1, 1], [0], [0]>} : vector<2x16x4xf32>, vector<2x16x4xf32>, vector<2x16x16xf32> -> vector<2x16x16xf32>
    "tpu.trace_stop"() : () -> ()
    %cst_309 = arith.constant 5.000000e-01 : f32
    %678 = vector.broadcast %cst_309 : f32 to vector<2x16x16xf32>
    %679 = arith.mulf %677, %678 : vector<2x16x16xf32>
    %680 = vector.broadcast %24 : vector<1x1x16xf32> to vector<2x16x16xf32>
    %681 = arith.addf %679, %680 : vector<2x16x16xf32>
    %cst_310 = arith.constant dense<0xFF800000> : vector<2x16xf32>
    %682 = vector.multi_reduction <maximumf>, %681, %cst_310 [2] : vector<2x16x16xf32> to vector<2x16xf32>
    %683 = vector.shape_cast %682 : vector<2x16xf32> to vector<2x16x1xf32>
    %684 = vector.broadcast %683 : vector<2x16x1xf32> to vector<2x16x16xf32>
    %685 = arith.subf %681, %684 : vector<2x16x16xf32>
    %686 = math.exp %685 : vector<2x16x16xf32>
    %cst_311 = arith.constant dense<0.000000e+00> : vector<2x16xf32>
    %687 = vector.multi_reduction <add>, %686, %cst_311 [2] : vector<2x16x16xf32> to vector<2x16xf32>
    %688 = vector.shape_cast %687 : vector<2x16xf32> to vector<2x16x1xf32>
    %689 = tpu.reciprocal %688 {approx = true} : vector<2x16x1xf32> -> vector<2x16x1xf32>
    %690 = vector.broadcast %689 : vector<2x16x1xf32> to vector<2x16x16xf32>
    %691 = arith.mulf %686, %690 : vector<2x16x16xf32>
    "tpu.trace_start"() <{level = 10 : i32, message = "bqk,bke->bqe"}> : () -> ()
    %cst_312 = arith.constant dense<0.000000e+00> : vector<2x16x4xf32>
    %692 = tpu.matmul %691, %676, %cst_312 {dimension_numbers = #tpu.dot_dimension_numbers<[2], [1], [1], [2], [0, 0, 0, 1, 1, 2], [0], [0]>} : vector<2x16x16xf32>, vector<2x16x4xf32>, vector<2x16x4xf32> -> vector<2x16x4xf32>
    "tpu.trace_stop"() : () -> ()
    %c0_313 = arith.constant 0 : index
    %c0_314 = arith.constant 0 : index
    %c24_315 = arith.constant 24 : index
    %693 = vector.load %arg24[%c0_313, %c0_314, %c24_315] : memref<2x16x32xf32, #tpu.memory_space<vmem>>, vector<2x16x4xf32>
    tpu.vector_store %arg24[%c0_313, %c0_314, %c24_315], %692 {strides = array<i32>} : memref<2x16x32xf32, #tpu.memory_space<vmem>>, vector<2x16x4xf32>,
    %694 = vector.extract_strided_slice %549 {offsets = [0, 0, 28], sizes = [2, 16, 4], strides = [1, 1, 1]} : vector<2x16x32xf32> to vector<2x16x4xf32>
    %695 = vector.extract_strided_slice %551 {offsets = [0, 0, 28], sizes = [2, 16, 4], strides = [1, 1, 1]} : vector<2x16x32xf32> to vector<2x16x4xf32>
    %696 = vector.extract_strided_slice %553 {offsets = [0, 0, 28], sizes = [2, 16, 4], strides = [1, 1, 1]} : vector<2x16x32xf32> to vector<2x16x4xf32>
    "tpu.trace_start"() <{level = 10 : i32, message = "bqe,bke->bqk"}> : () -> ()
    %cst_316 = arith.constant dense<0.000000e+00> : vector<2x16x16xf32>
    %697 = tpu.matmul %694, %695, %cst_316 {dimension_numbers = #tpu.dot_dimension_numbers<[2], [2], [1], [1], [0, 0, 0, 1, 1, 1], [0], [0]>} : vector<2x16x4xf32>, vector<2x16x4xf32>, vector<2x16x16xf32> -> vector<2x16x16xf32>
    "tpu.trace_stop"() : () -> ()
    %cst_317 = arith.constant 5.000000e-01 : f32
    %698 = vector.broadcast %cst_317 : f32 to vector<2x16x16xf32>
    %699 = arith.mulf %697, %698 : vector<2x16x16xf32>
    %700 = vector.broadcast %24 : vector<1x1x16xf32> to vector<2x16x16xf32>
    %701 = arith.addf %699, %700 : vector<2x16x16xf32>
    %cst_318 = arith.constant dense<0xFF800000> : vector<2x16xf32>
    %702 = vector.multi_reduction <maximumf>, %701, %cst_318 [2] : vector<2x16x16xf32> to vector<2x16xf32>
    %703 = vector.shape_cast %702 : vector<2x16xf32> to vector<2x16x1xf32>
    %704 = vector.broadcast %703 : vector<2x16x1xf32> to vector<2x16x16xf32>
    %705 = arith.subf %701, %704 : vector<2x16x16xf32>
    %706 = math.exp %705 : vector<2x16x16xf32>
    %cst_319 = arith.constant dense<0.000000e+00> : vector<2x16xf32>
    %707 = vector.multi_reduction <add>, %706, %cst_319 [2] : vector<2x16x16xf32> to vector<2x16xf32>
    %708 = vector.shape_cast %707 : vector<2x16xf32> to vector<2x16x1xf32>
    %709 = tpu.reciprocal %708 {approx = true} : vector<2x16x1xf32> -> vector<2x16x1xf32>
    %710 = vector.broadcast %709 : vector<2x16x1xf32> to vector<2x16x16xf32>
    %711 = arith.mulf %706, %710 : vector<2x16x16xf32>
    "tpu.trace_start"() <{level = 10 : i32, message = "bqk,bke->bqe"}> : () -> ()
    %cst_320 = arith.constant dense<0.000000e+00> : vector<2x16x4xf32>
    %712 = tpu.matmul %711, %696, %cst_320 {dimension_numbers = #tpu.dot_dimension_numbers<[2], [1], [1], [2], [0, 0, 0, 1, 1, 2], [0], [0]>} : vector<2x16x16xf32>, vector<2x16x4xf32>, vector<2x16x4xf32> -> vector<2x16x4xf32>
    "tpu.trace_stop"() : () -> ()
    %c0_321 = arith.constant 0 : index
    %c0_322 = arith.constant 0 : index
    %c28_323 = arith.constant 28 : index
    %713 = vector.load %arg24[%c0_321, %c0_322, %c28_323] : memref<2x16x32xf32, #tpu.memory_space<vmem>>, vector<2x16x4xf32>
    tpu.vector_store %arg24[%c0_321, %c0_322, %c28_323], %712 {strides = array<i32>} : memref<2x16x32xf32, #tpu.memory_space<vmem>>, vector<2x16x4xf32>,
    %c0_324 = arith.constant 0 : index
    %c0_325 = arith.constant 0 : index
    %c0_326 = arith.constant 0 : index
    %714 = vector.load %arg24[%c0_324, %c0_325, %c0_326] : memref<2x16x32xf32, #tpu.memory_space<vmem>>, vector<2x16x32xf32>
    %715 = vector.shape_cast %714 : vector<2x16x32xf32> to vector<32x32xf32>
    %c2_327 = arith.constant 2 : index
    %c0_328 = arith.constant 0 : index
    %c0_329 = arith.constant 0 : index
    %716 = vector.load %arg7[%c2_327, %c0_328, %c0_329] : memref<3x32x32xf32, #tpu.memory_space<vmem>>, vector<1x32x32xf32>
    %717 = vector.shape_cast %716 : vector<1x32x32xf32> to vector<32x32xf32>
    %cst_330 = arith.constant dense<0.000000e+00> : vector<32x32xf32>
    %718 = tpu.matmul %715, %717, %cst_330 {dimension_numbers = #tpu.dot_dimension_numbers<[1], [0], [0], [1], [0, 0, 1, 1], [], []>} : vector<32x32xf32>, vector<32x32xf32>, vector<32x32xf32> -> vector<32x32xf32>
    %c2_331 = arith.constant 2 : index
    %c0_332 = arith.constant 0 : index
    %c0_333 = arith.constant 0 : index
    %719 = vector.load %arg8[%c2_331, %c0_332, %c0_333] : memref<3x1x32xf32, #tpu.memory_space<vmem>>, vector<1x1x32xf32>
    %720 = vector.shape_cast %719 : vector<1x1x32xf32> to vector<1x32xf32>
    %721 = vector.broadcast %720 : vector<1x32xf32> to vector<32x32xf32>
    %722 = arith.addf %718, %721 : vector<32x32xf32>
    %723 = arith.addf %540, %722 : vector<32x32xf32>
    %c2_334 = arith.constant 2 : index
    %c0_335 = arith.constant 0 : index
    %c0_336 = arith.constant 0 : index
    %724 = vector.load %arg9[%c2_334, %c0_335, %c0_336] : memref<3x1x32xf32, #tpu.memory_space<vmem>>, vector<1x1x32xf32>
    %725 = vector.shape_cast %724 : vector<1x1x32xf32> to vector<1x32xf32>
    %c2_337 = arith.constant 2 : index
    %c0_338 = arith.constant 0 : index
    %c0_339 = arith.constant 0 : index
    %726 = vector.load %arg10[%c2_337, %c0_338, %c0_339] : memref<3x1x32xf32, #tpu.memory_space<vmem>>, vector<1x1x32xf32>
    %727 = vector.shape_cast %726 : vector<1x1x32xf32> to vector<1x32xf32>
    %cst_340 = arith.constant dense<0.000000e+00> : vector<32xf32>
    %728 = vector.multi_reduction <add>, %723, %cst_340 [1] : vector<32x32xf32> to vector<32xf32>
    %729 = vector.shape_cast %728 : vector<32xf32> to vector<32x1xf32>
    %cst_341 = arith.constant 3.200000e+01 : f32
    %730 = vector.broadcast %cst_341 : f32 to vector<32x1xf32>
    %731 = arith.divf %729, %730 : vector<32x1xf32>
    %732 = vector.broadcast %731 : vector<32x1xf32> to vector<32x32xf32>
    %733 = arith.subf %723, %732 : vector<32x32xf32>
    %734 = arith.mulf %733, %733 : vector<32x32xf32>
    %cst_342 = arith.constant dense<0.000000e+00> : vector<32xf32>
    %735 = vector.multi_reduction <add>, %734, %cst_342 [1] : vector<32x32xf32> to vector<32xf32>
    %736 = vector.shape_cast %735 : vector<32xf32> to vector<32x1xf32>
    %cst_343 = arith.constant 3.200000e+01 : f32
    %737 = vector.broadcast %cst_343 : f32 to vector<32x1xf32>
    %738 = arith.divf %736, %737 : vector<32x1xf32>
    %739 = vector.broadcast %731 : vector<32x1xf32> to vector<32x32xf32>
    %740 = arith.subf %723, %739 : vector<32x32xf32>
    %cst_344 = arith.constant 9.99999974E-6 : f32
    %741 = vector.broadcast %cst_344 : f32 to vector<32x1xf32>
    %742 = arith.addf %738, %741 : vector<32x1xf32>
    %743 = math.rsqrt %742 : vector<32x1xf32>
    %744 = vector.broadcast %743 : vector<32x1xf32> to vector<32x32xf32>
    %745 = arith.mulf %740, %744 : vector<32x32xf32>
    %746 = vector.broadcast %725 : vector<1x32xf32> to vector<32x32xf32>
    %747 = arith.mulf %745, %746 : vector<32x32xf32>
    %748 = vector.broadcast %727 : vector<1x32xf32> to vector<32x32xf32>
    %749 = arith.addf %747, %748 : vector<32x32xf32>
    %c2_345 = arith.constant 2 : index
    %c0_346 = arith.constant 0 : index
    %c0_347 = arith.constant 0 : index
    %750 = vector.load %arg13[%c2_345, %c0_346, %c0_347] : memref<3x32x512xf32, #tpu.memory_space<vmem>>, vector<1x32x512xf32>
    %751 = vector.shape_cast %750 : vector<1x32x512xf32> to vector<32x512xf32>
    %cst_348 = arith.constant dense<0.000000e+00> : vector<32x512xf32>
    %752 = tpu.matmul %749, %751, %cst_348 {dimension_numbers = #tpu.dot_dimension_numbers<[1], [0], [0], [1], [0, 0, 1, 1], [], []>} : vector<32x32xf32>, vector<32x512xf32>, vector<32x512xf32> -> vector<32x512xf32>
    %c2_349 = arith.constant 2 : index
    %c0_350 = arith.constant 0 : index
    %c0_351 = arith.constant 0 : index
    %753 = vector.load %arg14[%c2_349, %c0_350, %c0_351] : memref<3x1x512xf32, #tpu.memory_space<vmem>>, vector<1x1x512xf32>
    %754 = vector.shape_cast %753 : vector<1x1x512xf32> to vector<1x512xf32>
    %755 = vector.broadcast %754 : vector<1x512xf32> to vector<32x512xf32>
    %756 = arith.addf %752, %755 : vector<32x512xf32>
    %cst_352 = arith.constant 5.000000e-01 : f32
    %757 = vector.broadcast %cst_352 : f32 to vector<32x512xf32>
    %758 = arith.mulf %757, %756 : vector<32x512xf32>
    %cst_353 = arith.constant 0.707106769 : f32
    %759 = vector.broadcast %cst_353 : f32 to vector<32x512xf32>
    %760 = arith.mulf %756, %759 : vector<32x512xf32>
    %761 = math.erf %760 : vector<32x512xf32>
    %cst_354 = arith.constant 1.000000e+00 : f32
    %762 = vector.broadcast %cst_354 : f32 to vector<32x512xf32>
    %763 = arith.addf %762, %761 : vector<32x512xf32>
    %764 = arith.mulf %758, %763 : vector<32x512xf32>
    %c2_355 = arith.constant 2 : index
    %c0_356 = arith.constant 0 : index
    %c0_357 = arith.constant 0 : index
    %765 = vector.load %arg15[%c2_355, %c0_356, %c0_357] : memref<3x512x32xf32, #tpu.memory_space<vmem>>, vector<1x512x32xf32>
    %766 = vector.shape_cast %765 : vector<1x512x32xf32> to vector<512x32xf32>
    %cst_358 = arith.constant dense<0.000000e+00> : vector<32x32xf32>
    %767 = tpu.matmul %764, %766, %cst_358 {dimension_numbers = #tpu.dot_dimension_numbers<[1], [0], [0], [1], [0, 0, 1, 1], [], []>} : vector<32x512xf32>, vector<512x32xf32>, vector<32x32xf32> -> vector<32x32xf32>
    %c2_359 = arith.constant 2 : index
    %c0_360 = arith.constant 0 : index
    %c0_361 = arith.constant 0 : index
    %768 = vector.load %arg16[%c2_359, %c0_360, %c0_361] : memref<3x1x32xf32, #tpu.memory_space<vmem>>, vector<1x1x32xf32>
    %769 = vector.shape_cast %768 : vector<1x1x32xf32> to vector<1x32xf32>
    %770 = vector.broadcast %769 : vector<1x32xf32> to vector<32x32xf32>
    %771 = arith.addf %767, %770 : vector<32x32xf32>
    %772 = arith.addf %749, %771 : vector<32x32xf32>
    %c2_362 = arith.constant 2 : index
    %c0_363 = arith.constant 0 : index
    %c0_364 = arith.constant 0 : index
    %773 = vector.load %arg11[%c2_362, %c0_363, %c0_364] : memref<3x1x32xf32, #tpu.memory_space<vmem>>, vector<1x1x32xf32>
    %774 = vector.shape_cast %773 : vector<1x1x32xf32> to vector<1x32xf32>
    %c2_365 = arith.constant 2 : index
    %c0_366 = arith.constant 0 : index
    %c0_367 = arith.constant 0 : index
    %775 = vector.load %arg12[%c2_365, %c0_366, %c0_367] : memref<3x1x32xf32, #tpu.memory_space<vmem>>, vector<1x1x32xf32>
    %776 = vector.shape_cast %775 : vector<1x1x32xf32> to vector<1x32xf32>
    %cst_368 = arith.constant dense<0.000000e+00> : vector<32xf32>
    %777 = vector.multi_reduction <add>, %772, %cst_368 [1] : vector<32x32xf32> to vector<32xf32>
    %778 = vector.shape_cast %777 : vector<32xf32> to vector<32x1xf32>
    %cst_369 = arith.constant 3.200000e+01 : f32
    %779 = vector.broadcast %cst_369 : f32 to vector<32x1xf32>
    %780 = arith.divf %778, %779 : vector<32x1xf32>
    %781 = vector.broadcast %780 : vector<32x1xf32> to vector<32x32xf32>
    %782 = arith.subf %772, %781 : vector<32x32xf32>
    %783 = arith.mulf %782, %782 : vector<32x32xf32>
    %cst_370 = arith.constant dense<0.000000e+00> : vector<32xf32>
    %784 = vector.multi_reduction <add>, %783, %cst_370 [1] : vector<32x32xf32> to vector<32xf32>
    %785 = vector.shape_cast %784 : vector<32xf32> to vector<32x1xf32>
    %cst_371 = arith.constant 3.200000e+01 : f32
    %786 = vector.broadcast %cst_371 : f32 to vector<32x1xf32>
    %787 = arith.divf %785, %786 : vector<32x1xf32>
    %788 = vector.broadcast %780 : vector<32x1xf32> to vector<32x32xf32>
    %789 = arith.subf %772, %788 : vector<32x32xf32>
    %cst_372 = arith.constant 9.99999974E-6 : f32
    %790 = vector.broadcast %cst_372 : f32 to vector<32x1xf32>
    %791 = arith.addf %787, %790 : vector<32x1xf32>
    %792 = math.rsqrt %791 : vector<32x1xf32>
    %793 = vector.broadcast %792 : vector<32x1xf32> to vector<32x32xf32>
    %794 = arith.mulf %789, %793 : vector<32x32xf32>
    %795 = vector.broadcast %774 : vector<1x32xf32> to vector<32x32xf32>
    %796 = arith.mulf %794, %795 : vector<32x32xf32>
    %797 = vector.broadcast %776 : vector<1x32xf32> to vector<32x32xf32>
    %798 = arith.addf %796, %797 : vector<32x32xf32>
    %c0_373 = arith.constant 0 : index
    %c0_374 = arith.constant 0 : index
    %799 = vector.load %arg17[%c0_373, %c0_374] : memref<1x32xf32, #tpu.memory_space<vmem>>, vector<1x32xf32>
    %c0_375 = arith.constant 0 : index
    %c0_376 = arith.constant 0 : index
    %800 = vector.load %arg18[%c0_375, %c0_376] : memref<1x32xf32, #tpu.memory_space<vmem>>, vector<1x32xf32>
    %cst_377 = arith.constant dense<0.000000e+00> : vector<32xf32>
    %801 = vector.multi_reduction <add>, %798, %cst_377 [1] : vector<32x32xf32> to vector<32xf32>
    %802 = vector.shape_cast %801 : vector<32xf32> to vector<32x1xf32>
    %cst_378 = arith.constant 3.200000e+01 : f32
    %803 = vector.broadcast %cst_378 : f32 to vector<32x1xf32>
    %804 = arith.divf %802, %803 : vector<32x1xf32>
    %805 = vector.broadcast %804 : vector<32x1xf32> to vector<32x32xf32>
    %806 = arith.subf %798, %805 : vector<32x32xf32>
    %807 = arith.mulf %806, %806 : vector<32x32xf32>
    %cst_379 = arith.constant dense<0.000000e+00> : vector<32xf32>
    %808 = vector.multi_reduction <add>, %807, %cst_379 [1] : vector<32x32xf32> to vector<32xf32>
    %809 = vector.shape_cast %808 : vector<32xf32> to vector<32x1xf32>
    %cst_380 = arith.constant 3.200000e+01 : f32
    %810 = vector.broadcast %cst_380 : f32 to vector<32x1xf32>
    %811 = arith.divf %809, %810 : vector<32x1xf32>
    %812 = vector.broadcast %804 : vector<32x1xf32> to vector<32x32xf32>
    %813 = arith.subf %798, %812 : vector<32x32xf32>
    %cst_381 = arith.constant 9.99999974E-6 : f32
    %814 = vector.broadcast %cst_381 : f32 to vector<32x1xf32>
    %815 = arith.addf %811, %814 : vector<32x1xf32>
    %816 = math.rsqrt %815 : vector<32x1xf32>
    %817 = vector.broadcast %816 : vector<32x1xf32> to vector<32x32xf32>
    %818 = arith.mulf %813, %817 : vector<32x32xf32>
    %819 = vector.broadcast %799 : vector<1x32xf32> to vector<32x32xf32>
    %820 = arith.mulf %818, %819 : vector<32x32xf32>
    %821 = vector.broadcast %800 : vector<1x32xf32> to vector<32x32xf32>
    %822 = arith.addf %820, %821 : vector<32x32xf32>
    %823 = vector.shape_cast %822 : vector<32x32xf32> to vector<2x16x32xf32>
    %824 = vector.extract_strided_slice %823 {offsets = [0, 0, 0], sizes = [2, 1, 32], strides = [1, 1, 1]} : vector<2x16x32xf32> to vector<2x1x32xf32>
    %825 = vector.shape_cast %824 : vector<2x1x32xf32> to vector<2x32xf32>
    %c0_382 = arith.constant 0 : index
    %c0_383 = arith.constant 0 : index
    %826 = vector.load %arg21[%c0_382, %c0_383] : memref<2x32xf32, #tpu.memory_space<vmem>>, vector<2x32xf32>
    tpu.vector_store %arg21[%c0_382, %c0_383], %825 {strides = array<i32>} : memref<2x32xf32, #tpu.memory_space<vmem>>, vector<2x32xf32>,
    %c0_384 = arith.constant 0 : index
    %c0_385 = arith.constant 0 : index
    %827 = vector.load %arg19[%c0_384, %c0_385] : memref<32x4xf32, #tpu.memory_space<vmem>>, vector<32x4xf32>
    %cst_386 = arith.constant dense<0.000000e+00> : vector<32x4xf32>
    %828 = tpu.matmul %822, %827, %cst_386 {dimension_numbers = #tpu.dot_dimension_numbers<[1], [0], [0], [1], [0, 0, 1, 1], [], []>} : vector<32x32xf32>, vector<32x4xf32>, vector<32x4xf32> -> vector<32x4xf32>
    %c0_387 = arith.constant 0 : index
    %c0_388 = arith.constant 0 : index
    %829 = vector.load %arg20[%c0_387, %c0_388] : memref<1x4xf32, #tpu.memory_space<vmem>>, vector<1x4xf32>
    %830 = vector.broadcast %829 : vector<1x4xf32> to vector<32x4xf32>
    %831 = arith.addf %828, %830 : vector<32x4xf32>
    %832 = vector.shape_cast %831 : vector<32x4xf32> to vector<2x16x4xf32>
    %833 = vector.extract_strided_slice %832 {offsets = [0, 1, 0], sizes = [2, 8, 4], strides = [1, 1, 1]} : vector<2x16x4xf32> to vector<2x8x4xf32>
    %c0_389 = arith.constant 0 : index
    %c0_390 = arith.constant 0 : index
    %c0_391 = arith.constant 0 : index
    %834 = vector.load %arg22[%c0_389, %c0_390, %c0_391] : memref<2x8x4xf32, #tpu.memory_space<vmem>>, vector<2x8x4xf32>
    tpu.vector_store %arg22[%c0_389, %c0_390, %c0_391], %833 {strides = array<i32>} : memref<2x8x4xf32, #tpu.memory_space<vmem>>, vector<2x8x4xf32>,
    return
  }
  func.func @transform_0(%arg0: i32) -> (i32, i32, i32) {
    %c0_i32 = arith.constant 0 : i32
    %c0_i32_0 = arith.constant 0 : i32
    %c0_i32_1 = arith.constant 0 : i32
    %c0_i32_2 = arith.constant 0 : i32
    return %c0_i32, %c0_i32_0, %c0_i32_1 : i32, i32, i32
  }
  func.func @transform_1(%arg0: i32) -> (i32, i32) {
    %c0_i32 = arith.constant 0 : i32
    %c0_i32_0 = arith.constant 0 : i32
    %c0_i32_1 = arith.constant 0 : i32
    return %c0_i32, %c0_i32_0 : i32, i32
  }
  func.func @transform_2(%arg0: i32) -> (i32, i32) {
    %c0_i32 = arith.constant 0 : i32
    %c0_i32_0 = arith.constant 0 : i32
    %c0_i32_1 = arith.constant 0 : i32
    return %c0_i32, %c0_i32_0 : i32, i32
  }
  func.func @transform_3(%arg0: i32) -> (i32, i32) {
    %c0_i32 = arith.constant 0 : i32
    %c0_i32_0 = arith.constant 0 : i32
    %c0_i32_1 = arith.constant 0 : i32
    return %c0_i32, %c0_i32_0 : i32, i32
  }
  func.func @transform_4(%arg0: i32) -> (i32, i32, i32) {
    %c0_i32 = arith.constant 0 : i32
    %c0_i32_0 = arith.constant 0 : i32
    %c0_i32_1 = arith.constant 0 : i32
    %c0_i32_2 = arith.constant 0 : i32
    return %c0_i32, %c0_i32_0, %c0_i32_1 : i32, i32, i32
  }
  func.func @transform_5(%arg0: i32) -> (i32, i32, i32) {
    %c0_i32 = arith.constant 0 : i32
    %c0_i32_0 = arith.constant 0 : i32
    %c0_i32_1 = arith.constant 0 : i32
    %c0_i32_2 = arith.constant 0 : i32
    return %c0_i32, %c0_i32_0, %c0_i32_1 : i32, i32, i32
  }
  func.func @transform_6(%arg0: i32) -> (i32, i32, i32) {
    %c0_i32 = arith.constant 0 : i32
    %c0_i32_0 = arith.constant 0 : i32
    %c0_i32_1 = arith.constant 0 : i32
    %c0_i32_2 = arith.constant 0 : i32
    return %c0_i32, %c0_i32_0, %c0_i32_1 : i32, i32, i32
  }
  func.func @transform_7(%arg0: i32) -> (i32, i32, i32) {
    %c0_i32 = arith.constant 0 : i32
    %c0_i32_0 = arith.constant 0 : i32
    %c0_i32_1 = arith.constant 0 : i32
    %c0_i32_2 = arith.constant 0 : i32
    return %c0_i32, %c0_i32_0, %c0_i32_1 : i32, i32, i32
  }
  func.func @transform_8(%arg0: i32) -> (i32, i32, i32) {
    %c0_i32 = arith.constant 0 : i32
    %c0_i32_0 = arith.constant 0 : i32
    %c0_i32_1 = arith.constant 0 : i32
    %c0_i32_2 = arith.constant 0 : i32
    return %c0_i32, %c0_i32_0, %c0_i32_1 : i32, i32, i32
  }
  func.func @transform_9(%arg0: i32) -> (i32, i32, i32) {
    %c0_i32 = arith.constant 0 : i32
    %c0_i32_0 = arith.constant 0 : i32
    %c0_i32_1 = arith.constant 0 : i32
    %c0_i32_2 = arith.constant 0 : i32
    return %c0_i32, %c0_i32_0, %c0_i32_1 : i32, i32, i32
  }
  func.func @transform_10(%arg0: i32) -> (i32, i32, i32) {
    %c0_i32 = arith.constant 0 : i32
    %c0_i32_0 = arith.constant 0 : i32
    %c0_i32_1 = arith.constant 0 : i32
    %c0_i32_2 = arith.constant 0 : i32
    return %c0_i32, %c0_i32_0, %c0_i32_1 : i32, i32, i32
  }
  func.func @transform_11(%arg0: i32) -> (i32, i32, i32) {
    %c0_i32 = arith.constant 0 : i32
    %c0_i32_0 = arith.constant 0 : i32
    %c0_i32_1 = arith.constant 0 : i32
    %c0_i32_2 = arith.constant 0 : i32
    return %c0_i32, %c0_i32_0, %c0_i32_1 : i32, i32, i32
  }
  func.func @transform_12(%arg0: i32) -> (i32, i32, i32) {
    %c0_i32 = arith.constant 0 : i32
    %c0_i32_0 = arith.constant 0 : i32
    %c0_i32_1 = arith.constant 0 : i32
    %c0_i32_2 = arith.constant 0 : i32
    return %c0_i32, %c0_i32_0, %c0_i32_1 : i32, i32, i32
  }
  func.func @transform_13(%arg0: i32) -> (i32, i32, i32) {
    %c0_i32 = arith.constant 0 : i32
    %c0_i32_0 = arith.constant 0 : i32
    %c0_i32_1 = arith.constant 0 : i32
    %c0_i32_2 = arith.constant 0 : i32
    return %c0_i32, %c0_i32_0, %c0_i32_1 : i32, i32, i32
  }
  func.func @transform_14(%arg0: i32) -> (i32, i32, i32) {
    %c0_i32 = arith.constant 0 : i32
    %c0_i32_0 = arith.constant 0 : i32
    %c0_i32_1 = arith.constant 0 : i32
    %c0_i32_2 = arith.constant 0 : i32
    return %c0_i32, %c0_i32_0, %c0_i32_1 : i32, i32, i32
  }
  func.func @transform_15(%arg0: i32) -> (i32, i32, i32) {
    %c0_i32 = arith.constant 0 : i32
    %c0_i32_0 = arith.constant 0 : i32
    %c0_i32_1 = arith.constant 0 : i32
    %c0_i32_2 = arith.constant 0 : i32
    return %c0_i32, %c0_i32_0, %c0_i32_1 : i32, i32, i32
  }
  func.func @transform_16(%arg0: i32) -> (i32, i32) {
    %c0_i32 = arith.constant 0 : i32
    %c0_i32_0 = arith.constant 0 : i32
    %c0_i32_1 = arith.constant 0 : i32
    return %c0_i32, %c0_i32_0 : i32, i32
  }
  func.func @transform_17(%arg0: i32) -> (i32, i32) {
    %c0_i32 = arith.constant 0 : i32
    %c0_i32_0 = arith.constant 0 : i32
    %c0_i32_1 = arith.constant 0 : i32
    return %c0_i32, %c0_i32_0 : i32, i32
  }
  func.func @transform_18(%arg0: i32) -> (i32, i32) {
    %c0_i32 = arith.constant 0 : i32
    %c0_i32_0 = arith.constant 0 : i32
    %c0_i32_1 = arith.constant 0 : i32
    return %c0_i32, %c0_i32_0 : i32, i32
  }
  func.func @transform_19(%arg0: i32) -> (i32, i32) {
    %c0_i32 = arith.constant 0 : i32
    %c0_i32_0 = arith.constant 0 : i32
    %c0_i32_1 = arith.constant 0 : i32
    return %c0_i32, %c0_i32_0 : i32, i32
  }
  func.func @transform_20(%arg0: i32) -> (i32, i32) {
    %c0_i32 = arith.constant 0 : i32
    %c0_i32_0 = arith.constant 0 : i32
    %c0_i32_1 = arith.constant 0 : i32
    return %c0_i32, %c0_i32_0 : i32, i32
  }
  func.func @transform_21(%arg0: i32) -> (i32, i32, i32) {
    %c0_i32 = arith.constant 0 : i32
    %c0_i32_0 = arith.constant 0 : i32
    %c0_i32_1 = arith.constant 0 : i32
    %c0_i32_2 = arith.constant 0 : i32
    return %c0_i32, %c0_i32_0, %c0_i32_1 : i32, i32, i32
  }
}

</mosaic_0001>

<bundles_post_ra>
// kernel: _lambda_.1
= control target key start
LH: loop header
LB: loop body
LE: loop exit
PB: predicated region body
PF: predicated region fallthrough
CT: control target
= control target key end

     0   :  { %s19656_s0 = inlined_call_operand.vmem [shape: f32[2,8,12], index: 0, kind: input, shape index: {}]   ;;  %s19657_s1 = inlined_call_operand.vmem [shape: f32[8,32], index: 1, kind: input, shape index: {}]   ;;  %s19658_s2 = inlined_call_operand.vmem [shape: f32[1,32], index: 2, kind: input, shape index: {}]   ;;  %s19659_s3 = inlined_call_operand.vmem [shape: f32[12,32], index: 3, kind: input, shape index: {}]   ;;  %s19660_s4 = inlined_call_operand.vmem [shape: f32[3,32,96], index: 4, kind: input, shape index: {}]   ;;  %s19661_s5 = inlined_call_operand.vmem [shape: f32[3,1,96], index: 5, kind: input, shape index: {}]   ;;  %s19662_s6 = inlined_call_operand.vmem [shape: f32[3,32,32], index: 6, kind: input, shape index: {}]   ;;  %s19663_s7 = inlined_call_operand.vmem [shape: f32[3,1,32], index: 7, kind: input, shape index: {}, may-alias: {7,9,11,15}]   ;;  %s19664_s8 = inlined_call_operand.vmem [shape: f32[3,1,32], index: 8, kind: input, shape index: {}, may-alias: {8,10}]   ;;  %s19665_s9 = inlined_call_operand.vmem [shape: f32[3,1,32], index: 9, kind: input, shape index: {}, may-alias: {7,9,11,15}]   ;;  %s19666_s10 = inlined_call_operand.vmem [shape: f32[3,1,32], index: 10, kind: input, shape index: {}, may-alias: {8,10}]   ;;  %s19667_s11 = inlined_call_operand.vmem [shape: f32[3,1,32], index: 11, kind: input, shape index: {}, may-alias: {7,9,11,15}]   ;;  %s19668_s12 = inlined_call_operand.hbm [shape: f32[3,32,512], index: 12, kind: input, shape index: {}]   ;;  %s19669_s13 = inlined_call_operand.vmem [shape: f32[3,1,512], index: 13, kind: input, shape index: {}]   ;;  %s19670_s14 = inlined_call_operand.hbm [shape: f32[3,512,32], index: 14, kind: input, shape index: {}]   ;;  %s19671_s15 = inlined_call_operand.vmem [shape: f32[3,1,32], index: 15, kind: input, shape index: {}, may-alias: {7,9,11,15}]   ;;  %s19672_s16 = inlined_call_operand.vmem [shape: f32[1,32], index: 16, kind: input, shape index: {}]   ;;  %s19673_s17 = inlined_call_operand.vmem [shape: f32[1,32], index: 17, kind: input, shape index: {}]   ;;  %s19674_s18 = inlined_call_operand.hbm [shape: f32[32,4], index: 18, kind: input, shape index: {}]   ;;  %s19675_s19 = inlined_call_operand.vmem [shape: f32[1,4], index: 19, kind: input, shape index: {}]   ;;  %s19676_s20 = inlined_call_operand.hbm [shape: f32[2,32], index: 20, kind: output, shape index: {0}]   ;;  %s19677_s21 = inlined_call_operand.vmem [shape: f32[2,8,4], index: 21, kind: output, shape index: {1}]  }
   0x1   :  { %19760 = sst [smem:[#allocation14_spill]] %s19656_s0 }
   0x2   :  { %19761 = sst [smem:[#allocation15_spill]] %s19657_s1 }
   0x3   :  { %19762 = sst [smem:[#allocation16_spill]] %s19658_s2 }
   0x4   :  { %19763 = sst [smem:[#allocation17_spill]] %s19659_s3 }
   0x5   :  { %19764 = sst [smem:[#allocation18_spill]] %s19660_s4 }
   0x6   :  { %19765 = sst [smem:[#allocation19_spill]] %s19661_s5 }
   0x7   :  { %19766 = sst [smem:[#allocation20_spill]] %s19671_s15 }
   0x8   :  { %19767 = sst [smem:[#allocation21_spill]] %s19672_s16 }
   0x9   :  { %19768 = sst [smem:[#allocation22_spill]] %s19673_s17 }
   0xa   :  { %19769 = sst [smem:[#allocation23_spill]] %s19675_s19 }
   0xb   :  { %19770 = sst [smem:[#allocation24_spill]] %s19676_s20 }
   0xc   :  { %19771 = sst [smem:[#allocation25_spill]] %s19677_s21 }
   0xd   :  { %27 = vsyncpa [#allocation5], 0 }
   0xe   :  { %28 = vsyncpa [#allocation8], 0 }
   0xf   :  { %29 = vsyncpa [#allocation6], 0  ;;  %s17275_s2 = smov [#allocation7]   ;;  %s17181_s3 = scalar_lea.hbm %s19670_s14, 24576 }
  0x10   :  { %s73_s25 = sshll.u32 %s17275_s2, 4  ;;  %p17182_p0 = scmp.ne.s32.totalorder %s19670_s14, %s17181_s3  ;;  %s74_s25 = int_to_ptr.vmem [resolvable:$true] %s73_s25 }
  0x11   :  { %p17185_p1 = scmp.lt.u32.totalorder %s17181_s3, %s19670_s14 }
  0x13   :  { %p17187_p2 = pnand %p17185_p1, %p17182_p0 }
  0x15   :  { %17190 = shalt.err (!%p17187_p2)
}
  0x16   :  { %s17191_s30 = scalar_lea.vmem %s74_s25, 24576  ;;  %p17196_p4 = scmp.lt.s32.totalorder %s74_s25, %s74_s25 }
  0x17   :  { %p17192_p3 = scmp.ne.s32.totalorder %s74_s25, %s17191_s30  ;;  %p17197_p5 = scmp.lt.s32.totalorder %s17191_s30, %s17191_s30 }
  0x19   :  { %p17198_p6 = por %p17197_p5, %p17196_p4 }
  0x1b   :  { %p17199_p7 = pnand %p17198_p6, %p17192_p3 }
  0x1d   :  { %17202 = shalt.err (!%p17199_p7)
}
  0x1e   :  { %s19682_s5 = smov 128   ;;  %s19739_s22 = smov 8  }
  0x1f   :  { %79 = dma.hbm_to_vmem [thread:$0]  %s19670_s14, 24576, %s74_s25, [#allocation8], %s19682_s5, %s19682_s5, %s19739_s22  }
  0x20   :  { %s17278_s24 = smov [#allocation4]   ;;  %s17203_s3 = scalar_lea.hbm %s19668_s12, 6144 }
  0x21   :  { %s59_s2 = sshll.u32 %s17278_s24, 4  ;;  %p17204_p8 = scmp.ne.s32.totalorder %s19668_s12, %s17203_s3  ;;  %s60_s2 = int_to_ptr.vmem [resolvable:$true] %s59_s2 }
  0x22   :  { %p17207_p9 = scmp.lt.u32.totalorder %s17203_s3, %s19668_s12 }
  0x24   :  { %p17209_p10 = pnand %p17207_p9, %p17204_p8 }
  0x26   :  { %17212 = shalt.err (!%p17209_p10)
}
  0x27   :  { %s17213_s30 = scalar_lea.vmem %s60_s2, 6144  ;;  %p17218_p12 = scmp.lt.s32.totalorder %s60_s2, %s60_s2 }
  0x28   :  { %p17214_p11 = scmp.ne.s32.totalorder %s60_s2, %s17213_s30  ;;  %p17219_p13 = scmp.lt.s32.totalorder %s17213_s30, %s17213_s30 }
  0x2a   :  { %p17220_p0 = por %p17219_p13, %p17218_p12 }
  0x2c   :  { %p17221_p1 = pnand %p17220_p0, %p17214_p11 }
  0x2e   :  { %17224 = shalt.err (!%p17221_p1)
}
  0x2f   :  { %s17279_s14 = smov 512   ;;  %s17280_s25 = smov 32  }
  0x30   :  { %65 = dma.hbm_to_vmem [thread:$0]  %s19668_s12, 6144, %s60_s2, [#allocation5], %s17279_s14, %s17279_s14, %s17280_s25  }
  0x31   :  { %s17281_s24 = smov [#allocation9]   ;;  %s17225_s28 = scalar_lea.hbm %s19674_s18, 512 }
  0x32   :  { %s91_s26 = sshll.u32 %s17281_s24, 4  ;;  %p17226_p2 = scmp.ne.s32.totalorder %s19674_s18, %s17225_s28  ;;  %s92_s26 = int_to_ptr.vmem [resolvable:$true] %s91_s26 }
  0x33   :  { %p17229_p3 = scmp.lt.u32.totalorder %s17225_s28, %s19674_s18 }
  0x35   :  { %p17231_p4 = pnand %p17229_p3, %p17226_p2 }
  0x37   :  { %17234 = shalt.err (!%p17231_p4)
}
  0x38   :  { %s17235_s5 = scalar_lea.vmem %s92_s26, 512  ;;  %p17240_p6 = scmp.lt.s32.totalorder %s92_s26, %s92_s26 }
  0x39   :  { %p17236_p5 = scmp.ne.s32.totalorder %s92_s26, %s17235_s5  ;;  %p17241_p7 = scmp.lt.s32.totalorder %s17235_s5, %s17235_s5 }
  0x3b   :  { %p17242_p8 = por %p17241_p7, %p17240_p6 }
  0x3d   :  { %p17243_p9 = pnand %p17242_p8, %p17236_p5 }
  0x3f   :  { %17246 = shalt.err (!%p17243_p9)
}
  0x40   :  { %s19772_s12 = smov 128  }
  0x41   :  { %97 = dma.hbm_to_vmem [thread:$0]  %s19674_s18, 512, %s92_s26, [#allocation8], %s19772_s12, %s19772_s12, %s19739_s22  }
  0x42   :  { %17269 = dma.done.wait [#allocation5], 6144  }
  0x43   :  { %17270 = vsyncadd [#allocation5], 4294961152 }
  0x44   :  { %17271 = dma.done.wait [#allocation8], 25088  }
  0x45   :  { %17272 = vsyncadd [#allocation8], 4294942208  ;;  %vm120_vm0 = vcmask 1043456   ;;  %vm113_vm1 = vcmask 97280   ;;  %vm17282_vm2 = vmmov 1   ;;  %s19773_s23 = sld [smem:[#allocation17_spill]]  ;;  %v216_v42 = vlaneseq }
  0x46   :  { %vm15340_vm3 = vmpackc.low %vm120_vm0, %vm17282_vm2  ;;  %s19774_s28 = sld [smem:[#allocation14_spill]]  ;;  %s19775_s4 = sld [smem:[#allocation18_spill]]  ;;  %vm203_vm4 = vcmask 253952   ;;  %vm209_vm5 = vcmask 260096   ;;  %v17283_v11 = vmov 0.0   ;;  %vm206_vm6 = vcmask 261120  }
  0x47   :  { %s19776_s25 = sld [smem:[#allocation16_spill]]  ;;  %210 = vst.msk [vmem:[#allocation2 + $0x9] sm:$0x7f] %vm209_vm5, %v17283_v11  ;;  %211 = vst.msk [vmem:[#allocation2 + $0x19] sm:$0x7f] %vm209_vm5, %v17283_v11  ;;  %s19778_s29 = sld [smem:[#allocation19_spill]] }
  0x48   :  { %vm334_vm7 = vcmask 31744   ;;  %s19729_s0 = smov 96   ;;  %v217_v43 = vand.u32 127, %v216_v42  ;;  %v17285_v46 = vmov -1e+30   ;;  %vm515_vm10 = vcmask 130048  }
  0x49   :  { %vm17534_vm8 = vmpackc.low %vm334_vm7, %vm334_vm7  ;;  %s19727_s30 = smov 64   ;;  %s19723_s12 = smov 92   ;;  %vm1162_vm11 = vcmask 64544   ;;  %vm1591_vm12 = vcmask 97344   ;;  %vm2020_vm13 = vcmask 130144   ;;  %vm2449_vm14 = vcmask 162944  }
  0x4a   :  { %vm218_vm9 = vcmp.lt.s32.totalorder %v217_v43, 9  ;;  %s19721_s2 = smov 124   ;;  %s19719_s14 = smov 60   ;;  %vm2878_vm15 = vcmask 195744   ;;  %vm3307_vm0 = vcmask 228544   ;;  %vm13318_vm2 = vcmask 1041409  }
  0x4b   :  { %v111_v0 = vld [vmem:[%s19773_s23] sm:$0xff]  ;;  %v112_v1 = vld [vmem:[%s19773_s23 + $0x8] sm:$0xf]  ;;  %v17551_v47 = vsel %vm218_vm9, 0.0, %v17285_v46  ;;  %s19715_s5 = smov 120   ;;  %s19713_s23 = smov 56  }
  0x4c   :  { %v109_v2 = vld [vmem:[%s19774_s28] sm:$0xff]  ;;  %v15339_v3 = vpack.c.bf16 %v112_v1, %v111_v0  ;;  %v110_v4 = vld [vmem:[%s19774_s28 + $0x8] sm:$0xff]  ;;  %v222_v9 = vld [vmem:[%s19775_s4 + $0x10] sm:$0xff]  ;;  %s19777_s28 = sld [smem:[#allocation15_spill]]  ;;  %s19711_s1 = smov 84  }
  0x4d   :  { %14566 = vmatprep.mubr.msk.f32.mxu0 %vm113_vm1, %v109_v2  ;;  %v220_v5 = vld [vmem:[%s19775_s4] sm:$0xff]  ;;  %v221_v6 = vld [vmem:[%s19775_s4 + $0x8] sm:$0xff]  ;;  %v223_v10 = vld [vmem:[%s19775_s4 + $0x18] sm:$0xff]  ;;  %s19709_s24 = smov 116   ;;  %s19707_s27 = smov 52  }
  0x4e   :  { %15341 = vmatprep.subr.msk.bf16.mxu0 %vm15340_vm3, %v15339_v3  ;;  %v202_v7 = vld [vmem:[%s19776_s25] sm:$0x1]  ;;  %v15345_v8 = vpack.c.bf16 %v221_v6, %v220_v5  ;;  %v15349_v12 = vpack.c.bf16 %v223_v10, %v222_v9  ;;  %s19717_s25 = smov 88   ;;  %s19703_s3 = smov 80  }
  0x4f   :  { %15344 = vmatpush3.bf16.msk.msra.mxu0 %vm15340_vm3, %v15339_v3  ;;  %204 = vst.msk [vmem:[#allocation2] sm:$0x1] %vm203_vm4, %v202_v7  ;;  %205 = vst.msk [vmem:[#allocation2 + $0x10] sm:$0x1] %vm203_vm4, %v202_v7  ;;  %v13458_v22 = vld [vmem:[%s19778_s29] ss:$0 sm:$0xff] }
  0x50   :  { %15346 = vmatprep.subr.bf16.mxu1 %v15345_v8  ;;  %s19689_s18 = smov 48   ;;  %s19687_s26 = smov 76   ;;  %vm13321_vm3 = vcmask 254976  }
  0x51   :  { %15348 = vmatpush3.bf16.msra.mxu1 %v15345_v8  ;;  %s19797_s21 = smov 104   ;;  %s19798_s19 = smov 40  }
  0x52   :  { %14567 = vmatmul.mubr.msk.f32.vlgmr.msra.gmra.mrb[0].mxu0 %vm113_vm1, %v110_v4  ;;  %15350 = vmatprep.subr.bf16.mxu1 %v15349_v12  ;;  %v199_v13 = vld [vmem:[%s19777_s28] sm:$0xff]  ;;  %s19683_s28 = smov 112   ;;  %vm3736_vm1 = vcmask 261344   ;;  %s19799_s20 = smov 68  }
  0x53   :  { %s19800_s17 = smov 100   ;;  %s19801_s16 = smov 36  }
  0x55   :  { %15352 = vmatpush3.bf16.msra.mxu1 %v15349_v12 }
 0x125   :  { %v14568_v14 = vpop.f32.mrb[0].mxu0 }
 0x126   :  { %v201_v15 = vadd.f32 %v14568_v14, %v199_v13  ;;  %v190_v16 = vpop.f32.mrb[1].mxu0 }
 0x127   :  { %v200_v17 = vadd.f32 %v199_v13, %v190_v16 }
 0x128   :  { %208 = vst.msk [vmem:[#allocation2 + $0x11] sm:$0xff] %vm206_vm6, %v201_v15 }
 0x129   :  { %207 = vst.msk [vmem:[#allocation2 + $0x1] sm:$0xff] %vm206_vm6, %v200_v17 }
 0x12f   :  { %v214_v20 = vld [vmem:[#allocation2 + $0x10] sm:$0xff]  ;;  %v215_v21 = vld [vmem:[#allocation2 + $0x18] sm:$0xff] }
 0x130   :  { %v212_v18 = vld [vmem:[#allocation2] sm:$0xff]  ;;  %v213_v19 = vld [vmem:[#allocation2 + $0x8] sm:$0xff] }
 0x131   :  { %14577 = vmatprep.mubr.msk.f32.mxu1 %vm206_vm6, %v212_v18 }
 0x132   :  { %14578 = vmatmul.mubr.msk.f32.vlgmr.msra.gmra.mrb[0].mxu1 %vm206_vm6, %v213_v19 }
 0x133   :  { %14580 = vmatprep.mubr.msk.f32.mxu1 %vm206_vm6, %v214_v20 }
 0x136   :  { %14581 = vmatmul.mubr.msk.f32.gmra.mrb[2].mxu1 %vm206_vm6, %v215_v21 }
 0x205   :  { %v14579_v23 = vpop.f32.mrb[0].mxu1 }
 0x206   :  { %v17508_v24 = vadd.f32 %v14579_v23, %v13458_v22  ;;  %v309_v25 = vpop.f32.mrb[1].mxu1 }
 0x207   :  { %v17510_v26 = vadd.f32 %v13458_v22, %v309_v25 }
 0x209   :  { %v14582_v27 = vpop.f32.mrb[2].mxu1  ;;  %14587 = vmatprep.mubr.msk.f32.mxu0 %vm334_vm7, %v17510_v26  ;;  %v17516_v28 = vpack.i.bf16 %v17508_v24, %v17510_v26 }
 0x20a   :  { %v17518_v29 = vadd.f32 %v14582_v27, %v13458_v22  ;;  %v319_v30 = vpop.f32.mrb[3].mxu1 }
 0x20b   :  { %v17520_v31 = vadd.f32 %v13458_v22, %v319_v30  ;;  %16162 = vrot.lane.b32.xlu0 %v17516_v28, %s19729_s0 }
 0x20d   :  { %14594 = vmatprep.mubr.msk.f32.mxu1 %vm334_vm7, %v17520_v31  ;;  %v17528_v32 = vpack.i.bf16 %v17518_v29, %v17520_v31 }
 0x20f   :  { %16167 = vrot.lane.b32.xlu0 %v17528_v32, %s19729_s0 }
 0x27d   :  { %v16163_v33 = vpop.permute.xlu0 %16162 }
 0x27e   :  { %v16165_v34 = vunpack.i.h.bf16 %v16163_v33  ;;  %v16164_v35 = vunpack.i.l.bf16 %v16163_v33 }
 0x280   :  { %v15353_v37 = vpack.c.bf16 %v16165_v34, %v16164_v35 }
 0x281   :  { %v16168_v38 = vpop.permute.xlu0 %16167 }
 0x282   :  { %v16170_v39 = vunpack.i.h.bf16 %v16168_v38  ;;  %v16169_v40 = vunpack.i.l.bf16 %v16168_v38  ;;  %15355 = vmatprep.subr.msk.bf16.mxu0 %vm17534_vm8, %v15353_v37 }
 0x283   :  { %15358 = vmatpush3.bf16.xpose.msk.msra.mxu0 %vm17534_vm8, %v15353_v37 }
 0x284   :  { %v15359_v41 = vpack.c.bf16 %v16170_v39, %v16169_v40 }
 0x286   :  { %15361 = vmatprep.subr.msk.bf16.mxu1 %vm17534_vm8, %v15359_v41 }
 0x287   :  { %15364 = vmatpush3.bf16.xpose.msk.msra.mxu1 %vm17534_vm8, %v15359_v41 }
 0x28a   :  { %14588 = vmatmul.mubr.msk.f32.vlgmr.msra.gmra.mrb[2].mxu0 %vm334_vm7, %v17508_v24 }
 0x28e   :  { %14595 = vmatmul.mubr.msk.f32.vlgmr.msra.gmra.mrb[4].mxu1 %vm334_vm7, %v17518_v29 }
 0x35d   :  { %v14589_v44 = vpop.f32.mrb[2].mxu0 }
 0x35e   :  { %v409_v45 = vpop.f32.mrb[3].mxu0  ;;  %v508_v48 = vmul.f32 0.5, %v14589_v44 }
 0x35f   :  { %v507_v49 = vmul.f32 0.5, %v409_v45 }
 0x360   :  { %v512_v56 = vadd.f32 %v508_v48, %v17551_v47 }
 0x361   :  { %v14596_v50 = vpop.f32.mrb[4].mxu1  ;;  %v511_v51 = vadd.f32 %v507_v49, %v17551_v47 }
 0x362   :  { %v498_v52 = vpop.f32.mrb[5].mxu1  ;;  %v510_v53 = vmul.f32 0.5, %v14596_v50  ;;  %v519_v59 = vsel %vm515_vm10, %v512_v56, -inf }
 0x363   :  { %v509_v54 = vmul.f32 0.5, %v498_v52  ;;  %v516_v55 = vsel %vm515_vm10, %v511_v51, -inf }
 0x364   :  { %517 = vmax.xlane.f32.xlu1 %v516_v55  ;;  %v514_v60 = vadd.f32 %v510_v53, %v17551_v47 }
 0x365   :  { %v513_v57 = vadd.f32 %v509_v54, %v17551_v47 }
 0x366   :  { %v525_v61 = vsel %vm515_vm10, %v514_v60, -inf }
 0x367   :  { %v522_v58 = vsel %vm515_vm10, %v513_v57, -inf }
 0x368   :  { %523 = vmax.xlane.f32.xlu0 %v522_v58  ;;  %520 = vmax.xlane.f32.xlu1 %v519_v59 }
 0x36c   :  { %526 = vmax.xlane.f32.xlu1 %v525_v61 }
 0x37d   :  { %16172 = vrot.lane.b32.xlu1 %v17516_v28, %s19727_s30 }
 0x37e   :  { %16177 = vrot.lane.b32.xlu0 %v17528_v32, %s19727_s30 }
 0x381   :  { %16182 = vrot.lane.b32.xlu1 %v17516_v28, %s19723_s12 }
 0x382   :  { %829 = vrot.lane.b32.xlu0 %v17520_v31, %s19721_s2 }
 0x385   :  { %16187 = vrot.lane.b32.xlu1 %v17528_v32, %s19723_s12  ;;  %s19788_s12 = smov 116  }
 0x389   :  { %738 = vrot.lane.b32.xlu1 %v17510_v26, %s19721_s2 }
 0x38d   :  { %740 = vrot.lane.b32.xlu1 %v17508_v24, %s19721_s2 }
 0x3f1   :  { %v518_v62 = vpop.xlane.xlu1 %517 }
 0x3f2   :  { %v528_v63 = vsub.f32 %v511_v51, %v518_v62 }
 0x3f4   :  { %v532_v4 = vmul.f32 1.442695, %v528_v63 }
 0x3f5   :  { %v524_v0 = vpop.xlane.xlu0 %523  ;;  %v521_v1 = vpop.xlane.xlu1 %520 }
 0x3f6   :  { %v529_v2 = vsub.f32 %v512_v56, %v521_v1  ;;  %v530_v8 = vsub.f32 %v513_v57, %v524_v0 }
 0x3f8   :  { %v534_v3 = vmul.f32 1.442695, %v529_v2  ;;  %v536_v17 = vmul.f32 1.442695, %v530_v8 }
 0x3f9   :  { %v527_v5 = vpop.xlane.xlu1 %526  ;;  %v16178_v7 = vpop.permute.xlu0 %16177 }
 0x3fa   :  { %v531_v6 = vsub.f32 %v514_v60, %v527_v5  ;;  %16641 = vpow2.f32 %v534_v3  ;;  %v16180_v12 = vunpack.i.h.bf16 %v16178_v7  ;;  %v16179_v13 = vunpack.i.l.bf16 %v16178_v7 }
 0x3fb   :  { %16643 = vpow2.f32 %v532_v4 }
 0x3fc   :  { %v538_v9 = vmul.f32 1.442695, %v531_v6  ;;  %v15369_v21 = vpack.c.bf16 %v16180_v12, %v16179_v13 }
 0x3fd   :  { %v16173_v10 = vpop.permute.xlu1 %16172  ;;  %v830_v58 = vpop.permute.xlu0 %829 }
 0x3fe   :  { %v16175_v14 = vunpack.i.h.bf16 %v16173_v10  ;;  %v16174_v15 = vunpack.i.l.bf16 %v16173_v10  ;;  %16645 = vpow2.f32 %v538_v9 }
 0x3ff   :  { %16647 = vpow2.f32 %v536_v17 }
 0x400   :  { %v15365_v16 = vpack.c.bf16 %v16175_v14, %v16174_v15 }
 0x401   :  { %v16183_v18 = vpop.permute.xlu1 %16182 }
 0x402   :  { %v16185_v19 = vunpack.i.h.bf16 %v16183_v18  ;;  %v16184_v20 = vunpack.i.l.bf16 %v16183_v18  ;;  %15366 = vmatprep.subr.bf16.mxu0 %v15365_v16 }
 0x403   :  { %15368 = vmatpush3.bf16.msra.mxu0 %v15365_v16 }
 0x404   :  { %v15373_v22 = vpack.c.bf16 %v16185_v19, %v16184_v20  ;;  %15370 = vmatprep.subr.bf16.mxu0 %v15369_v21  ;;  %v16642_v23 = vpop.eup %16641 }
 0x405   :  { %v16188_v25 = vpop.permute.xlu1 %16187  ;;  %v543_v27 = vsel %vm515_vm10, %v16642_v23, 0.0  ;;  %v16644_v30 = vpop.eup %16643 }
 0x406   :  { %15375 = vmatprep.subr.msk.bf16.mxu1 %vm17534_vm8, %v15373_v22  ;;  %544 = vadd.xlane.f32.xlu1 %v543_v27  ;;  %v540_v34 = vsel %vm515_vm10, %v16644_v30, 0.0  ;;  %v16190_v49 = vunpack.i.h.bf16 %v16188_v25  ;;  %v16189_v50 = vunpack.i.l.bf16 %v16188_v25 }
 0x407   :  { %15378 = vmatpush3.bf16.xpose.msk.msra.mxu1 %vm17534_vm8, %v15373_v22 }
 0x408   :  { %v16646_v35 = vpop.eup %16645  ;;  %v15379_v53 = vpack.c.bf16 %v16190_v49, %v16189_v50 }
 0x409   :  { %v739_v33 = vpop.permute.xlu1 %738  ;;  %v549_v38 = vsel %vm515_vm10, %v16646_v35, 0.0  ;;  %v16648_v39 = vpop.eup %16647 }
 0x40a   :  { %14615 = vmatprep.mubr.msk.f32.mxu1 %vm334_vm7, %v739_v33  ;;  %541 = vadd.xlane.f32.xlu1 %v540_v34  ;;  %v546_v40 = vsel %vm515_vm10, %v16648_v39, 0.0 }
 0x40d   :  { %v741_v37 = vpop.permute.xlu1 %740 }
 0x40e   :  { %14616 = vmatmul.mubr.msk.f32.vlgmr.msra.gmra.mrb[6].mxu1 %vm334_vm7, %v741_v37  ;;  %550 = vadd.xlane.f32.xlu1 %v549_v38 }
 0x412   :  { %547 = vadd.xlane.f32.xlu1 %v546_v40 }
 0x423   :  { %831 = vrot.lane.b32.xlu1 %v17518_v29, %s19721_s2  ;;  %s19781_s2 = smov 92  }
 0x493   :  { %v545_v41 = vpop.xlane.xlu1 %544 }
 0x494   :  { %16649 = vrcp.f32 %v545_v41 }
 0x497   :  { %v542_v43 = vpop.xlane.xlu1 %541 }
 0x498   :  { %16651 = vrcp.f32 %v542_v43 }
 0x49b   :  { %v551_v44 = vpop.xlane.xlu1 %550 }
 0x49c   :  { %16653 = vrcp.f32 %v551_v44 }
 0x49e   :  { %v16650_v46 = vpop.eup %16649 }
 0x49f   :  { %v548_v45 = vpop.xlane.xlu1 %547  ;;  %v557_v52 = vmul.f32 %v16650_v46, %v16642_v23 }
 0x4a0   :  { %16655 = vrcp.f32 %v548_v45 }
 0x4a2   :  { %v16652_v48 = vpop.eup %16651 }
 0x4a3   :  { %v556_v51 = vmul.f32 %v16652_v48, %v16644_v30  ;;  %v832_v59 = vpop.permute.xlu1 %831 }
 0x4a5   :  { %14601 = vmatprep.mubr.msk.f32.mxu0 %vm515_vm10, %v556_v51 }
 0x4a6   :  { %14602 = vmatmul.mubr.msk.f32.vlgmr.msra.gmra.mrb[4].mxu0 %vm515_vm10, %v557_v52  ;;  %v16654_v54 = vpop.eup %16653 }
 0x4a7   :  { %15372 = vmatpush3.bf16.msra.mxu0 %v15369_v21  ;;  %v559_v57 = vmul.f32 %v16654_v54, %v16646_v35 }
 0x4a8   :  { %15381 = vmatprep.subr.msk.bf16.mxu0 %vm17534_vm8, %v15379_v53 }
 0x4aa   :  { %v16656_v55 = vpop.eup %16655 }
 0x4ab   :  { %v558_v56 = vmul.f32 %v16656_v55, %v16648_v39 }
 0x4ad   :  { %14608 = vmatprep.mubr.msk.f32.mxu0 %vm515_vm10, %v558_v56 }
 0x4ae   :  { %14609 = vmatmul.mubr.msk.f32.vlgmr.msra.gmra.mrb[6].mxu0 %vm515_vm10, %v559_v57 }
 0x4af   :  { %14622 = vmatprep.mubr.msk.f32.mxu0 %vm334_vm7, %v830_v58 }
 0x4b0   :  { %15384 = vmatpush3.bf16.xpose.msk.msra.mxu0 %vm17534_vm8, %v15379_v53 }
 0x4b7   :  { %14623 = vmatmul.mubr.msk.f32.vlgmr.msra.gmra.mrb[8].mxu0 %vm334_vm7, %v832_v59 }
 0x4e1   :  { %v14617_v60 = vpop.f32.mrb[6].mxu1 }
 0x4e2   :  { %v921_v61 = vmul.f32 0.5, %v14617_v60  ;;  %v820_v62 = vpop.f32.mrb[7].mxu1 }
 0x4e3   :  { %v920_v63 = vmul.f32 0.5, %v820_v62 }
 0x4e4   :  { %v925_v0 = vadd.f32 %v921_v61, %v17551_v47 }
 0x4e5   :  { %v924_v1 = vadd.f32 %v920_v63, %v17551_v47 }
 0x4e6   :  { %v931_v2 = vsel %vm515_vm10, %v925_v0, -inf }
 0x4e7   :  { %932 = vmax.xlane.f32.xlu1 %v931_v2  ;;  %v928_v3 = vsel %vm515_vm10, %v924_v1, -inf }
 0x4e8   :  { %929 = vmax.xlane.f32.xlu0 %v928_v3 }
 0x574   :  { %v933_v9 = vpop.xlane.xlu1 %932 }
 0x575   :  { %v930_v4 = vpop.xlane.xlu0 %929  ;;  %v941_v14 = vsub.f32 %v925_v0, %v933_v9 }
 0x576   :  { %v940_v5 = vsub.f32 %v924_v1, %v930_v4 }
 0x577   :  { %v946_v16 = vmul.f32 1.442695, %v941_v14 }
 0x578   :  { %v944_v6 = vmul.f32 1.442695, %v940_v5 }
 0x579   :  { %v14603_v7 = vpop.f32.mrb[4].mxu0 }
 0x57a   :  { %16657 = vpow2.f32 %v944_v6  ;;  %735 = vst.msk [vmem:[#allocation3 + $0x8] sm:$0xff] %vm334_vm7, %v14603_v7  ;;  %v638_v8 = vpop.f32.mrb[5].mxu0 }
 0x57b   :  { %734 = vst.msk [vmem:[#allocation3] sm:$0xff] %vm334_vm7, %v638_v8  ;;  %16659 = vpow2.f32 %v946_v16 }
 0x581   :  { %v14610_v10 = vpop.f32.mrb[6].mxu0 }
 0x582   :  { %737 = vst.msk [vmem:[#allocation3 + $0x18] sm:$0xff] %vm334_vm7, %v14610_v10  ;;  %v725_v12 = vpop.f32.mrb[7].mxu0 }
 0x583   :  { %736 = vst.msk [vmem:[#allocation3 + $0x10] sm:$0xff] %vm334_vm7, %v725_v12 }
 0x584   :  { %v16658_v13 = vpop.eup %16657 }
 0x585   :  { %v952_v15 = vsel %vm515_vm10, %v16658_v13, 0.0  ;;  %v16660_v27 = vpop.eup %16659 }
 0x586   :  { %953 = vadd.xlane.f32.xlu1 %v952_v15  ;;  %v955_v30 = vsel %vm515_vm10, %v16660_v27, 0.0 }
 0x58a   :  { %v14624_v17 = vpop.f32.mrb[8].mxu0 }
 0x58b   :  { %v911_v18 = vpop.f32.mrb[9].mxu0  ;;  %v923_v19 = vmul.f32 0.5, %v14624_v17 }
 0x58c   :  { %v922_v20 = vmul.f32 0.5, %v911_v18 }
 0x58d   :  { %v927_v23 = vadd.f32 %v923_v19, %v17551_v47 }
 0x58e   :  { %v926_v21 = vadd.f32 %v922_v20, %v17551_v47 }
 0x58f   :  { %v937_v25 = vsel %vm515_vm10, %v927_v23, -inf }
 0x590   :  { %v934_v22 = vsel %vm515_vm10, %v926_v21, -inf }
 0x591   :  { %935 = vmax.xlane.f32.xlu0 %v934_v22 }
 0x595   :  { %938 = vmax.xlane.f32.xlu0 %v937_v25 }
 0x597   :  { %16192 = vrot.lane.b32.xlu1 %v17516_v28, %s19719_s14 }
 0x599   :  { %956 = vadd.xlane.f32.xlu0 %v955_v30 }
 0x59b   :  { %16202 = vrot.lane.b32.xlu1 %v17516_v28, %s19717_s25 }
 0x59f   :  { %16207 = vrot.lane.b32.xlu1 %v17528_v32, %s19717_s25  ;;  %s19783_s25 = smov 60  }
 0x5a3   :  { %1169 = vrot.lane.b32.xlu1 %v17508_v24, %s19715_s5 }
 0x5af   :  { %16197 = vrot.lane.b32.xlu0 %v17528_v32, %s19719_s14  ;;  %s19782_s14 = smov 124  }
 0x613   :  { %v954_v33 = vpop.xlane.xlu1 %953 }
 0x614   :  { %16661 = vrcp.f32 %v954_v33 }
 0x617   :  { %v16193_v34 = vpop.permute.xlu1 %16192 }
 0x618   :  { %v16195_v35 = vunpack.i.h.bf16 %v16193_v34  ;;  %v16194_v37 = vunpack.i.l.bf16 %v16193_v34 }
 0x61a   :  { %v15385_v38 = vpack.c.bf16 %v16195_v35, %v16194_v37 }
 0x61b   :  { %v16203_v39 = vpop.permute.xlu1 %16202 }
 0x61c   :  { %v16205_v40 = vunpack.i.h.bf16 %v16203_v39  ;;  %v16204_v41 = vunpack.i.l.bf16 %v16203_v39  ;;  %15386 = vmatprep.subr.bf16.mxu1 %v15385_v38 }
 0x61d   :  { %15388 = vmatpush3.bf16.msra.mxu1 %v15385_v38 }
 0x61e   :  { %v16662_v43 = vpop.eup %16661  ;;  %v15393_v44 = vpack.c.bf16 %v16205_v40, %v16204_v41  ;;  %v936_v45 = vpop.xlane.xlu0 %935 }
 0x61f   :  { %v968_v46 = vmul.f32 %v16662_v43, %v16658_v13  ;;  %v942_v48 = vsub.f32 %v926_v21, %v936_v45  ;;  %v16208_v54 = vpop.permute.xlu1 %16207 }
 0x620   :  { %15395 = vmatprep.subr.msk.bf16.mxu1 %vm17534_vm8, %v15393_v44  ;;  %v16210_v56 = vunpack.i.h.bf16 %v16208_v54  ;;  %v16209_v57 = vunpack.i.l.bf16 %v16208_v54 }
 0x621   :  { %14629 = vmatprep.mubr.msk.f32.mxu1 %vm515_vm10, %v968_v46  ;;  %v948_v49 = vmul.f32 1.442695, %v942_v48 }
 0x622   :  { %v939_v50 = vpop.xlane.xlu0 %938  ;;  %v15399_v63 = vpack.c.bf16 %v16210_v56, %v16209_v57 }
 0x623   :  { %16663 = vpow2.f32 %v948_v49  ;;  %v943_v51 = vsub.f32 %v927_v23, %v939_v50  ;;  %v1170_v4 = vpop.permute.xlu1 %1169 }
 0x625   :  { %v950_v52 = vmul.f32 1.442695, %v943_v51 }
 0x626   :  { %v957_v53 = vpop.xlane.xlu0 %956 }
 0x627   :  { %16665 = vpow2.f32 %v950_v52 }
 0x628   :  { %16667 = vrcp.f32 %v957_v53 }
 0x62a   :  { %v16198_v55 = vpop.permute.xlu0 %16197 }
 0x62b   :  { %v16200_v58 = vunpack.i.h.bf16 %v16198_v55  ;;  %v16199_v59 = vunpack.i.l.bf16 %v16198_v55 }
 0x62d   :  { %v16664_v60 = vpop.eup %16663  ;;  %v15389_v61 = vpack.c.bf16 %v16200_v58, %v16199_v59 }
 0x62e   :  { %v958_v62 = vsel %vm515_vm10, %v16664_v60, 0.0 }
 0x62f   :  { %959 = vadd.xlane.f32.xlu1 %v958_v62  ;;  %15390 = vmatprep.subr.bf16.mxu0 %v15389_v61 }
 0x630   :  { %15392 = vmatpush3.bf16.msra.mxu0 %v15389_v61 }
 0x631   :  { %v16666_v0 = vpop.eup %16665  ;;  %15401 = vmatprep.subr.msk.bf16.mxu0 %vm17534_vm8, %v15399_v63 }
 0x632   :  { %v16668_v1 = vpop.eup %16667  ;;  %v961_v2 = vsel %vm515_vm10, %v16666_v0, 0.0 }
 0x633   :  { %962 = vadd.xlane.f32.xlu0 %v961_v2  ;;  %v969_v3 = vmul.f32 %v16668_v1, %v16660_v27 }
 0x635   :  { %14630 = vmatmul.mubr.msk.f32.vlgmr.msra.gmra.mrb[8].mxu1 %vm515_vm10, %v969_v3 }
 0x636   :  { %15398 = vmatpush3.bf16.xpose.msk.msra.mxu1 %vm17534_vm8, %v15393_v44 }
 0x640   :  { %1260 = vrot.lane.b32.xlu1 %v17518_v29, %s19715_s5 }
 0x649   :  { %1167 = vrot.lane.b32.xlu0 %v17510_v26, %s19715_s5 }
 0x64d   :  { %1258 = vrot.lane.b32.xlu0 %v17520_v31, %s19715_s5  ;;  %s19784_s5 = smov 88  }
 0x6bc   :  { %v960_v5 = vpop.xlane.xlu1 %959 }
 0x6bd   :  { %16669 = vrcp.f32 %v960_v5 }
 0x6c0   :  { %v963_v6 = vpop.xlane.xlu0 %962  ;;  %v1261_v14 = vpop.permute.xlu1 %1260 }
 0x6c1   :  { %16671 = vrcp.f32 %v963_v6 }
 0x6c4   :  { %v1168_v7 = vpop.permute.xlu0 %1167 }
 0x6c5   :  { %14643 = vmatprep.mubr.msk.f32.mxu1 %vm334_vm7, %v1168_v7 }
 0x6c6   :  { %14644 = vmatmul.mubr.msk.f32.vlgmr.msra.gmra.mrb[10].mxu1 %vm334_vm7, %v1170_v4 }
 0x6c7   :  { %v16670_v8 = vpop.eup %16669 }
 0x6c8   :  { %v970_v9 = vmul.f32 %v16670_v8, %v16664_v60  ;;  %v1259_v13 = vpop.permute.xlu0 %1258 }
 0x6ca   :  { %14636 = vmatprep.mubr.msk.f32.mxu0 %vm515_vm10, %v970_v9 }
 0x6cb   :  { %v16672_v10 = vpop.eup %16671 }
 0x6cc   :  { %v971_v12 = vmul.f32 %v16672_v10, %v16666_v0 }
 0x6ce   :  { %14637 = vmatmul.mubr.msk.f32.vlgmr.msra.gmra.mrb[10].mxu0 %vm515_vm10, %v971_v12 }
 0x6cf   :  { %15404 = vmatpush3.bf16.xpose.msk.msra.mxu0 %vm17534_vm8, %v15399_v63  ;;  %14650 = vmatprep.mubr.msk.f32.mxu0 %vm334_vm7, %v1259_v13 }
 0x6d6   :  { %14651 = vmatmul.mubr.msk.f32.vlgmr.msra.gmra.mrb[12].mxu0 %vm334_vm7, %v1261_v14 }
 0x708   :  { %v17645_v15 = vpop.f32.mrb[8].mxu1 }
 0x709   :  { %v17647_v16 = vpop.f32.mrb[9].mxu1 }
 0x799   :  { %v14645_v17 = vpop.f32.mrb[10].mxu1 }
 0x79a   :  { %v1350_v18 = vmul.f32 0.5, %v14645_v17  ;;  %v1249_v19 = vpop.f32.mrb[11].mxu1 }
 0x79b   :  { %v1349_v20 = vmul.f32 0.5, %v1249_v19 }
 0x79c   :  { %v1354_v21 = vadd.f32 %v1350_v18, %v17551_v47 }
 0x79d   :  { %v1353_v22 = vadd.f32 %v1349_v20, %v17551_v47 }
 0x79e   :  { %v1360_v23 = vsel %vm515_vm10, %v1354_v21, -inf }
 0x79f   :  { %1361 = vmax.xlane.f32.xlu1 %v1360_v23  ;;  %v1357_v25 = vsel %vm515_vm10, %v1353_v22, -inf }
 0x7a0   :  { %1358 = vmax.xlane.f32.xlu0 %v1357_v25 }
 0x7a1   :  { %v17653_v27 = vpop.f32.mrb[10].mxu0 }
 0x7a2   :  { %v17655_v30 = vpop.f32.mrb[11].mxu0 }
 0x7a9   :  { %v14652_v33 = vpop.f32.mrb[12].mxu0 }
 0x7aa   :  { %v1340_v34 = vpop.f32.mrb[13].mxu0  ;;  %v1352_v35 = vmul.f32 0.5, %v14652_v33 }
 0x7ab   :  { %v1351_v37 = vmul.f32 0.5, %v1340_v34 }
 0x7ac   :  { %v1356_v40 = vadd.f32 %v1352_v35, %v17551_v47 }
 0x7ad   :  { %v1355_v38 = vadd.f32 %v1351_v37, %v17551_v47 }
 0x7ae   :  { %v1366_v41 = vsel %vm515_vm10, %v1356_v40, -inf }
 0x7af   :  { %v1363_v39 = vsel %vm515_vm10, %v1355_v38, -inf }
 0x7b0   :  { %1364 = vmax.xlane.f32.xlu0 %v1363_v39 }
 0x7b4   :  { %1367 = vmax.xlane.f32.xlu0 %v1366_v41 }
 0x82c   :  { %v1362_v43 = vpop.xlane.xlu1 %1361 }
 0x82d   :  { %v1370_v44 = vsub.f32 %v1354_v21, %v1362_v43  ;;  %v1359_v45 = vpop.xlane.xlu0 %1358 }
 0x82e   :  { %v1369_v46 = vsub.f32 %v1353_v22, %v1359_v45 }
 0x82f   :  { %v1375_v48 = vmul.f32 1.442695, %v1370_v44 }
 0x830   :  { %v1373_v49 = vmul.f32 1.442695, %v1369_v46 }
 0x831   :  { %16673 = vpow2.f32 %v1375_v48 }
 0x832   :  { %16675 = vpow2.f32 %v1373_v49 }
 0x83b   :  { %v16674_v50 = vpop.eup %16673 }
 0x83c   :  { %v16676_v51 = vpop.eup %16675  ;;  %v1384_v52 = vsel %vm515_vm10, %v16674_v50, 0.0 }
 0x83d   :  { %1385 = vadd.xlane.f32.xlu0 %v1384_v52  ;;  %v1381_v53 = vsel %vm515_vm10, %v16676_v51, 0.0  ;;  %v1365_v54 = vpop.xlane.xlu0 %1364 }
 0x83e   :  { %1382 = vadd.xlane.f32.xlu1 %v1381_v53  ;;  %v1371_v58 = vsub.f32 %v1355_v38, %v1365_v54 }
 0x840   :  { %v1377_v59 = vmul.f32 1.442695, %v1371_v58 }
 0x841   :  { %v1368_v55 = vpop.xlane.xlu0 %1367 }
 0x842   :  { %v1372_v56 = vsub.f32 %v1356_v40, %v1368_v55 }
 0x844   :  { %v1379_v57 = vmul.f32 1.442695, %v1372_v56 }
 0x846   :  { %16677 = vpow2.f32 %v1379_v57 }
 0x847   :  { %16679 = vpow2.f32 %v1377_v59 }
 0x84f   :  { %16212 = vrot.lane.b32.xlu1 %v17516_v28, %s19713_s23 }
 0x850   :  { %v16678_v60 = vpop.eup %16677 }
 0x851   :  { %v1390_v61 = vsel %vm515_vm10, %v16678_v60, 0.0  ;;  %v16680_v62 = vpop.eup %16679 }
 0x852   :  { %v1387_v63 = vsel %vm515_vm10, %v16680_v62, 0.0 }
 0x853   :  { %16222 = vrot.lane.b32.xlu1 %v17516_v28, %s19711_s1  ;;  %16217 = vrot.lane.b32.xlu0 %v17528_v32, %s19713_s23  ;;  %s19786_s23 = smov 56  }
 0x857   :  { %16227 = vrot.lane.b32.xlu1 %v17528_v32, %s19711_s1  ;;  %s19725_s1 = smov 28  }
 0x85b   :  { %1598 = vrot.lane.b32.xlu1 %v17508_v24, %s19709_s24 }
 0x872   :  { %1391 = vadd.xlane.f32.xlu0 %v1390_v61 }
 0x87f   :  { %1388 = vadd.xlane.f32.xlu1 %v1387_v63 }
 0x888   :  { %1596 = vrot.lane.b32.xlu0 %v17510_v26, %s19709_s24 }
 0x88c   :  { %1687 = vrot.lane.b32.xlu0 %v17520_v31, %s19709_s24 }
 0x890   :  { %1689 = vrot.lane.b32.xlu1 %v17518_v29, %s19709_s24  ;;  %s19787_s24 = smov 84  }
 0x8ca   :  { %v1386_v0 = vpop.xlane.xlu0 %1385 }
 0x8cb   :  { %16681 = vrcp.f32 %v1386_v0  ;;  %v1383_v1 = vpop.xlane.xlu1 %1382 }
 0x8cc   :  { %16683 = vrcp.f32 %v1383_v1 }
 0x8ce   :  { %v16218_v2 = vpop.permute.xlu0 %16217 }
 0x8cf   :  { %v16220_v3 = vunpack.i.h.bf16 %v16218_v2  ;;  %v16219_v4 = vunpack.i.l.bf16 %v16218_v2  ;;  %v16213_v5 = vpop.permute.xlu1 %16212 }
 0x8d0   :  { %v16215_v6 = vunpack.i.h.bf16 %v16213_v5  ;;  %v16214_v7 = vunpack.i.l.bf16 %v16213_v5 }
 0x8d1   :  { %v15409_v8 = vpack.c.bf16 %v16220_v3, %v16219_v4 }
 0x8d2   :  { %v15405_v9 = vpack.c.bf16 %v16215_v6, %v16214_v7 }
 0x8d3   :  { %v16223_v10 = vpop.permute.xlu1 %16222  ;;  %15410 = vmatprep.subr.bf16.mxu0 %v15409_v8 }
 0x8d4   :  { %v16225_v12 = vunpack.i.h.bf16 %v16223_v10  ;;  %v16224_v13 = vunpack.i.l.bf16 %v16223_v10  ;;  %15406 = vmatprep.subr.bf16.mxu1 %v15405_v9  ;;  %15412 = vmatpush3.bf16.msra.mxu0 %v15409_v8 }
 0x8d5   :  { %v16682_v14 = vpop.eup %16681  ;;  %15408 = vmatpush3.bf16.msra.mxu1 %v15405_v9 }
 0x8d6   :  { %v16684_v17 = vpop.eup %16683  ;;  %v15413_v18 = vpack.c.bf16 %v16225_v12, %v16224_v13  ;;  %v1398_v23 = vmul.f32 %v16682_v14, %v16674_v50 }
 0x8d7   :  { %v16228_v19 = vpop.permute.xlu1 %16227  ;;  %v1397_v20 = vmul.f32 %v16684_v17, %v16676_v51 }
 0x8d8   :  { %v16230_v21 = vunpack.i.h.bf16 %v16228_v19  ;;  %v16229_v22 = vunpack.i.l.bf16 %v16228_v19  ;;  %15415 = vmatprep.subr.msk.bf16.mxu1 %vm17534_vm8, %v15413_v18 }
 0x8d9   :  { %14657 = vmatprep.mubr.msk.f32.mxu1 %vm515_vm10, %v1397_v20 }
 0x8da   :  { %v15419_v25 = vpack.c.bf16 %v16230_v21, %v16229_v22  ;;  %14658 = vmatmul.mubr.msk.f32.vlgmr.msra.gmra.mrb[12].mxu1 %vm515_vm10, %v1398_v23 }
 0x8db   :  { %v1599_v35 = vpop.permute.xlu1 %1598 }
 0x8dc   :  { %15421 = vmatprep.subr.msk.bf16.mxu0 %vm17534_vm8, %v15419_v25 }
 0x8de   :  { %15418 = vmatpush3.bf16.xpose.msk.msra.mxu1 %vm17534_vm8, %v15413_v18 }
 0x8ff   :  { %v1392_v33 = vpop.xlane.xlu0 %1391 }
 0x900   :  { %16685 = vrcp.f32 %v1392_v33 }
 0x903   :  { %v1597_v34 = vpop.permute.xlu0 %1596 }
 0x904   :  { %14671 = vmatprep.mubr.msk.f32.mxu1 %vm334_vm7, %v1597_v34 }
 0x905   :  { %14672 = vmatmul.mubr.msk.f32.vlgmr.msra.gmra.mrb[14].mxu1 %vm334_vm7, %v1599_v35 }
 0x907   :  { %v1688_v43 = vpop.permute.xlu0 %1687 }
 0x90a   :  { %v16686_v38 = vpop.eup %16685 }
 0x90b   :  { %v1400_v41 = vmul.f32 %v16686_v38, %v16678_v60 }
 0x90c   :  { %v1389_v37 = vpop.xlane.xlu1 %1388 }
 0x90d   :  { %16687 = vrcp.f32 %v1389_v37 }
 0x910   :  { %v1690_v44 = vpop.permute.xlu1 %1689 }
 0x917   :  { %v16688_v39 = vpop.eup %16687 }
 0x918   :  { %v1399_v40 = vmul.f32 %v16688_v39, %v16680_v62 }
 0x91a   :  { %14664 = vmatprep.mubr.msk.f32.mxu0 %vm515_vm10, %v1399_v40 }
 0x91b   :  { %14665 = vmatmul.mubr.msk.f32.vlgmr.msra.gmra.mrb[14].mxu0 %vm515_vm10, %v1400_v41 }
 0x91c   :  { %15424 = vmatpush3.bf16.xpose.msk.msra.mxu0 %vm17534_vm8, %v15419_v25  ;;  %14678 = vmatprep.mubr.msk.f32.mxu0 %vm334_vm7, %v1688_v43 }
 0x923   :  { %14679 = vmatmul.mubr.msk.f32.vlgmr.msra.gmra.mrb[16].mxu0 %vm334_vm7, %v1690_v44 }
 0x9ad   :  { %v17697_v45 = vpop.f32.mrb[12].mxu1 }
 0x9ae   :  { %v17699_v46 = vpop.f32.mrb[13].mxu1 }
 0x9d8   :  { %v14673_v48 = vpop.f32.mrb[14].mxu1 }
 0x9d9   :  { %v1779_v49 = vmul.f32 0.5, %v14673_v48  ;;  %v1678_v50 = vpop.f32.mrb[15].mxu1 }
 0x9da   :  { %v1778_v51 = vmul.f32 0.5, %v1678_v50 }
 0x9db   :  { %v1783_v52 = vadd.f32 %v1779_v49, %v17551_v47 }
 0x9dc   :  { %v1782_v53 = vadd.f32 %v1778_v51, %v17551_v47 }
 0x9dd   :  { %v1789_v54 = vsel %vm515_vm10, %v1783_v52, -inf }
 0x9de   :  { %1790 = vmax.xlane.f32.xlu1 %v1789_v54  ;;  %v1786_v55 = vsel %vm515_vm10, %v1782_v53, -inf }
 0x9df   :  { %1787 = vmax.xlane.f32.xlu0 %v1786_v55 }
 0x9ee   :  { %v17705_v56 = vpop.f32.mrb[14].mxu0 }
 0x9ef   :  { %v17707_v57 = vpop.f32.mrb[15].mxu0 }
 0x9f6   :  { %v14680_v58 = vpop.f32.mrb[16].mxu0 }
 0x9f7   :  { %v1769_v59 = vpop.f32.mrb[17].mxu0  ;;  %v1781_v60 = vmul.f32 0.5, %v14680_v58 }
 0x9f8   :  { %v1780_v61 = vmul.f32 0.5, %v1769_v59 }
 0x9f9   :  { %v1785_v0 = vadd.f32 %v1781_v60, %v17551_v47 }
 0x9fa   :  { %v1784_v62 = vadd.f32 %v1780_v61, %v17551_v47 }
 0x9fb   :  { %v1795_v1 = vsel %vm515_vm10, %v1785_v0, -inf }
 0x9fc   :  { %v1792_v63 = vsel %vm515_vm10, %v1784_v62, -inf }
 0x9fd   :  { %1793 = vmax.xlane.f32.xlu0 %v1792_v63 }
 0xa01   :  { %1796 = vmax.xlane.f32.xlu0 %v1795_v1 }
 0xa6b   :  { %v1791_v2 = vpop.xlane.xlu1 %1790 }
 0xa6c   :  { %v1799_v3 = vsub.f32 %v1783_v52, %v1791_v2  ;;  %v1788_v4 = vpop.xlane.xlu0 %1787 }
 0xa6d   :  { %v1798_v5 = vsub.f32 %v1782_v53, %v1788_v4 }
 0xa6e   :  { %v1804_v6 = vmul.f32 1.442695, %v1799_v3 }
 0xa6f   :  { %v1802_v7 = vmul.f32 1.442695, %v1798_v5 }
 0xa70   :  { %16689 = vpow2.f32 %v1804_v6 }
 0xa71   :  { %16691 = vpow2.f32 %v1802_v7 }
 0xa7a   :  { %v16690_v8 = vpop.eup %16689 }
 0xa7b   :  { %v16692_v9 = vpop.eup %16691  ;;  %v1813_v10 = vsel %vm515_vm10, %v16690_v8, 0.0 }
 0xa7c   :  { %1814 = vadd.xlane.f32.xlu0 %v1813_v10  ;;  %v1810_v12 = vsel %vm515_vm10, %v16692_v9, 0.0 }
 0xa7d   :  { %1811 = vadd.xlane.f32.xlu1 %v1810_v12 }
 0xa8a   :  { %v1794_v13 = vpop.xlane.xlu0 %1793 }
 0xa8b   :  { %v1800_v19 = vsub.f32 %v1784_v62, %v1794_v13 }
 0xa8d   :  { %v1806_v20 = vmul.f32 1.442695, %v1800_v19 }
 0xa8e   :  { %16232 = vrot.lane.b32.xlu1 %v17516_v28, %s19707_s27  ;;  %v1797_v14 = vpop.xlane.xlu0 %1796 }
 0xa8f   :  { %v1801_v17 = vsub.f32 %v1785_v0, %v1797_v14 }
 0xa91   :  { %v1808_v18 = vmul.f32 1.442695, %v1801_v17 }
 0xa92   :  { %16242 = vrot.lane.b32.xlu1 %v17516_v28, %s19703_s3  ;;  %16237 = vrot.lane.b32.xlu0 %v17528_v32, %s19707_s27  ;;  %s19731_s27 = smov 24  }
 0xa93   :  { %16693 = vpow2.f32 %v1808_v18 }
 0xa94   :  { %16695 = vpow2.f32 %v1806_v20 }
 0xa96   :  { %16247 = vrot.lane.b32.xlu1 %v17528_v32, %s19703_s3  ;;  %s19735_s3 = smov 16  }
 0xa9a   :  { %2027 = vrot.lane.b32.xlu1 %v17508_v24, %s19683_s28 }
 0xa9d   :  { %v16694_v21 = vpop.eup %16693 }
 0xa9e   :  { %v1819_v22 = vsel %vm515_vm10, %v16694_v21, 0.0  ;;  %v16696_v23 = vpop.eup %16695 }
 0xa9f   :  { %v1816_v25 = vsel %vm515_vm10, %v16696_v23, 0.0 }
 0xab1   :  { %1820 = vadd.xlane.f32.xlu0 %v1819_v22 }
 0xabe   :  { %1817 = vadd.xlane.f32.xlu1 %v1816_v25 }
 0xac7   :  { %2025 = vrot.lane.b32.xlu0 %v17510_v26, %s19683_s28 }
 0xacb   :  { %2116 = vrot.lane.b32.xlu0 %v17520_v31, %s19683_s28 }
 0xacf   :  { %2118 = vrot.lane.b32.xlu1 %v17518_v29, %s19683_s28  ;;  %s19685_s28 = smov 108  }
 0xb09   :  { %v1815_v33 = vpop.xlane.xlu0 %1814 }
 0xb0a   :  { %16697 = vrcp.f32 %v1815_v33  ;;  %v1812_v34 = vpop.xlane.xlu1 %1811 }
 0xb0b   :  { %16699 = vrcp.f32 %v1812_v34 }
 0xb0d   :  { %v16238_v35 = vpop.permute.xlu0 %16237 }
 0xb0e   :  { %v16240_v37 = vunpack.i.h.bf16 %v16238_v35  ;;  %v16239_v38 = vunpack.i.l.bf16 %v16238_v35  ;;  %v16233_v39 = vpop.permute.xlu1 %16232 }
 0xb0f   :  { %v16235_v40 = vunpack.i.h.bf16 %v16233_v39  ;;  %v16234_v41 = vunpack.i.l.bf16 %v16233_v39 }
 0xb10   :  { %v15429_v43 = vpack.c.bf16 %v16240_v37, %v16239_v38 }
 0xb11   :  { %v15425_v44 = vpack.c.bf16 %v16235_v40, %v16234_v41 }
 0xb12   :  { %v16243_v48 = vpop.permute.xlu1 %16242  ;;  %15430 = vmatprep.subr.bf16.mxu0 %v15429_v43 }
 0xb13   :  { %v16245_v49 = vunpack.i.h.bf16 %v16243_v48  ;;  %v16244_v50 = vunpack.i.l.bf16 %v16243_v48  ;;  %15426 = vmatprep.subr.bf16.mxu1 %v15425_v44  ;;  %15432 = vmatpush3.bf16.msra.mxu0 %v15429_v43 }
 0xb14   :  { %v16698_v51 = vpop.eup %16697  ;;  %15428 = vmatpush3.bf16.msra.mxu1 %v15425_v44 }
 0xb15   :  { %v16700_v52 = vpop.eup %16699  ;;  %v15433_v53 = vpack.c.bf16 %v16245_v49, %v16244_v50  ;;  %v1827_v60 = vmul.f32 %v16698_v51, %v16690_v8 }
 0xb16   :  { %v16248_v54 = vpop.permute.xlu1 %16247  ;;  %v1826_v55 = vmul.f32 %v16700_v52, %v16692_v9 }
 0xb17   :  { %v16250_v58 = vunpack.i.h.bf16 %v16248_v54  ;;  %v16249_v59 = vunpack.i.l.bf16 %v16248_v54  ;;  %15435 = vmatprep.subr.msk.bf16.mxu1 %vm17534_vm8, %v15433_v53 }
 0xb18   :  { %14685 = vmatprep.mubr.msk.f32.mxu1 %vm515_vm10, %v1826_v55 }
 0xb19   :  { %v15439_v61 = vpack.c.bf16 %v16250_v58, %v16249_v59  ;;  %14686 = vmatmul.mubr.msk.f32.vlgmr.msra.gmra.mrb[16].mxu1 %vm515_vm10, %v1827_v60 }
 0xb1a   :  { %v2028_v0 = vpop.permute.xlu1 %2027 }
 0xb1b   :  { %15441 = vmatprep.subr.msk.bf16.mxu0 %vm17534_vm8, %v15439_v61 }
 0xb1d   :  { %15438 = vmatpush3.bf16.xpose.msk.msra.mxu1 %vm17534_vm8, %v15433_v53 }
 0xb3e   :  { %v1821_v62 = vpop.xlane.xlu0 %1820 }
 0xb3f   :  { %16701 = vrcp.f32 %v1821_v62 }
 0xb42   :  { %v2026_v63 = vpop.permute.xlu0 %2025 }
 0xb43   :  { %14699 = vmatprep.mubr.msk.f32.mxu1 %vm334_vm7, %v2026_v63 }
 0xb44   :  { %14700 = vmatmul.mubr.msk.f32.vlgmr.msra.gmra.mrb[18].mxu1 %vm334_vm7, %v2028_v0 }
 0xb46   :  { %v2117_v6 = vpop.permute.xlu0 %2116 }
 0xb49   :  { %v16702_v2 = vpop.eup %16701 }
 0xb4a   :  { %v1829_v5 = vmul.f32 %v16702_v2, %v16694_v21 }
 0xb4b   :  { %v1818_v1 = vpop.xlane.xlu1 %1817 }
 0xb4c   :  { %16703 = vrcp.f32 %v1818_v1 }
 0xb4f   :  { %v2119_v7 = vpop.permute.xlu1 %2118 }
 0xb56   :  { %v16704_v3 = vpop.eup %16703 }
 0xb57   :  { %v1828_v4 = vmul.f32 %v16704_v3, %v16696_v23 }
 0xb59   :  { %14692 = vmatprep.mubr.msk.f32.mxu0 %vm515_vm10, %v1828_v4 }
 0xb5a   :  { %14693 = vmatmul.mubr.msk.f32.vlgmr.msra.gmra.mrb[18].mxu0 %vm515_vm10, %v1829_v5 }
 0xb5b   :  { %15444 = vmatpush3.bf16.xpose.msk.msra.mxu0 %vm17534_vm8, %v15439_v61  ;;  %14706 = vmatprep.mubr.msk.f32.mxu0 %vm334_vm7, %v2117_v6 }
 0xb62   :  { %14707 = vmatmul.mubr.msk.f32.vlgmr.msra.gmra.mrb[20].mxu0 %vm334_vm7, %v2119_v7 }
 0xbec   :  { %v17749_v8 = vpop.f32.mrb[16].mxu1 }
 0xbed   :  { %v17751_v9 = vpop.f32.mrb[17].mxu1 }
 0xc17   :  { %v14701_v10 = vpop.f32.mrb[18].mxu1 }
 0xc18   :  { %v2208_v12 = vmul.f32 0.5, %v14701_v10  ;;  %v2107_v13 = vpop.f32.mrb[19].mxu1 }
 0xc19   :  { %v2207_v14 = vmul.f32 0.5, %v2107_v13 }
 0xc1a   :  { %v2212_v17 = vadd.f32 %v2208_v12, %v17551_v47 }
 0xc1b   :  { %v2211_v18 = vadd.f32 %v2207_v14, %v17551_v47 }
 0xc1c   :  { %v2218_v19 = vsel %vm515_vm10, %v2212_v17, -inf }
 0xc1d   :  { %2219 = vmax.xlane.f32.xlu1 %v2218_v19  ;;  %v2215_v20 = vsel %vm515_vm10, %v2211_v18, -inf }
 0xc1e   :  { %2216 = vmax.xlane.f32.xlu0 %v2215_v20 }
 0xc2d   :  { %v17757_v21 = vpop.f32.mrb[18].mxu0 }
 0xc2e   :  { %v17759_v22 = vpop.f32.mrb[19].mxu0 }
 0xc35   :  { %v14708_v23 = vpop.f32.mrb[20].mxu0 }
 0xc36   :  { %v2198_v25 = vpop.f32.mrb[21].mxu0  ;;  %v2210_v33 = vmul.f32 0.5, %v14708_v23 }
 0xc37   :  { %v2209_v34 = vmul.f32 0.5, %v2198_v25 }
 0xc38   :  { %v2214_v38 = vadd.f32 %v2210_v33, %v17551_v47 }
 0xc39   :  { %v2213_v35 = vadd.f32 %v2209_v34, %v17551_v47 }
 0xc3a   :  { %v2224_v39 = vsel %vm515_vm10, %v2214_v38, -inf }
 0xc3b   :  { %v2221_v37 = vsel %vm515_vm10, %v2213_v35, -inf }
 0xc3c   :  { %2222 = vmax.xlane.f32.xlu0 %v2221_v37 }
 0xc40   :  { %2225 = vmax.xlane.f32.xlu0 %v2224_v39 }
 0xcaa   :  { %v2220_v40 = vpop.xlane.xlu1 %2219 }
 0xcab   :  { %v2228_v41 = vsub.f32 %v2212_v17, %v2220_v40  ;;  %v2217_v43 = vpop.xlane.xlu0 %2216 }
 0xcac   :  { %v2227_v44 = vsub.f32 %v2211_v18, %v2217_v43 }
 0xcad   :  { %v2233_v48 = vmul.f32 1.442695, %v2228_v41 }
 0xcae   :  { %v2231_v49 = vmul.f32 1.442695, %v2227_v44 }
 0xcaf   :  { %16705 = vpow2.f32 %v2233_v48 }
 0xcb0   :  { %16707 = vpow2.f32 %v2231_v49 }
 0xcb9   :  { %v16706_v50 = vpop.eup %16705 }
 0xcba   :  { %v16708_v51 = vpop.eup %16707  ;;  %v2242_v52 = vsel %vm515_vm10, %v16706_v50, 0.0 }
 0xcbb   :  { %2243 = vadd.xlane.f32.xlu0 %v2242_v52  ;;  %v2239_v53 = vsel %vm515_vm10, %v16708_v51, 0.0 }
 0xcbc   :  { %2240 = vadd.xlane.f32.xlu1 %v2239_v53 }
 0xcc9   :  { %v2223_v54 = vpop.xlane.xlu0 %2222 }
 0xcca   :  { %v2229_v60 = vsub.f32 %v2213_v35, %v2223_v54 }
 0xccc   :  { %v2235_v61 = vmul.f32 1.442695, %v2229_v60 }
 0xccd   :  { %16252 = vrot.lane.b32.xlu1 %v17516_v28, %s19689_s18  ;;  %v2226_v55 = vpop.xlane.xlu0 %2225 }
 0xcce   :  { %v2230_v58 = vsub.f32 %v2214_v38, %v2226_v55 }
 0xcd0   :  { %v2237_v59 = vmul.f32 1.442695, %v2230_v58 }
 0xcd1   :  { %16262 = vrot.lane.b32.xlu1 %v17516_v28, %s19687_s26  ;;  %16257 = vrot.lane.b32.xlu0 %v17528_v32, %s19689_s18  ;;  %s19691_s18 = smov 104  }
 0xcd2   :  { %16709 = vpow2.f32 %v2237_v59 }
 0xcd3   :  { %16711 = vpow2.f32 %v2235_v61 }
 0xcd5   :  { %16267 = vrot.lane.b32.xlu1 %v17528_v32, %s19687_s26  ;;  %s19693_s26 = smov 72  }
 0xcd9   :  { %2456 = vrot.lane.b32.xlu1 %v17508_v24, %s19685_s28 }
 0xcdc   :  { %v16710_v62 = vpop.eup %16709 }
 0xcdd   :  { %v2248_v63 = vsel %vm515_vm10, %v16710_v62, 0.0  ;;  %v16712_v0 = vpop.eup %16711 }
 0xcde   :  { %v2245_v1 = vsel %vm515_vm10, %v16712_v0, 0.0 }
 0xcf0   :  { %2249 = vadd.xlane.f32.xlu0 %v2248_v63 }
 0xcfd   :  { %2246 = vadd.xlane.f32.xlu1 %v2245_v1 }
 0xd06   :  { %2454 = vrot.lane.b32.xlu0 %v17510_v26, %s19685_s28 }
 0xd0a   :  { %2545 = vrot.lane.b32.xlu0 %v17520_v31, %s19685_s28 }
 0xd0e   :  { %2547 = vrot.lane.b32.xlu1 %v17518_v29, %s19685_s28  ;;  %s19695_s28 = smov 44  }
 0xd48   :  { %v2244_v2 = vpop.xlane.xlu0 %2243 }
 0xd49   :  { %16713 = vrcp.f32 %v2244_v2  ;;  %v2241_v3 = vpop.xlane.xlu1 %2240 }
 0xd4a   :  { %16715 = vrcp.f32 %v2241_v3 }
 0xd4c   :  { %v16258_v4 = vpop.permute.xlu0 %16257 }
 0xd4d   :  { %v16260_v5 = vunpack.i.h.bf16 %v16258_v4  ;;  %v16259_v6 = vunpack.i.l.bf16 %v16258_v4  ;;  %v16253_v7 = vpop.permute.xlu1 %16252 }
 0xd4e   :  { %v16255_v10 = vunpack.i.h.bf16 %v16253_v7  ;;  %v16254_v12 = vunpack.i.l.bf16 %v16253_v7 }
 0xd4f   :  { %v15449_v13 = vpack.c.bf16 %v16260_v5, %v16259_v6 }
 0xd50   :  { %v15445_v14 = vpack.c.bf16 %v16255_v10, %v16254_v12 }
 0xd51   :  { %v16263_v17 = vpop.permute.xlu1 %16262  ;;  %15450 = vmatprep.subr.bf16.mxu0 %v15449_v13 }
 0xd52   :  { %v16265_v18 = vunpack.i.h.bf16 %v16263_v17  ;;  %v16264_v19 = vunpack.i.l.bf16 %v16263_v17  ;;  %15446 = vmatprep.subr.bf16.mxu1 %v15445_v14  ;;  %15452 = vmatpush3.bf16.msra.mxu0 %v15449_v13 }
 0xd53   :  { %v16714_v20 = vpop.eup %16713  ;;  %15448 = vmatpush3.bf16.msra.mxu1 %v15445_v14 }
 0xd54   :  { %v16716_v23 = vpop.eup %16715  ;;  %v15453_v25 = vpack.c.bf16 %v16265_v18, %v16264_v19  ;;  %v2256_v38 = vmul.f32 %v16714_v20, %v16706_v50 }
 0xd55   :  { %v16268_v33 = vpop.permute.xlu1 %16267  ;;  %v2255_v34 = vmul.f32 %v16716_v23, %v16708_v51 }
 0xd56   :  { %v16270_v35 = vunpack.i.h.bf16 %v16268_v33  ;;  %v16269_v37 = vunpack.i.l.bf16 %v16268_v33  ;;  %15455 = vmatprep.subr.msk.bf16.mxu1 %vm17534_vm8, %v15453_v25 }
 0xd57   :  { %14713 = vmatprep.mubr.msk.f32.mxu1 %vm515_vm10, %v2255_v34 }
 0xd58   :  { %v15459_v39 = vpack.c.bf16 %v16270_v35, %v16269_v37  ;;  %14714 = vmatmul.mubr.msk.f32.vlgmr.msra.gmra.mrb[20].mxu1 %vm515_vm10, %v2256_v38 }
 0xd59   :  { %v2457_v43 = vpop.permute.xlu1 %2456 }
 0xd5a   :  { %15461 = vmatprep.subr.msk.bf16.mxu0 %vm17534_vm8, %v15459_v39 }
 0xd5c   :  { %15458 = vmatpush3.bf16.xpose.msk.msra.mxu1 %vm17534_vm8, %v15453_v25 }
 0xd7d   :  { %v2250_v40 = vpop.xlane.xlu0 %2249 }
 0xd7e   :  { %16717 = vrcp.f32 %v2250_v40 }
 0xd81   :  { %v2455_v41 = vpop.permute.xlu0 %2454 }
 0xd82   :  { %14727 = vmatprep.mubr.msk.f32.mxu1 %vm334_vm7, %v2455_v41 }
 0xd83   :  { %14728 = vmatmul.mubr.msk.f32.vlgmr.msra.gmra.mrb[22].mxu1 %vm334_vm7, %v2457_v43 }
 0xd85   :  { %v2546_v52 = vpop.permute.xlu0 %2545 }
 0xd88   :  { %v16718_v48 = vpop.eup %16717 }
 0xd89   :  { %v2258_v51 = vmul.f32 %v16718_v48, %v16710_v62 }
 0xd8a   :  { %v2247_v44 = vpop.xlane.xlu1 %2246 }
 0xd8b   :  { %16719 = vrcp.f32 %v2247_v44 }
 0xd8e   :  { %v2548_v53 = vpop.permute.xlu1 %2547 }
 0xd95   :  { %v16720_v49 = vpop.eup %16719 }
 0xd96   :  { %v2257_v50 = vmul.f32 %v16720_v49, %v16712_v0 }
 0xd98   :  { %14720 = vmatprep.mubr.msk.f32.mxu0 %vm515_vm10, %v2257_v50 }
 0xd99   :  { %14721 = vmatmul.mubr.msk.f32.vlgmr.msra.gmra.mrb[22].mxu0 %vm515_vm10, %v2258_v51 }
 0xd9a   :  { %15464 = vmatpush3.bf16.xpose.msk.msra.mxu0 %vm17534_vm8, %v15459_v39  ;;  %14734 = vmatprep.mubr.msk.f32.mxu0 %vm334_vm7, %v2546_v52 }
 0xda1   :  { %14735 = vmatmul.mubr.msk.f32.vlgmr.msra.gmra.mrb[24].mxu0 %vm334_vm7, %v2548_v53 }
 0xe2b   :  { %v17801_v54 = vpop.f32.mrb[20].mxu1 }
 0xe2c   :  { %v17803_v55 = vpop.f32.mrb[21].mxu1 }
 0xe56   :  { %v14729_v58 = vpop.f32.mrb[22].mxu1 }
 0xe57   :  { %v2637_v59 = vmul.f32 0.5, %v14729_v58  ;;  %v2536_v60 = vpop.f32.mrb[23].mxu1 }
 0xe58   :  { %v2636_v61 = vmul.f32 0.5, %v2536_v60 }
 0xe59   :  { %v2641_v62 = vadd.f32 %v2637_v59, %v17551_v47 }
 0xe5a   :  { %v2640_v63 = vadd.f32 %v2636_v61, %v17551_v47 }
 0xe5b   :  { %v2647_v0 = vsel %vm515_vm10, %v2641_v62, -inf }
 0xe5c   :  { %2648 = vmax.xlane.f32.xlu1 %v2647_v0  ;;  %v2644_v1 = vsel %vm515_vm10, %v2640_v63, -inf }
 0xe5d   :  { %2645 = vmax.xlane.f32.xlu0 %v2644_v1 }
 0xe6c   :  { %v17809_v2 = vpop.f32.mrb[22].mxu0 }
 0xe6d   :  { %v17811_v3 = vpop.f32.mrb[23].mxu0 }
 0xe74   :  { %v14736_v4 = vpop.f32.mrb[24].mxu0 }
 0xe75   :  { %v2627_v5 = vpop.f32.mrb[25].mxu0  ;;  %v2639_v6 = vmul.f32 0.5, %v14736_v4 }
 0xe76   :  { %v2638_v7 = vmul.f32 0.5, %v2627_v5 }
 0xe77   :  { %v2643_v13 = vadd.f32 %v2639_v6, %v17551_v47 }
 0xe78   :  { %v2642_v10 = vadd.f32 %v2638_v7, %v17551_v47 }
 0xe79   :  { %v2653_v14 = vsel %vm515_vm10, %v2643_v13, -inf }
 0xe7a   :  { %v2650_v12 = vsel %vm515_vm10, %v2642_v10, -inf }
 0xe7b   :  { %2651 = vmax.xlane.f32.xlu0 %v2650_v12 }
 0xe7f   :  { %2654 = vmax.xlane.f32.xlu0 %v2653_v14 }
 0xee9   :  { %v2649_v17 = vpop.xlane.xlu1 %2648 }
 0xeea   :  { %v2657_v18 = vsub.f32 %v2641_v62, %v2649_v17  ;;  %v2646_v19 = vpop.xlane.xlu0 %2645 }
 0xeeb   :  { %v2656_v20 = vsub.f32 %v2640_v63, %v2646_v19 }
 0xeec   :  { %v2662_v23 = vmul.f32 1.442695, %v2657_v18 }
 0xeed   :  { %v2660_v25 = vmul.f32 1.442695, %v2656_v20 }
 0xeee   :  { %16721 = vpow2.f32 %v2662_v23 }
 0xeef   :  { %16723 = vpow2.f32 %v2660_v25 }
 0xef8   :  { %v16722_v33 = vpop.eup %16721 }
 0xef9   :  { %v16724_v34 = vpop.eup %16723  ;;  %v2671_v35 = vsel %vm515_vm10, %v16722_v33, 0.0 }
 0xefa   :  { %2672 = vadd.xlane.f32.xlu0 %v2671_v35  ;;  %v2668_v37 = vsel %vm515_vm10, %v16724_v34, 0.0 }
 0xefb   :  { %2669 = vadd.xlane.f32.xlu1 %v2668_v37 }
 0xf08   :  { %v2652_v38 = vpop.xlane.xlu0 %2651 }
 0xf09   :  { %v2658_v43 = vsub.f32 %v2642_v10, %v2652_v38 }
 0xf0b   :  { %v2664_v44 = vmul.f32 1.442695, %v2658_v43 }
 0xf0c   :  { %16272 = vrot.lane.b32.xlu1 %v17516_v28, %s19695_s28  ;;  %v2655_v39 = vpop.xlane.xlu0 %2654 }
 0xf0d   :  { %v2659_v40 = vsub.f32 %v2643_v13, %v2655_v39 }
 0xf0f   :  { %v2666_v41 = vmul.f32 1.442695, %v2659_v40 }
 0xf10   :  { %16282 = vrot.lane.b32.xlu1 %v17516_v28, %s19693_s26  ;;  %16277 = vrot.lane.b32.xlu0 %v17528_v32, %s19695_s28  ;;  %s19697_s28 = smov 100  }
 0xf11   :  { %16725 = vpow2.f32 %v2666_v41 }
 0xf12   :  { %16727 = vpow2.f32 %v2664_v44 }
 0xf14   :  { %16287 = vrot.lane.b32.xlu1 %v17528_v32, %s19693_s26  ;;  %s19699_s26 = smov 68  }
 0xf18   :  { %2885 = vrot.lane.b32.xlu1 %v17508_v24, %s19691_s18 }
 0xf1b   :  { %v16726_v48 = vpop.eup %16725 }
 0xf1c   :  { %v2677_v49 = vsel %vm515_vm10, %v16726_v48, 0.0  ;;  %v16728_v50 = vpop.eup %16727 }
 0xf1d   :  { %v2674_v51 = vsel %vm515_vm10, %v16728_v50, 0.0 }
 0xf2f   :  { %2678 = vadd.xlane.f32.xlu0 %v2677_v49 }
 0xf3c   :  { %2675 = vadd.xlane.f32.xlu1 %v2674_v51 }
 0xf45   :  { %2883 = vrot.lane.b32.xlu0 %v17510_v26, %s19691_s18 }
 0xf49   :  { %2974 = vrot.lane.b32.xlu0 %v17520_v31, %s19691_s18 }
 0xf4d   :  { %2976 = vrot.lane.b32.xlu1 %v17518_v29, %s19691_s18  ;;  %s19701_s18 = smov 40  }
 0xf87   :  { %v2673_v52 = vpop.xlane.xlu0 %2672 }
 0xf88   :  { %16729 = vrcp.f32 %v2673_v52  ;;  %v2670_v53 = vpop.xlane.xlu1 %2669 }
 0xf89   :  { %16731 = vrcp.f32 %v2670_v53 }
 0xf8b   :  { %v16278_v58 = vpop.permute.xlu0 %16277 }
 0xf8c   :  { %v16280_v59 = vunpack.i.h.bf16 %v16278_v58  ;;  %v16279_v60 = vunpack.i.l.bf16 %v16278_v58  ;;  %v16273_v61 = vpop.permute.xlu1 %16272 }
 0xf8d   :  { %v16275_v62 = vunpack.i.h.bf16 %v16273_v61  ;;  %v16274_v63 = vunpack.i.l.bf16 %v16273_v61 }
 0xf8e   :  { %v15469_v0 = vpack.c.bf16 %v16280_v59, %v16279_v60 }
 0xf8f   :  { %v15465_v1 = vpack.c.bf16 %v16275_v62, %v16274_v63 }
 0xf90   :  { %v16283_v4 = vpop.permute.xlu1 %16282  ;;  %15470 = vmatprep.subr.bf16.mxu0 %v15469_v0 }
 0xf91   :  { %v16285_v5 = vunpack.i.h.bf16 %v16283_v4  ;;  %v16284_v6 = vunpack.i.l.bf16 %v16283_v4  ;;  %15466 = vmatprep.subr.bf16.mxu1 %v15465_v1  ;;  %15472 = vmatpush3.bf16.msra.mxu0 %v15469_v0 }
 0xf92   :  { %v16730_v7 = vpop.eup %16729  ;;  %15468 = vmatpush3.bf16.msra.mxu1 %v15465_v1 }
 0xf93   :  { %v16732_v10 = vpop.eup %16731  ;;  %v15473_v12 = vpack.c.bf16 %v16285_v5, %v16284_v6  ;;  %v2685_v19 = vmul.f32 %v16730_v7, %v16722_v33 }
 0xf94   :  { %v16288_v13 = vpop.permute.xlu1 %16287  ;;  %v2684_v14 = vmul.f32 %v16732_v10, %v16724_v34 }
 0xf95   :  { %v16290_v17 = vunpack.i.h.bf16 %v16288_v13  ;;  %v16289_v18 = vunpack.i.l.bf16 %v16288_v13  ;;  %15475 = vmatprep.subr.msk.bf16.mxu1 %vm17534_vm8, %v15473_v12 }
 0xf96   :  { %14741 = vmatprep.mubr.msk.f32.mxu1 %vm515_vm10, %v2684_v14 }
 0xf97   :  { %v15479_v20 = vpack.c.bf16 %v16290_v17, %v16289_v18  ;;  %14742 = vmatmul.mubr.msk.f32.vlgmr.msra.gmra.mrb[24].mxu1 %vm515_vm10, %v2685_v19 }
 0xf98   :  { %v2886_v34 = vpop.permute.xlu1 %2885 }
 0xf99   :  { %15481 = vmatprep.subr.msk.bf16.mxu0 %vm17534_vm8, %v15479_v20 }
 0xf9b   :  { %15478 = vmatpush3.bf16.xpose.msk.msra.mxu1 %vm17534_vm8, %v15473_v12 }
 0xfbc   :  { %v2679_v23 = vpop.xlane.xlu0 %2678 }
 0xfbd   :  { %16733 = vrcp.f32 %v2679_v23 }
 0xfc0   :  { %v2884_v25 = vpop.permute.xlu0 %2883 }
 0xfc1   :  { %14755 = vmatprep.mubr.msk.f32.mxu1 %vm334_vm7, %v2884_v25 }
 0xfc2   :  { %14756 = vmatmul.mubr.msk.f32.vlgmr.msra.gmra.mrb[26].mxu1 %vm334_vm7, %v2886_v34 }
 0xfc4   :  { %v2975_v40 = vpop.permute.xlu0 %2974 }
 0xfc7   :  { %v16734_v35 = vpop.eup %16733 }
 0xfc8   :  { %v2687_v39 = vmul.f32 %v16734_v35, %v16726_v48 }
 0xfc9   :  { %v2676_v33 = vpop.xlane.xlu1 %2675 }
 0xfca   :  { %16735 = vrcp.f32 %v2676_v33 }
 0xfcd   :  { %v2977_v41 = vpop.permute.xlu1 %2976 }
 0xfd4   :  { %v16736_v37 = vpop.eup %16735 }
 0xfd5   :  { %v2686_v38 = vmul.f32 %v16736_v37, %v16728_v50 }
 0xfd7   :  { %14748 = vmatprep.mubr.msk.f32.mxu0 %vm515_vm10, %v2686_v38 }
 0xfd8   :  { %14749 = vmatmul.mubr.msk.f32.vlgmr.msra.gmra.mrb[26].mxu0 %vm515_vm10, %v2687_v39 }
 0xfd9   :  { %15484 = vmatpush3.bf16.xpose.msk.msra.mxu0 %vm17534_vm8, %v15479_v20  ;;  %14762 = vmatprep.mubr.msk.f32.mxu0 %vm334_vm7, %v2975_v40 }
 0xfe0   :  { %14763 = vmatmul.mubr.msk.f32.vlgmr.msra.gmra.mrb[28].mxu0 %vm334_vm7, %v2977_v41 }
0x106a   :  { %v17853_v43 = vpop.f32.mrb[24].mxu1 }
0x106b   :  { %v17855_v44 = vpop.f32.mrb[25].mxu1 }
0x1095   :  { %v14757_v49 = vpop.f32.mrb[26].mxu1 }
0x1096   :  { %v3066_v50 = vmul.f32 0.5, %v14757_v49  ;;  %v2965_v48 = vpop.f32.mrb[27].mxu1 }
0x1097   :  { %v3065_v51 = vmul.f32 0.5, %v2965_v48 }
0x1098   :  { %v3070_v52 = vadd.f32 %v3066_v50, %v17551_v47 }
0x1099   :  { %v3069_v53 = vadd.f32 %v3065_v51, %v17551_v47 }
0x109a   :  { %v3076_v58 = vsel %vm515_vm10, %v3070_v52, -inf }
0x109b   :  { %3077 = vmax.xlane.f32.xlu1 %v3076_v58  ;;  %v3073_v59 = vsel %vm515_vm10, %v3069_v53, -inf }
0x109c   :  { %3074 = vmax.xlane.f32.xlu0 %v3073_v59 }
0x10ab   :  { %v17861_v60 = vpop.f32.mrb[26].mxu0 }
0x10ac   :  { %v17863_v61 = vpop.f32.mrb[27].mxu0 }
0x10b3   :  { %v14764_v62 = vpop.f32.mrb[28].mxu0 }
0x10b4   :  { %v3056_v63 = vpop.f32.mrb[29].mxu0  ;;  %v3068_v0 = vmul.f32 0.5, %v14764_v62 }
0x10b5   :  { %v3067_v1 = vmul.f32 0.5, %v3056_v63 }
0x10b6   :  { %v3072_v6 = vadd.f32 %v3068_v0, %v17551_v47 }
0x10b7   :  { %v3071_v4 = vadd.f32 %v3067_v1, %v17551_v47 }
0x10b8   :  { %v3082_v7 = vsel %vm515_vm10, %v3072_v6, -inf }
0x10b9   :  { %v3079_v5 = vsel %vm515_vm10, %v3071_v4, -inf }
0x10ba   :  { %3080 = vmax.xlane.f32.xlu0 %v3079_v5 }
0x10be   :  { %3083 = vmax.xlane.f32.xlu0 %v3082_v7 }
0x1128   :  { %v3078_v10 = vpop.xlane.xlu1 %3077 }
0x1129   :  { %v3086_v12 = vsub.f32 %v3070_v52, %v3078_v10  ;;  %v3075_v13 = vpop.xlane.xlu0 %3074 }
0x112a   :  { %v3085_v14 = vsub.f32 %v3069_v53, %v3075_v13 }
0x112b   :  { %v3091_v17 = vmul.f32 1.442695, %v3086_v12 }
0x112c   :  { %v3089_v18 = vmul.f32 1.442695, %v3085_v14 }
0x112d   :  { %16737 = vpow2.f32 %v3091_v17 }
0x112e   :  { %16739 = vpow2.f32 %v3089_v18 }
0x1137   :  { %v16738_v19 = vpop.eup %16737 }
0x1138   :  { %v16740_v20 = vpop.eup %16739  ;;  %v3100_v23 = vsel %vm515_vm10, %v16738_v19, 0.0 }
0x1139   :  { %3101 = vadd.xlane.f32.xlu0 %v3100_v23  ;;  %v3097_v25 = vsel %vm515_vm10, %v16740_v20, 0.0 }
0x113a   :  { %3098 = vadd.xlane.f32.xlu1 %v3097_v25 }
0x1147   :  { %v3081_v34 = vpop.xlane.xlu0 %3080 }
0x1148   :  { %v3087_v38 = vsub.f32 %v3071_v4, %v3081_v34 }
0x114a   :  { %v3093_v39 = vmul.f32 1.442695, %v3087_v38 }
0x114b   :  { %16292 = vrot.lane.b32.xlu1 %v17516_v28, %s19701_s18  ;;  %v3084_v33 = vpop.xlane.xlu0 %3083 }
0x114c   :  { %v3088_v35 = vsub.f32 %v3072_v6, %v3084_v33 }
0x114e   :  { %v3095_v37 = vmul.f32 1.442695, %v3088_v35 }
0x114f   :  { %16302 = vrot.lane.b32.xlu1 %v17516_v28, %s19699_s26  ;;  %16297 = vrot.lane.b32.xlu0 %v17528_v32, %s19701_s18  ;;  %s19737_s18 = smov 12  }
0x1150   :  { %16741 = vpow2.f32 %v3095_v37 }
0x1151   :  { %16743 = vpow2.f32 %v3093_v39 }
0x1153   :  { %16307 = vrot.lane.b32.xlu1 %v17528_v32, %s19699_s26  ;;  %s19741_s26 = smov 4  }
0x1157   :  { %3314 = vrot.lane.b32.xlu1 %v17508_v24, %s19697_s28 }
0x115a   :  { %v16742_v40 = vpop.eup %16741 }
0x115b   :  { %v3106_v41 = vsel %vm515_vm10, %v16742_v40, 0.0  ;;  %v16744_v49 = vpop.eup %16743 }
0x115c   :  { %v3103_v50 = vsel %vm515_vm10, %v16744_v49, 0.0 }
0x116e   :  { %3107 = vadd.xlane.f32.xlu0 %v3106_v41 }
0x117b   :  { %3104 = vadd.xlane.f32.xlu1 %v3103_v50 }
0x1184   :  { %3312 = vrot.lane.b32.xlu0 %v17510_v26, %s19697_s28 }
0x1188   :  { %3403 = vrot.lane.b32.xlu0 %v17520_v31, %s19697_s28 }
0x118c   :  { %3405 = vrot.lane.b32.xlu1 %v17518_v29, %s19697_s28  ;;  %s19705_s28 = smov 36  }
0x11c6   :  { %v3102_v24 = vpop.xlane.xlu0 %3101 }
0x11c7   :  { %16745 = vrcp.f32 %v3102_v24  ;;  %v3099_v48 = vpop.xlane.xlu1 %3098 }
0x11c8   :  { %16747 = vrcp.f32 %v3099_v48 }
0x11ca   :  { %v16298_v51 = vpop.permute.xlu0 %16297 }
0x11cb   :  { %v16300_v52 = vunpack.i.h.bf16 %v16298_v51  ;;  %v16299_v53 = vunpack.i.l.bf16 %v16298_v51  ;;  %v16293_v58 = vpop.permute.xlu1 %16292 }
0x11cc   :  { %v16295_v59 = vunpack.i.h.bf16 %v16293_v58  ;;  %v16294_v62 = vunpack.i.l.bf16 %v16293_v58 }
0x11cd   :  { %v15489_v63 = vpack.c.bf16 %v16300_v52, %v16299_v53 }
0x11ce   :  { %v15485_v0 = vpack.c.bf16 %v16295_v59, %v16294_v62 }
0x11cf   :  { %v16303_v1 = vpop.permute.xlu1 %16302  ;;  %15490 = vmatprep.subr.bf16.mxu0 %v15489_v63 }
0x11d0   :  { %v16305_v26 = vunpack.i.h.bf16 %v16303_v1  ;;  %v16304_v4 = vunpack.i.l.bf16 %v16303_v1  ;;  %15486 = vmatprep.subr.bf16.mxu1 %v15485_v0  ;;  %15492 = vmatpush3.bf16.msra.mxu0 %v15489_v63 }
0x11d1   :  { %v16746_v31 = vpop.eup %16745  ;;  %15488 = vmatpush3.bf16.msra.mxu1 %v15485_v0 }
0x11d2   :  { %v16748_v29 = vpop.eup %16747  ;;  %v15493_v5 = vpack.c.bf16 %v16305_v26, %v16304_v4  ;;  %v3114_v13 = vmul.f32 %v16746_v31, %v16738_v19 }
0x11d3   :  { %v16308_v6 = vpop.permute.xlu1 %16307  ;;  %v3113_v7 = vmul.f32 %v16748_v29, %v16740_v20 }
0x11d4   :  { %v16310_v10 = vunpack.i.h.bf16 %v16308_v6  ;;  %v16309_v12 = vunpack.i.l.bf16 %v16308_v6  ;;  %15495 = vmatprep.subr.msk.bf16.mxu1 %vm17534_vm8, %v15493_v5 }
0x11d5   :  { %14769 = vmatprep.mubr.msk.f32.mxu1 %vm515_vm10, %v3113_v7 }
0x11d6   :  { %v15499_v14 = vpack.c.bf16 %v16310_v10, %v16309_v12  ;;  %14770 = vmatmul.mubr.msk.f32.vlgmr.msra.gmra.mrb[28].mxu1 %vm515_vm10, %v3114_v13 }
0x11d7   :  { %v3315_v20 = vpop.permute.xlu1 %3314 }
0x11d8   :  { %15501 = vmatprep.subr.msk.bf16.mxu0 %vm17534_vm8, %v15499_v14 }
0x11da   :  { %15498 = vmatpush3.bf16.xpose.msk.msra.mxu1 %vm17534_vm8, %v15493_v5 }
0x11fb   :  { %v3108_v17 = vpop.xlane.xlu0 %3107 }
0x11fc   :  { %16749 = vrcp.f32 %v3108_v17 }
0x11ff   :  { %v3313_v18 = vpop.permute.xlu0 %3312 }
0x1200   :  { %14783 = vmatprep.mubr.msk.f32.mxu1 %vm334_vm7, %v3313_v18 }
0x1201   :  { %14784 = vmatmul.mubr.msk.f32.vlgmr.msra.gmra.mrb[30].mxu1 %vm334_vm7, %v3315_v20 }
0x1203   :  { %v3404_v35 = vpop.permute.xlu0 %3403 }
0x1206   :  { %v16750_v23 = vpop.eup %16749 }
0x1207   :  { %v3116_v33 = vmul.f32 %v16750_v23, %v16742_v40 }
0x1208   :  { %v3105_v19 = vpop.xlane.xlu1 %3104 }
0x1209   :  { %16751 = vrcp.f32 %v3105_v19 }
0x120c   :  { %v3406_v37 = vpop.permute.xlu1 %3405 }
0x1213   :  { %v16752_v25 = vpop.eup %16751 }
0x1214   :  { %v3115_v34 = vmul.f32 %v16752_v25, %v16744_v49 }
0x1216   :  { %14776 = vmatprep.mubr.msk.f32.mxu0 %vm515_vm10, %v3115_v34 }
0x1217   :  { %14777 = vmatmul.mubr.msk.f32.vlgmr.msra.gmra.mrb[30].mxu0 %vm515_vm10, %v3116_v33 }
0x1218   :  { %15504 = vmatpush3.bf16.xpose.msk.msra.mxu0 %vm17534_vm8, %v15499_v14  ;;  %14790 = vmatprep.mubr.msk.f32.mxu0 %vm334_vm7, %v3404_v35 }
0x121f   :  { %14791 = vmatmul.mubr.msk.f32.vlgmr.msra.gmra.mrb[32].mxu0 %vm334_vm7, %v3406_v37 }
0x12a9   :  { %v17905_v38 = vpop.f32.mrb[28].mxu1 }
0x12aa   :  { %v17907_v39 = vpop.f32.mrb[29].mxu1 }
0x12d4   :  { %v14785_v41 = vpop.f32.mrb[30].mxu1 }
0x12d5   :  { %v3495_v49 = vmul.f32 0.5, %v14785_v41  ;;  %v3394_v40 = vpop.f32.mrb[31].mxu1 }
0x12d6   :  { %v3494_v50 = vmul.f32 0.5, %v3394_v40 }
0x12d7   :  { %v3499_v24 = vadd.f32 %v3495_v49, %v17551_v47 }
0x12d8   :  { %v3498_v48 = vadd.f32 %v3494_v50, %v17551_v47 }
0x12d9   :  { %v3505_v51 = vsel %vm515_vm10, %v3499_v24, -inf }
0x12da   :  { %3506 = vmax.xlane.f32.xlu1 %v3505_v51  ;;  %v3502_v52 = vsel %vm515_vm10, %v3498_v48, -inf }
0x12db   :  { %3503 = vmax.xlane.f32.xlu0 %v3502_v52 }
0x12ea   :  { %v17913_v53 = vpop.f32.mrb[30].mxu0 }
0x12eb   :  { %v17915_v58 = vpop.f32.mrb[31].mxu0 }
0x12f2   :  { %v14792_v59 = vpop.f32.mrb[32].mxu0 }
0x12f3   :  { %v3485_v62 = vpop.f32.mrb[33].mxu0  ;;  %v3497_v63 = vmul.f32 0.5, %v14792_v59 }
0x12f4   :  { %v3496_v0 = vmul.f32 0.5, %v3485_v62 }
0x12f5   :  { %v3501_v26 = vadd.f32 %v3497_v63, %v17551_v47 }
0x12f6   :  { %v3500_v1 = vadd.f32 %v3496_v0, %v17551_v47 }
0x12f7   :  { %v3511_v31 = vsel %vm515_vm10, %v3501_v26, -inf }
0x12f8   :  { %v3508_v4 = vsel %vm515_vm10, %v3500_v1, -inf }
0x12f9   :  { %3509 = vmax.xlane.f32.xlu0 %v3508_v4 }
0x12fd   :  { %3512 = vmax.xlane.f32.xlu0 %v3511_v31 }
0x1367   :  { %v3507_v29 = vpop.xlane.xlu1 %3506 }
0x1368   :  { %v3515_v5 = vsub.f32 %v3499_v24, %v3507_v29  ;;  %v3504_v6 = vpop.xlane.xlu0 %3503 }
0x1369   :  { %v3514_v7 = vsub.f32 %v3498_v48, %v3504_v6 }
0x136a   :  { %v3520_v10 = vmul.f32 1.442695, %v3515_v5 }
0x136b   :  { %v3518_v12 = vmul.f32 1.442695, %v3514_v7 }
0x136c   :  { %16753 = vpow2.f32 %v3520_v10  ;;  %v3745_v10 = vld [vmem:[%s19662_s6] sm:$0xff] }
0x136d   :  { %16755 = vpow2.f32 %v3518_v12  ;;  %v3746_v12 = vld [vmem:[%s19662_s6 + $0x8] sm:$0xff] }
0x1376   :  { %v17921_v13 = vpop.eup %16753 }
0x1377   :  { %v16756_v14 = vpop.eup %16755  ;;  %v3529_v17 = vsel %vm515_vm10, %v17921_v13, 0.0 }
0x1378   :  { %3530 = vadd.xlane.f32.xlu0 %v3529_v17  ;;  %v3526_v18 = vsel %vm515_vm10, %v16756_v14, 0.0  ;;  %v3748_v17 = vld [vmem:[%s19662_s6 + $0x18] sm:$0xff] }
0x1379   :  { %3527 = vadd.xlane.f32.xlu1 %v3526_v18 }
0x1386   :  { %v3510_v20 = vpop.xlane.xlu0 %3509 }
0x1387   :  { %v3516_v19 = vsub.f32 %v3500_v1, %v3510_v20 }
0x1389   :  { %v3522_v23 = vmul.f32 1.442695, %v3516_v19 }
0x138a   :  { %v3513_v25 = vpop.xlane.xlu0 %3512 }
0x138b   :  { %16757 = vpow2.f32 %v3522_v23  ;;  %v3517_v34 = vsub.f32 %v3501_v26, %v3513_v25 }
0x138d   :  { %v3524_v33 = vmul.f32 1.442695, %v3517_v34 }
0x138f   :  { %16759 = vpow2.f32 %v3524_v33 }
0x1395   :  { %v16758_v35 = vpop.eup %16757 }
0x1396   :  { %v3532_v37 = vsel %vm515_vm10, %v16758_v35, 0.0 }
0x1397   :  { %3533 = vadd.xlane.f32.xlu1 %v3532_v37 }
0x1399   :  { %v17927_v41 = vpop.eup %16759 }
0x139a   :  { %v3535_v49 = vsel %vm515_vm10, %v17927_v41, 0.0 }
0x139b   :  { %3536 = vadd.xlane.f32.xlu0 %v3535_v49 }
0x13a8   :  { %16312 = vrot.lane.b32.xlu1 %v17516_v28, %s19705_s28 }
0x13ac   :  { %1150 = vrot.lane.b32.xlu1 %v17647_v16, %s19741_s26 }
0x13b0   :  { %1152 = vrot.lane.b32.xlu1 %v17645_v15, %s19741_s26 }
0x13b1   :  { %16317 = vrot.lane.b32.xlu0 %v17528_v32, %s19705_s28  ;;  %s19733_s28 = smov 20  }
0x13b4   :  { %1581 = vrot.lane.b32.xlu1 %v17697_v45, %s19739_s22 }
0x13b5   :  { %1579 = vrot.lane.b32.xlu0 %v17699_v46, %s19739_s22 }
0x13b8   :  { %2010 = vrot.lane.b32.xlu1 %v17749_v8, %s19737_s18 }
0x13b9   :  { %2008 = vrot.lane.b32.xlu0 %v17751_v9, %s19737_s18 }
0x13bc   :  { %2439 = vrot.lane.b32.xlu1 %v17801_v54, %s19735_s3 }
0x13bd   :  { %2437 = vrot.lane.b32.xlu0 %v17803_v55, %s19735_s3 }
0x13c0   :  { %2868 = vrot.lane.b32.xlu1 %v17853_v43, %s19733_s28 }
0x13c1   :  { %2866 = vrot.lane.b32.xlu0 %v17855_v44, %s19733_s28 }
0x13c4   :  { %3297 = vrot.lane.b32.xlu1 %v17905_v38, %s19731_s27 }
0x13c5   :  { %3295 = vrot.lane.b32.xlu0 %v17907_v39, %s19731_s27 }
0x1405   :  { %v3531_v16 = vpop.xlane.xlu0 %3530 }
0x1406   :  { %v3528_v28 = vpop.xlane.xlu1 %3527 }
0x1407   :  { %16761 = vrcp.f32 %v3528_v28 }
0x1408   :  { %16763 = vrcp.f32 %v3531_v16 }
0x1411   :  { %v16762_v32 = vpop.eup %16761 }
0x1412   :  { %v3542_v15 = vmul.f32 %v16762_v32, %v16756_v14  ;;  %v16764_v43 = vpop.eup %16763  ;;  %v3747_v14 = vld [vmem:[%s19662_s6 + $0x10] sm:$0xff] }
0x1413   :  { %v3543_v24 = vmul.f32 %v16764_v43, %v17921_v13  ;;  %v15513_v13 = vpack.c.bf16 %v3746_v12, %v3745_v10  ;;  %v15517_v18 = vpack.c.bf16 %v3748_v17, %v3747_v14 }
0x1414   :  { %14797 = vmatprep.mubr.msk.f32.mxu1 %vm515_vm10, %v3542_v15  ;;  %v13559_v15 = vld [vmem:[%s19663_s7] ss:$0 sm:$0xff] }
0x1424   :  { %v3534_v45 = vpop.xlane.xlu1 %3533 }
0x1425   :  { %16765 = vrcp.f32 %v3534_v45 }
0x1428   :  { %v16313_v46 = vpop.permute.xlu1 %16312  ;;  %v3537_v8 = vpop.xlane.xlu0 %3536 }
0x1429   :  { %v16315_v9 = vunpack.i.h.bf16 %v16313_v46  ;;  %v16314_v54 = vunpack.i.l.bf16 %v16313_v46  ;;  %16767 = vrcp.f32 %v3537_v8 }
0x142b   :  { %v15505_v55 = vpack.c.bf16 %v16315_v9, %v16314_v54  ;;  %v17177_v9 = vld [vmem:[#allocation2 + $0x8] sm:$0xff] }
0x142c   :  { %v1151_v44 = vpop.permute.xlu1 %1150  ;;  %v16318_v38 = vpop.permute.xlu0 %16317 }
0x142d   :  { %1163 = vst.msk [vmem:[#allocation3] sm:$0xff] %vm1162_vm11, %v1151_v44  ;;  %v16320_v39 = vunpack.i.h.bf16 %v16318_v38  ;;  %v16319_v40 = vunpack.i.l.bf16 %v16318_v38  ;;  %15506 = vmatprep.subr.bf16.mxu1 %v15505_v55 }
0x142e   :  { %15508 = vmatpush3.bf16.msra.mxu1 %v15505_v55  ;;  %v17178_v55 = vld [vmem:[#allocation2] sm:$0xff] }
0x142f   :  { %v16766_v50 = vpop.eup %16765  ;;  %v15509_v48 = vpack.c.bf16 %v16320_v39, %v16319_v40  ;;  %15514 = vmatprep.subr.bf16.mxu1 %v15513_v13 }
0x1430   :  { %v1153_v51 = vpop.permute.xlu1 %1152  ;;  %v1580_v52 = vpop.permute.xlu0 %1579  ;;  %v3544_v59 = vmul.f32 %v16766_v50, %v16758_v35 }
0x1431   :  { %1164 = vst.msk [vmem:[#allocation3 + $0x8] sm:$0xff] %vm1162_vm11, %v1153_v51  ;;  %14798 = vmatmul.mubr.msk.f32.vlgmr.msra.gmra.mrb[32].mxu1 %vm515_vm10, %v3543_v24  ;;  %15510 = vmatprep.subr.bf16.mxu0 %v15509_v48 }
0x1432   :  { %1592 = vst.msk [vmem:[#allocation3] sm:$0xff] %vm1591_vm12, %v1580_v52  ;;  %15512 = vmatpush3.bf16.msra.mxu0 %v15509_v48  ;;  %14804 = vmatprep.mubr.msk.f32.mxu0 %vm515_vm10, %v3544_v59  ;;  %v17179_v48 = vld [vmem:[#allocation2 + $0x10] sm:$0xff]  ;;  %v17180_v52 = vld [vmem:[#allocation2 + $0x18] sm:$0xff] }
0x1433   :  { %v16768_v62 = vpop.eup %16767  ;;  %15516 = vmatpush3.bf16.msra.mxu1 %v15513_v13 }
0x1434   :  { %v1582_v63 = vpop.permute.xlu1 %1581  ;;  %v2009_v0 = vpop.permute.xlu0 %2008  ;;  %v3545_v1 = vmul.f32 %v16768_v62, %v17927_v41  ;;  %15518 = vmatprep.subr.bf16.mxu1 %v15517_v18 }
0x1435   :  { %1593 = vst.msk [vmem:[#allocation3 + $0x8] sm:$0xff] %vm1591_vm12, %v1582_v63 }
0x1436   :  { %2021 = vst.msk [vmem:[#allocation3] sm:$0xff] %vm2020_vm13, %v2009_v0  ;;  %14805 = vmatmul.mubr.msk.f32.vlgmr.msra.gmra.mrb[34].mxu0 %vm515_vm10, %v3545_v1 }
0x1437   :  { %4046 = vmatprep.mubr.f32.mxu0 %v17283_v11  ;;  %15520 = vmatpush3.bf16.msra.mxu1 %v15517_v18 }
0x1438   :  { %v2011_v26 = vpop.permute.xlu1 %2010  ;;  %v2438_v4 = vpop.permute.xlu0 %2437 }
0x1439   :  { %2022 = vst.msk [vmem:[#allocation3 + $0x8] sm:$0xff] %vm2020_vm13, %v2011_v26 }
0x143a   :  { %2450 = vst.msk [vmem:[#allocation3] sm:$0xff] %vm2449_vm14, %v2438_v4 }
0x143c   :  { %v2440_v31 = vpop.permute.xlu1 %2439  ;;  %v2867_v29 = vpop.permute.xlu0 %2866 }
0x143d   :  { %2451 = vst.msk [vmem:[#allocation3 + $0x8] sm:$0xff] %vm2449_vm14, %v2440_v31 }
0x143e   :  { %2879 = vst.msk [vmem:[#allocation3] sm:$0xff] %vm2878_vm15, %v2867_v29 }
0x1440   :  { %v2869_v5 = vpop.permute.xlu1 %2868  ;;  %v3296_v6 = vpop.permute.xlu0 %3295 }
0x1441   :  { %2880 = vst.msk [vmem:[#allocation3 + $0x8] sm:$0xff] %vm2878_vm15, %v2869_v5 }
0x1442   :  { %3308 = vst.msk [vmem:[#allocation3] sm:$0xff] %vm3307_vm0, %v3296_v6 }
0x1444   :  { %v3298_v7 = vpop.permute.xlu1 %3297 }
0x1445   :  { %3309 = vst.msk [vmem:[#allocation3 + $0x8] sm:$0xff] %vm3307_vm0, %v3298_v7 }
0x1504   :  { %v14799_v20 = vpop.f32.mrb[32].mxu1 }
0x1505   :  { %3726 = vrot.lane.b32.xlu1 %v14799_v20, %s19725_s1  ;;  %v3624_v19 = vpop.f32.mrb[33].mxu1 }
0x1506   :  { %3724 = vrot.lane.b32.xlu0 %v3624_v19, %s19725_s1 }
0x1509   :  { %1156 = vrot.lane.b32.xlu1 %v17653_v27, %s19741_s26  ;;  %v14806_v23 = vpop.f32.mrb[34].mxu0 }
0x150a   :  { %1154 = vrot.lane.b32.xlu0 %v17655_v30, %s19741_s26  ;;  %v3711_v25 = vpop.f32.mrb[35].mxu0  ;;  %s19796_s26 = smov 72  }
0x150d   :  { %1585 = vrot.lane.b32.xlu1 %v17705_v56, %s19739_s22 }
0x150e   :  { %1583 = vrot.lane.b32.xlu0 %v17707_v57, %s19739_s22  ;;  %s19795_s22 = smov 44  }
0x1511   :  { %2014 = vrot.lane.b32.xlu1 %v17757_v21, %s19737_s18 }
0x1512   :  { %2012 = vrot.lane.b32.xlu0 %v17759_v22, %s19737_s18  ;;  %s19794_s18 = smov 108  }
0x1515   :  { %2443 = vrot.lane.b32.xlu1 %v17809_v2, %s19735_s3 }
0x1516   :  { %2441 = vrot.lane.b32.xlu0 %v17811_v3, %s19735_s3  ;;  %s19793_s3 = smov 76  }
0x1519   :  { %2872 = vrot.lane.b32.xlu1 %v17861_v60, %s19733_s28 }
0x151a   :  { %2870 = vrot.lane.b32.xlu0 %v17863_v61, %s19733_s28  ;;  %s19792_s28 = smov 48  }
0x151d   :  { %3301 = vrot.lane.b32.xlu1 %v17913_v53, %s19731_s27 }
0x151e   :  { %3299 = vrot.lane.b32.xlu0 %v17915_v58, %s19731_s27  ;;  %s19791_s27 = smov 112  }
0x1521   :  { %3730 = vrot.lane.b32.xlu1 %v14806_v23, %s19725_s1 }
0x1522   :  { %3728 = vrot.lane.b32.xlu0 %v3711_v25, %s19725_s1  ;;  %s19785_s1 = smov 120  }
0x1577   :  { %v3727_v27 = vpop.permute.xlu1 %3726 }
0x1578   :  { %3738 = vst.msk [vmem:[#allocation3 + $0x8] sm:$0xff] %vm3736_vm1, %v3727_v27  ;;  %v3725_v30 = vpop.permute.xlu0 %3724  ;;  %v3933_v27 = vld [vmem:[#allocation4 + $0x8] sm:$0xff] }
0x1579   :  { %3737 = vst.msk [vmem:[#allocation3] sm:$0xff] %vm3736_vm1, %v3725_v30  ;;  %v3937_v30 = vld [vmem:[#allocation4 + $0x28] sm:$0xff] }
0x157b   :  { %v1157_v56 = vpop.permute.xlu1 %1156 }
0x157c   :  { %1166 = vst.msk [vmem:[#allocation3 + $0x18] sm:$0xff] %vm1162_vm11, %v1157_v56  ;;  %v1155_v57 = vpop.permute.xlu0 %1154  ;;  %v3935_v56 = vld [vmem:[#allocation4 + $0x18] sm:$0xff] }
0x157d   :  { %1165 = vst.msk [vmem:[#allocation3 + $0x10] sm:$0xff] %vm1162_vm11, %v1155_v57  ;;  %v15521_v57 = vpack.c.bf16 %v3937_v30, %v3933_v27  ;;  %v4243_v27 = vld [vmem:[#allocation7 + $0x18] sm:$0xff] }
0x157f   :  { %v1586_v21 = vpop.permute.xlu1 %1585  ;;  %v3742_v3 = vld [vmem:[#allocation3 + $0x8] sm:$0xff]  ;;  %15522 = vmatprep.subr.bf16.mxu0 %v15521_v57  ;;  %v4275_v57 = vld [vmem:[#allocation7 + $0x118] sm:$0xff] }
0x1580   :  { %1595 = vst.msk [vmem:[#allocation3 + $0x18] sm:$0xff] %vm1591_vm12, %v1586_v21  ;;  %v1584_v22 = vpop.permute.xlu0 %1583  ;;  %v3741_v2 = vld [vmem:[#allocation3] sm:$0xff]  ;;  %v3939_v21 = vld [vmem:[#allocation4 + $0x38] sm:$0xff] }
0x1581   :  { %1594 = vst.msk [vmem:[#allocation3 + $0x10] sm:$0xff] %vm1591_vm12, %v1584_v22  ;;  %14815 = vmatprep.mubr.msk.f32.mxu1 %vm206_vm6, %v3741_v2  ;;  %v3932_v22 = vld [vmem:[#allocation4] sm:$0xff] }
0x1582   :  { %14816 = vmatmul.mubr.msk.f32.vlgmr.msra.gmra.mrb[34].mxu1 %vm206_vm6, %v3742_v3  ;;  %v3936_v2 = vld [vmem:[#allocation4 + $0x20] sm:$0xff] }
0x1583   :  { %v2015_v60 = vpop.permute.xlu1 %2014 }
0x1584   :  { %2024 = vst.msk [vmem:[#allocation3 + $0x18] sm:$0xff] %vm2020_vm13, %v2015_v60  ;;  %v2013_v61 = vpop.permute.xlu0 %2012  ;;  %v15529_v60 = vpack.c.bf16 %v3939_v21, %v3935_v56  ;;  %v4274_v56 = vld [vmem:[#allocation7 + $0x110] sm:$0xff]  ;;  %v4260_v21 = vld [vmem:[#allocation7 + $0xa0] sm:$0xff] }
0x1585   :  { %2023 = vst.msk [vmem:[#allocation3 + $0x10] sm:$0xff] %vm2020_vm13, %v2013_v61  ;;  %v15523_v61 = vpack.c.bf16 %v3936_v2, %v3932_v22  ;;  %v4261_v22 = vld [vmem:[#allocation7 + $0xa8] sm:$0xff]  ;;  %v4292_v2 = vld [vmem:[#allocation7 + $0x1a0] sm:$0xff] }
0x1586   :  { %15530 = vmatprep.subr.bf16.mxu1 %v15529_v60 }
0x1587   :  { %v2444_v53 = vpop.permute.xlu1 %2443  ;;  %15524 = vmatpush1.bf16.msra.mxu0 %v15523_v61 }
0x1588   :  { %2453 = vst.msk [vmem:[#allocation3 + $0x18] sm:$0xff] %vm2449_vm14, %v2444_v53  ;;  %v2442_v58 = vpop.permute.xlu0 %2441  ;;  %v3934_v53 = vld [vmem:[#allocation4 + $0x10] sm:$0xff] }
0x1589   :  { %2452 = vst.msk [vmem:[#allocation3 + $0x10] sm:$0xff] %vm2449_vm14, %v2442_v58  ;;  %v3938_v58 = vld [vmem:[#allocation4 + $0x30] sm:$0xff] }
0x158b   :  { %v2873_v34 = vpop.permute.xlu1 %2872 }
0x158c   :  { %2882 = vst.msk [vmem:[#allocation3 + $0x18] sm:$0xff] %vm2878_vm15, %v2873_v34  ;;  %v2871_v33 = vpop.permute.xlu0 %2870  ;;  %v3941_v34 = vld [vmem:[#allocation4 + $0x48] sm:$0xff] }
0x158d   :  { %2881 = vst.msk [vmem:[#allocation3 + $0x10] sm:$0xff] %vm2878_vm15, %v2871_v33  ;;  %v15531_v33 = vpack.c.bf16 %v3938_v58, %v3934_v53  ;;  %v15575_v53 = vpack.c.bf16 %v4275_v57, %v4274_v56  ;;  %v4244_v58 = vld [vmem:[#allocation7 + $0x20] sm:$0xff]  ;;  %v4299_v56 = vld [vmem:[#allocation7 + $0x1d8] sm:$0xff]  ;;  %v4250_v57 = vld [vmem:[#allocation7 + $0x50] sm:$0xff] }
0x158f   :  { %v3302_v35 = vpop.permute.xlu1 %3301  ;;  %15532 = vmatpush1.bf16.msra.mxu1 %v15531_v33 }
0x1590   :  { %3311 = vst.msk [vmem:[#allocation3 + $0x18] sm:$0xff] %vm3307_vm0, %v3302_v35  ;;  %v3300_v37 = vpop.permute.xlu0 %3299  ;;  %v3945_v35 = vld [vmem:[#allocation4 + $0x68] sm:$0xff] }
0x1591   :  { %3310 = vst.msk [vmem:[#allocation3 + $0x10] sm:$0xff] %vm3307_vm0, %v3300_v37  ;;  %v3943_v37 = vld [vmem:[#allocation4 + $0x58] sm:$0xff] }
0x1593   :  { %v3731_v41 = vpop.permute.xlu1 %3730 }
0x1594   :  { %3740 = vst.msk [vmem:[#allocation3 + $0x18] sm:$0xff] %vm3736_vm1, %v3731_v41  ;;  %v3729_v49 = vpop.permute.xlu0 %3728  ;;  %v3947_v41 = vld [vmem:[#allocation4 + $0x78] sm:$0xff] }
0x1595   :  { %3739 = vst.msk [vmem:[#allocation3 + $0x10] sm:$0xff] %vm3736_vm1, %v3729_v49  ;;  %v15525_v49 = vpack.c.bf16 %v3945_v35, %v3941_v34  ;;  %v15545_v34 = vpack.c.bf16 %v4261_v22, %v4260_v21  ;;  %v4245_v35 = vld [vmem:[#allocation7 + $0x28] sm:$0xff]  ;;  %v4251_v21 = vld [vmem:[#allocation7 + $0x58] sm:$0xff] }
0x1597   :  { %15526 = vmatprep.subr.bf16.mxu0 %v15525_v49 }
0x159b   :  { %v3744_v32 = vld [vmem:[#allocation3 + $0x18] sm:$0xff] }
0x159c   :  { %v3743_v28 = vld [vmem:[#allocation3 + $0x10] sm:$0xff] }
0x159d   :  { %14818 = vmatprep.mubr.msk.f32.mxu1 %vm206_vm6, %v3743_v28  ;;  %v15533_v28 = vpack.c.bf16 %v3947_v41, %v3943_v37  ;;  %v4276_v37 = vld [vmem:[#allocation7 + $0x120] sm:$0xff]  ;;  %v4277_v41 = vld [vmem:[#allocation7 + $0x128] sm:$0xff] }
0x159e   :  { %14819 = vmatmul.mubr.msk.f32.gmra.mrb[36].mxu1 %vm206_vm6, %v3744_v32  ;;  %v3940_v32 = vld [vmem:[#allocation4 + $0x40] sm:$0xff] }
0x159f   :  { %4135 = vmatprep.mubr.f32.mxu1 %v17283_v11  ;;  %15534 = vmatprep.subr.bf16.mxu1 %v15533_v28  ;;  %v15547_v28 = vpack.c.bf16 %v4245_v35, %v4244_v58  ;;  %v4268_v58 = vld [vmem:[#allocation7 + $0xe0] sm:$0xff] }
0x1655   :  { %v14817_v16 = vpop.f32.mrb[34].mxu1 }
0x1656   :  { %v3840_v45 = vadd.f32 %v14817_v16, %v13559_v15  ;;  %v3834_v46 = vpop.f32.mrb[35].mxu1  ;;  %v3942_v16 = vld [vmem:[#allocation4 + $0x50] sm:$0xff] }
0x1657   :  { %v3835_v8 = vadd.f32 %v13559_v15, %v3834_v46  ;;  %v3946_v46 = vld [vmem:[#allocation4 + $0x70] sm:$0xff] }
0x1658   :  { %v3854_v54 = vadd.f32 %v17177_v9, %v3840_v45  ;;  %v4256_v9 = vld [vmem:[#allocation7 + $0x80] sm:$0xff] }
0x1659   :  { %v3853_v43 = vadd.f32 %v17178_v55, %v3835_v8  ;;  %v15535_v8 = vpack.c.bf16 %v3946_v46, %v3942_v16  ;;  %v4288_v55 = vld [vmem:[#allocation7 + $0x180] sm:$0xff] }
0x165a   :  { %v3862_v44 = vsel %vm206_vm6, %v3854_v54, 0.0 }
0x165b   :  { %3863 = vadd.xlane.f32.xlu1 %v3862_v44  ;;  %v3859_v38 = vsel %vm206_vm6, %v3853_v43, 0.0  ;;  %15536 = vmatpush1.bf16.msra.mxu1 %v15535_v8  ;;  %v4289_v44 = vld [vmem:[#allocation7 + $0x188] sm:$0xff] }
0x165c   :  { %3860 = vadd.xlane.f32.xlu0 %v3859_v38  ;;  %v15569_v38 = vpack.c.bf16 %v4289_v44, %v4288_v55 }
0x165e   :  { %15570 = vmatprep.subr.bf16.mxu1 %v15569_v38 }
0x1671   :  { %v14820_v39 = vpop.f32.mrb[36].mxu1 }
0x1672   :  { %v3844_v40 = vpop.f32.mrb[37].mxu1  ;;  %v3850_v50 = vadd.f32 %v14820_v39, %v13559_v15 }
0x1673   :  { %v3845_v24 = vadd.f32 %v13559_v15, %v3844_v40  ;;  %v3944_v15 = vld [vmem:[#allocation4 + $0x60] sm:$0xff] }
0x1674   :  { %v3856_v59 = vadd.f32 %v17180_v52, %v3850_v50  ;;  %v15527_v45 = vpack.c.bf16 %v3944_v15, %v3940_v32  ;;  %v15579_v32 = vpack.c.bf16 %v4277_v41, %v4276_v37  ;;  %v4301_v37 = vld [vmem:[#allocation7 + $0x1e8] sm:$0xff]  ;;  %v4252_v41 = vld [vmem:[#allocation7 + $0x60] sm:$0xff] }
0x1675   :  { %v3855_v51 = vadd.f32 %v17179_v48, %v3845_v24 }
0x1676   :  { %v3868_v63 = vsel %vm206_vm6, %v3856_v59, 0.0  ;;  %15528 = vmatpush1.bf16.msra.mxu0 %v15527_v45 }
0x1677   :  { %v3865_v62 = vsel %vm206_vm6, %v3855_v51, 0.0 }
0x1678   :  { %3866 = vadd.xlane.f32.xlu0 %v3865_v62  ;;  %v18069_v62 = vld [vmem:[%s19664_s8] ss:$0 sm:$0xff] }
0x167c   :  { %3869 = vadd.xlane.f32.xlu0 %v3868_v63 }
0x16e8   :  { %v3864_v0 = vpop.xlane.xlu1 %3863 }
0x16e9   :  { %v3873_v1 = vmul.f32 0.03125, %v3864_v0  ;;  %v3861_v26 = vpop.xlane.xlu0 %3860  ;;  %v18075_v0 = vld [vmem:[%s19665_s9] ss:$0 sm:$0xff] }
0x16ea   :  { %v3872_v4 = vmul.f32 0.03125, %v3861_v26  ;;  %v4240_v26 = vld [vmem:[#allocation7] sm:$0xff] }
0x16eb   :  { %v18046_v31 = vsub.f32 %v3854_v54, %v3873_v1  ;;  %v4257_v54 = vld [vmem:[#allocation7 + $0x88] sm:$0xff] }
0x16ec   :  { %v18048_v29 = vsub.f32 %v3853_v43, %v3872_v4  ;;  %v15537_v43 = vpack.c.bf16 %v4257_v54, %v4256_v9  ;;  %v4241_v4 = vld [vmem:[#allocation7 + $0x8] sm:$0xff] }
0x16ed   :  { %v3881_v5 = vmul.f32 %v18046_v31, %v18046_v31 }
0x16ee   :  { %v3880_v6 = vmul.f32 %v18048_v29, %v18048_v29  ;;  %15538 = vmatprep.subr.bf16.mxu0 %v15537_v43 }
0x16ef   :  { %v3887_v7 = vsel %vm206_vm6, %v3881_v5, 0.0  ;;  %v4272_v5 = vld [vmem:[#allocation7 + $0x100] sm:$0xff] }
0x16f0   :  { %3888 = vadd.xlane.f32.xlu0 %v3887_v7  ;;  %v3884_v10 = vsel %vm206_vm6, %v3880_v6, 0.0  ;;  %v4273_v6 = vld [vmem:[#allocation7 + $0x108] sm:$0xff]  ;;  %v4258_v7 = vld [vmem:[#allocation7 + $0x90] sm:$0xff] }
0x16f1   :  { %3885 = vadd.xlane.f32.xlu1 %v3884_v10 }
0x1705   :  { %v3867_v12 = vpop.xlane.xlu0 %3866 }
0x1706   :  { %v3874_v13 = vmul.f32 0.03125, %v3867_v12  ;;  %v4259_v12 = vld [vmem:[#allocation7 + $0x98] sm:$0xff] }
0x1708   :  { %v18056_v14 = vsub.f32 %v3855_v51, %v3874_v13  ;;  %v4290_v13 = vld [vmem:[#allocation7 + $0x190] sm:$0xff] }
0x1709   :  { %v3870_v17 = vpop.xlane.xlu0 %3869 }
0x170a   :  { %v3875_v18 = vmul.f32 0.03125, %v3870_v17  ;;  %v3882_v20 = vmul.f32 %v18056_v14, %v18056_v14  ;;  %v4291_v17 = vld [vmem:[#allocation7 + $0x198] sm:$0xff] }
0x170b   :  { %v15573_v30 = vpack.c.bf16 %v4291_v17, %v4290_v13 }
0x170c   :  { %v18060_v19 = vsub.f32 %v3856_v59, %v3875_v18  ;;  %v3890_v23 = vsel %vm206_vm6, %v3882_v20, 0.0  ;;  %v15539_v20 = vpack.c.bf16 %v4241_v4, %v4240_v26  ;;  %v4264_v26 = vld [vmem:[#allocation7 + $0xc0] sm:$0xff]  ;;  %v4265_v4 = vld [vmem:[#allocation7 + $0xc8] sm:$0xff] }
0x170d   :  { %3891 = vadd.xlane.f32.xlu1 %v3890_v23  ;;  %v15571_v23 = vpack.c.bf16 %v4273_v6, %v4272_v5  ;;  %v4296_v5 = vld [vmem:[#allocation7 + $0x1c0] sm:$0xff]  ;;  %v15553_v6 = vpack.c.bf16 %v4265_v4, %v4264_v26 }
0x170e   :  { %v3883_v25 = vmul.f32 %v18060_v19, %v18060_v19 }
0x1710   :  { %v3893_v3 = vsel %vm206_vm6, %v3883_v25, 0.0  ;;  %v4242_v25 = vld [vmem:[#allocation7 + $0x10] sm:$0xff] }
0x1711   :  { %3894 = vadd.xlane.f32.xlu0 %v3893_v3  ;;  %v4293_v3 = vld [vmem:[#allocation7 + $0x1a8] sm:$0xff]  ;;  %v15543_v61 = vpack.c.bf16 %v4243_v27, %v4242_v25  ;;  %v4266_v25 = vld [vmem:[#allocation7 + $0xd0] sm:$0xff]  ;;  %v4267_v27 = vld [vmem:[#allocation7 + $0xd8] sm:$0xff] }
0x1712   :  { %v15577_v33 = vpack.c.bf16 %v4293_v3, %v4292_v2  ;;  %v15559_v2 = vpack.c.bf16 %v4251_v21, %v4250_v57  ;;  %v4282_v3 = vld [vmem:[#allocation7 + $0x150] sm:$0xff] }
0x177d   :  { %v3889_v39 = vpop.xlane.xlu0 %3888 }
0x177e   :  { %v3897_v40 = vmul.f32 0.03125, %v3889_v39  ;;  %v3886_v50 = vpop.xlane.xlu1 %3885 }
0x177f   :  { %v3896_v24 = vmul.f32 0.03125, %v3886_v50  ;;  %v4294_v50 = vld [vmem:[#allocation7 + $0x1b0] sm:$0xff] }
0x1780   :  { %v3901_v48 = vadd.f32 1e-05, %v3897_v40  ;;  %v4263_v40 = vld [vmem:[#allocation7 + $0xb8] sm:$0xff] }
0x1781   :  { %v3900_v51 = vadd.f32 1e-05, %v3896_v24 }
0x1782   :  { %16769 = vrsqrt.f32 %v3901_v48  ;;  %v4295_v48 = vld [vmem:[#allocation7 + $0x1b8] sm:$0xff] }
0x1783   :  { %16771 = vrsqrt.f32 %v3900_v51  ;;  %v4246_v51 = vld [vmem:[#allocation7 + $0x30] sm:$0xff] }
0x178c   :  { %v16770_v52 = vpop.eup %16769 }
0x178d   :  { %v16772_v59 = vpop.eup %16771  ;;  %v3909_v1 = vmul.f32 %v16770_v52, %v18046_v31  ;;  %v15541_v31 = vpack.c.bf16 %v4259_v12, %v4258_v7  ;;  %v4247_v52 = vld [vmem:[#allocation7 + $0x38] sm:$0xff]  ;;  %v4297_v7 = vld [vmem:[#allocation7 + $0x1c8] sm:$0xff] }
0x178e   :  { %v3908_v63 = vmul.f32 %v16772_v59, %v18048_v29  ;;  %v15581_v59 = vpack.c.bf16 %v4295_v48, %v4294_v50  ;;  %v4249_v12 = vld [vmem:[#allocation7 + $0x48] sm:$0xff]  ;;  %v15585_v13 = vpack.c.bf16 %v4297_v7, %v4296_v5  ;;  %v4287_v50 = vld [vmem:[#allocation7 + $0x178] sm:$0xff]  ;;  %v3951_v48 = vshrl.u32 %v216_v42, 7 }
0x178f   :  { %v3919_v29 = vmul.f32 %v18069_v62, %v3909_v1  ;;  %v4279_v1 = vld [vmem:[#allocation7 + $0x138] sm:$0xff] }
0x1790   :  { %v3918_v10 = vmul.f32 %v18069_v62, %v3908_v63  ;;  %v4278_v63 = vld [vmem:[#allocation7 + $0x130] sm:$0xff] }
0x1791   :  { %v18090_v60 = vadd.f32 %v18075_v0, %v3919_v29  ;;  %v4280_v29 = vld [vmem:[#allocation7 + $0x140] sm:$0xff] }
0x1792   :  { %v18080_v18 = vadd.f32 %v18075_v0, %v3918_v10  ;;  %v4248_v10 = vld [vmem:[#allocation7 + $0x40] sm:$0xff] }
0x1793   :  { %v15555_v17 = vpack.c.bf16 %v4249_v12, %v4248_v10 }
0x1794   :  { %13566 = vmatmul.mubr.msk.f32.vlgmr.msra.gmra.mrb[36].mxu0 %vm206_vm6, %v18080_v18  ;;  %13570 = vmatmul.mubr.msk.f32.vlgmr.msra.gmra.mrb[38].mxu1 %vm206_vm6, %v18080_v18 }
0x1795   :  { %4052 = vmatprep.mubr.f32.mxu0 %v17283_v11  ;;  %4141 = vmatprep.mubr.f32.mxu1 %v17283_v11 }
0x1796   :  { %15540 = vmatpush3.bf16.msra.mxu0 %v15539_v20  ;;  %15572 = vmatpush3.bf16.msra.mxu1 %v15571_v23  ;;  %v4281_v20 = vld [vmem:[#allocation7 + $0x148] sm:$0xff] }
0x1797   :  { %15542 = vmatprep.subr.bf16.mxu0 %v15541_v31  ;;  %15574 = vmatprep.subr.bf16.mxu1 %v15573_v30  ;;  %v15587_v23 = vpack.c.bf16 %v4281_v20, %v4280_v29  ;;  %v4298_v31 = vld [vmem:[#allocation7 + $0x1d0] sm:$0xff]  ;;  %v15557_v30 = vpack.c.bf16 %v4267_v27, %v4266_v25 }
0x1798   :  { %13567 = vmatmul.mubr.msk.f32.gmra.mrb[38].mxu0 %vm206_vm6, %v18090_v60  ;;  %13571 = vmatmul.mubr.msk.f32.gmra.mrb[40].mxu1 %vm206_vm6, %v18090_v60  ;;  %v15589_v22 = vpack.c.bf16 %v4299_v56, %v4298_v31 }
0x1799   :  { %4058 = vmatprep.mubr.f32.mxu0 %v17283_v11  ;;  %4147 = vmatprep.mubr.f32.mxu1 %v17283_v11 }
0x179a   :  { %v3892_v49 = vpop.xlane.xlu1 %3891  ;;  %15544 = vmatpush3.bf16.msra.mxu0 %v15543_v61  ;;  %15576 = vmatpush3.bf16.msra.mxu1 %v15575_v53  ;;  %v4283_v61 = vld [vmem:[#allocation7 + $0x158] sm:$0xff] }
0x179b   :  { %v3898_v15 = vmul.f32 0.03125, %v3892_v49  ;;  %15546 = vmatprep.subr.bf16.mxu0 %v15545_v34  ;;  %15578 = vmatprep.subr.bf16.mxu1 %v15577_v33  ;;  %v15591_v53 = vpack.c.bf16 %v4283_v61, %v4282_v3  ;;  %v4269_v34 = vld [vmem:[#allocation7 + $0xe8] sm:$0xff]  ;;  %v4300_v33 = vld [vmem:[#allocation7 + $0x1e0] sm:$0xff] }
0x179c   :  { %v15561_v35 = vpack.c.bf16 %v4269_v34, %v4268_v58  ;;  %v4253_v49 = vld [vmem:[#allocation7 + $0x68] sm:$0xff] }
0x179d   :  { %v3902_v16 = vadd.f32 1e-05, %v3898_v15  ;;  %v4284_v15 = vld [vmem:[#allocation7 + $0x160] sm:$0xff] }
0x179e   :  { %v3895_v45 = vpop.xlane.xlu0 %3894  ;;  %15548 = vmatpush3.bf16.msra.mxu0 %v15547_v28  ;;  %15580 = vmatpush3.bf16.msra.mxu1 %v15579_v32  ;;  %v15593_v28 = vpack.c.bf16 %v4301_v37, %v4300_v33  ;;  %v15563_v32 = vpack.c.bf16 %v4253_v49, %v4252_v41 }
0x179f   :  { %16773 = vrsqrt.f32 %v3902_v16  ;;  %v3899_v46 = vmul.f32 0.03125, %v3895_v45  ;;  %15582 = vmatprep.subr.bf16.mxu1 %v15581_v59  ;;  %v4285_v16 = vld [vmem:[#allocation7 + $0x168] sm:$0xff]  ;;  %v3948_v59 = vld [vmem:[%s19669_s13] sm:$0xf] }
0x17a0   :  { %v15595_v45 = vpack.c.bf16 %v4285_v16, %v4284_v15 }
0x17a1   :  { %v3903_v8 = vadd.f32 1e-05, %v3899_v46  ;;  %v4270_v46 = vld [vmem:[#allocation7 + $0xf0] sm:$0xff] }
0x17a3   :  { %16775 = vrsqrt.f32 %v3903_v8  ;;  %v4271_v8 = vld [vmem:[#allocation7 + $0xf8] sm:$0xff] }
0x17a9   :  { %v16774_v9 = vpop.eup %16773 }
0x17aa   :  { %v3910_v54 = vmul.f32 %v16774_v9, %v18056_v14  ;;  %v4302_v9 = vld [vmem:[#allocation7 + $0x1f0] sm:$0xff] }
0x17ac   :  { %v3920_v55 = vmul.f32 %v18069_v62, %v3910_v54  ;;  %v15565_v54 = vpack.c.bf16 %v4271_v8, %v4270_v46 }
0x17ad   :  { %v16776_v43 = vpop.eup %16775 }
0x17ae   :  { %v18101_v44 = vadd.f32 %v18075_v0, %v3920_v55  ;;  %v3911_v38 = vmul.f32 %v16776_v43, %v18060_v19  ;;  %v4262_v19 = vld [vmem:[#allocation7 + $0xb0] sm:$0xff]  ;;  %v4303_v55 = vld [vmem:[#allocation7 + $0x1f8] sm:$0xff] }
0x17af   :  { %v15549_v24 = vpack.c.bf16 %v4263_v40, %v4262_v19  ;;  %v4254_v43 = vld [vmem:[#allocation7 + $0x70] sm:$0xff] }
0x17b0   :  { %13568 = vmatmul.mubr.msk.f32.gmra.mrb[40].mxu0 %vm206_vm6, %v18101_v44  ;;  %13572 = vmatmul.mubr.msk.f32.gmra.mrb[42].mxu1 %vm206_vm6, %v18101_v44  ;;  %v3921_v39 = vmul.f32 %v18069_v62, %v3911_v38  ;;  %v15551_v62 = vpack.c.bf16 %v4247_v52, %v4246_v51  ;;  %v4255_v38 = vld [vmem:[#allocation7 + $0x78] sm:$0xff]  ;;  %v4286_v40 = vld [vmem:[#allocation7 + $0x170] sm:$0xff]  ;;  %v18119_v51 = vsub.s32 0, %v3951_v48  ;;  %v18121_v52 = vsub.s32 2, %v3951_v48 }
0x17b1   :  { %4064 = vmatprep.mubr.f32.mxu0 %v17283_v11  ;;  %4153 = vmatprep.mubr.f32.mxu1 %v17283_v11  ;;  %v15567_v19 = vpack.c.bf16 %v4255_v38, %v4254_v43 }
0x17b2   :  { %v18112_v14 = vadd.f32 %v18075_v0, %v3921_v39  ;;  %15550 = vmatprep.subr.bf16.mxu0 %v15549_v24  ;;  %v15583_v0 = vpack.c.bf16 %v4279_v1, %v4278_v63  ;;  %v15597_v39 = vpack.c.bf16 %v4303_v55, %v4302_v9  ;;  %v15599_v24 = vpack.c.bf16 %v4287_v50, %v4286_v40 }
0x17b3   :  { %15552 = vmatpush3.bf16.msra.mxu0 %v15551_v62  ;;  %v18126_v62 = vsub.s32 1, %v3951_v48  ;;  %v18128_v63 = vsub.s32 3, %v3951_v48  ;;  %v18131_v1 = vrot.slane %v3948_v59, %v18119_v51 }
0x17b4   :  { %13569 = vmatmul.mubr.msk.f32.gmra.mrb[42].mxu0 %vm206_vm6, %v18112_v14  ;;  %13573 = vmatmul.mubr.msk.f32.gmra.mrb[44].mxu1 %vm206_vm6, %v18112_v14 }
0x17b5   :  { %15584 = vmatpush3.bf16.msra.mxu1 %v15583_v0  ;;  %15554 = vmatprep.subr.bf16.mxu0 %v15553_v6  ;;  %v18134_v0 = vrot.slane %v3948_v59, %v18121_v52  ;;  %v18137_v42 = vrot.slane %v3948_v59, %v18126_v62  ;;  %v18140_v26 = vrot.slane %v3948_v59, %v18128_v63 }
0x17b6   :  { %15586 = vmatprep.subr.bf16.mxu1 %v15585_v13 }
0x17b7   :  { %15556 = vmatpush3.bf16.msra.mxu0 %v15555_v17 }
0x17b8   :  { %15558 = vmatprep.subr.bf16.mxu0 %v15557_v30 }
0x17b9   :  { %15588 = vmatpush3.bf16.msra.mxu1 %v15587_v23 }
0x17ba   :  { %15590 = vmatprep.subr.bf16.mxu1 %v15589_v22 }
0x17bb   :  { %15560 = vmatpush3.bf16.msra.mxu0 %v15559_v2 }
0x17bc   :  { %15562 = vmatprep.subr.bf16.mxu0 %v15561_v35 }
0x17bd   :  { %15592 = vmatpush3.bf16.msra.mxu1 %v15591_v53 }
0x17be   :  { %15594 = vmatprep.subr.bf16.mxu1 %v15593_v28 }
0x17bf   :  { %15564 = vmatpush3.bf16.msra.mxu0 %v15563_v32 }
0x17c0   :  { %15566 = vmatprep.subr.bf16.mxu0 %v15565_v54 }
0x17c1   :  { %15596 = vmatpush3.bf16.msra.mxu1 %v15595_v45 }
0x17c2   :  { %15598 = vmatprep.subr.bf16.mxu1 %v15597_v39 }
0x17c3   :  { %15568 = vmatpush3.bf16.msra.mxu0 %v15567_v19 }
0x17c5   :  { %15600 = vmatpush3.bf16.msra.mxu1 %v15599_v24 }
0x1867   :  { %v4048_v4 = vpop.f32.mrb[36].mxu0  ;;  %v4137_v5 = vpop.f32.mrb[38].mxu1 }
0x1868   :  { %v4049_v6 = vadd.f32 %v4048_v4, %v18131_v1  ;;  %v4138_v7 = vadd.f32 %v4137_v5, %v18134_v0  ;;  %v4050_v10 = vpop.f32.mrb[37].mxu0  ;;  %v4139_v12 = vpop.f32.mrb[39].mxu1 }
0x1869   :  { %v4051_v13 = vadd.f32 %v4050_v10, %v18137_v42  ;;  %v4140_v17 = vadd.f32 %v4139_v12, %v18140_v26 }
0x186a   :  { %v4176_v29 = vmul.f32 0.70710677, %v4049_v6  ;;  %v4178_v20 = vmul.f32 0.70710677, %v4138_v7  ;;  %v4160_v15 = vmul.f32 0.5, %v4049_v6  ;;  %v4162_v8 = vmul.f32 0.5, %v4138_v7 }
0x186b   :  { %v4177_v23 = vmul.f32 0.70710677, %v4051_v13  ;;  %v4179_v25 = vmul.f32 0.70710677, %v4140_v17  ;;  %v4054_v27 = vpop.f32.mrb[38].mxu0  ;;  %v4143_v31 = vpop.f32.mrb[40].mxu1 }
0x186c   :  { %16777 = verf.f32 %v4176_v29  ;;  %v4055_v30 = vadd.f32 %v4054_v27, %v18131_v1  ;;  %v4144_v56 = vadd.f32 %v4143_v31, %v18134_v0  ;;  %v4056_v57 = vpop.f32.mrb[39].mxu0  ;;  %v4145_v21 = vpop.f32.mrb[41].mxu1  ;;  %v4161_v28 = vmul.f32 0.5, %v4051_v13 }
0x186d   :  { %16779 = verf.f32 %v4178_v20  ;;  %v4057_v22 = vadd.f32 %v4056_v57, %v18137_v42  ;;  %v4146_v2 = vadd.f32 %v4145_v21, %v18140_v26  ;;  %v4163_v16 = vmul.f32 0.5, %v4140_v17 }
0x186e   :  { %16781 = verf.f32 %v4177_v23  ;;  %v4180_v3 = vmul.f32 0.70710677, %v4055_v30  ;;  %v4182_v61 = vmul.f32 0.70710677, %v4144_v56  ;;  %v4164_v59 = vmul.f32 0.5, %v4055_v30 }
0x186f   :  { %16783 = verf.f32 %v4179_v25  ;;  %v4181_v53 = vmul.f32 0.70710677, %v4057_v22  ;;  %v4183_v58 = vmul.f32 0.70710677, %v4146_v2  ;;  %v4165_v24 = vmul.f32 0.5, %v4057_v22 }
0x1870   :  { %16785 = verf.f32 %v4180_v3  ;;  %v4167_v4 = vmul.f32 0.5, %v4146_v2  ;;  %v4166_v6 = vmul.f32 0.5, %v4144_v56 }
0x1871   :  { %16787 = verf.f32 %v4182_v61 }
0x1872   :  { %16789 = verf.f32 %v4181_v53 }
0x1873   :  { %16791 = verf.f32 %v4183_v58 }
0x1876   :  { %v16778_v34 = vpop.eup %16777 }
0x1877   :  { %v16780_v33 = vpop.eup %16779  ;;  %v4208_v37 = vadd.f32 1.0, %v16778_v34 }
0x1878   :  { %v16782_v35 = vpop.eup %16781  ;;  %v4210_v49 = vadd.f32 1.0, %v16780_v33 }
0x1879   :  { %v16784_v41 = vpop.eup %16783  ;;  %v4209_v32 = vadd.f32 1.0, %v16782_v35  ;;  %v4224_v55 = vmul.f32 %v4208_v37, %v4160_v15 }
0x187a   :  { %v4211_v45 = vadd.f32 1.0, %v16784_v41  ;;  %v16786_v46 = vpop.eup %16785  ;;  %v4226_v39 = vmul.f32 %v4210_v49, %v4162_v8 }
0x187b   :  { %v4225_v9 = vmul.f32 %v4209_v32, %v4161_v28  ;;  %v16788_v54 = vpop.eup %16787  ;;  %v4212_v19 = vadd.f32 1.0, %v16786_v46 }
0x187c   :  { %v4227_v43 = vmul.f32 %v4211_v45, %v4163_v16  ;;  %v16790_v38 = vpop.eup %16789  ;;  %v4214_v50 = vadd.f32 1.0, %v16788_v54 }
0x187d   :  { %4375 = vmatprep.mubr.f32.mxu0 %v4225_v9  ;;  %v16792_v40 = vpop.eup %16791  ;;  %v4213_v48 = vadd.f32 1.0, %v16790_v38  ;;  %v4228_v12 = vmul.f32 %v4212_v19, %v4164_v59 }
0x187e   :  { %4460 = vmatprep.mubr.f32.mxu1 %v4227_v43  ;;  %4376 = vmatmul.mubr.f32.vlgmr.msra.gmra.mrb[44].mxu0 %v4224_v55  ;;  %v4215_v5 = vadd.f32 1.0, %v16792_v40  ;;  %v4230_v13 = vmul.f32 %v4214_v50, %v4166_v6 }
0x187f   :  { %4461 = vmatmul.mubr.f32.vlgmr.msra.gmra.mrb[46].mxu1 %v4226_v39  ;;  %v4229_v7 = vmul.f32 %v4213_v48, %v4165_v24 }
0x1880   :  { %v4231_v10 = vmul.f32 %v4215_v5, %v4167_v4 }
0x1881   :  { %4380 = vmatprep.mubr.f32.mxu0 %v4229_v7 }
0x1882   :  { %4465 = vmatprep.mubr.f32.mxu1 %v4231_v10  ;;  %4381 = vmatmul.mubr.f32.gmra.mrb[46].mxu0 %v4228_v12 }
0x1883   :  { %v4060_v17 = vpop.f32.mrb[40].mxu0  ;;  %v4149_v29 = vpop.f32.mrb[42].mxu1  ;;  %4466 = vmatmul.mubr.f32.gmra.mrb[48].mxu1 %v4230_v13 }
0x1884   :  { %v4061_v20 = vadd.f32 %v4060_v17, %v18131_v1  ;;  %v4150_v23 = vadd.f32 %v4149_v29, %v18134_v0  ;;  %v4062_v25 = vpop.f32.mrb[41].mxu0  ;;  %v4151_v27 = vpop.f32.mrb[43].mxu1 }
0x1885   :  { %v4063_v31 = vadd.f32 %v4062_v25, %v18137_v42  ;;  %v4152_v30 = vadd.f32 %v4151_v27, %v18140_v26  ;;  %v13574_v27 = vld [vmem:[%s19671_s15] ss:$0 sm:$0xff] }
0x1886   :  { %v4184_v56 = vmul.f32 0.70710677, %v4061_v20  ;;  %v4186_v57 = vmul.f32 0.70710677, %v4150_v23  ;;  %v4170_v55 = vmul.f32 0.5, %v4150_v23 }
0x1887   :  { %v4185_v21 = vmul.f32 0.70710677, %v4063_v31  ;;  %v4187_v22 = vmul.f32 0.70710677, %v4152_v30  ;;  %v4066_v2 = vpop.f32.mrb[42].mxu0  ;;  %v4155_v3 = vpop.f32.mrb[44].mxu1 }
0x1888   :  { %16793 = verf.f32 %v4184_v56  ;;  %v4067_v61 = vadd.f32 %v4066_v2, %v18131_v1  ;;  %v4156_v53 = vadd.f32 %v4155_v3, %v18134_v0  ;;  %v4068_v58 = vpop.f32.mrb[43].mxu0  ;;  %v4157_v34 = vpop.f32.mrb[45].mxu1  ;;  %v4169_v46 = vmul.f32 0.5, %v4063_v31 }
0x1889   :  { %16795 = verf.f32 %v4186_v57  ;;  %v4069_v33 = vadd.f32 %v4068_v58, %v18137_v42  ;;  %v4158_v35 = vadd.f32 %v4157_v34, %v18140_v26  ;;  %v4168_v42 = vmul.f32 0.5, %v4061_v20 }
0x188a   :  { %16797 = verf.f32 %v4185_v21  ;;  %v4188_v37 = vmul.f32 0.70710677, %v4067_v61  ;;  %v4190_v41 = vmul.f32 0.70710677, %v4156_v53  ;;  %v4171_v9 = vmul.f32 0.5, %v4152_v30 }
0x188b   :  { %16799 = verf.f32 %v4187_v22  ;;  %v4189_v49 = vmul.f32 0.70710677, %v4069_v33  ;;  %v4191_v28 = vmul.f32 0.70710677, %v4158_v35  ;;  %v4173_v4 = vmul.f32 0.5, %v4069_v33 }
0x188c   :  { %16801 = verf.f32 %v4188_v37  ;;  %v4172_v6 = vmul.f32 0.5, %v4067_v61  ;;  %v4175_v7 = vmul.f32 0.5, %v4158_v35  ;;  %v4174_v12 = vmul.f32 0.5, %v4156_v53 }
0x188d   :  { %16803 = verf.f32 %v4190_v41 }
0x188e   :  { %16805 = verf.f32 %v4189_v49 }
0x188f   :  { %16807 = verf.f32 %v4191_v28 }
0x1892   :  { %v16794_v32 = vpop.eup %16793 }
0x1893   :  { %v16796_v1 = vpop.eup %16795  ;;  %v4216_v0 = vadd.f32 1.0, %v16794_v32 }
0x1894   :  { %v16798_v15 = vpop.eup %16797  ;;  %v4218_v45 = vadd.f32 1.0, %v16796_v1 }
0x1895   :  { %v16800_v16 = vpop.eup %16799  ;;  %v4217_v8 = vadd.f32 1.0, %v16798_v15  ;;  %v4232_v19 = vmul.f32 %v4216_v0, %v4168_v42 }
0x1896   :  { %v4219_v26 = vadd.f32 1.0, %v16800_v16  ;;  %v16802_v54 = vpop.eup %16801  ;;  %v4234_v24 = vmul.f32 %v4218_v45, %v4170_v55 }
0x1897   :  { %v4233_v43 = vmul.f32 %v4217_v8, %v4169_v46  ;;  %v16804_v38 = vpop.eup %16803  ;;  %v4220_v50 = vadd.f32 1.0, %v16802_v54 }
0x1898   :  { %v4235_v39 = vmul.f32 %v4219_v26, %v4171_v9  ;;  %v16806_v40 = vpop.eup %16805  ;;  %v4222_v59 = vadd.f32 1.0, %v16804_v38 }
0x1899   :  { %4385 = vmatprep.mubr.f32.mxu0 %v4233_v43  ;;  %v16808_v48 = vpop.eup %16807  ;;  %v4221_v5 = vadd.f32 1.0, %v16806_v40  ;;  %v4236_v29 = vmul.f32 %v4220_v50, %v4172_v6 }
0x189a   :  { %4470 = vmatprep.mubr.f32.mxu1 %v4235_v39  ;;  %4386 = vmatmul.mubr.f32.gmra.mrb[48].mxu0 %v4232_v19  ;;  %v4223_v10 = vadd.f32 1.0, %v16808_v48  ;;  %v4238_v20 = vmul.f32 %v4222_v59, %v4174_v12 }
0x189b   :  { %4471 = vmatmul.mubr.f32.gmra.mrb[50].mxu1 %v4234_v24  ;;  %v4237_v13 = vmul.f32 %v4221_v5, %v4173_v4 }
0x189c   :  { %v4239_v17 = vmul.f32 %v4223_v10, %v4175_v7 }
0x189d   :  { %4390 = vmatprep.mubr.f32.mxu0 %v4237_v13 }
0x189e   :  { %4475 = vmatprep.mubr.f32.mxu1 %v4239_v17  ;;  %4391 = vmatmul.mubr.f32.gmra.mrb[50].mxu0 %v4236_v29 }
0x189f   :  { %4476 = vmatmul.mubr.f32.gmra.mrb[52].mxu1 %v4238_v20 }
0x1951   :  { %v14034_v23 = vpop.f32.mrb[44].mxu0 }
0x1952   :  { %v14078_v25 = vpop.f32.mrb[46].mxu1  ;;  %v14035_v31 = vpop.f32.mrb[45].mxu0 }
0x1953   :  { %v14036_v30 = vadd.f32 %v14035_v31, %v14034_v23  ;;  %v14079_v56 = vpop.f32.mrb[47].mxu1 }
0x1954   :  { %v14080_v57 = vadd.f32 %v14079_v56, %v14078_v25  ;;  %v13578_v56 = vld [vmem:[%s19775_s4 + $0x28] sm:$0xff] }
0x1955   :  { %v4378_v21 = vadd.f32 %v14036_v30, %v13574_v27  ;;  %v14037_v22 = vpop.f32.mrb[46].mxu0  ;;  %v13577_v30 = vld [vmem:[%s19775_s4 + $0x20] sm:$0xff] }
0x1956   :  { %v14081_v3 = vpop.f32.mrb[48].mxu1  ;;  %v14038_v61 = vpop.f32.mrb[47].mxu0 }
0x1957   :  { %v4463_v2 = vadd.f32 %v14080_v57, %v4378_v21  ;;  %v14039_v53 = vadd.f32 %v14038_v61, %v14037_v22  ;;  %v14082_v58 = vpop.f32.mrb[49].mxu1  ;;  %v15601_v57 = vpack.c.bf16 %v13578_v56, %v13577_v30  ;;  %v13579_v21 = vld [vmem:[%s19775_s4 + $0x30] sm:$0xff]  ;;  %v13580_v22 = vld [vmem:[%s19775_s4 + $0x38] sm:$0xff] }
0x1958   :  { %v14083_v34 = vadd.f32 %v14082_v58, %v14081_v3 }
0x1959   :  { %v4481_v33 = vadd.f32 %v4463_v2, %v18080_v18  ;;  %v4383_v35 = vadd.f32 %v14039_v53, %v13574_v27  ;;  %15602 = vmatprep.subr.bf16.mxu0 %v15601_v57  ;;  %v15605_v2 = vpack.c.bf16 %v13580_v22, %v13579_v21 }
0x195a   :  { %15604 = vmatpush3.bf16.msra.mxu0 %v15601_v57 }
0x195b   :  { %v4487_v37 = vsel %vm206_vm6, %v4481_v33, 0.0  ;;  %v4468_v41 = vadd.f32 %v14083_v34, %v4383_v35  ;;  %15606 = vmatprep.subr.bf16.mxu0 %v15605_v2 }
0x195c   :  { %4488 = vadd.xlane.f32.xlu1 %v4487_v37  ;;  %v13575_v37 = vld [vmem:[%s19666_s10] ss:$0 sm:$0xff] }
0x195d   :  { %v4482_v49 = vadd.f32 %v4468_v41, %v18090_v60 }
0x195e   :  { %15608 = vmatpush3.bf16.msra.mxu0 %v15605_v2 }
0x195f   :  { %v4490_v28 = vsel %vm206_vm6, %v4482_v49, 0.0 }
0x1960   :  { %4491 = vadd.xlane.f32.xlu0 %v4490_v28 }
0x196d   :  { %v14040_v32 = vpop.f32.mrb[48].mxu0 }
0x196e   :  { %v14084_v1 = vpop.f32.mrb[50].mxu1  ;;  %v14041_v15 = vpop.f32.mrb[49].mxu0 }
0x196f   :  { %v14042_v0 = vadd.f32 %v14041_v15, %v14040_v32  ;;  %v14085_v16 = vpop.f32.mrb[51].mxu1 }
0x1970   :  { %v14086_v45 = vadd.f32 %v14085_v16, %v14084_v1 }
0x1971   :  { %v4388_v46 = vadd.f32 %v14042_v0, %v13574_v27  ;;  %v14043_v8 = vpop.f32.mrb[50].mxu0 }
0x1972   :  { %v14087_v18 = vpop.f32.mrb[52].mxu1  ;;  %v14044_v9 = vpop.f32.mrb[51].mxu0 }
0x1973   :  { %v4473_v42 = vadd.f32 %v14086_v45, %v4388_v46  ;;  %v14045_v26 = vadd.f32 %v14044_v9, %v14043_v8  ;;  %v14088_v54 = vpop.f32.mrb[53].mxu1 }
0x1974   :  { %v14089_v55 = vadd.f32 %v14088_v54, %v14087_v18 }
0x1975   :  { %v4483_v43 = vadd.f32 %v4473_v42, %v18101_v44  ;;  %v4393_v60 = vadd.f32 %v14045_v26, %v13574_v27 }
0x1977   :  { %v4493_v38 = vsel %vm206_vm6, %v4483_v43, 0.0  ;;  %v4478_v39 = vadd.f32 %v14089_v55, %v4393_v60 }
0x1978   :  { %4494 = vadd.xlane.f32.xlu1 %v4493_v38 }
0x1979   :  { %v4484_v19 = vadd.f32 %v4478_v39, %v18112_v14 }
0x197b   :  { %v4496_v40 = vsel %vm206_vm6, %v4484_v19, 0.0 }
0x197c   :  { %4497 = vadd.xlane.f32.xlu0 %v4496_v40  ;;  %v13582_v40 = vld [vmem:[%s19778_s29 + $0x1] ss:$0 sm:$0xff] }
0x19e9   :  { %v4489_v50 = vpop.xlane.xlu1 %4488 }
0x19ea   :  { %v4499_v24 = vmul.f32 0.03125, %v4489_v50 }
0x19ec   :  { %v4503_v48 = vsub.f32 %v4481_v33, %v4499_v24 }
0x19ed   :  { %v4492_v59 = vpop.xlane.xlu0 %4491 }
0x19ee   :  { %v4507_v4 = vmul.f32 %v4503_v48, %v4503_v48  ;;  %v4500_v5 = vmul.f32 0.03125, %v4492_v59 }
0x19f0   :  { %v4511_v6 = vsel %vm206_vm6, %v4507_v4, 0.0  ;;  %v4504_v7 = vsub.f32 %v4482_v49, %v4500_v5  ;;  %v13576_v49 = vld [vmem:[%s19667_s11] ss:$0 sm:$0xff] }
0x19f1   :  { %4512 = vadd.xlane.f32.xlu1 %v4511_v6 }
0x19f2   :  { %v4508_v44 = vmul.f32 %v4504_v7, %v4504_v7 }
0x19f4   :  { %v4514_v10 = vsel %vm206_vm6, %v4508_v44, 0.0 }
0x19f5   :  { %4515 = vadd.xlane.f32.xlu0 %v4514_v10 }
0x1a05   :  { %v4495_v12 = vpop.xlane.xlu1 %4494 }
0x1a06   :  { %v4501_v13 = vmul.f32 0.03125, %v4495_v12 }
0x1a08   :  { %v4505_v14 = vsub.f32 %v4483_v43, %v4501_v13 }
0x1a09   :  { %v4498_v17 = vpop.xlane.xlu0 %4497 }
0x1a0a   :  { %v4509_v29 = vmul.f32 %v4505_v14, %v4505_v14  ;;  %v4502_v20 = vmul.f32 0.03125, %v4498_v17 }
0x1a0c   :  { %v4517_v23 = vsel %vm206_vm6, %v4509_v29, 0.0  ;;  %v4506_v25 = vsub.f32 %v4484_v19, %v4502_v20 }
0x1a0d   :  { %4518 = vadd.xlane.f32.xlu1 %v4517_v23 }
0x1a0e   :  { %v4510_v27 = vmul.f32 %v4506_v25, %v4506_v25 }
0x1a10   :  { %v4520_v31 = vsel %vm206_vm6, %v4510_v27, 0.0 }
0x1a11   :  { %4521 = vadd.xlane.f32.xlu0 %v4520_v31 }
0x1a7e   :  { %v4513_v3 = vpop.xlane.xlu1 %4512 }
0x1a7f   :  { %v4523_v61 = vmul.f32 0.03125, %v4513_v3 }
0x1a81   :  { %v4527_v53 = vadd.f32 1e-05, %v4523_v61 }
0x1a82   :  { %v4516_v58 = vpop.xlane.xlu0 %4515 }
0x1a83   :  { %16809 = vrsqrt.f32 %v4527_v53  ;;  %v4524_v34 = vmul.f32 0.03125, %v4516_v58 }
0x1a85   :  { %v4528_v33 = vadd.f32 1e-05, %v4524_v34 }
0x1a87   :  { %16811 = vrsqrt.f32 %v4528_v33 }
0x1a8d   :  { %v16810_v35 = vpop.eup %16809 }
0x1a8e   :  { %v4535_v41 = vmul.f32 %v16810_v35, %v4503_v48 }
0x1a90   :  { %v4545_v28 = vmul.f32 %v13575_v37, %v4535_v41 }
0x1a91   :  { %v16812_v32 = vpop.eup %16811 }
0x1a92   :  { %v18191_v1 = vadd.f32 %v13576_v49, %v4545_v28  ;;  %v4536_v15 = vmul.f32 %v16812_v32, %v4504_v7 }
0x1a94   :  { %14829 = vmatprep.mubr.msk.f32.mxu0 %vm206_vm6, %v18191_v1  ;;  %v4546_v0 = vmul.f32 %v13575_v37, %v4536_v15 }
0x1a96   :  { %v18195_v16 = vadd.f32 %v13576_v49, %v4546_v0 }
0x1a98   :  { %14830 = vmatmul.mubr.msk.f32.vlgmr.msra.gmra.mrb[52].mxu0 %vm206_vm6, %v18195_v16 }
0x1a9a   :  { %v4519_v45 = vpop.xlane.xlu1 %4518 }
0x1a9b   :  { %v4525_v46 = vmul.f32 0.03125, %v4519_v45 }
0x1a9d   :  { %v4529_v8 = vadd.f32 1e-05, %v4525_v46 }
0x1a9e   :  { %v4522_v42 = vpop.xlane.xlu0 %4521 }
0x1a9f   :  { %16813 = vrsqrt.f32 %v4529_v8  ;;  %v4526_v18 = vmul.f32 0.03125, %v4522_v42 }
0x1aa1   :  { %v4530_v9 = vadd.f32 1e-05, %v4526_v18 }
0x1aa3   :  { %16815 = vrsqrt.f32 %v4530_v9 }
0x1aa9   :  { %v16814_v26 = vpop.eup %16813 }
0x1aaa   :  { %v4537_v54 = vmul.f32 %v16814_v26, %v4505_v14 }
0x1aac   :  { %v4547_v55 = vmul.f32 %v13575_v37, %v4537_v54 }
0x1aad   :  { %v16816_v43 = vpop.eup %16815 }
0x1aae   :  { %v18199_v60 = vadd.f32 %v13576_v49, %v4547_v55  ;;  %v4538_v38 = vmul.f32 %v16816_v43, %v4506_v25 }
0x1ab0   :  { %14832 = vmatprep.mubr.msk.f32.mxu0 %vm206_vm6, %v18199_v60  ;;  %v4548_v39 = vmul.f32 %v13575_v37, %v4538_v38 }
0x1ab2   :  { %v18203_v19 = vadd.f32 %v13576_v49, %v4548_v39 }
0x1ab4   :  { %14833 = vmatmul.mubr.msk.f32.gmra.mrb[54].mxu0 %vm206_vm6, %v18203_v19 }
0x1b6b   :  { %v14831_v50 = vpop.f32.mrb[52].mxu0 }
0x1b6c   :  { %v18210_v24 = vadd.f32 %v14831_v50, %v13582_v40  ;;  %v4650_v48 = vpop.f32.mrb[53].mxu0 }
0x1b6d   :  { %v18212_v59 = vadd.f32 %v13582_v40, %v4650_v48 }
0x1b6f   :  { %14839 = vmatprep.mubr.msk.f32.mxu1 %vm334_vm7, %v18212_v59  ;;  %v18218_v4 = vpack.i.bf16 %v18210_v24, %v18212_v59 }
0x1b71   :  { %16322 = vrot.lane.b32.xlu1 %v18218_v4, %s19729_s0 }
0x1b87   :  { %v14834_v5 = vpop.f32.mrb[54].mxu0 }
0x1b88   :  { %v18222_v6 = vadd.f32 %v14834_v5, %v13582_v40  ;;  %v4660_v7 = vpop.f32.mrb[55].mxu0 }
0x1b89   :  { %v18224_v44 = vadd.f32 %v13582_v40, %v4660_v7 }
0x1b8b   :  { %14846 = vmatprep.mubr.msk.f32.mxu0 %vm334_vm7, %v18224_v44  ;;  %v18230_v10 = vpack.i.bf16 %v18222_v6, %v18224_v44 }
0x1b8d   :  { %16327 = vrot.lane.b32.xlu0 %v18230_v10, %s19729_s0  ;;  %s19790_s0 = smov 80  }
0x1be3   :  { %v16323_v12 = vpop.permute.xlu1 %16322 }
0x1be4   :  { %v16325_v13 = vunpack.i.h.bf16 %v16323_v12  ;;  %v16324_v14 = vunpack.i.l.bf16 %v16323_v12 }
0x1be6   :  { %v15609_v17 = vpack.c.bf16 %v16325_v13, %v16324_v14 }
0x1be8   :  { %15611 = vmatprep.subr.msk.bf16.mxu1 %vm17534_vm8, %v15609_v17 }
0x1be9   :  { %15614 = vmatpush3.bf16.xpose.msk.msra.mxu1 %vm17534_vm8, %v15609_v17 }
0x1bf0   :  { %14840 = vmatmul.mubr.msk.f32.vlgmr.msra.gmra.mrb[54].mxu1 %vm334_vm7, %v18210_v24 }
0x1bff   :  { %v16328_v29 = vpop.permute.xlu0 %16327 }
0x1c00   :  { %v16330_v20 = vunpack.i.h.bf16 %v16328_v29  ;;  %v16329_v23 = vunpack.i.l.bf16 %v16328_v29 }
0x1c02   :  { %v15615_v25 = vpack.c.bf16 %v16330_v20, %v16329_v23 }
0x1c04   :  { %15617 = vmatprep.subr.msk.bf16.mxu0 %vm17534_vm8, %v15615_v25 }
0x1c05   :  { %15620 = vmatpush3.bf16.xpose.msk.msra.mxu0 %vm17534_vm8, %v15615_v25 }
0x1c0c   :  { %14847 = vmatmul.mubr.msk.f32.vlgmr.msra.gmra.mrb[56].mxu0 %vm334_vm7, %v18222_v6 }
0x1cc3   :  { %v14841_v27 = vpop.f32.mrb[54].mxu1 }
0x1cc4   :  { %v4848_v31 = vmul.f32 0.5, %v14841_v27  ;;  %v4749_v30 = vpop.f32.mrb[55].mxu1 }
0x1cc5   :  { %v4847_v56 = vmul.f32 0.5, %v4749_v30 }
0x1cc6   :  { %v4852_v57 = vadd.f32 %v4848_v31, %v17551_v47 }
0x1cc7   :  { %v4851_v21 = vadd.f32 %v4847_v56, %v17551_v47 }
0x1cc8   :  { %v4858_v22 = vsel %vm515_vm10, %v4852_v57, -inf }
0x1cc9   :  { %4859 = vmax.xlane.f32.xlu0 %v4858_v22  ;;  %v4855_v2 = vsel %vm515_vm10, %v4851_v21, -inf }
0x1cca   :  { %4856 = vmax.xlane.f32.xlu1 %v4855_v2 }
0x1cdf   :  { %v14848_v3 = vpop.f32.mrb[56].mxu0 }
0x1ce0   :  { %v4850_v61 = vmul.f32 0.5, %v14848_v3  ;;  %v4838_v53 = vpop.f32.mrb[57].mxu0 }
0x1ce1   :  { %v4849_v58 = vmul.f32 0.5, %v4838_v53 }
0x1ce2   :  { %v4854_v34 = vadd.f32 %v4850_v61, %v17551_v47 }
0x1ce3   :  { %v4853_v33 = vadd.f32 %v4849_v58, %v17551_v47 }
0x1ce4   :  { %v4864_v35 = vsel %vm515_vm10, %v4854_v34, -inf }
0x1ce5   :  { %4865 = vmax.xlane.f32.xlu0 %v4864_v35  ;;  %v4861_v37 = vsel %vm515_vm10, %v4853_v33, -inf }
0x1ce6   :  { %4862 = vmax.xlane.f32.xlu1 %v4861_v37 }
0x1d56   :  { %v4860_v41 = vpop.xlane.xlu0 %4859 }
0x1d57   :  { %v4868_v49 = vsub.f32 %v4852_v57, %v4860_v41  ;;  %v4857_v28 = vpop.xlane.xlu1 %4856 }
0x1d58   :  { %v4867_v32 = vsub.f32 %v4851_v21, %v4857_v28 }
0x1d59   :  { %v4873_v15 = vmul.f32 1.442695, %v4868_v49 }
0x1d5a   :  { %v4871_v0 = vmul.f32 1.442695, %v4867_v32 }
0x1d5b   :  { %16817 = vpow2.f32 %v4873_v15 }
0x1d5c   :  { %16819 = vpow2.f32 %v4871_v0 }
0x1d65   :  { %v16818_v45 = vpop.eup %16817 }
0x1d66   :  { %v16820_v46 = vpop.eup %16819  ;;  %v4882_v8 = vsel %vm515_vm10, %v16818_v45, 0.0 }
0x1d67   :  { %4883 = vadd.xlane.f32.xlu0 %v4882_v8  ;;  %v4879_v42 = vsel %vm515_vm10, %v16820_v46, 0.0 }
0x1d68   :  { %4880 = vadd.xlane.f32.xlu1 %v4879_v42 }
0x1d72   :  { %v4866_v18 = vpop.xlane.xlu0 %4865 }
0x1d73   :  { %v4870_v9 = vsub.f32 %v4854_v34, %v4866_v18  ;;  %v4863_v54 = vpop.xlane.xlu1 %4862 }
0x1d74   :  { %v4869_v55 = vsub.f32 %v4853_v33, %v4863_v54 }
0x1d75   :  { %v4877_v26 = vmul.f32 1.442695, %v4870_v9 }
0x1d76   :  { %v4875_v43 = vmul.f32 1.442695, %v4869_v55 }
0x1d77   :  { %16821 = vpow2.f32 %v4877_v26 }
0x1d78   :  { %16823 = vpow2.f32 %v4875_v43 }
0x1d79   :  { %16332 = vrot.lane.b32.xlu1 %v18218_v4, %s19727_s30 }
0x1d7d   :  { %16337 = vrot.lane.b32.xlu0 %v18230_v10, %s19727_s30  ;;  %16342 = vrot.lane.b32.xlu1 %v18218_v4, %s19781_s2  ;;  %s19789_s30 = smov 52  }
0x1d81   :  { %16347 = vrot.lane.b32.xlu1 %v18230_v10, %s19781_s2  ;;  %v16822_v38 = vpop.eup %16821 }
0x1d82   :  { %v4888_v39 = vsel %vm515_vm10, %v16822_v38, 0.0  ;;  %v16824_v40 = vpop.eup %16823 }
0x1d83   :  { %v4885_v50 = vsel %vm515_vm10, %v16824_v40, 0.0 }
0x1d85   :  { %5079 = vrot.lane.b32.xlu1 %v18210_v24, %s19782_s14 }
0x1d9c   :  { %4889 = vadd.xlane.f32.xlu0 %v4888_v39 }
0x1da9   :  { %4886 = vadd.xlane.f32.xlu1 %v4885_v50 }
0x1db2   :  { %5077 = vrot.lane.b32.xlu0 %v18212_v59, %s19782_s14 }
0x1db6   :  { %5168 = vrot.lane.b32.xlu0 %v18224_v44, %s19782_s14 }
0x1dba   :  { %5170 = vrot.lane.b32.xlu1 %v18222_v6, %s19782_s14 }
0x1df4   :  { %v4884_v48 = vpop.xlane.xlu0 %4883 }
0x1df5   :  { %16825 = vrcp.f32 %v4884_v48  ;;  %v4881_v5 = vpop.xlane.xlu1 %4880 }
0x1df6   :  { %16827 = vrcp.f32 %v4881_v5 }
0x1df8   :  { %v16338_v7 = vpop.permute.xlu0 %16337 }
0x1df9   :  { %v16340_v12 = vunpack.i.h.bf16 %v16338_v7  ;;  %v16339_v13 = vunpack.i.l.bf16 %v16338_v7  ;;  %v16333_v14 = vpop.permute.xlu1 %16332 }
0x1dfa   :  { %v16335_v17 = vunpack.i.h.bf16 %v16333_v14  ;;  %v16334_v29 = vunpack.i.l.bf16 %v16333_v14 }
0x1dfb   :  { %v15625_v20 = vpack.c.bf16 %v16340_v12, %v16339_v13 }
0x1dfc   :  { %v15621_v23 = vpack.c.bf16 %v16335_v17, %v16334_v29 }
0x1dfd   :  { %15626 = vmatprep.subr.bf16.mxu0 %v15625_v20  ;;  %v16343_v25 = vpop.permute.xlu1 %16342 }
0x1dfe   :  { %v16345_v27 = vunpack.i.h.bf16 %v16343_v25  ;;  %v16344_v31 = vunpack.i.l.bf16 %v16343_v25  ;;  %15622 = vmatprep.subr.bf16.mxu1 %v15621_v23  ;;  %15628 = vmatpush3.bf16.msra.mxu0 %v15625_v20 }
0x1dff   :  { %v16826_v30 = vpop.eup %16825  ;;  %15624 = vmatpush3.bf16.msra.mxu1 %v15621_v23 }
0x1e00   :  { %v16828_v56 = vpop.eup %16827  ;;  %v15629_v57 = vpack.c.bf16 %v16345_v27, %v16344_v31  ;;  %v4896_v61 = vmul.f32 %v16826_v30, %v16818_v45 }
0x1e01   :  { %v16348_v21 = vpop.permute.xlu1 %16347  ;;  %v4895_v22 = vmul.f32 %v16828_v56, %v16820_v46 }
0x1e02   :  { %v16350_v2 = vunpack.i.h.bf16 %v16348_v21  ;;  %v16349_v3 = vunpack.i.l.bf16 %v16348_v21  ;;  %15631 = vmatprep.subr.msk.bf16.mxu1 %vm17534_vm8, %v15629_v57 }
0x1e03   :  { %14853 = vmatprep.mubr.msk.f32.mxu1 %vm515_vm10, %v4895_v22 }
0x1e04   :  { %v15635_v53 = vpack.c.bf16 %v16350_v2, %v16349_v3  ;;  %14854 = vmatmul.mubr.msk.f32.vlgmr.msra.gmra.mrb[56].mxu1 %vm515_vm10, %v4896_v61 }
0x1e05   :  { %v5080_v33 = vpop.permute.xlu1 %5079 }
0x1e06   :  { %15637 = vmatprep.subr.msk.bf16.mxu0 %vm17534_vm8, %v15635_v53 }
0x1e08   :  { %15634 = vmatpush3.bf16.xpose.msk.msra.mxu1 %vm17534_vm8, %v15629_v57 }
0x1e29   :  { %v4890_v58 = vpop.xlane.xlu0 %4889 }
0x1e2a   :  { %16829 = vrcp.f32 %v4890_v58 }
0x1e2d   :  { %v5078_v34 = vpop.permute.xlu0 %5077 }
0x1e2e   :  { %14867 = vmatprep.mubr.msk.f32.mxu1 %vm334_vm7, %v5078_v34 }
0x1e2f   :  { %14868 = vmatmul.mubr.msk.f32.vlgmr.msra.gmra.mrb[58].mxu1 %vm334_vm7, %v5080_v33 }
0x1e31   :  { %v5169_v32 = vpop.permute.xlu0 %5168 }
0x1e34   :  { %v16830_v37 = vpop.eup %16829 }
0x1e35   :  { %v4898_v28 = vmul.f32 %v16830_v37, %v16822_v38 }
0x1e36   :  { %v4887_v35 = vpop.xlane.xlu1 %4886 }
0x1e37   :  { %16831 = vrcp.f32 %v4887_v35 }
0x1e3a   :  { %v5171_v15 = vpop.permute.xlu1 %5170 }
0x1e41   :  { %v16832_v41 = vpop.eup %16831 }
0x1e42   :  { %v4897_v49 = vmul.f32 %v16832_v41, %v16824_v40 }
0x1e44   :  { %14860 = vmatprep.mubr.msk.f32.mxu0 %vm515_vm10, %v4897_v49 }
0x1e45   :  { %14861 = vmatmul.mubr.msk.f32.vlgmr.msra.gmra.mrb[58].mxu0 %vm515_vm10, %v4898_v28 }
0x1e46   :  { %15640 = vmatpush3.bf16.xpose.msk.msra.mxu0 %vm17534_vm8, %v15635_v53  ;;  %14874 = vmatprep.mubr.msk.f32.mxu0 %vm334_vm7, %v5169_v32 }
0x1e4d   :  { %14875 = vmatmul.mubr.msk.f32.vlgmr.msra.gmra.mrb[60].mxu0 %vm334_vm7, %v5171_v15 }
0x1ed7   :  { %v14855_v0 = vpop.f32.mrb[56].mxu1 }
0x1ed8   :  { %5074 = vst.msk [vmem:[#allocation3 + $0x8] sm:$0xff] %vm334_vm7, %v14855_v0  ;;  %v4977_v45 = vpop.f32.mrb[57].mxu1 }
0x1ed9   :  { %5073 = vst.msk [vmem:[#allocation3] sm:$0xff] %vm334_vm7, %v4977_v45 }
0x1f02   :  { %v14869_v46 = vpop.f32.mrb[58].mxu1 }
0x1f03   :  { %v5260_v8 = vmul.f32 0.5, %v14869_v46  ;;  %v5159_v42 = vpop.f32.mrb[59].mxu1 }
0x1f04   :  { %v5259_v18 = vmul.f32 0.5, %v5159_v42 }
0x1f05   :  { %v5264_v9 = vadd.f32 %v5260_v8, %v17551_v47 }
0x1f06   :  { %v5263_v26 = vadd.f32 %v5259_v18, %v17551_v47 }
0x1f07   :  { %v5270_v54 = vsel %vm515_vm10, %v5264_v9, -inf }
0x1f08   :  { %5271 = vmax.xlane.f32.xlu1 %v5270_v54  ;;  %v5267_v55 = vsel %vm515_vm10, %v5263_v26, -inf }
0x1f09   :  { %5268 = vmax.xlane.f32.xlu0 %v5267_v55 }
0x1f18   :  { %v14862_v43 = vpop.f32.mrb[58].mxu0 }
0x1f19   :  { %5076 = vst.msk [vmem:[#allocation3 + $0x18] sm:$0xff] %vm334_vm7, %v14862_v43  ;;  %v5064_v38 = vpop.f32.mrb[59].mxu0 }
0x1f1a   :  { %5075 = vst.msk [vmem:[#allocation3 + $0x10] sm:$0xff] %vm334_vm7, %v5064_v38 }
0x1f20   :  { %v14876_v39 = vpop.f32.mrb[60].mxu0 }
0x1f21   :  { %v5250_v40 = vpop.f32.mrb[61].mxu0  ;;  %v5262_v50 = vmul.f32 0.5, %v14876_v39 }
0x1f22   :  { %v5261_v48 = vmul.f32 0.5, %v5250_v40 }
0x1f23   :  { %v5266_v7 = vadd.f32 %v5262_v50, %v17551_v47 }
0x1f24   :  { %v5265_v5 = vadd.f32 %v5261_v48, %v17551_v47 }
0x1f25   :  { %v5276_v13 = vsel %vm515_vm10, %v5266_v7, -inf }
0x1f26   :  { %v5273_v12 = vsel %vm515_vm10, %v5265_v5, -inf }
0x1f27   :  { %5274 = vmax.xlane.f32.xlu0 %v5273_v12 }
0x1f2b   :  { %5277 = vmax.xlane.f32.xlu0 %v5276_v13 }
0x1f95   :  { %v5272_v14 = vpop.xlane.xlu1 %5271 }
0x1f96   :  { %v5280_v17 = vsub.f32 %v5264_v9, %v5272_v14  ;;  %v5269_v29 = vpop.xlane.xlu0 %5268 }
0x1f97   :  { %v5279_v20 = vsub.f32 %v5263_v26, %v5269_v29 }
0x1f98   :  { %v5285_v23 = vmul.f32 1.442695, %v5280_v17 }
0x1f99   :  { %v5283_v25 = vmul.f32 1.442695, %v5279_v20 }
0x1f9a   :  { %16833 = vpow2.f32 %v5285_v23 }
0x1f9b   :  { %16835 = vpow2.f32 %v5283_v25 }
0x1fa4   :  { %v16834_v27 = vpop.eup %16833 }
0x1fa5   :  { %v16836_v31 = vpop.eup %16835  ;;  %v5294_v30 = vsel %vm515_vm10, %v16834_v27, 0.0 }
0x1fa6   :  { %5295 = vadd.xlane.f32.xlu0 %v5294_v30  ;;  %v5291_v56 = vsel %vm515_vm10, %v16836_v31, 0.0 }
0x1fa7   :  { %5292 = vadd.xlane.f32.xlu1 %v5291_v56 }
0x1fb4   :  { %v5275_v57 = vpop.xlane.xlu0 %5274 }
0x1fb5   :  { %v5281_v3 = vsub.f32 %v5265_v5, %v5275_v57 }
0x1fb7   :  { %v5287_v61 = vmul.f32 1.442695, %v5281_v3 }
0x1fb8   :  { %16352 = vrot.lane.b32.xlu1 %v18218_v4, %s19783_s25  ;;  %v5278_v21 = vpop.xlane.xlu0 %5277 }
0x1fb9   :  { %v5282_v22 = vsub.f32 %v5266_v7, %v5278_v21 }
0x1fbb   :  { %v5289_v2 = vmul.f32 1.442695, %v5282_v22 }
0x1fbc   :  { %16357 = vrot.lane.b32.xlu0 %v18230_v10, %s19783_s25  ;;  %16362 = vrot.lane.b32.xlu1 %v18218_v4, %s19784_s5 }
0x1fbd   :  { %16837 = vpow2.f32 %v5289_v2 }
0x1fbe   :  { %16839 = vpow2.f32 %v5287_v61 }
0x1fc0   :  { %16367 = vrot.lane.b32.xlu1 %v18230_v10, %s19784_s5 }
0x1fc4   :  { %5507 = vrot.lane.b32.xlu1 %v18210_v24, %s19785_s1 }
0x1fc7   :  { %v16838_v53 = vpop.eup %16837 }
0x1fc8   :  { %v5300_v58 = vsel %vm515_vm10, %v16838_v53, 0.0  ;;  %v16840_v34 = vpop.eup %16839 }
0x1fc9   :  { %v5297_v33 = vsel %vm515_vm10, %v16840_v34, 0.0 }
0x1fdb   :  { %5301 = vadd.xlane.f32.xlu0 %v5300_v58 }
0x1fe8   :  { %5298 = vadd.xlane.f32.xlu1 %v5297_v33 }
0x1ff1   :  { %5505 = vrot.lane.b32.xlu0 %v18212_v59, %s19785_s1 }
0x1ff5   :  { %5596 = vrot.lane.b32.xlu0 %v18224_v44, %s19785_s1 }
0x1ff9   :  { %5598 = vrot.lane.b32.xlu1 %v18222_v6, %s19785_s1 }
0x2033   :  { %v5296_v35 = vpop.xlane.xlu0 %5295 }
0x2034   :  { %16841 = vrcp.f32 %v5296_v35  ;;  %v5293_v37 = vpop.xlane.xlu1 %5292 }
0x2035   :  { %16843 = vrcp.f32 %v5293_v37 }
0x2037   :  { %v16358_v41 = vpop.permute.xlu0 %16357 }
0x2038   :  { %v16360_v49 = vunpack.i.h.bf16 %v16358_v41  ;;  %v16359_v28 = vunpack.i.l.bf16 %v16358_v41  ;;  %v16353_v32 = vpop.permute.xlu1 %16352 }
0x2039   :  { %v16355_v15 = vunpack.i.h.bf16 %v16353_v32  ;;  %v16354_v0 = vunpack.i.l.bf16 %v16353_v32 }
0x203a   :  { %v15645_v45 = vpack.c.bf16 %v16360_v49, %v16359_v28 }
0x203b   :  { %v15641_v46 = vpack.c.bf16 %v16355_v15, %v16354_v0 }
0x203c   :  { %v16363_v8 = vpop.permute.xlu1 %16362  ;;  %15646 = vmatprep.subr.bf16.mxu0 %v15645_v45 }
0x203d   :  { %v16365_v42 = vunpack.i.h.bf16 %v16363_v8  ;;  %v16364_v18 = vunpack.i.l.bf16 %v16363_v8  ;;  %15642 = vmatprep.subr.bf16.mxu1 %v15641_v46  ;;  %15648 = vmatpush3.bf16.msra.mxu0 %v15645_v45 }
0x203e   :  { %v16842_v9 = vpop.eup %16841  ;;  %15644 = vmatpush3.bf16.msra.mxu1 %v15641_v46 }
0x203f   :  { %v16844_v26 = vpop.eup %16843  ;;  %v15649_v54 = vpack.c.bf16 %v16365_v42, %v16364_v18  ;;  %v5308_v40 = vmul.f32 %v16842_v9, %v16834_v27 }
0x2040   :  { %v16368_v55 = vpop.permute.xlu1 %16367  ;;  %v5307_v43 = vmul.f32 %v16844_v26, %v16836_v31 }
0x2041   :  { %v16370_v38 = vunpack.i.h.bf16 %v16368_v55  ;;  %v16369_v39 = vunpack.i.l.bf16 %v16368_v55  ;;  %15651 = vmatprep.subr.msk.bf16.mxu1 %vm17534_vm8, %v15649_v54 }
0x2042   :  { %14881 = vmatprep.mubr.msk.f32.mxu1 %vm515_vm10, %v5307_v43 }
0x2043   :  { %v15655_v50 = vpack.c.bf16 %v16370_v38, %v16369_v39  ;;  %14882 = vmatmul.mubr.msk.f32.vlgmr.msra.gmra.mrb[60].mxu1 %vm515_vm10, %v5308_v40 }
0x2044   :  { %v5508_v7 = vpop.permute.xlu1 %5507 }
0x2045   :  { %15657 = vmatprep.subr.msk.bf16.mxu0 %vm17534_vm8, %v15655_v50 }
0x2047   :  { %15654 = vmatpush3.bf16.xpose.msk.msra.mxu1 %vm17534_vm8, %v15649_v54 }
0x2068   :  { %v5302_v48 = vpop.xlane.xlu0 %5301 }
0x2069   :  { %16845 = vrcp.f32 %v5302_v48 }
0x206c   :  { %v5506_v5 = vpop.permute.xlu0 %5505 }
0x206d   :  { %14895 = vmatprep.mubr.msk.f32.mxu1 %vm334_vm7, %v5506_v5 }
0x206e   :  { %14896 = vmatmul.mubr.msk.f32.vlgmr.msra.gmra.mrb[62].mxu1 %vm334_vm7, %v5508_v7 }
0x2070   :  { %v5597_v20 = vpop.permute.xlu0 %5596 }
0x2073   :  { %v16846_v13 = vpop.eup %16845 }
0x2074   :  { %v5310_v29 = vmul.f32 %v16846_v13, %v16838_v53 }
0x2075   :  { %v5299_v12 = vpop.xlane.xlu1 %5298 }
0x2076   :  { %16847 = vrcp.f32 %v5299_v12 }
0x2079   :  { %v5599_v23 = vpop.permute.xlu1 %5598 }
0x2080   :  { %v16848_v14 = vpop.eup %16847 }
0x2081   :  { %v5309_v17 = vmul.f32 %v16848_v14, %v16840_v34 }
0x2083   :  { %14888 = vmatprep.mubr.msk.f32.mxu0 %vm515_vm10, %v5309_v17 }
0x2084   :  { %14889 = vmatmul.mubr.msk.f32.vlgmr.msra.gmra.mrb[62].mxu0 %vm515_vm10, %v5310_v29 }
0x2085   :  { %15660 = vmatpush3.bf16.xpose.msk.msra.mxu0 %vm17534_vm8, %v15655_v50  ;;  %14902 = vmatprep.mubr.msk.f32.mxu0 %vm334_vm7, %v5597_v20 }
0x208c   :  { %14903 = vmatmul.mubr.msk.f32.vlgmr.msra.gmra.mrb[64].mxu0 %vm334_vm7, %v5599_v23 }
0x2116   :  { %v18338_v25 = vpop.f32.mrb[60].mxu1 }
0x2117   :  { %v18340_v27 = vpop.f32.mrb[61].mxu1 }
0x2141   :  { %v14897_v31 = vpop.f32.mrb[62].mxu1 }
0x2142   :  { %v5688_v30 = vmul.f32 0.5, %v14897_v31  ;;  %v5587_v56 = vpop.f32.mrb[63].mxu1 }
0x2143   :  { %v5687_v57 = vmul.f32 0.5, %v5587_v56 }
0x2144   :  { %v5692_v21 = vadd.f32 %v5688_v30, %v17551_v47 }
0x2145   :  { %v5691_v22 = vadd.f32 %v5687_v57, %v17551_v47 }
0x2146   :  { %v5698_v2 = vsel %vm515_vm10, %v5692_v21, -inf }
0x2147   :  { %5699 = vmax.xlane.f32.xlu1 %v5698_v2  ;;  %v5695_v3 = vsel %vm515_vm10, %v5691_v22, -inf }
0x2148   :  { %5696 = vmax.xlane.f32.xlu0 %v5695_v3 }
0x2157   :  { %v18346_v61 = vpop.f32.mrb[62].mxu0 }
0x2158   :  { %v18348_v53 = vpop.f32.mrb[63].mxu0 }
0x215f   :  { %v14904_v58 = vpop.f32.mrb[64].mxu0 }
0x2160   :  { %v5678_v34 = vpop.f32.mrb[65].mxu0  ;;  %v5690_v33 = vmul.f32 0.5, %v14904_v58 }
0x2161   :  { %v5689_v35 = vmul.f32 0.5, %v5678_v34 }
0x2162   :  { %v5694_v41 = vadd.f32 %v5690_v33, %v17551_v47 }
0x2163   :  { %v5693_v37 = vadd.f32 %v5689_v35, %v17551_v47 }
0x2164   :  { %v5704_v28 = vsel %vm515_vm10, %v5694_v41, -inf }
0x2165   :  { %v5701_v49 = vsel %vm515_vm10, %v5693_v37, -inf }
0x2166   :  { %5702 = vmax.xlane.f32.xlu0 %v5701_v49 }
0x216a   :  { %5705 = vmax.xlane.f32.xlu0 %v5704_v28 }
0x21d4   :  { %v5700_v32 = vpop.xlane.xlu1 %5699 }
0x21d5   :  { %v5708_v15 = vsub.f32 %v5692_v21, %v5700_v32  ;;  %v5697_v0 = vpop.xlane.xlu0 %5696 }
0x21d6   :  { %v5707_v45 = vsub.f32 %v5691_v22, %v5697_v0 }
0x21d7   :  { %v5713_v46 = vmul.f32 1.442695, %v5708_v15 }
0x21d8   :  { %v5711_v8 = vmul.f32 1.442695, %v5707_v45 }
0x21d9   :  { %16849 = vpow2.f32 %v5713_v46 }
0x21da   :  { %16851 = vpow2.f32 %v5711_v8 }
0x21e3   :  { %v16850_v42 = vpop.eup %16849 }
0x21e4   :  { %v16852_v18 = vpop.eup %16851  ;;  %v5722_v9 = vsel %vm515_vm10, %v16850_v42, 0.0 }
0x21e5   :  { %5723 = vadd.xlane.f32.xlu0 %v5722_v9  ;;  %v5719_v26 = vsel %vm515_vm10, %v16852_v18, 0.0 }
0x21e6   :  { %5720 = vadd.xlane.f32.xlu1 %v5719_v26 }
0x21f3   :  { %v5703_v54 = vpop.xlane.xlu0 %5702 }
0x21f4   :  { %v5709_v39 = vsub.f32 %v5693_v37, %v5703_v54 }
0x21f6   :  { %v5715_v40 = vmul.f32 1.442695, %v5709_v39 }
0x21f7   :  { %16372 = vrot.lane.b32.xlu1 %v18218_v4, %s19786_s23  ;;  %v5706_v55 = vpop.xlane.xlu0 %5705 }
0x21f8   :  { %v5710_v43 = vsub.f32 %v5694_v41, %v5706_v55 }
0x21fa   :  { %v5717_v38 = vmul.f32 1.442695, %v5710_v43 }
0x21fb   :  { %16382 = vrot.lane.b32.xlu1 %v18218_v4, %s19787_s24  ;;  %16377 = vrot.lane.b32.xlu0 %v18230_v10, %s19786_s23 }
0x21fc   :  { %16853 = vpow2.f32 %v5717_v38 }
0x21fd   :  { %16855 = vpow2.f32 %v5715_v40 }
0x21ff   :  { %16387 = vrot.lane.b32.xlu1 %v18230_v10, %s19787_s24 }
0x2203   :  { %5935 = vrot.lane.b32.xlu1 %v18210_v24, %s19788_s12 }
0x2206   :  { %v16854_v50 = vpop.eup %16853 }
0x2207   :  { %v5728_v48 = vsel %vm515_vm10, %v16854_v50, 0.0  ;;  %v16856_v5 = vpop.eup %16855 }
0x2208   :  { %v5725_v7 = vsel %vm515_vm10, %v16856_v5, 0.0 }
0x221a   :  { %5729 = vadd.xlane.f32.xlu0 %v5728_v48 }
0x2227   :  { %5726 = vadd.xlane.f32.xlu1 %v5725_v7 }
0x2230   :  { %5933 = vrot.lane.b32.xlu0 %v18212_v59, %s19788_s12 }
0x2234   :  { %6024 = vrot.lane.b32.xlu0 %v18224_v44, %s19788_s12 }
0x2238   :  { %6026 = vrot.lane.b32.xlu1 %v18222_v6, %s19788_s12 }
0x2272   :  { %v5724_v12 = vpop.xlane.xlu0 %5723 }
0x2273   :  { %16857 = vrcp.f32 %v5724_v12  ;;  %v5721_v13 = vpop.xlane.xlu1 %5720 }
0x2274   :  { %16859 = vrcp.f32 %v5721_v13 }
0x2276   :  { %v16378_v14 = vpop.permute.xlu0 %16377 }
0x2277   :  { %v16380_v17 = vunpack.i.h.bf16 %v16378_v14  ;;  %v16379_v29 = vunpack.i.l.bf16 %v16378_v14  ;;  %v16373_v20 = vpop.permute.xlu1 %16372 }
0x2278   :  { %v16375_v23 = vunpack.i.h.bf16 %v16373_v20  ;;  %v16374_v31 = vunpack.i.l.bf16 %v16373_v20 }
0x2279   :  { %v15665_v30 = vpack.c.bf16 %v16380_v17, %v16379_v29 }
0x227a   :  { %v15661_v56 = vpack.c.bf16 %v16375_v23, %v16374_v31 }
0x227b   :  { %v16383_v57 = vpop.permute.xlu1 %16382  ;;  %15666 = vmatprep.subr.bf16.mxu0 %v15665_v30 }
0x227c   :  { %v16385_v21 = vunpack.i.h.bf16 %v16383_v57  ;;  %v16384_v22 = vunpack.i.l.bf16 %v16383_v57  ;;  %15662 = vmatprep.subr.bf16.mxu1 %v15661_v56  ;;  %15668 = vmatpush3.bf16.msra.mxu0 %v15665_v30 }
0x227d   :  { %v16858_v2 = vpop.eup %16857  ;;  %15664 = vmatpush3.bf16.msra.mxu1 %v15661_v56 }
0x227e   :  { %v16860_v3 = vpop.eup %16859  ;;  %v15669_v58 = vpack.c.bf16 %v16385_v21, %v16384_v22  ;;  %v5736_v41 = vmul.f32 %v16858_v2, %v16850_v42 }
0x227f   :  { %v16388_v34 = vpop.permute.xlu1 %16387  ;;  %v5735_v33 = vmul.f32 %v16860_v3, %v16852_v18 }
0x2280   :  { %v16390_v35 = vunpack.i.h.bf16 %v16388_v34  ;;  %v16389_v37 = vunpack.i.l.bf16 %v16388_v34  ;;  %15671 = vmatprep.subr.msk.bf16.mxu1 %vm17534_vm8, %v15669_v58 }
0x2281   :  { %14909 = vmatprep.mubr.msk.f32.mxu1 %vm515_vm10, %v5735_v33 }
0x2282   :  { %v15675_v49 = vpack.c.bf16 %v16390_v35, %v16389_v37  ;;  %14910 = vmatmul.mubr.msk.f32.vlgmr.msra.gmra.mrb[64].mxu1 %vm515_vm10, %v5736_v41 }
0x2283   :  { %v5936_v15 = vpop.permute.xlu1 %5935 }
0x2284   :  { %15677 = vmatprep.subr.msk.bf16.mxu0 %vm17534_vm8, %v15675_v49 }
0x2286   :  { %15674 = vmatpush3.bf16.xpose.msk.msra.mxu1 %vm17534_vm8, %v15669_v58 }
0x22a7   :  { %v5730_v28 = vpop.xlane.xlu0 %5729 }
0x22a8   :  { %16861 = vrcp.f32 %v5730_v28 }
0x22ab   :  { %v5934_v32 = vpop.permute.xlu0 %5933 }
0x22ac   :  { %14923 = vmatprep.mubr.msk.f32.mxu1 %vm334_vm7, %v5934_v32 }
0x22ad   :  { %14924 = vmatmul.mubr.msk.f32.vlgmr.msra.gmra.mrb[66].mxu1 %vm334_vm7, %v5936_v15 }
0x22af   :  { %v6025_v18 = vpop.permute.xlu0 %6024 }
0x22b2   :  { %v16862_v45 = vpop.eup %16861 }
0x22b3   :  { %v5738_v42 = vmul.f32 %v16862_v45, %v16854_v50 }
0x22b4   :  { %v5727_v0 = vpop.xlane.xlu1 %5726 }
0x22b5   :  { %16863 = vrcp.f32 %v5727_v0 }
0x22b8   :  { %v6027_v9 = vpop.permute.xlu1 %6026 }
0x22bf   :  { %v16864_v46 = vpop.eup %16863 }
0x22c0   :  { %v5737_v8 = vmul.f32 %v16864_v46, %v16856_v5 }
0x22c2   :  { %14916 = vmatprep.mubr.msk.f32.mxu0 %vm515_vm10, %v5737_v8 }
0x22c3   :  { %14917 = vmatmul.mubr.msk.f32.vlgmr.msra.gmra.mrb[66].mxu0 %vm515_vm10, %v5738_v42 }
0x22c4   :  { %15680 = vmatpush3.bf16.xpose.msk.msra.mxu0 %vm17534_vm8, %v15675_v49  ;;  %14930 = vmatprep.mubr.msk.f32.mxu0 %vm334_vm7, %v6025_v18 }
0x22cb   :  { %14931 = vmatmul.mubr.msk.f32.vlgmr.msra.gmra.mrb[68].mxu0 %vm334_vm7, %v6027_v9 }
0x2355   :  { %v18390_v26 = vpop.f32.mrb[64].mxu1 }
0x2356   :  { %v18392_v54 = vpop.f32.mrb[65].mxu1 }
0x2380   :  { %v14925_v55 = vpop.f32.mrb[66].mxu1 }
0x2381   :  { %v6116_v43 = vmul.f32 0.5, %v14925_v55  ;;  %v6015_v38 = vpop.f32.mrb[67].mxu1 }
0x2382   :  { %v6115_v39 = vmul.f32 0.5, %v6015_v38 }
0x2383   :  { %v6120_v40 = vadd.f32 %v6116_v43, %v17551_v47 }
0x2384   :  { %v6119_v50 = vadd.f32 %v6115_v39, %v17551_v47 }
0x2385   :  { %v6126_v48 = vsel %vm515_vm10, %v6120_v40, -inf }
0x2386   :  { %6127 = vmax.xlane.f32.xlu1 %v6126_v48  ;;  %v6123_v5 = vsel %vm515_vm10, %v6119_v50, -inf }
0x2387   :  { %6124 = vmax.xlane.f32.xlu0 %v6123_v5 }
0x2396   :  { %v18398_v7 = vpop.f32.mrb[66].mxu0 }
0x2397   :  { %v18400_v12 = vpop.f32.mrb[67].mxu0 }
0x239e   :  { %v14932_v13 = vpop.f32.mrb[68].mxu0 }
0x239f   :  { %v6106_v14 = vpop.f32.mrb[69].mxu0  ;;  %v6118_v17 = vmul.f32 0.5, %v14932_v13 }
0x23a0   :  { %v6117_v29 = vmul.f32 0.5, %v6106_v14 }
0x23a1   :  { %v6122_v23 = vadd.f32 %v6118_v17, %v17551_v47 }
0x23a2   :  { %v6121_v20 = vadd.f32 %v6117_v29, %v17551_v47 }
0x23a3   :  { %v6132_v30 = vsel %vm515_vm10, %v6122_v23, -inf }
0x23a4   :  { %v6129_v31 = vsel %vm515_vm10, %v6121_v20, -inf }
0x23a5   :  { %6130 = vmax.xlane.f32.xlu0 %v6129_v31 }
0x23a9   :  { %6133 = vmax.xlane.f32.xlu0 %v6132_v30 }
0x2413   :  { %v6128_v56 = vpop.xlane.xlu1 %6127 }
0x2414   :  { %v6136_v57 = vsub.f32 %v6120_v40, %v6128_v56  ;;  %v6125_v21 = vpop.xlane.xlu0 %6124 }
0x2415   :  { %v6135_v22 = vsub.f32 %v6119_v50, %v6125_v21 }
0x2416   :  { %v6141_v2 = vmul.f32 1.442695, %v6136_v57 }
0x2417   :  { %v6139_v3 = vmul.f32 1.442695, %v6135_v22 }
0x2418   :  { %16865 = vpow2.f32 %v6141_v2 }
0x2419   :  { %16867 = vpow2.f32 %v6139_v3 }
0x2422   :  { %v16866_v58 = vpop.eup %16865 }
0x2423   :  { %v16868_v34 = vpop.eup %16867  ;;  %v6150_v33 = vsel %vm515_vm10, %v16866_v58, 0.0 }
0x2424   :  { %6151 = vadd.xlane.f32.xlu0 %v6150_v33  ;;  %v6147_v35 = vsel %vm515_vm10, %v16868_v34, 0.0 }
0x2425   :  { %6148 = vadd.xlane.f32.xlu1 %v6147_v35 }
0x2432   :  { %v6131_v37 = vpop.xlane.xlu0 %6130 }
0x2433   :  { %v6137_v32 = vsub.f32 %v6121_v20, %v6131_v37 }
0x2435   :  { %v6143_v15 = vmul.f32 1.442695, %v6137_v32 }
0x2436   :  { %16392 = vrot.lane.b32.xlu1 %v18218_v4, %s19789_s30  ;;  %v6134_v41 = vpop.xlane.xlu0 %6133 }
0x2437   :  { %v6138_v49 = vsub.f32 %v6122_v23, %v6134_v41 }
0x2439   :  { %v6145_v28 = vmul.f32 1.442695, %v6138_v49 }
0x243a   :  { %16402 = vrot.lane.b32.xlu1 %v18218_v4, %s19790_s0  ;;  %16397 = vrot.lane.b32.xlu0 %v18230_v10, %s19789_s30 }
0x243b   :  { %16869 = vpow2.f32 %v6145_v28 }
0x243c   :  { %16871 = vpow2.f32 %v6143_v15 }
0x243e   :  { %16407 = vrot.lane.b32.xlu1 %v18230_v10, %s19790_s0 }
0x2442   :  { %6363 = vrot.lane.b32.xlu1 %v18210_v24, %s19791_s27 }
0x2445   :  { %v16870_v0 = vpop.eup %16869 }
0x2446   :  { %v6156_v45 = vsel %vm515_vm10, %v16870_v0, 0.0  ;;  %v16872_v46 = vpop.eup %16871 }
0x2447   :  { %v6153_v8 = vsel %vm515_vm10, %v16872_v46, 0.0 }
0x2459   :  { %6157 = vadd.xlane.f32.xlu0 %v6156_v45 }
0x2466   :  { %6154 = vadd.xlane.f32.xlu1 %v6153_v8 }
0x246f   :  { %6361 = vrot.lane.b32.xlu0 %v18212_v59, %s19791_s27 }
0x2473   :  { %6452 = vrot.lane.b32.xlu0 %v18224_v44, %s19791_s27 }
0x2477   :  { %6454 = vrot.lane.b32.xlu1 %v18222_v6, %s19791_s27 }
0x24b1   :  { %v6152_v42 = vpop.xlane.xlu0 %6151 }
0x24b2   :  { %16873 = vrcp.f32 %v6152_v42  ;;  %v6149_v18 = vpop.xlane.xlu1 %6148 }
0x24b3   :  { %16875 = vrcp.f32 %v6149_v18 }
0x24b5   :  { %v16398_v9 = vpop.permute.xlu0 %16397 }
0x24b6   :  { %v16400_v55 = vunpack.i.h.bf16 %v16398_v9  ;;  %v16399_v43 = vunpack.i.l.bf16 %v16398_v9  ;;  %v16393_v38 = vpop.permute.xlu1 %16392 }
0x24b7   :  { %v16395_v39 = vunpack.i.h.bf16 %v16393_v38  ;;  %v16394_v40 = vunpack.i.l.bf16 %v16393_v38 }
0x24b8   :  { %v15685_v50 = vpack.c.bf16 %v16400_v55, %v16399_v43 }
0x24b9   :  { %v15681_v48 = vpack.c.bf16 %v16395_v39, %v16394_v40 }
0x24ba   :  { %v16403_v5 = vpop.permute.xlu1 %16402  ;;  %15686 = vmatprep.subr.bf16.mxu0 %v15685_v50 }
0x24bb   :  { %v16405_v13 = vunpack.i.h.bf16 %v16403_v5  ;;  %v16404_v14 = vunpack.i.l.bf16 %v16403_v5  ;;  %15682 = vmatprep.subr.bf16.mxu1 %v15681_v48  ;;  %15688 = vmatpush3.bf16.msra.mxu0 %v15685_v50 }
0x24bc   :  { %v16874_v17 = vpop.eup %16873  ;;  %15684 = vmatpush3.bf16.msra.mxu1 %v15681_v48 }
0x24bd   :  { %v16876_v29 = vpop.eup %16875  ;;  %v15689_v20 = vpack.c.bf16 %v16405_v13, %v16404_v14  ;;  %v6164_v57 = vmul.f32 %v16874_v17, %v16866_v58 }
0x24be   :  { %v16408_v23 = vpop.permute.xlu1 %16407  ;;  %v6163_v31 = vmul.f32 %v16876_v29, %v16868_v34 }
0x24bf   :  { %v16410_v30 = vunpack.i.h.bf16 %v16408_v23  ;;  %v16409_v56 = vunpack.i.l.bf16 %v16408_v23  ;;  %15691 = vmatprep.subr.msk.bf16.mxu1 %vm17534_vm8, %v15689_v20 }
0x24c0   :  { %14937 = vmatprep.mubr.msk.f32.mxu1 %vm515_vm10, %v6163_v31 }
0x24c1   :  { %v15695_v21 = vpack.c.bf16 %v16410_v30, %v16409_v56  ;;  %14938 = vmatmul.mubr.msk.f32.vlgmr.msra.gmra.mrb[68].mxu1 %vm515_vm10, %v6164_v57 }
0x24c2   :  { %v6364_v3 = vpop.permute.xlu1 %6363 }
0x24c3   :  { %15697 = vmatprep.subr.msk.bf16.mxu0 %vm17534_vm8, %v15695_v21 }
0x24c5   :  { %15694 = vmatpush3.bf16.xpose.msk.msra.mxu1 %vm17534_vm8, %v15689_v20 }
0x24e6   :  { %v6158_v22 = vpop.xlane.xlu0 %6157 }
0x24e7   :  { %16877 = vrcp.f32 %v6158_v22 }
0x24ea   :  { %v6362_v2 = vpop.permute.xlu0 %6361 }
0x24eb   :  { %14951 = vmatprep.mubr.msk.f32.mxu1 %vm334_vm7, %v6362_v2 }
0x24ec   :  { %14952 = vmatmul.mubr.msk.f32.vlgmr.msra.gmra.mrb[70].mxu1 %vm334_vm7, %v6364_v3 }
0x24ee   :  { %v6453_v41 = vpop.permute.xlu0 %6452 }
0x24f1   :  { %v16878_v34 = vpop.eup %16877 }
0x24f2   :  { %v6166_v37 = vmul.f32 %v16878_v34, %v16870_v0 }
0x24f3   :  { %v6155_v58 = vpop.xlane.xlu1 %6154 }
0x24f4   :  { %16879 = vrcp.f32 %v6155_v58 }
0x24f7   :  { %v6455_v49 = vpop.permute.xlu1 %6454 }
0x24fe   :  { %v16880_v33 = vpop.eup %16879 }
0x24ff   :  { %v6165_v35 = vmul.f32 %v16880_v33, %v16872_v46 }
0x2501   :  { %14944 = vmatprep.mubr.msk.f32.mxu0 %vm515_vm10, %v6165_v35 }
0x2502   :  { %14945 = vmatmul.mubr.msk.f32.vlgmr.msra.gmra.mrb[70].mxu0 %vm515_vm10, %v6166_v37 }
0x2503   :  { %15700 = vmatpush3.bf16.xpose.msk.msra.mxu0 %vm17534_vm8, %v15695_v21  ;;  %14958 = vmatprep.mubr.msk.f32.mxu0 %vm334_vm7, %v6453_v41 }
0x250a   :  { %14959 = vmatmul.mubr.msk.f32.vlgmr.msra.gmra.mrb[72].mxu0 %vm334_vm7, %v6455_v49 }
0x2594   :  { %v18442_v28 = vpop.f32.mrb[68].mxu1 }
0x2595   :  { %v18444_v32 = vpop.f32.mrb[69].mxu1 }
0x25bf   :  { %v14953_v15 = vpop.f32.mrb[70].mxu1 }
0x25c0   :  { %v6544_v45 = vmul.f32 0.5, %v14953_v15  ;;  %v6443_v0 = vpop.f32.mrb[71].mxu1 }
0x25c1   :  { %v6543_v46 = vmul.f32 0.5, %v6443_v0 }
0x25c2   :  { %v6548_v8 = vadd.f32 %v6544_v45, %v17551_v47 }
0x25c3   :  { %v6547_v42 = vadd.f32 %v6543_v46, %v17551_v47 }
0x25c4   :  { %v6554_v18 = vsel %vm515_vm10, %v6548_v8, -inf }
0x25c5   :  { %6555 = vmax.xlane.f32.xlu1 %v6554_v18  ;;  %v6551_v9 = vsel %vm515_vm10, %v6547_v42, -inf }
0x25c6   :  { %6552 = vmax.xlane.f32.xlu0 %v6551_v9 }
0x25d5   :  { %v18450_v55 = vpop.f32.mrb[70].mxu0 }
0x25d6   :  { %v18452_v43 = vpop.f32.mrb[71].mxu0 }
0x25dd   :  { %v14960_v38 = vpop.f32.mrb[72].mxu0 }
0x25de   :  { %v6534_v39 = vpop.f32.mrb[73].mxu0  ;;  %v6546_v40 = vmul.f32 0.5, %v14960_v38 }
0x25df   :  { %v6545_v50 = vmul.f32 0.5, %v6534_v39 }
0x25e0   :  { %v6550_v5 = vadd.f32 %v6546_v40, %v17551_v47 }
0x25e1   :  { %v6549_v48 = vadd.f32 %v6545_v50, %v17551_v47 }
0x25e2   :  { %v6560_v14 = vsel %vm515_vm10, %v6550_v5, -inf }
0x25e3   :  { %v6557_v13 = vsel %vm515_vm10, %v6549_v48, -inf }
0x25e4   :  { %6558 = vmax.xlane.f32.xlu0 %v6557_v13 }
0x25e8   :  { %6561 = vmax.xlane.f32.xlu0 %v6560_v14 }
0x2652   :  { %v6556_v17 = vpop.xlane.xlu1 %6555 }
0x2653   :  { %v6564_v29 = vsub.f32 %v6548_v8, %v6556_v17  ;;  %v6553_v20 = vpop.xlane.xlu0 %6552 }
0x2654   :  { %v6563_v23 = vsub.f32 %v6547_v42, %v6553_v20 }
0x2655   :  { %v6569_v31 = vmul.f32 1.442695, %v6564_v29 }
0x2656   :  { %v6567_v30 = vmul.f32 1.442695, %v6563_v23 }
0x2657   :  { %16881 = vpow2.f32 %v6569_v31 }
0x2658   :  { %16883 = vpow2.f32 %v6567_v30 }
0x2661   :  { %v16882_v56 = vpop.eup %16881 }
0x2662   :  { %v16884_v57 = vpop.eup %16883  ;;  %v6578_v21 = vsel %vm515_vm10, %v16882_v56, 0.0 }
0x2663   :  { %6579 = vadd.xlane.f32.xlu0 %v6578_v21  ;;  %v6575_v22 = vsel %vm515_vm10, %v16884_v57, 0.0 }
0x2664   :  { %6576 = vadd.xlane.f32.xlu1 %v6575_v22 }
0x2671   :  { %v6559_v2 = vpop.xlane.xlu0 %6558 }
0x2672   :  { %v6565_v33 = vsub.f32 %v6549_v48, %v6559_v2 }
0x2674   :  { %v6571_v35 = vmul.f32 1.442695, %v6565_v33 }
0x2675   :  { %16412 = vrot.lane.b32.xlu1 %v18218_v4, %s19792_s28  ;;  %v6562_v3 = vpop.xlane.xlu0 %6561 }
0x2676   :  { %v6566_v58 = vsub.f32 %v6550_v5, %v6562_v3 }
0x2678   :  { %v6573_v34 = vmul.f32 1.442695, %v6566_v58 }
0x2679   :  { %16422 = vrot.lane.b32.xlu1 %v18218_v4, %s19793_s3  ;;  %16417 = vrot.lane.b32.xlu0 %v18230_v10, %s19792_s28 }
0x267a   :  { %16885 = vpow2.f32 %v6573_v34 }
0x267b   :  { %16887 = vpow2.f32 %v6571_v35 }
0x267d   :  { %16427 = vrot.lane.b32.xlu1 %v18230_v10, %s19793_s3 }
0x2681   :  { %6791 = vrot.lane.b32.xlu1 %v18210_v24, %s19794_s18 }
0x2684   :  { %v16886_v37 = vpop.eup %16885 }
0x2685   :  { %v6584_v41 = vsel %vm515_vm10, %v16886_v37, 0.0  ;;  %v16888_v49 = vpop.eup %16887 }
0x2686   :  { %v6581_v15 = vsel %vm515_vm10, %v16888_v49, 0.0 }
0x2698   :  { %6585 = vadd.xlane.f32.xlu0 %v6584_v41 }
0x26a5   :  { %6582 = vadd.xlane.f32.xlu1 %v6581_v15 }
0x26ae   :  { %6789 = vrot.lane.b32.xlu0 %v18212_v59, %s19794_s18 }
0x26b2   :  { %6880 = vrot.lane.b32.xlu0 %v18224_v44, %s19794_s18 }
0x26b6   :  { %6882 = vrot.lane.b32.xlu1 %v18222_v6, %s19794_s18 }
0x26f0   :  { %v6580_v45 = vpop.xlane.xlu0 %6579 }
0x26f1   :  { %16889 = vrcp.f32 %v6580_v45  ;;  %v6577_v0 = vpop.xlane.xlu1 %6576 }
0x26f2   :  { %16891 = vrcp.f32 %v6577_v0 }
0x26f4   :  { %v16418_v46 = vpop.permute.xlu0 %16417 }
0x26f5   :  { %v16420_v8 = vunpack.i.h.bf16 %v16418_v46  ;;  %v16419_v42 = vunpack.i.l.bf16 %v16418_v46  ;;  %v16413_v18 = vpop.permute.xlu1 %16412 }
0x26f6   :  { %v16415_v9 = vunpack.i.h.bf16 %v16413_v18  ;;  %v16414_v38 = vunpack.i.l.bf16 %v16413_v18 }
0x26f7   :  { %v15705_v39 = vpack.c.bf16 %v16420_v8, %v16419_v42 }
0x26f8   :  { %v15701_v40 = vpack.c.bf16 %v16415_v9, %v16414_v38 }
0x26f9   :  { %v16423_v50 = vpop.permute.xlu1 %16422  ;;  %15706 = vmatprep.subr.bf16.mxu0 %v15705_v39 }
0x26fa   :  { %v16425_v48 = vunpack.i.h.bf16 %v16423_v50  ;;  %v16424_v5 = vunpack.i.l.bf16 %v16423_v50  ;;  %15702 = vmatprep.subr.bf16.mxu1 %v15701_v40  ;;  %15708 = vmatpush3.bf16.msra.mxu0 %v15705_v39 }
0x26fb   :  { %v16890_v13 = vpop.eup %16889  ;;  %15704 = vmatpush3.bf16.msra.mxu1 %v15701_v40 }
0x26fc   :  { %v16892_v14 = vpop.eup %16891  ;;  %v15709_v17 = vpack.c.bf16 %v16425_v48, %v16424_v5  ;;  %v6592_v30 = vmul.f32 %v16890_v13, %v16882_v56 }
0x26fd   :  { %v16428_v29 = vpop.permute.xlu1 %16427  ;;  %v6591_v20 = vmul.f32 %v16892_v14, %v16884_v57 }
0x26fe   :  { %v16430_v23 = vunpack.i.h.bf16 %v16428_v29  ;;  %v16429_v31 = vunpack.i.l.bf16 %v16428_v29  ;;  %15711 = vmatprep.subr.msk.bf16.mxu1 %vm17534_vm8, %v15709_v17 }
0x26ff   :  { %14965 = vmatprep.mubr.msk.f32.mxu1 %vm515_vm10, %v6591_v20 }
0x2700   :  { %v15715_v21 = vpack.c.bf16 %v16430_v23, %v16429_v31  ;;  %14966 = vmatmul.mubr.msk.f32.vlgmr.msra.gmra.mrb[72].mxu1 %vm515_vm10, %v6592_v30 }
0x2701   :  { %v6792_v57 = vpop.permute.xlu1 %6791 }
0x2702   :  { %15717 = vmatprep.subr.msk.bf16.mxu0 %vm17534_vm8, %v15715_v21 }
0x2704   :  { %15714 = vmatpush3.bf16.xpose.msk.msra.mxu1 %vm17534_vm8, %v15709_v17 }
0x2725   :  { %v6586_v22 = vpop.xlane.xlu0 %6585 }
0x2726   :  { %16893 = vrcp.f32 %v6586_v22 }
0x2729   :  { %v6790_v2 = vpop.permute.xlu0 %6789 }
0x272a   :  { %14979 = vmatprep.mubr.msk.f32.mxu1 %vm334_vm7, %v6790_v2 }
0x272b   :  { %14980 = vmatmul.mubr.msk.f32.vlgmr.msra.gmra.mrb[74].mxu1 %vm334_vm7, %v6792_v57 }
0x272d   :  { %v6881_v35 = vpop.permute.xlu0 %6880 }
0x2730   :  { %v16894_v3 = vpop.eup %16893 }
0x2731   :  { %v6594_v33 = vmul.f32 %v16894_v3, %v16886_v37 }
0x2732   :  { %v6583_v56 = vpop.xlane.xlu1 %6582 }
0x2733   :  { %16895 = vrcp.f32 %v6583_v56 }
0x2736   :  { %v6883_v41 = vpop.permute.xlu1 %6882 }
0x273d   :  { %v16896_v58 = vpop.eup %16895 }
0x273e   :  { %v6593_v34 = vmul.f32 %v16896_v58, %v16888_v49 }
0x2740   :  { %14972 = vmatprep.mubr.msk.f32.mxu0 %vm515_vm10, %v6593_v34 }
0x2741   :  { %14973 = vmatmul.mubr.msk.f32.vlgmr.msra.gmra.mrb[74].mxu0 %vm515_vm10, %v6594_v33 }
0x2742   :  { %15720 = vmatpush3.bf16.xpose.msk.msra.mxu0 %vm17534_vm8, %v15715_v21  ;;  %14986 = vmatprep.mubr.msk.f32.mxu0 %vm334_vm7, %v6881_v35 }
0x2749   :  { %14987 = vmatmul.mubr.msk.f32.vlgmr.msra.gmra.mrb[76].mxu0 %vm334_vm7, %v6883_v41 }
0x27d3   :  { %v18494_v15 = vpop.f32.mrb[72].mxu1 }
0x27d4   :  { %v18496_v45 = vpop.f32.mrb[73].mxu1 }
0x27fe   :  { %v14981_v0 = vpop.f32.mrb[74].mxu1 }
0x27ff   :  { %v6972_v49 = vmul.f32 0.5, %v14981_v0  ;;  %v6871_v37 = vpop.f32.mrb[75].mxu1 }
0x2800   :  { %v6971_v46 = vmul.f32 0.5, %v6871_v37 }
0x2801   :  { %v6976_v8 = vadd.f32 %v6972_v49, %v17551_v47 }
0x2802   :  { %v6975_v42 = vadd.f32 %v6971_v46, %v17551_v47 }
0x2803   :  { %v6982_v18 = vsel %vm515_vm10, %v6976_v8, -inf }
0x2804   :  { %6983 = vmax.xlane.f32.xlu1 %v6982_v18  ;;  %v6979_v9 = vsel %vm515_vm10, %v6975_v42, -inf }
0x2805   :  { %6980 = vmax.xlane.f32.xlu0 %v6979_v9 }
0x2814   :  { %v18502_v38 = vpop.f32.mrb[74].mxu0 }
0x2815   :  { %v18504_v39 = vpop.f32.mrb[75].mxu0 }
0x281c   :  { %v14988_v40 = vpop.f32.mrb[76].mxu0 }
0x281d   :  { %v6962_v50 = vpop.f32.mrb[77].mxu0  ;;  %v6974_v48 = vmul.f32 0.5, %v14988_v40 }
0x281e   :  { %v6973_v5 = vmul.f32 0.5, %v6962_v50 }
0x281f   :  { %v6978_v14 = vadd.f32 %v6974_v48, %v17551_v47 }
0x2820   :  { %v6977_v13 = vadd.f32 %v6973_v5, %v17551_v47 }
0x2821   :  { %v6988_v29 = vsel %vm515_vm10, %v6978_v14, -inf }
0x2822   :  { %v6985_v17 = vsel %vm515_vm10, %v6977_v13, -inf }
0x2823   :  { %6986 = vmax.xlane.f32.xlu0 %v6985_v17 }
0x2827   :  { %6989 = vmax.xlane.f32.xlu0 %v6988_v29 }
0x2891   :  { %v6984_v20 = vpop.xlane.xlu1 %6983 }
0x2892   :  { %v6992_v23 = vsub.f32 %v6976_v8, %v6984_v20  ;;  %v6981_v31 = vpop.xlane.xlu0 %6980 }
0x2893   :  { %v6991_v30 = vsub.f32 %v6975_v42, %v6981_v31 }
0x2894   :  { %v6997_v21 = vmul.f32 1.442695, %v6992_v23 }
0x2895   :  { %v6995_v22 = vmul.f32 1.442695, %v6991_v30 }
0x2896   :  { %16897 = vpow2.f32 %v6997_v21 }
0x2897   :  { %16899 = vpow2.f32 %v6995_v22 }
0x28a0   :  { %v16898_v2 = vpop.eup %16897 }
0x28a1   :  { %v16900_v57 = vpop.eup %16899  ;;  %v7006_v56 = vsel %vm515_vm10, %v16898_v2, 0.0 }
0x28a2   :  { %7007 = vadd.xlane.f32.xlu0 %v7006_v56  ;;  %v7003_v3 = vsel %vm515_vm10, %v16900_v57, 0.0 }
0x28a3   :  { %7004 = vadd.xlane.f32.xlu1 %v7003_v3 }
0x28b0   :  { %v6987_v58 = vpop.xlane.xlu0 %6986 }
0x28b1   :  { %v6993_v41 = vsub.f32 %v6977_v13, %v6987_v58 }
0x28b3   :  { %v6999_v0 = vmul.f32 1.442695, %v6993_v41 }
0x28b4   :  { %16432 = vrot.lane.b32.xlu1 %v18218_v4, %s19795_s22  ;;  %v6990_v34 = vpop.xlane.xlu0 %6989 }
0x28b5   :  { %v6994_v33 = vsub.f32 %v6978_v14, %v6990_v34 }
0x28b7   :  { %v7001_v35 = vmul.f32 1.442695, %v6994_v33 }
0x28b8   :  { %16442 = vrot.lane.b32.xlu1 %v18218_v4, %s19796_s26  ;;  %16437 = vrot.lane.b32.xlu0 %v18230_v10, %s19795_s22 }
0x28b9   :  { %16901 = vpow2.f32 %v7001_v35 }
0x28ba   :  { %16903 = vpow2.f32 %v6999_v0 }
0x28bc   :  { %16447 = vrot.lane.b32.xlu1 %v18230_v10, %s19796_s26  ;;  %s19806_s26 = smov 20  }
0x28c0   :  { %7219 = vrot.lane.b32.xlu1 %v18210_v24, %s19797_s21 }
0x28c3   :  { %v16902_v49 = vpop.eup %16901 }
0x28c4   :  { %v7012_v37 = vsel %vm515_vm10, %v16902_v49, 0.0  ;;  %v16904_v46 = vpop.eup %16903 }
0x28c5   :  { %v7009_v8 = vsel %vm515_vm10, %v16904_v46, 0.0 }
0x28d7   :  { %7013 = vadd.xlane.f32.xlu0 %v7012_v37 }
0x28e4   :  { %7010 = vadd.xlane.f32.xlu1 %v7009_v8 }
0x28ed   :  { %7217 = vrot.lane.b32.xlu0 %v18212_v59, %s19797_s21 }
0x28f1   :  { %7308 = vrot.lane.b32.xlu0 %v18224_v44, %s19797_s21 }
0x28f5   :  { %7310 = vrot.lane.b32.xlu1 %v18222_v6, %s19797_s21  ;;  %s19805_s21 = smov 16  }
0x292f   :  { %v7008_v42 = vpop.xlane.xlu0 %7007 }
0x2930   :  { %16905 = vrcp.f32 %v7008_v42  ;;  %v7005_v18 = vpop.xlane.xlu1 %7004 }
0x2931   :  { %16907 = vrcp.f32 %v7005_v18 }
0x2933   :  { %v16438_v9 = vpop.permute.xlu0 %16437 }
0x2934   :  { %v16440_v40 = vunpack.i.h.bf16 %v16438_v9  ;;  %v16439_v50 = vunpack.i.l.bf16 %v16438_v9  ;;  %v16433_v48 = vpop.permute.xlu1 %16432 }
0x2935   :  { %v16435_v5 = vunpack.i.h.bf16 %v16433_v48  ;;  %v16434_v13 = vunpack.i.l.bf16 %v16433_v48 }
0x2936   :  { %v15725_v14 = vpack.c.bf16 %v16440_v40, %v16439_v50 }
0x2937   :  { %v15721_v17 = vpack.c.bf16 %v16435_v5, %v16434_v13 }
0x2938   :  { %v16443_v29 = vpop.permute.xlu1 %16442  ;;  %15726 = vmatprep.subr.bf16.mxu0 %v15725_v14 }
0x2939   :  { %v16445_v20 = vunpack.i.h.bf16 %v16443_v29  ;;  %v16444_v23 = vunpack.i.l.bf16 %v16443_v29  ;;  %15722 = vmatprep.subr.bf16.mxu1 %v15721_v17  ;;  %15728 = vmatpush3.bf16.msra.mxu0 %v15725_v14 }
0x293a   :  { %v16906_v31 = vpop.eup %16905  ;;  %15724 = vmatpush3.bf16.msra.mxu1 %v15721_v17 }
0x293b   :  { %v16908_v30 = vpop.eup %16907  ;;  %v15729_v21 = vpack.c.bf16 %v16445_v20, %v16444_v23  ;;  %v7020_v34 = vmul.f32 %v16906_v31, %v16898_v2 }
0x293c   :  { %v16448_v22 = vpop.permute.xlu1 %16447  ;;  %v7019_v56 = vmul.f32 %v16908_v30, %v16900_v57 }
0x293d   :  { %v16450_v3 = vunpack.i.h.bf16 %v16448_v22  ;;  %v16449_v58 = vunpack.i.l.bf16 %v16448_v22  ;;  %15731 = vmatprep.subr.msk.bf16.mxu1 %vm17534_vm8, %v15729_v21 }
0x293e   :  { %14993 = vmatprep.mubr.msk.f32.mxu1 %vm515_vm10, %v7019_v56 }
0x293f   :  { %v15735_v33 = vpack.c.bf16 %v16450_v3, %v16449_v58  ;;  %14994 = vmatmul.mubr.msk.f32.vlgmr.msra.gmra.mrb[76].mxu1 %vm515_vm10, %v7020_v34 }
0x2940   :  { %v7220_v57 = vpop.permute.xlu1 %7219 }
0x2941   :  { %15737 = vmatprep.subr.msk.bf16.mxu0 %vm17534_vm8, %v15735_v33 }
0x2943   :  { %15734 = vmatpush3.bf16.xpose.msk.msra.mxu1 %vm17534_vm8, %v15729_v21 }
0x2964   :  { %v7014_v35 = vpop.xlane.xlu0 %7013 }
0x2965   :  { %16909 = vrcp.f32 %v7014_v35 }
0x2968   :  { %v7218_v41 = vpop.permute.xlu0 %7217 }
0x2969   :  { %15007 = vmatprep.mubr.msk.f32.mxu1 %vm334_vm7, %v7218_v41 }
0x296a   :  { %15008 = vmatmul.mubr.msk.f32.vlgmr.msra.gmra.mrb[78].mxu1 %vm334_vm7, %v7220_v57 }
0x296c   :  { %v7309_v18 = vpop.permute.xlu0 %7308 }
0x296f   :  { %v16910_v0 = vpop.eup %16909 }
0x2970   :  { %v7022_v42 = vmul.f32 %v16910_v0, %v16902_v49 }
0x2971   :  { %v7011_v2 = vpop.xlane.xlu1 %7010 }
0x2972   :  { %16911 = vrcp.f32 %v7011_v2 }
0x2975   :  { %v7311_v9 = vpop.permute.xlu1 %7310 }
0x297c   :  { %v16912_v37 = vpop.eup %16911 }
0x297d   :  { %v7021_v8 = vmul.f32 %v16912_v37, %v16904_v46 }
0x297f   :  { %15000 = vmatprep.mubr.msk.f32.mxu0 %vm515_vm10, %v7021_v8 }
0x2980   :  { %15001 = vmatmul.mubr.msk.f32.vlgmr.msra.gmra.mrb[78].mxu0 %vm515_vm10, %v7022_v42 }
0x2981   :  { %15740 = vmatpush3.bf16.xpose.msk.msra.mxu0 %vm17534_vm8, %v15735_v33  ;;  %15014 = vmatprep.mubr.msk.f32.mxu0 %vm334_vm7, %v7309_v18 }
0x2988   :  { %15015 = vmatmul.mubr.msk.f32.vlgmr.msra.gmra.mrb[80].mxu0 %vm334_vm7, %v7311_v9 }
0x2a12   :  { %v18546_v40 = vpop.f32.mrb[76].mxu1 }
0x2a13   :  { %v18548_v50 = vpop.f32.mrb[77].mxu1 }
0x2a3d   :  { %v15009_v48 = vpop.f32.mrb[78].mxu1 }
0x2a3e   :  { %v7400_v46 = vmul.f32 0.5, %v15009_v48  ;;  %v7299_v49 = vpop.f32.mrb[79].mxu1 }
0x2a3f   :  { %v7399_v5 = vmul.f32 0.5, %v7299_v49 }
0x2a40   :  { %v7404_v13 = vadd.f32 %v7400_v46, %v17551_v47 }
0x2a41   :  { %v7403_v14 = vadd.f32 %v7399_v5, %v17551_v47 }
0x2a42   :  { %v7410_v17 = vsel %vm515_vm10, %v7404_v13, -inf }
0x2a43   :  { %7411 = vmax.xlane.f32.xlu1 %v7410_v17  ;;  %v7407_v29 = vsel %vm515_vm10, %v7403_v14, -inf }
0x2a44   :  { %7408 = vmax.xlane.f32.xlu0 %v7407_v29 }
0x2a53   :  { %v18554_v20 = vpop.f32.mrb[78].mxu0 }
0x2a54   :  { %v18556_v23 = vpop.f32.mrb[79].mxu0 }
0x2a5b   :  { %v15016_v31 = vpop.f32.mrb[80].mxu0 }
0x2a5c   :  { %v7390_v30 = vpop.f32.mrb[81].mxu0  ;;  %v7402_v21 = vmul.f32 0.5, %v15016_v31 }
0x2a5d   :  { %v7401_v22 = vmul.f32 0.5, %v7390_v30 }
0x2a5e   :  { %v7406_v3 = vadd.f32 %v7402_v21, %v17551_v47 }
0x2a5f   :  { %v7405_v56 = vadd.f32 %v7401_v22, %v17551_v47 }
0x2a60   :  { %v7416_v34 = vsel %vm515_vm10, %v7406_v3, -inf }
0x2a61   :  { %v7413_v58 = vsel %vm515_vm10, %v7405_v56, -inf }
0x2a62   :  { %7414 = vmax.xlane.f32.xlu0 %v7413_v58 }
0x2a66   :  { %7417 = vmax.xlane.f32.xlu0 %v7416_v34 }
0x2ad0   :  { %v7412_v33 = vpop.xlane.xlu1 %7411 }
0x2ad1   :  { %v7420_v35 = vsub.f32 %v7404_v13, %v7412_v33  ;;  %v7409_v41 = vpop.xlane.xlu0 %7408 }
0x2ad2   :  { %v7419_v57 = vsub.f32 %v7403_v14, %v7409_v41 }
0x2ad3   :  { %v7425_v2 = vmul.f32 1.442695, %v7420_v35 }
0x2ad4   :  { %v7423_v0 = vmul.f32 1.442695, %v7419_v57 }
0x2ad5   :  { %16913 = vpow2.f32 %v7425_v2 }
0x2ad6   :  { %16915 = vpow2.f32 %v7423_v0 }
0x2adf   :  { %v16914_v37 = vpop.eup %16913 }
0x2ae0   :  { %v16916_v8 = vpop.eup %16915  ;;  %v7434_v42 = vsel %vm515_vm10, %v16914_v37, 0.0 }
0x2ae1   :  { %7435 = vadd.xlane.f32.xlu0 %v7434_v42  ;;  %v7431_v18 = vsel %vm515_vm10, %v16916_v8, 0.0 }
0x2ae2   :  { %7432 = vadd.xlane.f32.xlu1 %v7431_v18 }
0x2aef   :  { %v7415_v9 = vpop.xlane.xlu0 %7414 }
0x2af0   :  { %v7421_v5 = vsub.f32 %v7405_v56, %v7415_v9 }
0x2af2   :  { %v7427_v13 = vmul.f32 1.442695, %v7421_v5 }
0x2af3   :  { %16452 = vrot.lane.b32.xlu1 %v18218_v4, %s19798_s19  ;;  %v7418_v48 = vpop.xlane.xlu0 %7417 }
0x2af4   :  { %v7422_v46 = vsub.f32 %v7406_v3, %v7418_v48 }
0x2af6   :  { %v7429_v49 = vmul.f32 1.442695, %v7422_v46 }
0x2af7   :  { %16462 = vrot.lane.b32.xlu1 %v18218_v4, %s19799_s20  ;;  %16457 = vrot.lane.b32.xlu0 %v18230_v10, %s19798_s19  ;;  %s19804_s19 = smov 12  }
0x2af8   :  { %16917 = vpow2.f32 %v7429_v49 }
0x2af9   :  { %16919 = vpow2.f32 %v7427_v13 }
0x2afb   :  { %16467 = vrot.lane.b32.xlu1 %v18230_v10, %s19799_s20  ;;  %s19803_s20 = smov 8  }
0x2aff   :  { %7647 = vrot.lane.b32.xlu1 %v18210_v24, %s19800_s17 }
0x2b02   :  { %v16918_v14 = vpop.eup %16917 }
0x2b03   :  { %v7440_v17 = vsel %vm515_vm10, %v16918_v14, 0.0  ;;  %v16920_v29 = vpop.eup %16919 }
0x2b04   :  { %v7437_v31 = vsel %vm515_vm10, %v16920_v29, 0.0 }
0x2b16   :  { %7441 = vadd.xlane.f32.xlu0 %v7440_v17 }
0x2b23   :  { %7438 = vadd.xlane.f32.xlu1 %v7437_v31 }
0x2b2c   :  { %7645 = vrot.lane.b32.xlu0 %v18212_v59, %s19800_s17 }
0x2b30   :  { %7736 = vrot.lane.b32.xlu0 %v18224_v44, %s19800_s17 }
0x2b34   :  { %7738 = vrot.lane.b32.xlu1 %v18222_v6, %s19800_s17  ;;  %s19802_s17 = smov 4  }
0x2b6e   :  { %v7436_v24 = vpop.xlane.xlu0 %7435 }
0x2b6f   :  { %16921 = vrcp.f32 %v7436_v24  ;;  %v7433_v30 = vpop.xlane.xlu1 %7432 }
0x2b70   :  { %16923 = vrcp.f32 %v7433_v30 }
0x2b72   :  { %v16458_v21 = vpop.permute.xlu0 %16457 }
0x2b73   :  { %v16460_v22 = vunpack.i.h.bf16 %v16458_v21  ;;  %v16459_v56 = vunpack.i.l.bf16 %v16458_v21  ;;  %v16453_v3 = vpop.permute.xlu1 %16452 }
0x2b74   :  { %v16455_v58 = vunpack.i.h.bf16 %v16453_v3  ;;  %v16454_v34 = vunpack.i.l.bf16 %v16453_v3 }
0x2b75   :  { %v15745_v33 = vpack.c.bf16 %v16460_v22, %v16459_v56 }
0x2b76   :  { %v15741_v35 = vpack.c.bf16 %v16455_v58, %v16454_v34 }
0x2b77   :  { %v16463_v41 = vpop.permute.xlu1 %16462  ;;  %15746 = vmatprep.subr.bf16.mxu0 %v15745_v33 }
0x2b78   :  { %v16465_v59 = vunpack.i.h.bf16 %v16463_v41  ;;  %v16464_v57 = vunpack.i.l.bf16 %v16463_v41  ;;  %15742 = vmatprep.subr.bf16.mxu1 %v15741_v35  ;;  %15748 = vmatpush3.bf16.msra.mxu0 %v15745_v33 }
0x2b79   :  { %v16922_v44 = vpop.eup %16921  ;;  %15744 = vmatpush3.bf16.msra.mxu1 %v15741_v35 }
0x2b7a   :  { %v16924_v6 = vpop.eup %16923  ;;  %v15749_v2 = vpack.c.bf16 %v16465_v59, %v16464_v57  ;;  %v7448_v48 = vmul.f32 %v16922_v44, %v16914_v37 }
0x2b7b   :  { %v16468_v0 = vpop.permute.xlu1 %16467  ;;  %v7447_v42 = vmul.f32 %v16924_v6, %v16916_v8 }
0x2b7c   :  { %v16470_v18 = vunpack.i.h.bf16 %v16468_v0  ;;  %v16469_v9 = vunpack.i.l.bf16 %v16468_v0  ;;  %15751 = vmatprep.subr.msk.bf16.mxu1 %vm17534_vm8, %v15749_v2 }
0x2b7d   :  { %15021 = vmatprep.mubr.msk.f32.mxu1 %vm515_vm10, %v7447_v42 }
0x2b7e   :  { %v15755_v46 = vpack.c.bf16 %v16470_v18, %v16469_v9  ;;  %15022 = vmatmul.mubr.msk.f32.vlgmr.msra.gmra.mrb[80].mxu1 %vm515_vm10, %v7448_v48 }
0x2b7f   :  { %v7648_v8 = vpop.permute.xlu1 %7647 }
0x2b80   :  { %15757 = vmatprep.subr.msk.bf16.mxu0 %vm17534_vm8, %v15755_v46 }
0x2b82   :  { %15754 = vmatpush3.bf16.xpose.msk.msra.mxu1 %vm17534_vm8, %v15749_v2 }
0x2ba3   :  { %v7442_v49 = vpop.xlane.xlu0 %7441 }
0x2ba4   :  { %16925 = vrcp.f32 %v7442_v49 }
0x2ba7   :  { %v7646_v5 = vpop.permute.xlu0 %7645 }
0x2ba8   :  { %15035 = vmatprep.mubr.msk.f32.mxu1 %vm334_vm7, %v7646_v5 }
0x2ba9   :  { %15036 = vmatmul.mubr.msk.f32.vlgmr.msra.gmra.mrb[82].mxu1 %vm334_vm7, %v7648_v8 }
0x2bab   :  { %v7737_v30 = vpop.permute.xlu0 %7736 }
0x2bae   :  { %v16926_v13 = vpop.eup %16925 }
0x2baf   :  { %v7450_v24 = vmul.f32 %v16926_v13, %v16918_v14 }
0x2bb0   :  { %v7439_v37 = vpop.xlane.xlu1 %7438 }
0x2bb1   :  { %16927 = vrcp.f32 %v7439_v37 }
0x2bb4   :  { %v7739_v21 = vpop.permute.xlu1 %7738 }
0x2bbb   :  { %v16928_v17 = vpop.eup %16927 }
0x2bbc   :  { %v7449_v31 = vmul.f32 %v16928_v17, %v16920_v29 }
0x2bbe   :  { %15028 = vmatprep.mubr.msk.f32.mxu0 %vm515_vm10, %v7449_v31 }
0x2bbf   :  { %15029 = vmatmul.mubr.msk.f32.vlgmr.msra.gmra.mrb[82].mxu0 %vm515_vm10, %v7450_v24 }
0x2bc0   :  { %15760 = vmatpush3.bf16.xpose.msk.msra.mxu0 %vm17534_vm8, %v15755_v46  ;;  %15042 = vmatprep.mubr.msk.f32.mxu0 %vm334_vm7, %v7737_v30 }
0x2bc7   :  { %15043 = vmatmul.mubr.msk.f32.vlgmr.msra.gmra.mrb[84].mxu0 %vm334_vm7, %v7739_v21 }
0x2c51   :  { %v18598_v22 = vpop.f32.mrb[80].mxu1 }
0x2c52   :  { %v18600_v56 = vpop.f32.mrb[81].mxu1 }
0x2c7c   :  { %v15037_v3 = vpop.f32.mrb[82].mxu1 }
0x2c7d   :  { %v7828_v29 = vmul.f32 0.5, %v15037_v3  ;;  %v7727_v14 = vpop.f32.mrb[83].mxu1 }
0x2c7e   :  { %v7827_v58 = vmul.f32 0.5, %v7727_v14 }
0x2c7f   :  { %v7832_v34 = vadd.f32 %v7828_v29, %v17551_v47 }
0x2c80   :  { %v7831_v33 = vadd.f32 %v7827_v58, %v17551_v47 }
0x2c81   :  { %v7838_v35 = vsel %vm515_vm10, %v7832_v34, -inf }
0x2c82   :  { %7839 = vmax.xlane.f32.xlu1 %v7838_v35  ;;  %v7835_v41 = vsel %vm515_vm10, %v7831_v33, -inf }
0x2c83   :  { %7836 = vmax.xlane.f32.xlu0 %v7835_v41 }
0x2c92   :  { %v18606_v59 = vpop.f32.mrb[82].mxu0 }
0x2c93   :  { %v18608_v57 = vpop.f32.mrb[83].mxu0 }
0x2c9a   :  { %v15044_v44 = vpop.f32.mrb[84].mxu0 }
0x2c9b   :  { %v7818_v6 = vpop.f32.mrb[85].mxu0  ;;  %v7830_v2 = vmul.f32 0.5, %v15044_v44 }
0x2c9c   :  { %v7829_v0 = vmul.f32 0.5, %v7818_v6 }
0x2c9d   :  { %v7834_v18 = vadd.f32 %v7830_v2, %v17551_v47 }
0x2c9e   :  { %v7833_v42 = vadd.f32 %v7829_v0, %v17551_v47 }
0x2c9f   :  { %v7844_v48 = vsel %vm515_vm10, %v7834_v18, -inf }
0x2ca0   :  { %v7841_v9 = vsel %vm515_vm10, %v7833_v42, -inf }
0x2ca1   :  { %7842 = vmax.xlane.f32.xlu0 %v7841_v9 }
0x2ca5   :  { %7845 = vmax.xlane.f32.xlu0 %v7844_v48 }
0x2d0f   :  { %v7840_v46 = vpop.xlane.xlu1 %7839 }
0x2d10   :  { %v7848_v49 = vsub.f32 %v7832_v34, %v7840_v46  ;;  %v7837_v5 = vpop.xlane.xlu0 %7836 }
0x2d11   :  { %v7847_v8 = vsub.f32 %v7831_v33, %v7837_v5 }
0x2d12   :  { %v7853_v37 = vmul.f32 1.442695, %v7848_v49 }
0x2d13   :  { %v7851_v13 = vmul.f32 1.442695, %v7847_v8 }
0x2d14   :  { %16929 = vpow2.f32 %v7853_v37 }
0x2d15   :  { %16931 = vpow2.f32 %v7851_v13 }
0x2d1e   :  { %v18614_v17 = vpop.eup %16929 }
0x2d1f   :  { %v16932_v31 = vpop.eup %16931  ;;  %v7862_v24 = vsel %vm515_vm10, %v18614_v17, 0.0 }
0x2d20   :  { %7863 = vadd.xlane.f32.xlu0 %v7862_v24  ;;  %v7859_v30 = vsel %vm515_vm10, %v16932_v31, 0.0 }
0x2d21   :  { %7860 = vadd.xlane.f32.xlu1 %v7859_v30 }
0x2d2e   :  { %v7843_v21 = vpop.xlane.xlu0 %7842 }
0x2d2f   :  { %v7849_v3 = vsub.f32 %v7833_v42, %v7843_v21 }
0x2d31   :  { %v7855_v29 = vmul.f32 1.442695, %v7849_v3  ;;  %v13683_v3 = vld [vmem:[%s19662_s6 + $0x20] sm:$0xff] }
0x2d32   :  { %v7846_v14 = vpop.xlane.xlu0 %7845 }
0x2d33   :  { %16933 = vpow2.f32 %v7855_v29  ;;  %v7850_v58 = vsub.f32 %v7834_v18, %v7846_v14  ;;  %v13684_v29 = vld [vmem:[%s19662_s6 + $0x28] sm:$0xff] }
0x2d34   :  { %v15769_v14 = vpack.c.bf16 %v13684_v29, %v13683_v3  ;;  %v8269_v3 = vld [vmem:[#allocation4 + $0x88] sm:$0xff] }
0x2d35   :  { %v7857_v34 = vmul.f32 1.442695, %v7850_v58  ;;  %v13685_v58 = vld [vmem:[%s19662_s6 + $0x30] sm:$0xff] }
0x2d36   :  { %v8273_v29 = vld [vmem:[#allocation4 + $0xa8] sm:$0xff] }
0x2d37   :  { %16935 = vpow2.f32 %v7857_v34  ;;  %v13686_v34 = vld [vmem:[%s19662_s6 + $0x38] sm:$0xff] }
0x2d3d   :  { %v16934_v33 = vpop.eup %16933 }
0x2d3e   :  { %v7865_v35 = vsel %vm515_vm10, %v16934_v33, 0.0 }
0x2d3f   :  { %7866 = vadd.xlane.f32.xlu1 %v7865_v35 }
0x2d41   :  { %v18620_v41 = vpop.eup %16935 }
0x2d42   :  { %v7868_v44 = vsel %vm515_vm10, %v18620_v41, 0.0 }
0x2d43   :  { %7869 = vadd.xlane.f32.xlu0 %v7868_v44 }
0x2d50   :  { %16472 = vrot.lane.b32.xlu1 %v18218_v4, %s19801_s16 }
0x2d54   :  { %5489 = vrot.lane.b32.xlu1 %v18340_v27, %s19802_s17 }
0x2d58   :  { %5491 = vrot.lane.b32.xlu1 %v18338_v25, %s19802_s17 }
0x2d59   :  { %16477 = vrot.lane.b32.xlu0 %v18230_v10, %s19801_s16  ;;  %s19807_s16 = smov 24  }
0x2d5c   :  { %5919 = vrot.lane.b32.xlu1 %v18390_v26, %s19803_s20 }
0x2d5d   :  { %5917 = vrot.lane.b32.xlu0 %v18392_v54, %s19803_s20 }
0x2d60   :  { %6347 = vrot.lane.b32.xlu1 %v18442_v28, %s19804_s19 }
0x2d61   :  { %6345 = vrot.lane.b32.xlu0 %v18444_v32, %s19804_s19 }
0x2d64   :  { %6775 = vrot.lane.b32.xlu1 %v18494_v15, %s19805_s21 }
0x2d65   :  { %6773 = vrot.lane.b32.xlu0 %v18496_v45, %s19805_s21 }
0x2d68   :  { %7203 = vrot.lane.b32.xlu1 %v18546_v40, %s19806_s26 }
0x2d69   :  { %7201 = vrot.lane.b32.xlu0 %v18548_v50, %s19806_s26 }
0x2d6c   :  { %7631 = vrot.lane.b32.xlu1 %v18598_v22, %s19807_s16 }
0x2d6d   :  { %7629 = vrot.lane.b32.xlu0 %v18600_v56, %s19807_s16 }
0x2d70   :  { %5495 = vrot.lane.b32.xlu1 %v18346_v61, %s19802_s17 }
0x2d71   :  { %5493 = vrot.lane.b32.xlu0 %v18348_v53, %s19802_s17  ;;  %s19809_s17 = smov 96  }
0x2d74   :  { %5923 = vrot.lane.b32.xlu1 %v18398_v7, %s19803_s20 }
0x2d75   :  { %5921 = vrot.lane.b32.xlu0 %v18400_v12, %s19803_s20  ;;  %s19824_s20 = smov 20  }
0x2d78   :  { %6351 = vrot.lane.b32.xlu1 %v18450_v55, %s19804_s19 }
0x2d79   :  { %6349 = vrot.lane.b32.xlu0 %v18452_v43, %s19804_s19  ;;  %s19823_s19 = smov 16  }
0x2d7c   :  { %6779 = vrot.lane.b32.xlu1 %v18502_v38, %s19805_s21 }
0x2d7d   :  { %6777 = vrot.lane.b32.xlu0 %v18504_v39, %s19805_s21  ;;  %s19808_s21 = smov 28  }
0x2d80   :  { %7207 = vrot.lane.b32.xlu1 %v18554_v20, %s19806_s26 }
0x2d81   :  { %7205 = vrot.lane.b32.xlu0 %v18556_v23, %s19806_s26 }
0x2dad   :  { %v7864_v27 = vpop.xlane.xlu0 %7863 }
0x2dae   :  { %v7861_v4 = vpop.xlane.xlu1 %7860 }
0x2daf   :  { %16937 = vrcp.f32 %v7861_v4 }
0x2db0   :  { %16939 = vrcp.f32 %v7864_v27 }
0x2db9   :  { %v16938_v10 = vpop.eup %16937 }
0x2dba   :  { %v7875_v25 = vmul.f32 %v16938_v10, %v16932_v31  ;;  %v16940_v28 = vpop.eup %16939 }
0x2dbb   :  { %v7876_v38 = vmul.f32 %v16940_v28, %v18614_v17 }
0x2dbc   :  { %15049 = vmatprep.mubr.msk.f32.mxu1 %vm515_vm10, %v7875_v25 }
0x2dcc   :  { %v7867_v61 = vpop.xlane.xlu1 %7866 }
0x2dcd   :  { %16941 = vrcp.f32 %v7867_v61 }
0x2dd0   :  { %v16473_v53 = vpop.permute.xlu1 %16472  ;;  %v7870_v26 = vpop.xlane.xlu0 %7869 }
0x2dd1   :  { %v16475_v54 = vunpack.i.h.bf16 %v16473_v53  ;;  %v16474_v7 = vunpack.i.l.bf16 %v16473_v53  ;;  %16943 = vrcp.f32 %v7870_v26 }
0x2dd3   :  { %v15761_v12 = vpack.c.bf16 %v16475_v54, %v16474_v7 }
0x2dd4   :  { %v5490_v32 = vpop.permute.xlu1 %5489  ;;  %v16478_v55 = vpop.permute.xlu0 %16477 }
0x2dd5   :  { %5501 = vst.msk [vmem:[#allocation3] sm:$0xff] %vm1162_vm11, %v5490_v32  ;;  %v16480_v43 = vunpack.i.h.bf16 %v16478_v55  ;;  %v16479_v15 = vunpack.i.l.bf16 %v16478_v55  ;;  %15762 = vmatprep.subr.bf16.mxu1 %v15761_v12 }
0x2dd6   :  { %15764 = vmatpush3.bf16.msra.mxu1 %v15761_v12  ;;  %v13688_v12 = vld [vmem:[%s19663_s7 + $0x1] ss:$0 sm:$0xff] }
0x2dd7   :  { %v16942_v45 = vpop.eup %16941  ;;  %v15765_v39 = vpack.c.bf16 %v16480_v43, %v16479_v15  ;;  %15770 = vmatprep.subr.bf16.mxu1 %v15769_v14 }
0x2dd8   :  { %v5492_v40 = vpop.permute.xlu1 %5491  ;;  %v5918_v50 = vpop.permute.xlu0 %5917  ;;  %v7877_v20 = vmul.f32 %v16942_v45, %v16934_v33  ;;  %v15773_v33 = vpack.c.bf16 %v13686_v34, %v13685_v58  ;;  %v15777_v58 = vpack.c.bf16 %v8273_v29, %v8269_v3  ;;  %v8275_v34 = vld [vmem:[#allocation4 + $0xb8] sm:$0xff] }
0x2dd9   :  { %5502 = vst.msk [vmem:[#allocation3 + $0x8] sm:$0xff] %vm1162_vm11, %v5492_v40  ;;  %15050 = vmatmul.mubr.msk.f32.vlgmr.msra.gmra.mrb[84].mxu1 %vm515_vm10, %v7876_v38  ;;  %15766 = vmatprep.subr.bf16.mxu0 %v15765_v39  ;;  %v8597_v29 = vld [vmem:[#allocation7 + $0x298] sm:$0xff] }
0x2dda   :  { %5929 = vst.msk [vmem:[#allocation3] sm:$0xff] %vm1591_vm12, %v5918_v50  ;;  %15768 = vmatpush3.bf16.msra.mxu0 %v15765_v39  ;;  %15056 = vmatprep.mubr.msk.f32.mxu0 %vm515_vm10, %v7877_v20 }
0x2ddb   :  { %v16944_v23 = vpop.eup %16943  ;;  %15772 = vmatpush3.bf16.msra.mxu1 %v15769_v14  ;;  %v8271_v14 = vld [vmem:[#allocation4 + $0x98] sm:$0xff]  ;;  %15778 = vmatprep.subr.bf16.mxu0 %v15777_v58 }
0x2ddc   :  { %v5920_v22 = vpop.permute.xlu1 %5919  ;;  %v6346_v56 = vpop.permute.xlu0 %6345  ;;  %v7878_v6 = vmul.f32 %v16944_v23, %v18620_v41  ;;  %15774 = vmatprep.subr.bf16.mxu1 %v15773_v33  ;;  %v8629_v58 = vld [vmem:[#allocation7 + $0x398] sm:$0xff] }
0x2ddd   :  { %5930 = vst.msk [vmem:[#allocation3 + $0x8] sm:$0xff] %vm1591_vm12, %v5920_v22 }
0x2dde   :  { %6357 = vst.msk [vmem:[#allocation3] sm:$0xff] %vm2020_vm13, %v6346_v56  ;;  %15057 = vmatmul.mubr.msk.f32.vlgmr.msra.gmra.mrb[86].mxu0 %vm515_vm10, %v7878_v6 }
0x2ddf   :  { %8383 = vmatprep.mubr.f32.mxu0 %v17283_v11  ;;  %15776 = vmatpush3.bf16.msra.mxu1 %v15773_v33  ;;  %v8268_v33 = vld [vmem:[#allocation4 + $0x80] sm:$0xff] }
0x2de0   :  { %v6348_v2 = vpop.permute.xlu1 %6347  ;;  %v6774_v0 = vpop.permute.xlu0 %6773 }
0x2de1   :  { %6358 = vst.msk [vmem:[#allocation3 + $0x8] sm:$0xff] %vm2020_vm13, %v6348_v2 }
0x2de2   :  { %6785 = vst.msk [vmem:[#allocation3] sm:$0xff] %vm2449_vm14, %v6774_v0 }
0x2de4   :  { %v6776_v42 = vpop.permute.xlu1 %6775  ;;  %v7202_v18 = vpop.permute.xlu0 %7201 }
0x2de5   :  { %6786 = vst.msk [vmem:[#allocation3 + $0x8] sm:$0xff] %vm2449_vm14, %v6776_v42 }
0x2de6   :  { %7213 = vst.msk [vmem:[#allocation3] sm:$0xff] %vm2878_vm15, %v7202_v18 }
0x2de8   :  { %v7204_v9 = vpop.permute.xlu1 %7203  ;;  %v7630_v48 = vpop.permute.xlu0 %7629 }
0x2de9   :  { %7214 = vst.msk [vmem:[#allocation3 + $0x8] sm:$0xff] %vm2878_vm15, %v7204_v9 }
0x2dea   :  { %7641 = vst.msk [vmem:[#allocation3] sm:$0xff] %vm3307_vm0, %v7630_v48 }
0x2dec   :  { %v7632_v46 = vpop.permute.xlu1 %7631  ;;  %v5494_v49 = vpop.permute.xlu0 %5493 }
0x2ded   :  { %7642 = vst.msk [vmem:[#allocation3 + $0x8] sm:$0xff] %vm3307_vm0, %v7632_v46 }
0x2dee   :  { %5503 = vst.msk [vmem:[#allocation3 + $0x10] sm:$0xff] %vm1162_vm11, %v5494_v49 }
0x2df0   :  { %v5496_v5 = vpop.permute.xlu1 %5495  ;;  %v5922_v8 = vpop.permute.xlu0 %5921 }
0x2df1   :  { %5504 = vst.msk [vmem:[#allocation3 + $0x18] sm:$0xff] %vm1162_vm11, %v5496_v5 }
0x2df2   :  { %5931 = vst.msk [vmem:[#allocation3 + $0x10] sm:$0xff] %vm1591_vm12, %v5922_v8 }
0x2df4   :  { %v5924_v37 = vpop.permute.xlu1 %5923  ;;  %v6350_v13 = vpop.permute.xlu0 %6349 }
0x2df5   :  { %5932 = vst.msk [vmem:[#allocation3 + $0x18] sm:$0xff] %vm1591_vm12, %v5924_v37 }
0x2df6   :  { %6359 = vst.msk [vmem:[#allocation3 + $0x10] sm:$0xff] %vm2020_vm13, %v6350_v13 }
0x2df8   :  { %v6352_v17 = vpop.permute.xlu1 %6351  ;;  %v6778_v31 = vpop.permute.xlu0 %6777 }
0x2df9   :  { %6360 = vst.msk [vmem:[#allocation3 + $0x18] sm:$0xff] %vm2020_vm13, %v6352_v17 }
0x2dfa   :  { %6787 = vst.msk [vmem:[#allocation3 + $0x10] sm:$0xff] %vm2449_vm14, %v6778_v31 }
0x2dfc   :  { %v6780_v24 = vpop.permute.xlu1 %6779  ;;  %v7206_v30 = vpop.permute.xlu0 %7205 }
0x2dfd   :  { %6788 = vst.msk [vmem:[#allocation3 + $0x18] sm:$0xff] %vm2449_vm14, %v6780_v24 }
0x2dfe   :  { %7215 = vst.msk [vmem:[#allocation3 + $0x10] sm:$0xff] %vm2878_vm15, %v7206_v30 }
0x2e00   :  { %v7208_v21 = vpop.permute.xlu1 %7207 }
0x2e01   :  { %7216 = vst.msk [vmem:[#allocation3 + $0x18] sm:$0xff] %vm2878_vm15, %v7208_v21 }
0x2eac   :  { %v15051_v35 = vpop.f32.mrb[84].mxu1 }
0x2ead   :  { %8059 = vrot.lane.b32.xlu1 %v15051_v35, %s19808_s21  ;;  %v7957_v41 = vpop.f32.mrb[85].mxu1  ;;  %v8272_v35 = vld [vmem:[#allocation4 + $0xa0] sm:$0xff] }
0x2eae   :  { %8057 = vrot.lane.b32.xlu0 %v7957_v41, %s19808_s21  ;;  %v15785_v41 = vpack.c.bf16 %v8275_v34, %v8271_v14  ;;  %v8628_v14 = vld [vmem:[#allocation7 + $0x390] sm:$0xff] }
0x2eb0   :  { %15786 = vmatprep.subr.bf16.mxu1 %v15785_v41  ;;  %v8580_v41 = vld [vmem:[#allocation7 + $0x210] sm:$0xff] }
0x2eb1   :  { %7635 = vrot.lane.b32.xlu1 %v18606_v59, %s19807_s16  ;;  %v15058_v44 = vpop.f32.mrb[86].mxu0 }
0x2eb2   :  { %7633 = vrot.lane.b32.xlu0 %v18608_v57, %s19807_s16  ;;  %v8044_v4 = vpop.f32.mrb[87].mxu0 }
0x2eb5   :  { %8063 = vrot.lane.b32.xlu1 %v15058_v44, %s19808_s21  ;;  %v15779_v44 = vpack.c.bf16 %v8272_v35, %v8268_v33 }
0x2eb6   :  { %8061 = vrot.lane.b32.xlu0 %v8044_v4, %s19808_s21  ;;  %v8270_v4 = vld [vmem:[#allocation4 + $0x90] sm:$0xff] }
0x2eb7   :  { %15780 = vmatpush1.bf16.msra.mxu0 %v15779_v44 }
0x2f1f   :  { %v8060_v10 = vpop.permute.xlu1 %8059 }
0x2f20   :  { %8070 = vst.msk [vmem:[#allocation3 + $0x8] sm:$0xff] %vm3736_vm1, %v8060_v10  ;;  %v8058_v25 = vpop.permute.xlu0 %8057  ;;  %v8274_v10 = vld [vmem:[#allocation4 + $0xb0] sm:$0xff] }
0x2f21   :  { %8069 = vst.msk [vmem:[#allocation3] sm:$0xff] %vm3736_vm1, %v8058_v25  ;;  %v15787_v25 = vpack.c.bf16 %v8274_v10, %v8270_v4  ;;  %v15829_v4 = vpack.c.bf16 %v8629_v58, %v8628_v14  ;;  %v8612_v10 = vld [vmem:[#allocation7 + $0x310] sm:$0xff]  ;;  %v8619_v14 = vld [vmem:[#allocation7 + $0x348] sm:$0xff] }
0x2f23   :  { %v7636_v27 = vpop.permute.xlu1 %7635 }
0x2f24   :  { %7644 = vst.msk [vmem:[#allocation3 + $0x18] sm:$0xff] %vm3307_vm0, %v7636_v27  ;;  %v7634_v61 = vpop.permute.xlu0 %7633  ;;  %v8277_v27 = vld [vmem:[#allocation4 + $0xc8] sm:$0xff] }
0x2f25   :  { %7643 = vst.msk [vmem:[#allocation3 + $0x10] sm:$0xff] %vm3307_vm0, %v7634_v61  ;;  %v8281_v61 = vld [vmem:[#allocation4 + $0xe8] sm:$0xff] }
0x2f27   :  { %v8064_v59 = vpop.permute.xlu1 %8063  ;;  %v8074_v26 = vld [vmem:[#allocation3 + $0x8] sm:$0xff] }
0x2f28   :  { %8072 = vst.msk [vmem:[#allocation3 + $0x18] sm:$0xff] %vm3736_vm1, %v8064_v59  ;;  %v8062_v57 = vpop.permute.xlu0 %8061  ;;  %v8073_v53 = vld [vmem:[#allocation3] sm:$0xff]  ;;  %v8279_v59 = vld [vmem:[#allocation4 + $0xd8] sm:$0xff] }
0x2f29   :  { %8071 = vst.msk [vmem:[#allocation3 + $0x10] sm:$0xff] %vm3736_vm1, %v8062_v57  ;;  %15067 = vmatprep.mubr.msk.f32.mxu1 %vm206_vm6, %v8073_v53  ;;  %v15781_v57 = vpack.c.bf16 %v8281_v61, %v8277_v27  ;;  %v8283_v53 = vld [vmem:[#allocation4 + $0xf8] sm:$0xff]  ;;  %v8598_v27 = vld [vmem:[#allocation7 + $0x2a0] sm:$0xff]  ;;  %v8599_v61 = vld [vmem:[#allocation7 + $0x2a8] sm:$0xff] }
0x2f2a   :  { %15068 = vmatmul.mubr.msk.f32.vlgmr.msra.gmra.mrb[86].mxu1 %vm206_vm6, %v8074_v26  ;;  %v8276_v26 = vld [vmem:[#allocation4 + $0xc0] sm:$0xff] }
0x2f2b   :  { %15788 = vmatpush1.bf16.msra.mxu1 %v15787_v25  ;;  %15782 = vmatprep.subr.bf16.mxu0 %v15781_v57  ;;  %v8613_v25 = vld [vmem:[#allocation7 + $0x318] sm:$0xff]  ;;  %v8631_v57 = vld [vmem:[#allocation7 + $0x3a8] sm:$0xff] }
0x2f2f   :  { %v8076_v7 = vld [vmem:[#allocation3 + $0x18] sm:$0xff] }
0x2f30   :  { %v8075_v54 = vld [vmem:[#allocation3 + $0x10] sm:$0xff] }
0x2f31   :  { %15070 = vmatprep.mubr.msk.f32.mxu1 %vm206_vm6, %v8075_v54  ;;  %v8280_v54 = vld [vmem:[#allocation4 + $0xe0] sm:$0xff] }
0x2f32   :  { %15071 = vmatmul.mubr.msk.f32.gmra.mrb[88].mxu1 %vm206_vm6, %v8076_v7  ;;  %v15789_v7 = vpack.c.bf16 %v8283_v53, %v8279_v59  ;;  %v8630_v59 = vld [vmem:[#allocation7 + $0x3a0] sm:$0xff] }
0x2f33   :  { %8472 = vmatprep.mubr.f32.mxu1 %v17283_v11 }
0x2f34   :  { %15790 = vmatprep.subr.bf16.mxu1 %v15789_v7 }
0x2ffd   :  { %v15069_v28 = vpop.f32.mrb[86].mxu1 }
0x2ffe   :  { %v8174_v32 = vadd.f32 %v15069_v28, %v13688_v12  ;;  %v8168_v55 = vpop.f32.mrb[87].mxu1  ;;  %v8278_v28 = vld [vmem:[#allocation4 + $0xd0] sm:$0xff] }
0x2fff   :  { %v8169_v43 = vadd.f32 %v13688_v12, %v8168_v55 }
0x3000   :  { %v8188_v15 = vadd.f32 %v8174_v32, %v18195_v16  ;;  %v8282_v32 = vld [vmem:[#allocation4 + $0xf0] sm:$0xff] }
0x3001   :  { %v8187_v45 = vadd.f32 %v8169_v43, %v18191_v1  ;;  %v15791_v55 = vpack.c.bf16 %v8282_v32, %v8278_v28  ;;  %v8594_v43 = vld [vmem:[#allocation7 + $0x280] sm:$0xff]  ;;  %v8583_v32 = vld [vmem:[#allocation7 + $0x228] sm:$0xff] }
0x3002   :  { %v8198_v38 = vsel %vm206_vm6, %v8188_v15, 0.0  ;;  %v8582_v28 = vld [vmem:[#allocation7 + $0x220] sm:$0xff] }
0x3003   :  { %8199 = vadd.xlane.f32.xlu1 %v8198_v38  ;;  %v8195_v39 = vsel %vm206_vm6, %v8187_v45, 0.0  ;;  %15792 = vmatpush1.bf16.msra.mxu1 %v15791_v55  ;;  %v15801_v55 = vpack.c.bf16 %v8599_v61, %v8598_v27  ;;  %v8620_v27 = vld [vmem:[#allocation7 + $0x350] sm:$0xff]  ;;  %v8621_v61 = vld [vmem:[#allocation7 + $0x358] sm:$0xff] }
0x3004   :  { %8196 = vadd.xlane.f32.xlu0 %v8195_v39  ;;  %v8627_v39 = vld [vmem:[#allocation7 + $0x388] sm:$0xff] }
0x3005   :  { %v15072_v40 = vpop.f32.mrb[88].mxu1 }
0x3006   :  { %v8178_v50 = vpop.f32.mrb[89].mxu1  ;;  %v8184_v20 = vadd.f32 %v15072_v40, %v13688_v12 }
0x3007   :  { %v8179_v23 = vadd.f32 %v13688_v12, %v8178_v50  ;;  %v15783_v12 = vpack.c.bf16 %v8280_v54, %v8276_v26 }
0x3008   :  { %v8190_v56 = vadd.f32 %v8184_v20, %v18203_v19 }
0x3009   :  { %v8189_v22 = vadd.f32 %v8179_v23, %v18199_v60  ;;  %15784 = vmatpush1.bf16.msra.mxu0 %v15783_v12  ;;  %v15831_v12 = vpack.c.bf16 %v8613_v25, %v8612_v10 }
0x300a   :  { %v8204_v16 = vsel %vm206_vm6, %v8190_v56, 0.0 }
0x300b   :  { %v8201_v6 = vsel %vm206_vm6, %v8189_v22, 0.0 }
0x300c   :  { %8202 = vadd.xlane.f32.xlu0 %v8201_v6 }
0x3010   :  { %8205 = vadd.xlane.f32.xlu0 %v8204_v16 }
0x3090   :  { %v8200_v1 = vpop.xlane.xlu1 %8199 }
0x3091   :  { %v8208_v2 = vmul.f32 0.03125, %v8200_v1  ;;  %v8197_v0 = vpop.xlane.xlu0 %8196 }
0x3092   :  { %v8207_v42 = vmul.f32 0.03125, %v8197_v0 }
0x3093   :  { %v18743_v18 = vsub.f32 %v8188_v15, %v8208_v2  ;;  %v8595_v15 = vld [vmem:[#allocation7 + $0x288] sm:$0xff] }
0x3094   :  { %v18745_v9 = vsub.f32 %v8187_v45, %v8207_v42  ;;  %v8626_v45 = vld [vmem:[#allocation7 + $0x380] sm:$0xff]  ;;  %v15793_v38 = vpack.c.bf16 %v8595_v15, %v8594_v43  ;;  %v15833_v43 = vpack.c.bf16 %v8631_v57, %v8630_v59  ;;  %v15847_v59 = vpack.c.bf16 %v8621_v61, %v8620_v27 }
0x3095   :  { %v8216_v48 = vmul.f32 %v18743_v18, %v18743_v18  ;;  %v15825_v40 = vpack.c.bf16 %v8627_v39, %v8626_v45  ;;  %v8614_v15 = vld [vmem:[#allocation7 + $0x320] sm:$0xff]  ;;  %v8615_v45 = vld [vmem:[#allocation7 + $0x328] sm:$0xff]  ;;  %v15803_v39 = vpack.c.bf16 %v8583_v32, %v8582_v28 }
0x3096   :  { %v8215_v60 = vmul.f32 %v18745_v9, %v18745_v9  ;;  %15794 = vmatprep.subr.bf16.mxu0 %v15793_v38  ;;  %v8606_v57 = vld [vmem:[#allocation7 + $0x2e0] sm:$0xff]  ;;  %v8591_v32 = vld [vmem:[#allocation7 + $0x268] sm:$0xff] }
0x3097   :  { %v8222_v19 = vsel %vm206_vm6, %v8216_v48, 0.0  ;;  %15826 = vmatprep.subr.bf16.mxu1 %v15825_v40  ;;  %v8590_v28 = vld [vmem:[#allocation7 + $0x260] sm:$0xff] }
0x3098   :  { %8223 = vadd.xlane.f32.xlu0 %v8222_v19  ;;  %v8219_v46 = vsel %vm206_vm6, %v8215_v60, 0.0 }
0x3099   :  { %8220 = vadd.xlane.f32.xlu1 %v8219_v46  ;;  %v8203_v49 = vpop.xlane.xlu0 %8202  ;;  %v18766_v46 = vld [vmem:[%s19664_s8 + $0x1] ss:$0 sm:$0xff] }
0x309a   :  { %v8209_v5 = vmul.f32 0.03125, %v8203_v49 }
0x309c   :  { %v18753_v8 = vsub.f32 %v8189_v22, %v8209_v5  ;;  %v18772_v5 = vld [vmem:[%s19665_s9 + $0x1] ss:$0 sm:$0xff] }
0x309d   :  { %v8206_v37 = vpop.xlane.xlu0 %8205 }
0x309e   :  { %v8210_v13 = vmul.f32 0.03125, %v8206_v37  ;;  %v8217_v17 = vmul.f32 %v18753_v8, %v18753_v8 }
0x30a0   :  { %v18757_v31 = vsub.f32 %v8190_v56, %v8210_v13  ;;  %v8225_v24 = vsel %vm206_vm6, %v8217_v17, 0.0  ;;  %v8578_v13 = vld [vmem:[#allocation7 + $0x200] sm:$0xff]  ;;  %v8579_v17 = vld [vmem:[#allocation7 + $0x208] sm:$0xff] }
0x30a1   :  { %8226 = vadd.xlane.f32.xlu1 %v8225_v24  ;;  %v8610_v24 = vld [vmem:[#allocation7 + $0x300] sm:$0xff]  ;;  %v15795_v33 = vpack.c.bf16 %v8579_v17, %v8578_v13  ;;  %v8635_v17 = vld [vmem:[#allocation7 + $0x3c8] sm:$0xff] }
0x30a2   :  { %v8218_v30 = vmul.f32 %v18757_v31, %v18757_v31 }
0x30a4   :  { %v8228_v21 = vsel %vm206_vm6, %v8218_v30, 0.0  ;;  %v8611_v30 = vld [vmem:[#allocation7 + $0x308] sm:$0xff] }
0x30a5   :  { %8229 = vadd.xlane.f32.xlu0 %v8228_v21  ;;  %v8596_v21 = vld [vmem:[#allocation7 + $0x290] sm:$0xff]  ;;  %v15827_v35 = vpack.c.bf16 %v8611_v30, %v8610_v24  ;;  %v8586_v24 = vld [vmem:[#allocation7 + $0x240] sm:$0xff]  ;;  %v8587_v30 = vld [vmem:[#allocation7 + $0x248] sm:$0xff] }
0x30a6   :  { %v15797_v44 = vpack.c.bf16 %v8597_v29, %v8596_v21  ;;  %v8618_v29 = vld [vmem:[#allocation7 + $0x340] sm:$0xff] }
0x30a7   :  { %v15843_v58 = vpack.c.bf16 %v8619_v14, %v8618_v29 }
0x3125   :  { %v8224_v50 = vpop.xlane.xlu0 %8223 }
0x3126   :  { %v8232_v20 = vmul.f32 0.03125, %v8224_v50  ;;  %v8221_v23 = vpop.xlane.xlu1 %8220 }
0x3127   :  { %v8231_v22 = vmul.f32 0.03125, %v8221_v23 }
0x3128   :  { %v8236_v56 = vadd.f32 1e-05, %v8232_v20  ;;  %v15835_v20 = vpack.c.bf16 %v8615_v45, %v8614_v15  ;;  %v8622_v15 = vld [vmem:[#allocation7 + $0x360] sm:$0xff]  ;;  %v8623_v45 = vld [vmem:[#allocation7 + $0x368] sm:$0xff] }
0x3129   :  { %v8235_v6 = vadd.f32 1e-05, %v8231_v22 }
0x312a   :  { %16945 = vrsqrt.f32 %v8236_v56  ;;  %v8601_v56 = vld [vmem:[#allocation7 + $0x2b8] sm:$0xff] }
0x312b   :  { %16947 = vrsqrt.f32 %v8235_v6  ;;  %v8632_v6 = vld [vmem:[#allocation7 + $0x3b0] sm:$0xff] }
0x312e   :  { %v8227_v16 = vpop.xlane.xlu1 %8226 }
0x312f   :  { %v8233_v1 = vmul.f32 0.03125, %v8227_v16 }
0x3131   :  { %v8237_v2 = vadd.f32 1e-05, %v8233_v1  ;;  %v8633_v1 = vld [vmem:[#allocation7 + $0x3b8] sm:$0xff] }
0x3132   :  { %v8230_v0 = vpop.xlane.xlu0 %8229 }
0x3133   :  { %16949 = vrsqrt.f32 %v8237_v2  ;;  %v8234_v42 = vmul.f32 0.03125, %v8230_v0  ;;  %v8584_v2 = vld [vmem:[#allocation7 + $0x230] sm:$0xff]  ;;  %v8585_v0 = vld [vmem:[#allocation7 + $0x238] sm:$0xff] }
0x3134   :  { %v16946_v48 = vpop.eup %16945 }
0x3135   :  { %v16948_v60 = vpop.eup %16947  ;;  %v8238_v19 = vadd.f32 1e-05, %v8234_v42  ;;  %v8244_v37 = vmul.f32 %v16946_v48, %v18743_v18  ;;  %v8581_v18 = vld [vmem:[#allocation7 + $0x218] sm:$0xff]  ;;  %v15837_v42 = vpack.c.bf16 %v8633_v1, %v8632_v6  ;;  %v15807_v48 = vpack.c.bf16 %v8585_v0, %v8584_v2  ;;  %v8624_v1 = vld [vmem:[#allocation7 + $0x370] sm:$0xff] }
0x3136   :  { %v8243_v49 = vmul.f32 %v16948_v60, %v18745_v9  ;;  %v15799_v26 = vpack.c.bf16 %v8581_v18, %v8580_v41  ;;  %v8616_v60 = vld [vmem:[#allocation7 + $0x330] sm:$0xff]  ;;  %v8637_v18 = vld [vmem:[#allocation7 + $0x3d8] sm:$0xff] }
0x3137   :  { %16951 = vrsqrt.f32 %v8238_v19  ;;  %v8254_v34 = vmul.f32 %v18766_v46, %v8244_v37  ;;  %v8617_v19 = vld [vmem:[#allocation7 + $0x338] sm:$0xff]  ;;  %v8634_v37 = vld [vmem:[#allocation7 + $0x3c0] sm:$0xff] }
0x3138   :  { %v8253_v3 = vmul.f32 %v18766_v46, %v8243_v49  ;;  %v8602_v49 = vld [vmem:[#allocation7 + $0x2c0] sm:$0xff]  ;;  %v15841_v21 = vpack.c.bf16 %v8635_v17, %v8634_v37  ;;  %v8625_v2 = vld [vmem:[#allocation7 + $0x378] sm:$0xff] }
0x3139   :  { %v18787_v54 = vadd.f32 %v18772_v5, %v8254_v34  ;;  %v8604_v34 = vld [vmem:[#allocation7 + $0x2d0] sm:$0xff]  ;;  %v15855_v0 = vpack.c.bf16 %v8625_v2, %v8624_v1 }
0x313a   :  { %v18777_v9 = vadd.f32 %v18772_v5, %v8253_v3  ;;  %v15811_v3 = vpack.c.bf16 %v8587_v30, %v8586_v24 }
0x313c   :  { %13698 = vmatmul.mubr.msk.f32.vlgmr.msra.gmra.mrb[88].mxu0 %vm206_vm6, %v18777_v9  ;;  %13702 = vmatmul.mubr.msk.f32.vlgmr.msra.gmra.mrb[90].mxu1 %vm206_vm6, %v18777_v9 }
0x313d   :  { %v16950_v53 = vpop.eup %16949  ;;  %8389 = vmatprep.mubr.f32.mxu0 %v17283_v11  ;;  %8478 = vmatprep.mubr.f32.mxu1 %v17283_v11 }
0x313e   :  { %v8245_v7 = vmul.f32 %v16950_v53, %v18753_v8  ;;  %15796 = vmatpush3.bf16.msra.mxu0 %v15795_v33  ;;  %15828 = vmatpush3.bf16.msra.mxu1 %v15827_v35  ;;  %v8605_v33 = vld [vmem:[#allocation7 + $0x2d8] sm:$0xff]  ;;  %v8636_v35 = vld [vmem:[#allocation7 + $0x3d0] sm:$0xff]  ;;  %v8607_v53 = vld [vmem:[#allocation7 + $0x2e8] sm:$0xff] }
0x313f   :  { %15798 = vmatprep.subr.bf16.mxu0 %v15797_v44  ;;  %15830 = vmatprep.subr.bf16.mxu1 %v15829_v4  ;;  %v15813_v41 = vpack.c.bf16 %v8605_v33, %v8604_v34  ;;  %v8588_v44 = vld [vmem:[#allocation7 + $0x250] sm:$0xff]  ;;  %v8589_v4 = vld [vmem:[#allocation7 + $0x258] sm:$0xff]  ;;  %v15845_v10 = vpack.c.bf16 %v8637_v18, %v8636_v35 }
0x3140   :  { %13699 = vmatmul.mubr.msk.f32.gmra.mrb[90].mxu0 %vm206_vm6, %v18787_v54  ;;  %13703 = vmatmul.mubr.msk.f32.gmra.mrb[92].mxu1 %vm206_vm6, %v18787_v54  ;;  %v8255_v38 = vmul.f32 %v18766_v46, %v8245_v7  ;;  %v15815_v25 = vpack.c.bf16 %v8589_v4, %v8588_v44  ;;  %v15817_v7 = vpack.c.bf16 %v8607_v53, %v8606_v57 }
0x3141   :  { %v16952_v8 = vpop.eup %16951  ;;  %8395 = vmatprep.mubr.f32.mxu0 %v17283_v11  ;;  %8484 = vmatprep.mubr.f32.mxu1 %v17283_v11 }
0x3142   :  { %v18798_v40 = vadd.f32 %v18772_v5, %v8255_v38  ;;  %v8246_v50 = vmul.f32 %v16952_v8, %v18757_v31  ;;  %15800 = vmatpush3.bf16.msra.mxu0 %v15799_v26  ;;  %15832 = vmatpush3.bf16.msra.mxu1 %v15831_v12  ;;  %v8600_v31 = vld [vmem:[#allocation7 + $0x2b0] sm:$0xff]  ;;  %v8638_v26 = vld [vmem:[#allocation7 + $0x3e0] sm:$0xff]  ;;  %v8639_v12 = vld [vmem:[#allocation7 + $0x3e8] sm:$0xff]  ;;  %v15851_v38 = vpack.c.bf16 %v8623_v45, %v8622_v15 }
0x3143   :  { %15802 = vmatprep.subr.bf16.mxu0 %v15801_v55  ;;  %15834 = vmatprep.subr.bf16.mxu1 %v15833_v43  ;;  %v15805_v16 = vpack.c.bf16 %v8601_v56, %v8600_v31  ;;  %v15849_v55 = vpack.c.bf16 %v8639_v12, %v8638_v26  ;;  %v15819_v43 = vpack.c.bf16 %v8591_v32, %v8590_v28  ;;  %v8608_v8 = vld [vmem:[#allocation7 + $0x2f0] sm:$0xff]  ;;  %v8593_v56 = vld [vmem:[#allocation7 + $0x278] sm:$0xff] }
0x3144   :  { %13700 = vmatmul.mubr.msk.f32.gmra.mrb[92].mxu0 %vm206_vm6, %v18798_v40  ;;  %13704 = vmatmul.mubr.msk.f32.gmra.mrb[94].mxu1 %vm206_vm6, %v18798_v40  ;;  %v8256_v23 = vmul.f32 %v18766_v46, %v8246_v50  ;;  %v15839_v46 = vpack.c.bf16 %v8617_v19, %v8616_v60  ;;  %v8640_v50 = vld [vmem:[#allocation7 + $0x3f0] sm:$0xff] }
0x3145   :  { %8401 = vmatprep.mubr.f32.mxu0 %v17283_v11  ;;  %8490 = vmatprep.mubr.f32.mxu1 %v17283_v11  ;;  %v8592_v31 = vld [vmem:[#allocation7 + $0x270] sm:$0xff] }
0x3146   :  { %v18809_v22 = vadd.f32 %v18772_v5, %v8256_v23  ;;  %15804 = vmatpush3.bf16.msra.mxu0 %v15803_v39  ;;  %15836 = vmatpush3.bf16.msra.mxu1 %v15835_v20  ;;  %v8603_v5 = vld [vmem:[#allocation7 + $0x2c8] sm:$0xff]  ;;  %v8609_v39 = vld [vmem:[#allocation7 + $0x2f8] sm:$0xff] }
0x3147   :  { %15806 = vmatprep.subr.bf16.mxu0 %v15805_v16  ;;  %15838 = vmatprep.subr.bf16.mxu1 %v15837_v42  ;;  %v15809_v13 = vpack.c.bf16 %v8603_v5, %v8602_v49  ;;  %v15821_v20 = vpack.c.bf16 %v8609_v39, %v8608_v8  ;;  %v8641_v23 = vld [vmem:[#allocation7 + $0x3f8] sm:$0xff]  ;;  %v15823_v16 = vpack.c.bf16 %v8593_v56, %v8592_v31 }
0x3148   :  { %13701 = vmatmul.mubr.msk.f32.gmra.mrb[94].mxu0 %vm206_vm6, %v18809_v22  ;;  %13705 = vmatmul.mubr.msk.f32.gmra.mrb[96].mxu1 %vm206_vm6, %v18809_v22  ;;  %v15853_v6 = vpack.c.bf16 %v8641_v23, %v8640_v50  ;;  %v13697_v42 = vld [vmem:[%s19669_s13 + $0x4] sm:$0xf] }
0x3149   :  { %v8298_v60 = vrot.slane %v13697_v42, %v18121_v52  ;;  %v8294_v19 = vrot.slane %v13697_v42, %v18126_v62 }
0x314a   :  { %15808 = vmatpush3.bf16.msra.mxu0 %v15807_v48  ;;  %15840 = vmatpush3.bf16.msra.mxu1 %v15839_v46  ;;  %v8290_v48 = vrot.slane %v13697_v42, %v18119_v51  ;;  %v8302_v46 = vrot.slane %v13697_v42, %v18128_v63 }
0x314b   :  { %15810 = vmatprep.subr.bf16.mxu0 %v15809_v13  ;;  %15842 = vmatprep.subr.bf16.mxu1 %v15841_v21 }
0x314e   :  { %15812 = vmatpush3.bf16.msra.mxu0 %v15811_v3  ;;  %15844 = vmatpush3.bf16.msra.mxu1 %v15843_v58 }
0x314f   :  { %15814 = vmatprep.subr.bf16.mxu0 %v15813_v41  ;;  %15846 = vmatprep.subr.bf16.mxu1 %v15845_v10 }
0x3152   :  { %15816 = vmatpush3.bf16.msra.mxu0 %v15815_v25  ;;  %15848 = vmatpush3.bf16.msra.mxu1 %v15847_v59 }
0x3153   :  { %15818 = vmatprep.subr.bf16.mxu0 %v15817_v7  ;;  %15850 = vmatprep.subr.bf16.mxu1 %v15849_v55 }
0x3156   :  { %15820 = vmatpush3.bf16.msra.mxu0 %v15819_v43  ;;  %15852 = vmatpush3.bf16.msra.mxu1 %v15851_v38 }
0x3157   :  { %15822 = vmatprep.subr.bf16.mxu0 %v15821_v20  ;;  %15854 = vmatprep.subr.bf16.mxu1 %v15853_v6 }
0x315a   :  { %15824 = vmatpush3.bf16.msra.mxu0 %v15823_v16  ;;  %15856 = vmatpush3.bf16.msra.mxu1 %v15855_v0 }
0x320f   :  { %v8385_v49 = vpop.f32.mrb[88].mxu0  ;;  %v8474_v5 = vpop.f32.mrb[90].mxu1 }
0x3210   :  { %v8386_v37 = vadd.f32 %v8385_v49, %v8290_v48  ;;  %v18822_v13 = vadd.f32 %v8474_v5, %v8298_v60  ;;  %v8387_v17 = vpop.f32.mrb[89].mxu0  ;;  %v8476_v24 = vpop.f32.mrb[91].mxu1 }
0x3211   :  { %v8388_v30 = vadd.f32 %v8387_v17, %v8294_v19  ;;  %v8477_v21 = vadd.f32 %v8476_v24, %v8302_v46 }
0x3212   :  { %v8513_v3 = vmul.f32 0.70710677, %v8386_v37  ;;  %v8515_v29 = vmul.f32 0.70710677, %v18822_v13  ;;  %v8497_v42 = vmul.f32 0.5, %v8386_v37 }
0x3213   :  { %v8514_v14 = vmul.f32 0.70710677, %v8388_v30  ;;  %v8516_v58 = vmul.f32 0.70710677, %v8477_v21  ;;  %v8391_v34 = vpop.f32.mrb[90].mxu0  ;;  %v8480_v33 = vpop.f32.mrb[92].mxu1 }
0x3214   :  { %16953 = verf.f32 %v8513_v3  ;;  %v18825_v35 = vadd.f32 %v8391_v34, %v8290_v48  ;;  %v18827_v41 = vadd.f32 %v8480_v33, %v8298_v60  ;;  %v8393_v18 = vpop.f32.mrb[91].mxu0  ;;  %v8482_v44 = vpop.f32.mrb[93].mxu1  ;;  %v8498_v24 = vmul.f32 0.5, %v8388_v30 }
0x3215   :  { %16955 = verf.f32 %v8515_v29  ;;  %v18829_v4 = vadd.f32 %v8393_v18, %v8294_v19  ;;  %v18831_v10 = vadd.f32 %v8482_v44, %v8302_v46 }
0x3216   :  { %16957 = verf.f32 %v8514_v14  ;;  %v8517_v25 = vmul.f32 0.70710677, %v18825_v35  ;;  %v8519_v59 = vmul.f32 0.70710677, %v18827_v41 }
0x3217   :  { %16959 = verf.f32 %v8516_v58  ;;  %v8397_v27 = vpop.f32.mrb[92].mxu0  ;;  %v8486_v61 = vpop.f32.mrb[94].mxu1  ;;  %v8518_v57 = vmul.f32 0.70710677, %v18829_v4  ;;  %v8520_v53 = vmul.f32 0.70710677, %v18831_v10 }
0x3218   :  { %16961 = verf.f32 %v8517_v25  ;;  %v18837_v26 = vadd.f32 %v8397_v27, %v8290_v48  ;;  %v18839_v7 = vadd.f32 %v8486_v61, %v8298_v60  ;;  %v8399_v12 = vpop.f32.mrb[93].mxu0  ;;  %v8488_v28 = vpop.f32.mrb[95].mxu1  ;;  %v8502_v61 = vmul.f32 0.5, %v18829_v4 }
0x3219   :  { %16963 = verf.f32 %v8519_v59  ;;  %v18841_v32 = vadd.f32 %v8399_v12, %v8294_v19  ;;  %v18843_v55 = vadd.f32 %v8488_v28, %v8302_v46 }
0x321a   :  { %16965 = verf.f32 %v8518_v57  ;;  %v8521_v43 = vmul.f32 0.70710677, %v18837_v26  ;;  %v8523_v38 = vmul.f32 0.70710677, %v18839_v7  ;;  %v8501_v57 = vmul.f32 0.5, %v18825_v35 }
0x321b   :  { %v8403_v15 = vpop.f32.mrb[94].mxu0  ;;  %v8492_v45 = vpop.f32.mrb[96].mxu1  ;;  %16967 = verf.f32 %v8520_v53  ;;  %v8522_v8 = vmul.f32 0.70710677, %v18841_v32  ;;  %v8524_v50 = vmul.f32 0.70710677, %v18843_v55 }
0x321c   :  { %v8405_v39 = vpop.f32.mrb[95].mxu0  ;;  %16969 = verf.f32 %v8521_v43  ;;  %v18849_v20 = vadd.f32 %v8403_v15, %v8290_v48  ;;  %v8494_v23 = vpop.f32.mrb[97].mxu1  ;;  %v18851_v56 = vadd.f32 %v8492_v45, %v8298_v60  ;;  %v8500_v60 = vmul.f32 0.5, %v8477_v21 }
0x321d   :  { %16971 = verf.f32 %v8523_v38  ;;  %v18853_v6 = vadd.f32 %v8405_v39, %v8294_v19  ;;  %v18856_v2 = vadd.f32 %v8494_v23, %v8302_v46  ;;  %v8499_v46 = vmul.f32 0.5, %v18822_v13 }
0x321e   :  { %v16954_v31 = vpop.eup %16953  ;;  %16973 = verf.f32 %v8522_v8  ;;  %v8525_v1 = vmul.f32 0.70710677, %v18849_v20  ;;  %v8527_v48 = vmul.f32 0.70710677, %v18851_v56  ;;  %v8504_v53 = vmul.f32 0.5, %v18831_v10 }
0x321f   :  { %v16956_v16 = vpop.eup %16955  ;;  %v8545_v49 = vadd.f32 1.0, %v16954_v31  ;;  %16975 = verf.f32 %v8524_v50  ;;  %v8526_v29 = vmul.f32 0.70710677, %v18853_v6  ;;  %v8528_v58 = vmul.f32 0.70710677, %v18856_v2 }
0x3220   :  { %v16958_v0 = vpop.eup %16957  ;;  %v8547_v17 = vadd.f32 1.0, %v16956_v16  ;;  %16977 = verf.f32 %v8525_v1  ;;  %v8503_v43 = vmul.f32 0.5, %v18827_v41  ;;  %v8506_v23 = vmul.f32 0.5, %v18841_v32 }
0x3221   :  { %v16960_v5 = vpop.eup %16959  ;;  %v8546_v3 = vadd.f32 1.0, %v16958_v0  ;;  %16979 = verf.f32 %v8527_v48  ;;  %v8561_v33 = vmul.f32 %v8545_v49, %v8497_v42  ;;  %v8505_v10 = vmul.f32 0.5, %v18837_v26 }
0x3222   :  { %v8548_v19 = vadd.f32 1.0, %v16960_v5  ;;  %v16962_v14 = vpop.eup %16961  ;;  %16981 = verf.f32 %v8526_v29  ;;  %v8563_v25 = vmul.f32 %v8547_v17, %v8499_v46  ;;  %v8508_v1 = vmul.f32 0.5, %v18843_v55 }
0x3223   :  { %v8562_v37 = vmul.f32 %v8546_v3, %v8498_v24  ;;  %v16964_v34 = vpop.eup %16963  ;;  %v8549_v30 = vadd.f32 1.0, %v16962_v14  ;;  %16983 = verf.f32 %v8528_v58  ;;  %v8507_v42 = vmul.f32 0.5, %v18839_v7 }
0x3224   :  { %v8564_v18 = vmul.f32 %v8548_v19, %v8500_v60  ;;  %v16966_v44 = vpop.eup %16965  ;;  %v8551_v27 = vadd.f32 1.0, %v16964_v34  ;;  %v8510_v26 = vmul.f32 0.5, %v18853_v6  ;;  %v8509_v55 = vmul.f32 0.5, %v18849_v20  ;;  %v13707_v20 = vld [vmem:[%s19671_s15 + $0x1] ss:$0 sm:$0xff] }
0x3225   :  { %8714 = vmatprep.mubr.f32.mxu0 %v8562_v37  ;;  %v16968_v21 = vpop.eup %16967  ;;  %v8550_v59 = vadd.f32 1.0, %v16966_v44  ;;  %v8565_v39 = vmul.f32 %v8549_v30, %v8501_v57  ;;  %v8512_v29 = vmul.f32 0.5, %v18856_v2  ;;  %v8511_v14 = vmul.f32 0.5, %v18851_v56 }
0x3226   :  { %8799 = vmatprep.mubr.f32.mxu1 %v8564_v18  ;;  %8715 = vmatmul.mubr.f32.vlgmr.msra.gmra.mrb[96].mxu0 %v8561_v33  ;;  %v16970_v13 = vpop.eup %16969  ;;  %v8552_v12 = vadd.f32 1.0, %v16968_v21  ;;  %v8567_v16 = vmul.f32 %v8551_v27, %v8503_v43 }
0x3227   :  { %8800 = vmatmul.mubr.f32.vlgmr.msra.gmra.mrb[98].mxu1 %v8563_v25  ;;  %v16972_v28 = vpop.eup %16971  ;;  %v8566_v15 = vmul.f32 %v8550_v59, %v8502_v61  ;;  %v8553_v38 = vadd.f32 1.0, %v16970_v13 }
0x3228   :  { %v16974_v45 = vpop.eup %16973  ;;  %v8568_v8 = vmul.f32 %v8552_v12, %v8504_v53  ;;  %v8555_v4 = vadd.f32 1.0, %v16972_v28 }
0x3229   :  { %v16976_v50 = vpop.eup %16975  ;;  %v8554_v31 = vadd.f32 1.0, %v16974_v45  ;;  %8719 = vmatprep.mubr.f32.mxu0 %v8566_v15  ;;  %v8569_v5 = vmul.f32 %v8553_v38, %v8505_v10 }
0x322a   :  { %v16978_v35 = vpop.eup %16977  ;;  %v8556_v0 = vadd.f32 1.0, %v16976_v50  ;;  %8804 = vmatprep.mubr.f32.mxu1 %v8568_v8  ;;  %8720 = vmatmul.mubr.f32.gmra.mrb[98].mxu0 %v8565_v39  ;;  %v8571_v24 = vmul.f32 %v8555_v4, %v8507_v42 }
0x322b   :  { %v16980_v41 = vpop.eup %16979  ;;  %8805 = vmatmul.mubr.f32.gmra.mrb[100].mxu1 %v8567_v16  ;;  %v8570_v49 = vmul.f32 %v8554_v31, %v8506_v23  ;;  %v8557_v32 = vadd.f32 1.0, %v16978_v35 }
0x322c   :  { %v8572_v48 = vmul.f32 %v8556_v0, %v8508_v1  ;;  %v16982_v17 = vpop.eup %16981  ;;  %v8559_v60 = vadd.f32 1.0, %v16980_v41 }
0x322d   :  { %8724 = vmatprep.mubr.f32.mxu0 %v8570_v49  ;;  %v16984_v3 = vpop.eup %16983  ;;  %v8558_v19 = vadd.f32 1.0, %v16982_v17  ;;  %v8573_v37 = vmul.f32 %v8557_v32, %v8509_v55 }
0x322e   :  { %8809 = vmatprep.mubr.f32.mxu1 %v8572_v48  ;;  %8725 = vmatmul.mubr.f32.gmra.mrb[100].mxu0 %v8569_v5  ;;  %v8560_v7 = vadd.f32 1.0, %v16984_v3  ;;  %v8575_v34 = vmul.f32 %v8559_v60, %v8511_v14 }
0x322f   :  { %8810 = vmatmul.mubr.f32.gmra.mrb[102].mxu1 %v8571_v24  ;;  %v8574_v46 = vmul.f32 %v8558_v19, %v8510_v26 }
0x3230   :  { %v8576_v58 = vmul.f32 %v8560_v7, %v8512_v29 }
0x3231   :  { %8729 = vmatprep.mubr.f32.mxu0 %v8574_v46 }
0x3232   :  { %8814 = vmatprep.mubr.f32.mxu1 %v8576_v58  ;;  %8730 = vmatmul.mubr.f32.gmra.mrb[102].mxu0 %v8573_v37 }
0x3233   :  { %8815 = vmatmul.mubr.f32.gmra.mrb[104].mxu1 %v8575_v34 }
0x32f9   :  { %v14266_v6 = vpop.f32.mrb[96].mxu0 }
0x32fa   :  { %v14310_v33 = vpop.f32.mrb[98].mxu1  ;;  %v14267_v18 = vpop.f32.mrb[97].mxu0 }
0x32fb   :  { %v14268_v2 = vadd.f32 %v14267_v18, %v14266_v6  ;;  %v14311_v44 = vpop.f32.mrb[99].mxu1 }
0x32fc   :  { %v14312_v25 = vadd.f32 %v14311_v44, %v14310_v33  ;;  %v13713_v44 = vld [vmem:[%s19775_s4 + $0x48] sm:$0xff] }
0x32fd   :  { %v8717_v30 = vadd.f32 %v14268_v2, %v13707_v20  ;;  %v14269_v56 = vpop.f32.mrb[98].mxu0  ;;  %v13712_v2 = vld [vmem:[%s19775_s4 + $0x40] sm:$0xff] }
0x32fe   :  { %v14313_v27 = vpop.f32.mrb[100].mxu1  ;;  %v14270_v61 = vpop.f32.mrb[99].mxu0 }
0x32ff   :  { %v8802_v21 = vadd.f32 %v14312_v25, %v8717_v30  ;;  %v14271_v59 = vadd.f32 %v14270_v61, %v14269_v56  ;;  %v14314_v13 = vpop.f32.mrb[101].mxu1  ;;  %v15857_v25 = vpack.c.bf16 %v13713_v44, %v13712_v2  ;;  %v13714_v30 = vld [vmem:[%s19775_s4 + $0x50] sm:$0xff]  ;;  %v13715_v56 = vld [vmem:[%s19775_s4 + $0x58] sm:$0xff] }
0x3300   :  { %v14315_v57 = vadd.f32 %v14314_v13, %v14313_v27 }
0x3301   :  { %v8820_v53 = vadd.f32 %v8802_v21, %v18777_v9  ;;  %v8722_v12 = vadd.f32 %v14271_v59, %v13707_v20  ;;  %v14272_v28 = vpop.f32.mrb[100].mxu0  ;;  %15858 = vmatprep.subr.bf16.mxu0 %v15857_v25  ;;  %v15861_v21 = vpack.c.bf16 %v13715_v56, %v13714_v30 }
0x3302   :  { %v14316_v43 = vpop.f32.mrb[102].mxu1  ;;  %v14273_v15 = vpop.f32.mrb[101].mxu0  ;;  %15860 = vmatpush3.bf16.msra.mxu0 %v15857_v25 }
0x3303   :  { %v8828_v45 = vsel %vm206_vm6, %v8820_v53, 0.0  ;;  %v8807_v38 = vadd.f32 %v14315_v57, %v8722_v12  ;;  %v14274_v8 = vadd.f32 %v14273_v15, %v14272_v28  ;;  %v14317_v39 = vpop.f32.mrb[103].mxu1  ;;  %15862 = vmatprep.subr.bf16.mxu0 %v15861_v21 }
0x3304   :  { %8829 = vadd.xlane.f32.xlu1 %v8828_v45  ;;  %v14318_v50 = vadd.f32 %v14317_v39, %v14316_v43 }
0x3305   :  { %v8727_v4 = vadd.f32 %v14274_v8, %v13707_v20  ;;  %v8821_v23 = vadd.f32 %v8807_v38, %v18787_v54  ;;  %v14275_v31 = vpop.f32.mrb[102].mxu0  ;;  %v13710_v8 = vld [vmem:[%s19666_s10 + $0x1] ss:$0 sm:$0xff] }
0x3306   :  { %v14319_v35 = vpop.f32.mrb[104].mxu1  ;;  %v14276_v10 = vpop.f32.mrb[103].mxu0  ;;  %15864 = vmatpush3.bf16.msra.mxu0 %v15861_v21 }
0x3307   :  { %v8812_v16 = vadd.f32 %v14318_v50, %v8727_v4  ;;  %v8831_v9 = vsel %vm206_vm6, %v8821_v23, 0.0  ;;  %v14277_v1 = vadd.f32 %v14276_v10, %v14275_v31  ;;  %v14320_v0 = vpop.f32.mrb[105].mxu1  ;;  %v13711_v4 = vld [vmem:[%s19667_s11 + $0x1] ss:$0 sm:$0xff] }
0x3308   :  { %8832 = vadd.xlane.f32.xlu0 %v8831_v9  ;;  %v14321_v41 = vadd.f32 %v14320_v0, %v14319_v35 }
0x3309   :  { %v8822_v42 = vadd.f32 %v8812_v16, %v18798_v40  ;;  %v8732_v49 = vadd.f32 %v14277_v1, %v13707_v20 }
0x330b   :  { %v8834_v48 = vsel %vm206_vm6, %v8822_v42, 0.0  ;;  %v8817_v5 = vadd.f32 %v14321_v41, %v8732_v49 }
0x330c   :  { %8835 = vadd.xlane.f32.xlu1 %v8834_v48 }
0x330d   :  { %v8823_v17 = vadd.f32 %v8817_v5, %v18809_v22 }
0x330f   :  { %v8837_v54 = vsel %vm206_vm6, %v8823_v17, 0.0 }
0x3310   :  { %8838 = vadd.xlane.f32.xlu0 %v8837_v54  ;;  %v13717_v54 = vld [vmem:[%s19778_s29 + $0x2] ss:$0 sm:$0xff]  ;;  %s19810_s29 = smov 64  }
0x3391   :  { %v8830_v32 = vpop.xlane.xlu1 %8829 }
0x3392   :  { %v8840_v24 = vmul.f32 0.03125, %v8830_v32 }
0x3394   :  { %v8844_v3 = vsub.f32 %v8820_v53, %v8840_v24 }
0x3395   :  { %v8833_v60 = vpop.xlane.xlu0 %8832 }
0x3396   :  { %v8848_v26 = vmul.f32 %v8844_v3, %v8844_v3  ;;  %v8841_v19 = vmul.f32 0.03125, %v8833_v60 }
0x3398   :  { %v8852_v55 = vsel %vm206_vm6, %v8848_v26, 0.0  ;;  %v8845_v29 = vsub.f32 %v8821_v23, %v8841_v19 }
0x3399   :  { %8853 = vadd.xlane.f32.xlu1 %v8852_v55  ;;  %v8836_v40 = vpop.xlane.xlu1 %8835 }
0x339a   :  { %v8842_v7 = vmul.f32 0.03125, %v8836_v40  ;;  %v8849_v14 = vmul.f32 %v8845_v29, %v8845_v29 }
0x339c   :  { %v8846_v46 = vsub.f32 %v8822_v42, %v8842_v7  ;;  %v8855_v58 = vsel %vm206_vm6, %v8849_v14, 0.0 }
0x339d   :  { %8856 = vadd.xlane.f32.xlu0 %v8855_v58  ;;  %v8839_v22 = vpop.xlane.xlu0 %8838 }
0x339e   :  { %v8850_v37 = vmul.f32 %v8846_v46, %v8846_v46  ;;  %v8843_v34 = vmul.f32 0.03125, %v8839_v22 }
0x33a0   :  { %v8858_v6 = vsel %vm206_vm6, %v8850_v37, 0.0  ;;  %v8847_v33 = vsub.f32 %v8823_v17, %v8843_v34 }
0x33a1   :  { %8859 = vadd.xlane.f32.xlu1 %v8858_v6 }
0x33a2   :  { %v8851_v20 = vmul.f32 %v8847_v33, %v8847_v33 }
0x33a4   :  { %v8861_v18 = vsel %vm206_vm6, %v8851_v20, 0.0 }
0x33a5   :  { %8862 = vadd.xlane.f32.xlu0 %v8861_v18 }
0x3426   :  { %v8854_v27 = vpop.xlane.xlu1 %8853 }
0x3427   :  { %v8864_v61 = vmul.f32 0.03125, %v8854_v27 }
0x3429   :  { %v8868_v59 = vadd.f32 1e-05, %v8864_v61 }
0x342a   :  { %v8857_v13 = vpop.xlane.xlu0 %8856 }
0x342b   :  { %16985 = vrsqrt.f32 %v8868_v59  ;;  %v8865_v57 = vmul.f32 0.03125, %v8857_v13 }
0x342d   :  { %v8869_v53 = vadd.f32 1e-05, %v8865_v57 }
0x342e   :  { %v8860_v12 = vpop.xlane.xlu1 %8859 }
0x342f   :  { %16987 = vrsqrt.f32 %v8869_v53  ;;  %v8866_v28 = vmul.f32 0.03125, %v8860_v12 }
0x3431   :  { %v8870_v43 = vadd.f32 1e-05, %v8866_v28 }
0x3432   :  { %v8863_v15 = vpop.xlane.xlu0 %8862 }
0x3433   :  { %16989 = vrsqrt.f32 %v8870_v43  ;;  %v8867_v38 = vmul.f32 0.03125, %v8863_v15 }
0x3435   :  { %v16986_v45 = vpop.eup %16985  ;;  %v8871_v50 = vadd.f32 1e-05, %v8867_v38 }
0x3436   :  { %v8876_v39 = vmul.f32 %v16986_v45, %v8844_v3 }
0x3437   :  { %16991 = vrsqrt.f32 %v8871_v50 }
0x3438   :  { %v8886_v23 = vmul.f32 %v13710_v8, %v8876_v39 }
0x3439   :  { %v16988_v31 = vpop.eup %16987 }
0x343a   :  { %v18907_v16 = vadd.f32 %v13711_v4, %v8886_v23  ;;  %v8877_v35 = vmul.f32 %v16988_v31, %v8845_v29 }
0x343c   :  { %15081 = vmatprep.mubr.msk.f32.mxu0 %vm206_vm6, %v18907_v16  ;;  %v8887_v10 = vmul.f32 %v13710_v8, %v8877_v35 }
0x343d   :  { %v16990_v9 = vpop.eup %16989 }
0x343e   :  { %v18911_v1 = vadd.f32 %v13711_v4, %v8887_v10  ;;  %v8878_v0 = vmul.f32 %v16990_v9, %v8846_v46 }
0x3440   :  { %15082 = vmatmul.mubr.msk.f32.vlgmr.msra.gmra.mrb[104].mxu0 %vm206_vm6, %v18911_v1  ;;  %v8888_v41 = vmul.f32 %v13710_v8, %v8878_v0 }
0x3441   :  { %v16992_v42 = vpop.eup %16991 }
0x3442   :  { %v18915_v49 = vadd.f32 %v13711_v4, %v8888_v41  ;;  %v8879_v48 = vmul.f32 %v16992_v42, %v8847_v33 }
0x3444   :  { %15084 = vmatprep.mubr.msk.f32.mxu0 %vm206_vm6, %v18915_v49  ;;  %v8889_v5 = vmul.f32 %v13710_v8, %v8879_v48 }
0x3446   :  { %v18919_v17 = vadd.f32 %v13711_v4, %v8889_v5 }
0x3448   :  { %15085 = vmatmul.mubr.msk.f32.gmra.mrb[106].mxu0 %vm206_vm6, %v18919_v17 }
0x3513   :  { %v15083_v32 = vpop.f32.mrb[104].mxu0 }
0x3514   :  { %v18926_v24 = vadd.f32 %v15083_v32, %v13717_v54  ;;  %v8991_v3 = vpop.f32.mrb[105].mxu0 }
0x3515   :  { %v18928_v60 = vadd.f32 %v13717_v54, %v8991_v3 }
0x3517   :  { %15091 = vmatprep.mubr.msk.f32.mxu1 %vm334_vm7, %v18928_v60  ;;  %v18934_v26 = vpack.i.bf16 %v18926_v24, %v18928_v60 }
0x3519   :  { %16482 = vrot.lane.b32.xlu1 %v18934_v26, %s19809_s17 }
0x351b   :  { %v15086_v19 = vpop.f32.mrb[106].mxu0 }
0x351c   :  { %v18938_v55 = vadd.f32 %v15086_v19, %v13717_v54  ;;  %v9001_v29 = vpop.f32.mrb[107].mxu0 }
0x351d   :  { %v18940_v40 = vadd.f32 %v13717_v54, %v9001_v29 }
0x351f   :  { %15098 = vmatprep.mubr.msk.f32.mxu0 %vm334_vm7, %v18940_v40  ;;  %v18946_v7 = vpack.i.bf16 %v18938_v55, %v18940_v40 }
0x3521   :  { %16487 = vrot.lane.b32.xlu0 %v18946_v7, %s19809_s17 }
0x358b   :  { %v16483_v14 = vpop.permute.xlu1 %16482 }
0x358c   :  { %v16485_v46 = vunpack.i.h.bf16 %v16483_v14  ;;  %v16484_v58 = vunpack.i.l.bf16 %v16483_v14 }
0x358e   :  { %v15865_v22 = vpack.c.bf16 %v16485_v46, %v16484_v58 }
0x3590   :  { %15867 = vmatprep.subr.msk.bf16.mxu1 %vm17534_vm8, %v15865_v22 }
0x3591   :  { %15870 = vmatpush3.bf16.xpose.msk.msra.mxu1 %vm17534_vm8, %v15865_v22 }
0x3593   :  { %v16488_v37 = vpop.permute.xlu0 %16487 }
0x3594   :  { %v16490_v34 = vunpack.i.h.bf16 %v16488_v37  ;;  %v16489_v6 = vunpack.i.l.bf16 %v16488_v37 }
0x3596   :  { %v15871_v33 = vpack.c.bf16 %v16490_v34, %v16489_v6 }
0x3598   :  { %15092 = vmatmul.mubr.msk.f32.vlgmr.msra.gmra.mrb[106].mxu1 %vm334_vm7, %v18926_v24  ;;  %15873 = vmatprep.subr.msk.bf16.mxu0 %vm17534_vm8, %v15871_v33 }
0x3599   :  { %15876 = vmatpush3.bf16.xpose.msk.msra.mxu0 %vm17534_vm8, %v15871_v33 }
0x35a0   :  { %15099 = vmatmul.mubr.msk.f32.vlgmr.msra.gmra.mrb[108].mxu0 %vm334_vm7, %v18938_v55 }
0x366b   :  { %v15093_v20 = vpop.f32.mrb[106].mxu1 }
0x366c   :  { %v9189_v18 = vmul.f32 0.5, %v15093_v20  ;;  %v9090_v2 = vpop.f32.mrb[107].mxu1 }
0x366d   :  { %v9188_v44 = vmul.f32 0.5, %v9090_v2 }
0x366e   :  { %v9193_v25 = vadd.f32 %v9189_v18, %v17551_v47 }
0x366f   :  { %v9192_v30 = vadd.f32 %v9188_v44, %v17551_v47 }
0x3670   :  { %v9199_v56 = vsel %vm515_vm10, %v9193_v25, -inf }
0x3671   :  { %9200 = vmax.xlane.f32.xlu0 %v9199_v56  ;;  %v9196_v21 = vsel %vm515_vm10, %v9192_v30, -inf }
0x3672   :  { %9197 = vmax.xlane.f32.xlu1 %v9196_v21 }
0x3673   :  { %v15100_v27 = vpop.f32.mrb[108].mxu0 }
0x3674   :  { %v9191_v61 = vmul.f32 0.5, %v15100_v27  ;;  %v9179_v59 = vpop.f32.mrb[109].mxu0 }
0x3675   :  { %v9190_v13 = vmul.f32 0.5, %v9179_v59 }
0x3676   :  { %v9195_v57 = vadd.f32 %v9191_v61, %v17551_v47 }
0x3677   :  { %v9194_v53 = vadd.f32 %v9190_v13, %v17551_v47 }
0x3678   :  { %v9205_v12 = vsel %vm515_vm10, %v9195_v57, -inf }
0x3679   :  { %9206 = vmax.xlane.f32.xlu0 %v9205_v12  ;;  %v9202_v28 = vsel %vm515_vm10, %v9194_v53, -inf }
0x367a   :  { %9203 = vmax.xlane.f32.xlu1 %v9202_v28 }
0x36fe   :  { %v9201_v43 = vpop.xlane.xlu0 %9200 }
0x36ff   :  { %v9209_v15 = vsub.f32 %v9193_v25, %v9201_v43  ;;  %v9198_v45 = vpop.xlane.xlu1 %9197 }
0x3700   :  { %v9208_v38 = vsub.f32 %v9192_v30, %v9198_v45 }
0x3701   :  { %v9214_v8 = vmul.f32 1.442695, %v9209_v15 }
0x3702   :  { %v9212_v39 = vmul.f32 1.442695, %v9208_v38 }
0x3703   :  { %16993 = vpow2.f32 %v9214_v8 }
0x3704   :  { %16995 = vpow2.f32 %v9212_v39 }
0x3706   :  { %v9207_v35 = vpop.xlane.xlu0 %9206 }
0x3707   :  { %v9211_v10 = vsub.f32 %v9195_v57, %v9207_v35  ;;  %v9204_v0 = vpop.xlane.xlu1 %9203 }
0x3708   :  { %v9210_v41 = vsub.f32 %v9194_v53, %v9204_v0 }
0x3709   :  { %v9218_v9 = vmul.f32 1.442695, %v9211_v10 }
0x370a   :  { %v9216_v42 = vmul.f32 1.442695, %v9210_v41 }
0x370b   :  { %16997 = vpow2.f32 %v9218_v9 }
0x370c   :  { %16999 = vpow2.f32 %v9216_v42 }
0x370d   :  { %v16994_v50 = vpop.eup %16993 }
0x370e   :  { %v16996_v4 = vpop.eup %16995  ;;  %v9223_v23 = vsel %vm515_vm10, %v16994_v50, 0.0 }
0x370f   :  { %9224 = vadd.xlane.f32.xlu0 %v9223_v23  ;;  %v9220_v31 = vsel %vm515_vm10, %v16996_v4, 0.0 }
0x3710   :  { %9221 = vadd.xlane.f32.xlu1 %v9220_v31 }
0x3715   :  { %v16998_v48 = vpop.eup %16997 }
0x3716   :  { %v9229_v5 = vsel %vm515_vm10, %v16998_v48, 0.0  ;;  %v17000_v54 = vpop.eup %16999 }
0x3717   :  { %v9226_v32 = vsel %vm515_vm10, %v17000_v54, 0.0 }
0x3721   :  { %16492 = vrot.lane.b32.xlu1 %v18934_v26, %s19810_s29 }
0x3725   :  { %16497 = vrot.lane.b32.xlu0 %v18946_v7, %s19810_s29  ;;  %16502 = vrot.lane.b32.xlu1 %v18934_v26, %s19781_s2 }
0x3729   :  { %16507 = vrot.lane.b32.xlu1 %v18946_v7, %s19781_s2  ;;  %s19815_s2 = smov 104  }
0x372d   :  { %9420 = vrot.lane.b32.xlu1 %v18926_v24, %s19782_s14 }
0x3744   :  { %9230 = vadd.xlane.f32.xlu0 %v9229_v5 }
0x3751   :  { %9227 = vadd.xlane.f32.xlu1 %v9226_v32 }
0x375a   :  { %9418 = vrot.lane.b32.xlu0 %v18928_v60, %s19782_s14 }
0x375e   :  { %9509 = vrot.lane.b32.xlu0 %v18940_v40, %s19782_s14 }
0x3762   :  { %9511 = vrot.lane.b32.xlu1 %v18938_v55, %s19782_s14  ;;  %s19816_s14 = smov 40  }
0x379c   :  { %v9225_v3 = vpop.xlane.xlu0 %9224 }
0x379d   :  { %17001 = vrcp.f32 %v9225_v3  ;;  %v9222_v19 = vpop.xlane.xlu1 %9221 }
0x379e   :  { %17003 = vrcp.f32 %v9222_v19 }
0x37a0   :  { %v16498_v29 = vpop.permute.xlu0 %16497 }
0x37a1   :  { %v16500_v14 = vunpack.i.h.bf16 %v16498_v29  ;;  %v16499_v46 = vunpack.i.l.bf16 %v16498_v29  ;;  %v16493_v58 = vpop.permute.xlu1 %16492 }
0x37a2   :  { %v16495_v22 = vunpack.i.h.bf16 %v16493_v58  ;;  %v16494_v37 = vunpack.i.l.bf16 %v16493_v58 }
0x37a3   :  { %v15881_v34 = vpack.c.bf16 %v16500_v14, %v16499_v46 }
0x37a4   :  { %v15877_v6 = vpack.c.bf16 %v16495_v22, %v16494_v37 }
0x37a5   :  { %15882 = vmatprep.subr.bf16.mxu0 %v15881_v34  ;;  %v16503_v33 = vpop.permute.xlu1 %16502 }
0x37a6   :  { %v16505_v20 = vunpack.i.h.bf16 %v16503_v33  ;;  %v16504_v18 = vunpack.i.l.bf16 %v16503_v33  ;;  %15878 = vmatprep.subr.bf16.mxu1 %v15877_v6  ;;  %15884 = vmatpush3.bf16.msra.mxu0 %v15881_v34 }
0x37a7   :  { %v17002_v2 = vpop.eup %17001  ;;  %15880 = vmatpush3.bf16.msra.mxu1 %v15877_v6 }
0x37a8   :  { %v17004_v44 = vpop.eup %17003  ;;  %v15885_v25 = vpack.c.bf16 %v16505_v20, %v16504_v18  ;;  %v9237_v61 = vmul.f32 %v17002_v2, %v16994_v50 }
0x37a9   :  { %v16508_v30 = vpop.permute.xlu1 %16507  ;;  %v9236_v56 = vmul.f32 %v17004_v44, %v16996_v4 }
0x37aa   :  { %v16510_v21 = vunpack.i.h.bf16 %v16508_v30  ;;  %v16509_v27 = vunpack.i.l.bf16 %v16508_v30  ;;  %15887 = vmatprep.subr.msk.bf16.mxu1 %vm17534_vm8, %v15885_v25 }
0x37ab   :  { %15105 = vmatprep.mubr.msk.f32.mxu1 %vm515_vm10, %v9236_v56 }
0x37ac   :  { %v15891_v59 = vpack.c.bf16 %v16510_v21, %v16509_v27  ;;  %15106 = vmatmul.mubr.msk.f32.vlgmr.msra.gmra.mrb[108].mxu1 %vm515_vm10, %v9237_v61 }
0x37ad   :  { %v9421_v53 = vpop.permute.xlu1 %9420 }
0x37ae   :  { %15893 = vmatprep.subr.msk.bf16.mxu0 %vm17534_vm8, %v15891_v59 }
0x37b0   :  { %15890 = vmatpush3.bf16.xpose.msk.msra.mxu1 %vm17534_vm8, %v15885_v25 }
0x37d1   :  { %v9231_v13 = vpop.xlane.xlu0 %9230 }
0x37d2   :  { %17005 = vrcp.f32 %v9231_v13 }
0x37d5   :  { %v9419_v57 = vpop.permute.xlu0 %9418 }
0x37d6   :  { %15119 = vmatprep.mubr.msk.f32.mxu1 %vm334_vm7, %v9419_v57 }
0x37d7   :  { %15120 = vmatmul.mubr.msk.f32.vlgmr.msra.gmra.mrb[110].mxu1 %vm334_vm7, %v9421_v53 }
0x37d9   :  { %v9510_v38 = vpop.permute.xlu0 %9509 }
0x37dc   :  { %v17006_v28 = vpop.eup %17005 }
0x37dd   :  { %v9239_v45 = vmul.f32 %v17006_v28, %v16998_v48 }
0x37de   :  { %v9228_v12 = vpop.xlane.xlu1 %9227 }
0x37df   :  { %17007 = vrcp.f32 %v9228_v12 }
0x37e2   :  { %v9512_v8 = vpop.permute.xlu1 %9511 }
0x37e9   :  { %v17008_v43 = vpop.eup %17007 }
0x37ea   :  { %v9238_v15 = vmul.f32 %v17008_v43, %v17000_v54 }
0x37ec   :  { %15112 = vmatprep.mubr.msk.f32.mxu0 %vm515_vm10, %v9238_v15 }
0x37ed   :  { %15113 = vmatmul.mubr.msk.f32.vlgmr.msra.gmra.mrb[110].mxu0 %vm515_vm10, %v9239_v45 }
0x37ee   :  { %15896 = vmatpush3.bf16.xpose.msk.msra.mxu0 %vm17534_vm8, %v15891_v59  ;;  %15126 = vmatprep.mubr.msk.f32.mxu0 %vm334_vm7, %v9510_v38 }
0x37f5   :  { %15127 = vmatmul.mubr.msk.f32.vlgmr.msra.gmra.mrb[112].mxu0 %vm334_vm7, %v9512_v8 }
0x387f   :  { %v15107_v39 = vpop.f32.mrb[108].mxu1 }
0x3880   :  { %9415 = vst.msk [vmem:[#allocation3 + $0x8] sm:$0xff] %vm334_vm7, %v15107_v39  ;;  %v9318_v50 = vpop.f32.mrb[109].mxu1 }
0x3881   :  { %9414 = vst.msk [vmem:[#allocation3] sm:$0xff] %vm334_vm7, %v9318_v50 }
0x38aa   :  { %v15121_v4 = vpop.f32.mrb[110].mxu1 }
0x38ab   :  { %v9601_v23 = vmul.f32 0.5, %v15121_v4  ;;  %v9500_v31 = vpop.f32.mrb[111].mxu1 }
0x38ac   :  { %v9600_v35 = vmul.f32 0.5, %v9500_v31 }
0x38ad   :  { %v9605_v10 = vadd.f32 %v9601_v23, %v17551_v47 }
0x38ae   :  { %v9604_v9 = vadd.f32 %v9600_v35, %v17551_v47 }
0x38af   :  { %v9611_v0 = vsel %vm515_vm10, %v9605_v10, -inf }
0x38b0   :  { %9612 = vmax.xlane.f32.xlu1 %v9611_v0  ;;  %v9608_v41 = vsel %vm515_vm10, %v9604_v9, -inf }
0x38b1   :  { %9609 = vmax.xlane.f32.xlu0 %v9608_v41 }
0x38c0   :  { %v15114_v42 = vpop.f32.mrb[110].mxu0 }
0x38c1   :  { %9417 = vst.msk [vmem:[#allocation3 + $0x18] sm:$0xff] %vm334_vm7, %v15114_v42  ;;  %v9405_v48 = vpop.f32.mrb[111].mxu0 }
0x38c2   :  { %9416 = vst.msk [vmem:[#allocation3 + $0x10] sm:$0xff] %vm334_vm7, %v9405_v48 }
0x38c8   :  { %v15128_v5 = vpop.f32.mrb[112].mxu0 }
0x38c9   :  { %v9591_v54 = vpop.f32.mrb[113].mxu0  ;;  %v9603_v32 = vmul.f32 0.5, %v15128_v5 }
0x38ca   :  { %v9602_v3 = vmul.f32 0.5, %v9591_v54 }
0x38cb   :  { %v9607_v29 = vadd.f32 %v9603_v32, %v17551_v47 }
0x38cc   :  { %v9606_v19 = vadd.f32 %v9602_v3, %v17551_v47 }
0x38cd   :  { %v9617_v46 = vsel %vm515_vm10, %v9607_v29, -inf }
0x38ce   :  { %v9614_v14 = vsel %vm515_vm10, %v9606_v19, -inf }
0x38cf   :  { %9615 = vmax.xlane.f32.xlu0 %v9614_v14 }
0x38d3   :  { %9618 = vmax.xlane.f32.xlu0 %v9617_v46 }
0x393d   :  { %v9613_v58 = vpop.xlane.xlu1 %9612 }
0x393e   :  { %v9621_v22 = vsub.f32 %v9605_v10, %v9613_v58  ;;  %v9610_v37 = vpop.xlane.xlu0 %9609 }
0x393f   :  { %v9620_v34 = vsub.f32 %v9604_v9, %v9610_v37 }
0x3940   :  { %v9626_v6 = vmul.f32 1.442695, %v9621_v22 }
0x3941   :  { %v9624_v33 = vmul.f32 1.442695, %v9620_v34 }
0x3942   :  { %17009 = vpow2.f32 %v9626_v6 }
0x3943   :  { %17011 = vpow2.f32 %v9624_v33 }
0x394c   :  { %v17010_v20 = vpop.eup %17009 }
0x394d   :  { %v17012_v18 = vpop.eup %17011  ;;  %v9635_v2 = vsel %vm515_vm10, %v17010_v20, 0.0 }
0x394e   :  { %9636 = vadd.xlane.f32.xlu0 %v9635_v2  ;;  %v9632_v44 = vsel %vm515_vm10, %v17012_v18, 0.0 }
0x394f   :  { %9633 = vadd.xlane.f32.xlu1 %v9632_v44 }
0x395c   :  { %v9616_v25 = vpop.xlane.xlu0 %9615 }
0x395d   :  { %v9622_v27 = vsub.f32 %v9606_v19, %v9616_v25 }
0x395f   :  { %v9628_v61 = vmul.f32 1.442695, %v9622_v27 }
0x3960   :  { %16512 = vrot.lane.b32.xlu1 %v18934_v26, %s19783_s25  ;;  %v9619_v30 = vpop.xlane.xlu0 %9618 }
0x3961   :  { %v9623_v56 = vsub.f32 %v9607_v29, %v9619_v30 }
0x3963   :  { %v9630_v21 = vmul.f32 1.442695, %v9623_v56 }
0x3964   :  { %16517 = vrot.lane.b32.xlu0 %v18946_v7, %s19783_s25  ;;  %16522 = vrot.lane.b32.xlu1 %v18934_v26, %s19784_s5  ;;  %s19817_s25 = smov 68  }
0x3965   :  { %17013 = vpow2.f32 %v9630_v21 }
0x3966   :  { %17015 = vpow2.f32 %v9628_v61 }
0x3968   :  { %16527 = vrot.lane.b32.xlu1 %v18946_v7, %s19784_s5  ;;  %s19818_s5 = smov 100  }
0x396c   :  { %9848 = vrot.lane.b32.xlu1 %v18926_v24, %s19785_s1 }
0x396f   :  { %v17014_v59 = vpop.eup %17013 }
0x3970   :  { %v9641_v13 = vsel %vm515_vm10, %v17014_v59, 0.0  ;;  %v17016_v57 = vpop.eup %17015 }
0x3971   :  { %v9638_v53 = vsel %vm515_vm10, %v17016_v57, 0.0 }
0x3983   :  { %9642 = vadd.xlane.f32.xlu0 %v9641_v13 }
0x3990   :  { %9639 = vadd.xlane.f32.xlu1 %v9638_v53 }
0x3999   :  { %9846 = vrot.lane.b32.xlu0 %v18928_v60, %s19785_s1 }
0x399d   :  { %9937 = vrot.lane.b32.xlu0 %v18940_v40, %s19785_s1 }
0x39a1   :  { %9939 = vrot.lane.b32.xlu1 %v18938_v55, %s19785_s1  ;;  %s19819_s1 = smov 36  }
0x39db   :  { %v9637_v12 = vpop.xlane.xlu0 %9636 }
0x39dc   :  { %17017 = vrcp.f32 %v9637_v12  ;;  %v9634_v28 = vpop.xlane.xlu1 %9633 }
0x39dd   :  { %17019 = vrcp.f32 %v9634_v28 }
0x39df   :  { %v16518_v43 = vpop.permute.xlu0 %16517 }
0x39e0   :  { %v16520_v15 = vunpack.i.h.bf16 %v16518_v43  ;;  %v16519_v45 = vunpack.i.l.bf16 %v16518_v43  ;;  %v16513_v38 = vpop.permute.xlu1 %16512 }
0x39e1   :  { %v16515_v8 = vunpack.i.h.bf16 %v16513_v38  ;;  %v16514_v39 = vunpack.i.l.bf16 %v16513_v38 }
0x39e2   :  { %v15901_v50 = vpack.c.bf16 %v16520_v15, %v16519_v45 }
0x39e3   :  { %v15897_v4 = vpack.c.bf16 %v16515_v8, %v16514_v39 }
0x39e4   :  { %v16523_v23 = vpop.permute.xlu1 %16522  ;;  %15902 = vmatprep.subr.bf16.mxu0 %v15901_v50 }
0x39e5   :  { %v16525_v31 = vunpack.i.h.bf16 %v16523_v23  ;;  %v16524_v35 = vunpack.i.l.bf16 %v16523_v23  ;;  %15898 = vmatprep.subr.bf16.mxu1 %v15897_v4  ;;  %15904 = vmatpush3.bf16.msra.mxu0 %v15901_v50 }
0x39e6   :  { %v17018_v10 = vpop.eup %17017  ;;  %15900 = vmatpush3.bf16.msra.mxu1 %v15897_v4 }
0x39e7   :  { %v17020_v9 = vpop.eup %17019  ;;  %v15905_v0 = vpack.c.bf16 %v16525_v31, %v16524_v35  ;;  %v9649_v54 = vmul.f32 %v17018_v10, %v17010_v20 }
0x39e8   :  { %v16528_v41 = vpop.permute.xlu1 %16527  ;;  %v9648_v42 = vmul.f32 %v17020_v9, %v17012_v18 }
0x39e9   :  { %v16530_v48 = vunpack.i.h.bf16 %v16528_v41  ;;  %v16529_v5 = vunpack.i.l.bf16 %v16528_v41  ;;  %15907 = vmatprep.subr.msk.bf16.mxu1 %vm17534_vm8, %v15905_v0 }
0x39ea   :  { %15133 = vmatprep.mubr.msk.f32.mxu1 %vm515_vm10, %v9648_v42 }
0x39eb   :  { %v15911_v32 = vpack.c.bf16 %v16530_v48, %v16529_v5  ;;  %15134 = vmatmul.mubr.msk.f32.vlgmr.msra.gmra.mrb[112].mxu1 %vm515_vm10, %v9649_v54 }
0x39ec   :  { %v9849_v29 = vpop.permute.xlu1 %9848 }
0x39ed   :  { %15913 = vmatprep.subr.msk.bf16.mxu0 %vm17534_vm8, %v15911_v32 }
0x39ef   :  { %15910 = vmatpush3.bf16.xpose.msk.msra.mxu1 %vm17534_vm8, %v15905_v0 }
0x3a10   :  { %v9643_v3 = vpop.xlane.xlu0 %9642 }
0x3a11   :  { %17021 = vrcp.f32 %v9643_v3 }
0x3a14   :  { %v9847_v19 = vpop.permute.xlu0 %9846 }
0x3a15   :  { %15147 = vmatprep.mubr.msk.f32.mxu1 %vm334_vm7, %v9847_v19 }
0x3a16   :  { %15148 = vmatmul.mubr.msk.f32.vlgmr.msra.gmra.mrb[114].mxu1 %vm334_vm7, %v9849_v29 }
0x3a18   :  { %v9938_v34 = vpop.permute.xlu0 %9937 }
0x3a1b   :  { %v17022_v46 = vpop.eup %17021 }
0x3a1c   :  { %v9651_v37 = vmul.f32 %v17022_v46, %v17014_v59 }
0x3a1d   :  { %v9640_v14 = vpop.xlane.xlu1 %9639 }
0x3a1e   :  { %17023 = vrcp.f32 %v9640_v14 }
0x3a21   :  { %v9940_v6 = vpop.permute.xlu1 %9939 }
0x3a28   :  { %v17024_v58 = vpop.eup %17023 }
0x3a29   :  { %v9650_v22 = vmul.f32 %v17024_v58, %v17016_v57 }
0x3a2b   :  { %15140 = vmatprep.mubr.msk.f32.mxu0 %vm515_vm10, %v9650_v22 }
0x3a2c   :  { %15141 = vmatmul.mubr.msk.f32.vlgmr.msra.gmra.mrb[114].mxu0 %vm515_vm10, %v9651_v37 }
0x3a2d   :  { %15916 = vmatpush3.bf16.xpose.msk.msra.mxu0 %vm17534_vm8, %v15911_v32  ;;  %15154 = vmatprep.mubr.msk.f32.mxu0 %vm334_vm7, %v9938_v34 }
0x3a34   :  { %15155 = vmatmul.mubr.msk.f32.vlgmr.msra.gmra.mrb[116].mxu0 %vm334_vm7, %v9940_v6 }
0x3abe   :  { %v19054_v33 = vpop.f32.mrb[112].mxu1 }
0x3abf   :  { %v19056_v20 = vpop.f32.mrb[113].mxu1 }
0x3ae9   :  { %v15149_v18 = vpop.f32.mrb[114].mxu1 }
0x3aea   :  { %v10029_v2 = vmul.f32 0.5, %v15149_v18  ;;  %v9928_v44 = vpop.f32.mrb[115].mxu1 }
0x3aeb   :  { %v10028_v25 = vmul.f32 0.5, %v9928_v44 }
0x3aec   :  { %v10033_v30 = vadd.f32 %v10029_v2, %v17551_v47 }
0x3aed   :  { %v10032_v56 = vadd.f32 %v10028_v25, %v17551_v47 }
0x3aee   :  { %v10039_v21 = vsel %vm515_vm10, %v10033_v30, -inf }
0x3aef   :  { %10040 = vmax.xlane.f32.xlu1 %v10039_v21  ;;  %v10036_v27 = vsel %vm515_vm10, %v10032_v56, -inf }
0x3af0   :  { %10037 = vmax.xlane.f32.xlu0 %v10036_v27 }
0x3aff   :  { %v19062_v61 = vpop.f32.mrb[114].mxu0 }
0x3b00   :  { %v19064_v59 = vpop.f32.mrb[115].mxu0 }
0x3b07   :  { %v15156_v13 = vpop.f32.mrb[116].mxu0 }
0x3b08   :  { %v10019_v57 = vpop.f32.mrb[117].mxu0  ;;  %v10031_v53 = vmul.f32 0.5, %v15156_v13 }
0x3b09   :  { %v10030_v12 = vmul.f32 0.5, %v10019_v57 }
0x3b0a   :  { %v10035_v43 = vadd.f32 %v10031_v53, %v17551_v47 }
0x3b0b   :  { %v10034_v28 = vadd.f32 %v10030_v12, %v17551_v47 }
0x3b0c   :  { %v10045_v45 = vsel %vm515_vm10, %v10035_v43, -inf }
0x3b0d   :  { %v10042_v15 = vsel %vm515_vm10, %v10034_v28, -inf }
0x3b0e   :  { %10043 = vmax.xlane.f32.xlu0 %v10042_v15 }
0x3b12   :  { %10046 = vmax.xlane.f32.xlu0 %v10045_v45 }
0x3b7c   :  { %v10041_v38 = vpop.xlane.xlu1 %10040 }
0x3b7d   :  { %v10049_v8 = vsub.f32 %v10033_v30, %v10041_v38  ;;  %v10038_v39 = vpop.xlane.xlu0 %10037 }
0x3b7e   :  { %v10048_v50 = vsub.f32 %v10032_v56, %v10038_v39 }
0x3b7f   :  { %v10054_v4 = vmul.f32 1.442695, %v10049_v8 }
0x3b80   :  { %v10052_v23 = vmul.f32 1.442695, %v10048_v50 }
0x3b81   :  { %17025 = vpow2.f32 %v10054_v4 }
0x3b82   :  { %17027 = vpow2.f32 %v10052_v23 }
0x3b8b   :  { %v17026_v31 = vpop.eup %17025 }
0x3b8c   :  { %v17028_v35 = vpop.eup %17027  ;;  %v10063_v10 = vsel %vm515_vm10, %v17026_v31, 0.0 }
0x3b8d   :  { %10064 = vadd.xlane.f32.xlu0 %v10063_v10  ;;  %v10060_v9 = vsel %vm515_vm10, %v17028_v35, 0.0 }
0x3b8e   :  { %10061 = vadd.xlane.f32.xlu1 %v10060_v9 }
0x3b9b   :  { %v10044_v0 = vpop.xlane.xlu0 %10043 }
0x3b9c   :  { %v10050_v5 = vsub.f32 %v10034_v28, %v10044_v0 }
0x3b9e   :  { %v10056_v54 = vmul.f32 1.442695, %v10050_v5 }
0x3b9f   :  { %16532 = vrot.lane.b32.xlu1 %v18934_v26, %s19786_s23  ;;  %v10047_v41 = vpop.xlane.xlu0 %10046 }
0x3ba0   :  { %v10051_v42 = vsub.f32 %v10035_v43, %v10047_v41 }
0x3ba2   :  { %v10058_v48 = vmul.f32 1.442695, %v10051_v42 }
0x3ba3   :  { %16542 = vrot.lane.b32.xlu1 %v18934_v26, %s19787_s24  ;;  %16537 = vrot.lane.b32.xlu0 %v18946_v7, %s19786_s23  ;;  %s19820_s23 = smov 4  }
0x3ba4   :  { %17029 = vpow2.f32 %v10058_v48 }
0x3ba5   :  { %17031 = vpow2.f32 %v10056_v54 }
0x3ba7   :  { %16547 = vrot.lane.b32.xlu1 %v18946_v7, %s19787_s24  ;;  %s19821_s24 = smov 8  }
0x3bab   :  { %10276 = vrot.lane.b32.xlu1 %v18926_v24, %s19788_s12 }
0x3bae   :  { %v17030_v32 = vpop.eup %17029 }
0x3baf   :  { %v10069_v3 = vsel %vm515_vm10, %v17030_v32, 0.0  ;;  %v17032_v19 = vpop.eup %17031 }
0x3bb0   :  { %v10066_v29 = vsel %vm515_vm10, %v17032_v19, 0.0 }
0x3bc2   :  { %10070 = vadd.xlane.f32.xlu0 %v10069_v3 }
0x3bcf   :  { %10067 = vadd.xlane.f32.xlu1 %v10066_v29 }
0x3bd8   :  { %10274 = vrot.lane.b32.xlu0 %v18928_v60, %s19788_s12 }
0x3bdc   :  { %10365 = vrot.lane.b32.xlu0 %v18940_v40, %s19788_s12 }
0x3be0   :  { %10367 = vrot.lane.b32.xlu1 %v18938_v55, %s19788_s12  ;;  %s19822_s12 = smov 12  }
0x3c1a   :  { %v10065_v14 = vpop.xlane.xlu0 %10064 }
0x3c1b   :  { %17033 = vrcp.f32 %v10065_v14  ;;  %v10062_v46 = vpop.xlane.xlu1 %10061 }
0x3c1c   :  { %17035 = vrcp.f32 %v10062_v46 }
0x3c1e   :  { %v16538_v58 = vpop.permute.xlu0 %16537 }
0x3c1f   :  { %v16540_v22 = vunpack.i.h.bf16 %v16538_v58  ;;  %v16539_v37 = vunpack.i.l.bf16 %v16538_v58  ;;  %v16533_v34 = vpop.permute.xlu1 %16532 }
0x3c20   :  { %v16535_v6 = vunpack.i.h.bf16 %v16533_v34  ;;  %v16534_v18 = vunpack.i.l.bf16 %v16533_v34 }
0x3c21   :  { %v15921_v2 = vpack.c.bf16 %v16540_v22, %v16539_v37 }
0x3c22   :  { %v15917_v44 = vpack.c.bf16 %v16535_v6, %v16534_v18 }
0x3c23   :  { %v16543_v25 = vpop.permute.xlu1 %16542  ;;  %15922 = vmatprep.subr.bf16.mxu0 %v15921_v2 }
0x3c24   :  { %v16545_v30 = vunpack.i.h.bf16 %v16543_v25  ;;  %v16544_v56 = vunpack.i.l.bf16 %v16543_v25  ;;  %15918 = vmatprep.subr.bf16.mxu1 %v15917_v44  ;;  %15924 = vmatpush3.bf16.msra.mxu0 %v15921_v2 }
0x3c25   :  { %v17034_v21 = vpop.eup %17033  ;;  %15920 = vmatpush3.bf16.msra.mxu1 %v15917_v44 }
0x3c26   :  { %v17036_v27 = vpop.eup %17035  ;;  %v15925_v13 = vpack.c.bf16 %v16545_v30, %v16544_v56  ;;  %v10077_v43 = vmul.f32 %v17034_v21, %v17026_v31 }
0x3c27   :  { %v16548_v57 = vpop.permute.xlu1 %16547  ;;  %v10076_v53 = vmul.f32 %v17036_v27, %v17028_v35 }
0x3c28   :  { %v16550_v12 = vunpack.i.h.bf16 %v16548_v57  ;;  %v16549_v28 = vunpack.i.l.bf16 %v16548_v57  ;;  %15927 = vmatprep.subr.msk.bf16.mxu1 %vm17534_vm8, %v15925_v13 }
0x3c29   :  { %15161 = vmatprep.mubr.msk.f32.mxu1 %vm515_vm10, %v10076_v53 }
0x3c2a   :  { %v15931_v15 = vpack.c.bf16 %v16550_v12, %v16549_v28  ;;  %15162 = vmatmul.mubr.msk.f32.vlgmr.msra.gmra.mrb[116].mxu1 %vm515_vm10, %v10077_v43 }
0x3c2b   :  { %v10277_v8 = vpop.permute.xlu1 %10276 }
0x3c2c   :  { %15933 = vmatprep.subr.msk.bf16.mxu0 %vm17534_vm8, %v15931_v15 }
0x3c2e   :  { %15930 = vmatpush3.bf16.xpose.msk.msra.mxu1 %vm17534_vm8, %v15925_v13 }
0x3c4f   :  { %v10071_v45 = vpop.xlane.xlu0 %10070 }
0x3c50   :  { %17037 = vrcp.f32 %v10071_v45 }
0x3c53   :  { %v10275_v38 = vpop.permute.xlu0 %10274 }
0x3c54   :  { %15175 = vmatprep.mubr.msk.f32.mxu1 %vm334_vm7, %v10275_v38 }
0x3c55   :  { %15176 = vmatmul.mubr.msk.f32.vlgmr.msra.gmra.mrb[118].mxu1 %vm334_vm7, %v10277_v8 }
0x3c57   :  { %v10366_v35 = vpop.permute.xlu0 %10365 }
0x3c5a   :  { %v17038_v50 = vpop.eup %17037 }
0x3c5b   :  { %v10079_v31 = vmul.f32 %v17038_v50, %v17030_v32 }
0x3c5c   :  { %v10068_v39 = vpop.xlane.xlu1 %10067 }
0x3c5d   :  { %17039 = vrcp.f32 %v10068_v39 }
0x3c60   :  { %v10368_v10 = vpop.permute.xlu1 %10367 }
0x3c67   :  { %v17040_v4 = vpop.eup %17039 }
0x3c68   :  { %v10078_v23 = vmul.f32 %v17040_v4, %v17032_v19 }
0x3c6a   :  { %15168 = vmatprep.mubr.msk.f32.mxu0 %vm515_vm10, %v10078_v23 }
0x3c6b   :  { %15169 = vmatmul.mubr.msk.f32.vlgmr.msra.gmra.mrb[118].mxu0 %vm515_vm10, %v10079_v31 }
0x3c6c   :  { %15936 = vmatpush3.bf16.xpose.msk.msra.mxu0 %vm17534_vm8, %v15931_v15  ;;  %15182 = vmatprep.mubr.msk.f32.mxu0 %vm334_vm7, %v10366_v35 }
0x3c73   :  { %15183 = vmatmul.mubr.msk.f32.vlgmr.msra.gmra.mrb[120].mxu0 %vm334_vm7, %v10368_v10 }
0x3cfd   :  { %v19106_v9 = vpop.f32.mrb[116].mxu1 }
0x3cfe   :  { %v19108_v0 = vpop.f32.mrb[117].mxu1 }
0x3d28   :  { %v15177_v41 = vpop.f32.mrb[118].mxu1 }
0x3d29   :  { %v10457_v42 = vmul.f32 0.5, %v15177_v41  ;;  %v10356_v48 = vpop.f32.mrb[119].mxu1 }
0x3d2a   :  { %v10456_v5 = vmul.f32 0.5, %v10356_v48 }
0x3d2b   :  { %v10461_v54 = vadd.f32 %v10457_v42, %v17551_v47 }
0x3d2c   :  { %v10460_v32 = vadd.f32 %v10456_v5, %v17551_v47 }
0x3d2d   :  { %v10467_v3 = vsel %vm515_vm10, %v10461_v54, -inf }
0x3d2e   :  { %10468 = vmax.xlane.f32.xlu1 %v10467_v3  ;;  %v10464_v19 = vsel %vm515_vm10, %v10460_v32, -inf }
0x3d2f   :  { %10465 = vmax.xlane.f32.xlu0 %v10464_v19 }
0x3d3e   :  { %v19114_v29 = vpop.f32.mrb[118].mxu0 }
0x3d3f   :  { %v19116_v14 = vpop.f32.mrb[119].mxu0 }
0x3d46   :  { %v15184_v46 = vpop.f32.mrb[120].mxu0 }
0x3d47   :  { %v10447_v58 = vpop.f32.mrb[121].mxu0  ;;  %v10459_v22 = vmul.f32 0.5, %v15184_v46 }
0x3d48   :  { %v10458_v37 = vmul.f32 0.5, %v10447_v58 }
0x3d49   :  { %v10463_v6 = vadd.f32 %v10459_v22, %v17551_v47 }
0x3d4a   :  { %v10462_v34 = vadd.f32 %v10458_v37, %v17551_v47 }
0x3d4b   :  { %v10473_v2 = vsel %vm515_vm10, %v10463_v6, -inf }
0x3d4c   :  { %v10470_v18 = vsel %vm515_vm10, %v10462_v34, -inf }
0x3d4d   :  { %10471 = vmax.xlane.f32.xlu0 %v10470_v18 }
0x3d51   :  { %10474 = vmax.xlane.f32.xlu0 %v10473_v2 }
0x3dbb   :  { %v10469_v44 = vpop.xlane.xlu1 %10468 }
0x3dbc   :  { %v10477_v25 = vsub.f32 %v10461_v54, %v10469_v44  ;;  %v10466_v30 = vpop.xlane.xlu0 %10465 }
0x3dbd   :  { %v10476_v56 = vsub.f32 %v10460_v32, %v10466_v30 }
0x3dbe   :  { %v10482_v21 = vmul.f32 1.442695, %v10477_v25 }
0x3dbf   :  { %v10480_v27 = vmul.f32 1.442695, %v10476_v56 }
0x3dc0   :  { %17041 = vpow2.f32 %v10482_v21 }
0x3dc1   :  { %17043 = vpow2.f32 %v10480_v27 }
0x3dca   :  { %v17042_v13 = vpop.eup %17041 }
0x3dcb   :  { %v17044_v57 = vpop.eup %17043  ;;  %v10491_v53 = vsel %vm515_vm10, %v17042_v13, 0.0 }
0x3dcc   :  { %10492 = vadd.xlane.f32.xlu0 %v10491_v53  ;;  %v10488_v12 = vsel %vm515_vm10, %v17044_v57, 0.0 }
0x3dcd   :  { %10489 = vadd.xlane.f32.xlu1 %v10488_v12 }
0x3dda   :  { %v10472_v28 = vpop.xlane.xlu0 %10471 }
0x3ddb   :  { %v10478_v38 = vsub.f32 %v10462_v34, %v10472_v28 }
0x3ddd   :  { %v10484_v8 = vmul.f32 1.442695, %v10478_v38 }
0x3dde   :  { %16552 = vrot.lane.b32.xlu1 %v18934_v26, %s19789_s30  ;;  %v10475_v43 = vpop.xlane.xlu0 %10474 }
0x3ddf   :  { %v10479_v15 = vsub.f32 %v10463_v6, %v10475_v43 }
0x3de1   :  { %v10486_v45 = vmul.f32 1.442695, %v10479_v15 }
0x3de2   :  { %16562 = vrot.lane.b32.xlu1 %v18934_v26, %s19790_s0  ;;  %16557 = vrot.lane.b32.xlu0 %v18946_v7, %s19789_s30  ;;  %s19812_s30 = smov 108  }
0x3de3   :  { %17045 = vpow2.f32 %v10486_v45 }
0x3de4   :  { %17047 = vpow2.f32 %v10484_v8 }
0x3de6   :  { %16567 = vrot.lane.b32.xlu1 %v18946_v7, %s19790_s0  ;;  %s19811_s0 = smov 76  }
0x3dea   :  { %10704 = vrot.lane.b32.xlu1 %v18926_v24, %s19791_s27 }
0x3ded   :  { %v17046_v39 = vpop.eup %17045 }
0x3dee   :  { %v10497_v50 = vsel %vm515_vm10, %v17046_v39, 0.0  ;;  %v17048_v4 = vpop.eup %17047 }
0x3def   :  { %v10494_v23 = vsel %vm515_vm10, %v17048_v4, 0.0 }
0x3e01   :  { %10498 = vadd.xlane.f32.xlu0 %v10497_v50 }
0x3e0e   :  { %10495 = vadd.xlane.f32.xlu1 %v10494_v23 }
0x3e17   :  { %10702 = vrot.lane.b32.xlu0 %v18928_v60, %s19791_s27 }
0x3e1b   :  { %10793 = vrot.lane.b32.xlu0 %v18940_v40, %s19791_s27 }
0x3e1f   :  { %10795 = vrot.lane.b32.xlu1 %v18938_v55, %s19791_s27  ;;  %s19813_s27 = smov 44  }
0x3e59   :  { %v10493_v31 = vpop.xlane.xlu0 %10492 }
0x3e5a   :  { %17049 = vrcp.f32 %v10493_v31  ;;  %v10490_v35 = vpop.xlane.xlu1 %10489 }
0x3e5b   :  { %17051 = vrcp.f32 %v10490_v35 }
0x3e5d   :  { %v16558_v10 = vpop.permute.xlu0 %16557 }
0x3e5e   :  { %v16560_v41 = vunpack.i.h.bf16 %v16558_v10  ;;  %v16559_v42 = vunpack.i.l.bf16 %v16558_v10  ;;  %v16553_v48 = vpop.permute.xlu1 %16552 }
0x3e5f   :  { %v16555_v5 = vunpack.i.h.bf16 %v16553_v48  ;;  %v16554_v54 = vunpack.i.l.bf16 %v16553_v48 }
0x3e60   :  { %v15941_v32 = vpack.c.bf16 %v16560_v41, %v16559_v42 }
0x3e61   :  { %v15937_v3 = vpack.c.bf16 %v16555_v5, %v16554_v54 }
0x3e62   :  { %v16563_v19 = vpop.permute.xlu1 %16562  ;;  %15942 = vmatprep.subr.bf16.mxu0 %v15941_v32 }
0x3e63   :  { %v16565_v46 = vunpack.i.h.bf16 %v16563_v19  ;;  %v16564_v58 = vunpack.i.l.bf16 %v16563_v19  ;;  %15938 = vmatprep.subr.bf16.mxu1 %v15937_v3  ;;  %15944 = vmatpush3.bf16.msra.mxu0 %v15941_v32 }
0x3e64   :  { %v17050_v22 = vpop.eup %17049  ;;  %15940 = vmatpush3.bf16.msra.mxu1 %v15937_v3 }
0x3e65   :  { %v17052_v37 = vpop.eup %17051  ;;  %v15945_v34 = vpack.c.bf16 %v16565_v46, %v16564_v58  ;;  %v10505_v25 = vmul.f32 %v17050_v22, %v17042_v13 }
0x3e66   :  { %v16568_v6 = vpop.permute.xlu1 %16567  ;;  %v10504_v18 = vmul.f32 %v17052_v37, %v17044_v57 }
0x3e67   :  { %v16570_v2 = vunpack.i.h.bf16 %v16568_v6  ;;  %v16569_v44 = vunpack.i.l.bf16 %v16568_v6  ;;  %15947 = vmatprep.subr.msk.bf16.mxu1 %vm17534_vm8, %v15945_v34 }
0x3e68   :  { %15189 = vmatprep.mubr.msk.f32.mxu1 %vm515_vm10, %v10504_v18 }
0x3e69   :  { %v15951_v30 = vpack.c.bf16 %v16570_v2, %v16569_v44  ;;  %15190 = vmatmul.mubr.msk.f32.vlgmr.msra.gmra.mrb[120].mxu1 %vm515_vm10, %v10505_v25 }
0x3e6a   :  { %v10705_v27 = vpop.permute.xlu1 %10704 }
0x3e6b   :  { %15953 = vmatprep.subr.msk.bf16.mxu0 %vm17534_vm8, %v15951_v30 }
0x3e6d   :  { %15950 = vmatpush3.bf16.xpose.msk.msra.mxu1 %vm17534_vm8, %v15945_v34 }
0x3e8e   :  { %v10499_v56 = vpop.xlane.xlu0 %10498 }
0x3e8f   :  { %17053 = vrcp.f32 %v10499_v56 }
0x3e92   :  { %v10703_v21 = vpop.permute.xlu0 %10702 }
0x3e93   :  { %15203 = vmatprep.mubr.msk.f32.mxu1 %vm334_vm7, %v10703_v21 }
0x3e94   :  { %15204 = vmatmul.mubr.msk.f32.vlgmr.msra.gmra.mrb[122].mxu1 %vm334_vm7, %v10705_v27 }
0x3e96   :  { %v10794_v43 = vpop.permute.xlu0 %10793 }
0x3e99   :  { %v17054_v57 = vpop.eup %17053 }
0x3e9a   :  { %v10507_v28 = vmul.f32 %v17054_v57, %v17046_v39 }
0x3e9b   :  { %v10496_v13 = vpop.xlane.xlu1 %10495 }
0x3e9c   :  { %17055 = vrcp.f32 %v10496_v13 }
0x3e9f   :  { %v10796_v15 = vpop.permute.xlu1 %10795 }
0x3ea6   :  { %v17056_v53 = vpop.eup %17055 }
0x3ea7   :  { %v10506_v12 = vmul.f32 %v17056_v53, %v17048_v4 }
0x3ea9   :  { %15196 = vmatprep.mubr.msk.f32.mxu0 %vm515_vm10, %v10506_v12 }
0x3eaa   :  { %15197 = vmatmul.mubr.msk.f32.vlgmr.msra.gmra.mrb[122].mxu0 %vm515_vm10, %v10507_v28 }
0x3eab   :  { %15956 = vmatpush3.bf16.xpose.msk.msra.mxu0 %vm17534_vm8, %v15951_v30  ;;  %15210 = vmatprep.mubr.msk.f32.mxu0 %vm334_vm7, %v10794_v43 }
0x3eb2   :  { %15211 = vmatmul.mubr.msk.f32.vlgmr.msra.gmra.mrb[124].mxu0 %vm334_vm7, %v10796_v15 }
0x3f3c   :  { %v19158_v45 = vpop.f32.mrb[120].mxu1 }
0x3f3d   :  { %v19160_v38 = vpop.f32.mrb[121].mxu1 }
0x3f67   :  { %v15205_v8 = vpop.f32.mrb[122].mxu1 }
0x3f68   :  { %v10885_v50 = vmul.f32 0.5, %v15205_v8  ;;  %v10784_v39 = vpop.f32.mrb[123].mxu1 }
0x3f69   :  { %v10884_v4 = vmul.f32 0.5, %v10784_v39 }
0x3f6a   :  { %v10889_v23 = vadd.f32 %v10885_v50, %v17551_v47 }
0x3f6b   :  { %v10888_v31 = vadd.f32 %v10884_v4, %v17551_v47 }
0x3f6c   :  { %v10895_v35 = vsel %vm515_vm10, %v10889_v23, -inf }
0x3f6d   :  { %10896 = vmax.xlane.f32.xlu1 %v10895_v35  ;;  %v10892_v10 = vsel %vm515_vm10, %v10888_v31, -inf }
0x3f6e   :  { %10893 = vmax.xlane.f32.xlu0 %v10892_v10 }
0x3f7d   :  { %v19166_v41 = vpop.f32.mrb[122].mxu0 }
0x3f7e   :  { %v19168_v42 = vpop.f32.mrb[123].mxu0 }
0x3f85   :  { %v15212_v48 = vpop.f32.mrb[124].mxu0 }
0x3f86   :  { %v10875_v5 = vpop.f32.mrb[125].mxu0  ;;  %v10887_v54 = vmul.f32 0.5, %v15212_v48 }
0x3f87   :  { %v10886_v32 = vmul.f32 0.5, %v10875_v5 }
0x3f88   :  { %v10891_v19 = vadd.f32 %v10887_v54, %v17551_v47 }
0x3f89   :  { %v10890_v3 = vadd.f32 %v10886_v32, %v17551_v47 }
0x3f8a   :  { %v10901_v58 = vsel %vm515_vm10, %v10891_v19, -inf }
0x3f8b   :  { %v10898_v46 = vsel %vm515_vm10, %v10890_v3, -inf }
0x3f8c   :  { %10899 = vmax.xlane.f32.xlu0 %v10898_v46 }
0x3f90   :  { %10902 = vmax.xlane.f32.xlu0 %v10901_v58 }
0x3ffa   :  { %v10897_v22 = vpop.xlane.xlu1 %10896 }
0x3ffb   :  { %v10905_v37 = vsub.f32 %v10889_v23, %v10897_v22  ;;  %v10894_v34 = vpop.xlane.xlu0 %10893 }
0x3ffc   :  { %v10904_v6 = vsub.f32 %v10888_v31, %v10894_v34 }
0x3ffd   :  { %v10910_v18 = vmul.f32 1.442695, %v10905_v37 }
0x3ffe   :  { %v10908_v2 = vmul.f32 1.442695, %v10904_v6 }
0x3fff   :  { %17057 = vpow2.f32 %v10910_v18 }
0x4000   :  { %17059 = vpow2.f32 %v10908_v2 }
0x4009   :  { %v17058_v44 = vpop.eup %17057 }
0x400a   :  { %v17060_v25 = vpop.eup %17059  ;;  %v10919_v30 = vsel %vm515_vm10, %v17058_v44, 0.0 }
0x400b   :  { %10920 = vadd.xlane.f32.xlu0 %v10919_v30  ;;  %v10916_v56 = vsel %vm515_vm10, %v17060_v25, 0.0 }
0x400c   :  { %10917 = vadd.xlane.f32.xlu1 %v10916_v56 }
0x4019   :  { %v10900_v21 = vpop.xlane.xlu0 %10899 }
0x401a   :  { %v10906_v53 = vsub.f32 %v10890_v3, %v10900_v21 }
0x401c   :  { %v10912_v12 = vmul.f32 1.442695, %v10906_v53 }
0x401d   :  { %16572 = vrot.lane.b32.xlu1 %v18934_v26, %s19792_s28  ;;  %v10903_v27 = vpop.xlane.xlu0 %10902 }
0x401e   :  { %v10907_v13 = vsub.f32 %v10891_v19, %v10903_v27 }
0x4020   :  { %v10914_v57 = vmul.f32 1.442695, %v10907_v13 }
0x4021   :  { %16582 = vrot.lane.b32.xlu1 %v18934_v26, %s19811_s0  ;;  %16577 = vrot.lane.b32.xlu0 %v18946_v7, %s19792_s28  ;;  %s19814_s28 = smov 72  }
0x4022   :  { %17061 = vpow2.f32 %v10914_v57 }
0x4023   :  { %17063 = vpow2.f32 %v10912_v12 }
0x4025   :  { %16587 = vrot.lane.b32.xlu1 %v18946_v7, %s19811_s0 }
0x4029   :  { %11132 = vrot.lane.b32.xlu1 %v18926_v24, %s19812_s30 }
0x402c   :  { %v17062_v28 = vpop.eup %17061 }
0x402d   :  { %v10925_v43 = vsel %vm515_vm10, %v17062_v28, 0.0  ;;  %v17064_v15 = vpop.eup %17063 }
0x402e   :  { %v10922_v8 = vsel %vm515_vm10, %v17064_v15, 0.0 }
0x4040   :  { %10926 = vadd.xlane.f32.xlu0 %v10925_v43 }
0x404d   :  { %10923 = vadd.xlane.f32.xlu1 %v10922_v8 }
0x4056   :  { %11130 = vrot.lane.b32.xlu0 %v18928_v60, %s19812_s30 }
0x405a   :  { %11221 = vrot.lane.b32.xlu0 %v18940_v40, %s19812_s30 }
0x405e   :  { %11223 = vrot.lane.b32.xlu1 %v18938_v55, %s19812_s30 }
0x4098   :  { %v10921_v50 = vpop.xlane.xlu0 %10920 }
0x4099   :  { %17065 = vrcp.f32 %v10921_v50  ;;  %v10918_v39 = vpop.xlane.xlu1 %10917 }
0x409a   :  { %17067 = vrcp.f32 %v10918_v39 }
0x409c   :  { %v16578_v4 = vpop.permute.xlu0 %16577 }
0x409d   :  { %v16580_v23 = vunpack.i.h.bf16 %v16578_v4  ;;  %v16579_v31 = vunpack.i.l.bf16 %v16578_v4  ;;  %v16573_v35 = vpop.permute.xlu1 %16572 }
0x409e   :  { %v16575_v10 = vunpack.i.h.bf16 %v16573_v35  ;;  %v16574_v48 = vunpack.i.l.bf16 %v16573_v35 }
0x409f   :  { %v15961_v5 = vpack.c.bf16 %v16580_v23, %v16579_v31 }
0x40a0   :  { %v15957_v54 = vpack.c.bf16 %v16575_v10, %v16574_v48 }
0x40a1   :  { %v16583_v32 = vpop.permute.xlu1 %16582  ;;  %15962 = vmatprep.subr.bf16.mxu0 %v15961_v5 }
0x40a2   :  { %v16585_v3 = vunpack.i.h.bf16 %v16583_v32  ;;  %v16584_v19 = vunpack.i.l.bf16 %v16583_v32  ;;  %15958 = vmatprep.subr.bf16.mxu1 %v15957_v54  ;;  %15964 = vmatpush3.bf16.msra.mxu0 %v15961_v5 }
0x40a3   :  { %v17066_v46 = vpop.eup %17065  ;;  %15960 = vmatpush3.bf16.msra.mxu1 %v15957_v54 }
0x40a4   :  { %v17068_v58 = vpop.eup %17067  ;;  %v15965_v22 = vpack.c.bf16 %v16585_v3, %v16584_v19  ;;  %v10933_v2 = vmul.f32 %v17066_v46, %v17058_v44 }
0x40a5   :  { %v16588_v37 = vpop.permute.xlu1 %16587  ;;  %v10932_v34 = vmul.f32 %v17068_v58, %v17060_v25 }
0x40a6   :  { %v16590_v6 = vunpack.i.h.bf16 %v16588_v37  ;;  %v16589_v18 = vunpack.i.l.bf16 %v16588_v37  ;;  %15967 = vmatprep.subr.msk.bf16.mxu1 %vm17534_vm8, %v15965_v22 }
0x40a7   :  { %15217 = vmatprep.mubr.msk.f32.mxu1 %vm515_vm10, %v10932_v34 }
0x40a8   :  { %v15971_v30 = vpack.c.bf16 %v16590_v6, %v16589_v18  ;;  %15218 = vmatmul.mubr.msk.f32.vlgmr.msra.gmra.mrb[124].mxu1 %vm515_vm10, %v10933_v2 }
0x40a9   :  { %v11133_v25 = vpop.permute.xlu1 %11132 }
0x40aa   :  { %15973 = vmatprep.subr.msk.bf16.mxu0 %vm17534_vm8, %v15971_v30 }
0x40ac   :  { %15970 = vmatpush3.bf16.xpose.msk.msra.mxu1 %vm17534_vm8, %v15965_v22 }
0x40cd   :  { %v10927_v56 = vpop.xlane.xlu0 %10926 }
0x40ce   :  { %17069 = vrcp.f32 %v10927_v56 }
0x40d1   :  { %v11131_v21 = vpop.permute.xlu0 %11130 }
0x40d2   :  { %15231 = vmatprep.mubr.msk.f32.mxu1 %vm334_vm7, %v11131_v21 }
0x40d3   :  { %15232 = vmatmul.mubr.msk.f32.vlgmr.msra.gmra.mrb[126].mxu1 %vm334_vm7, %v11133_v25 }
0x40d5   :  { %v11222_v12 = vpop.permute.xlu0 %11221 }
0x40d8   :  { %v17070_v27 = vpop.eup %17069 }
0x40d9   :  { %v10935_v53 = vmul.f32 %v17070_v27, %v17062_v28 }
0x40da   :  { %v10924_v44 = vpop.xlane.xlu1 %10923 }
0x40db   :  { %17071 = vrcp.f32 %v10924_v44 }
0x40de   :  { %v11224_v43 = vpop.permute.xlu1 %11223 }
0x40e5   :  { %v17072_v13 = vpop.eup %17071 }
0x40e6   :  { %v10934_v57 = vmul.f32 %v17072_v13, %v17064_v15 }
0x40e8   :  { %15224 = vmatprep.mubr.msk.f32.mxu0 %vm515_vm10, %v10934_v57 }
0x40e9   :  { %15225 = vmatmul.mubr.msk.f32.vlgmr.msra.gmra.mrb[126].mxu0 %vm515_vm10, %v10935_v53 }
0x40ea   :  { %15976 = vmatpush3.bf16.xpose.msk.msra.mxu0 %vm17534_vm8, %v15971_v30  ;;  %15238 = vmatprep.mubr.msk.f32.mxu0 %vm334_vm7, %v11222_v12 }
0x40f1   :  { %15239 = vmatmul.mubr.msk.f32.vlgmr.msra.gmra.mrb[128].mxu0 %vm334_vm7, %v11224_v43 }
0x417b   :  { %v19210_v8 = vpop.f32.mrb[124].mxu1 }
0x417c   :  { %v19212_v50 = vpop.f32.mrb[125].mxu1 }
0x41a6   :  { %v15233_v39 = vpop.f32.mrb[126].mxu1 }
0x41a7   :  { %v11313_v15 = vmul.f32 0.5, %v15233_v39  ;;  %v11212_v28 = vpop.f32.mrb[127].mxu1 }
0x41a8   :  { %v11312_v4 = vmul.f32 0.5, %v11212_v28 }
0x41a9   :  { %v11317_v23 = vadd.f32 %v11313_v15, %v17551_v47 }
0x41aa   :  { %v11316_v31 = vadd.f32 %v11312_v4, %v17551_v47 }
0x41ab   :  { %v11323_v35 = vsel %vm515_vm10, %v11317_v23, -inf }
0x41ac   :  { %11324 = vmax.xlane.f32.xlu1 %v11323_v35  ;;  %v11320_v10 = vsel %vm515_vm10, %v11316_v31, -inf }
0x41ad   :  { %11321 = vmax.xlane.f32.xlu0 %v11320_v10 }
0x41bc   :  { %v19218_v48 = vpop.f32.mrb[126].mxu0 }
0x41bd   :  { %v19220_v5 = vpop.f32.mrb[127].mxu0 }
0x41c4   :  { %v15240_v54 = vpop.f32.mrb[128].mxu0 }
0x41c5   :  { %v11303_v32 = vpop.f32.mrb[129].mxu0  ;;  %v11315_v3 = vmul.f32 0.5, %v15240_v54 }
0x41c6   :  { %v11314_v19 = vmul.f32 0.5, %v11303_v32 }
0x41c7   :  { %v11319_v58 = vadd.f32 %v11315_v3, %v17551_v47 }
0x41c8   :  { %v11318_v46 = vadd.f32 %v11314_v19, %v17551_v47 }
0x41c9   :  { %v11329_v37 = vsel %vm515_vm10, %v11319_v58, -inf }
0x41ca   :  { %v11326_v22 = vsel %vm515_vm10, %v11318_v46, -inf }
0x41cb   :  { %11327 = vmax.xlane.f32.xlu0 %v11326_v22 }
0x41cf   :  { %11330 = vmax.xlane.f32.xlu0 %v11329_v37 }
0x4239   :  { %v11325_v34 = vpop.xlane.xlu1 %11324 }
0x423a   :  { %v11333_v6 = vsub.f32 %v11317_v23, %v11325_v34  ;;  %v11322_v18 = vpop.xlane.xlu0 %11321 }
0x423b   :  { %v11332_v2 = vsub.f32 %v11316_v31, %v11322_v18 }
0x423c   :  { %v11338_v30 = vmul.f32 1.442695, %v11333_v6 }
0x423d   :  { %v11336_v56 = vmul.f32 1.442695, %v11332_v2 }
0x423e   :  { %17073 = vpow2.f32 %v11338_v30 }
0x423f   :  { %17075 = vpow2.f32 %v11336_v56 }
0x4248   :  { %v17074_v21 = vpop.eup %17073 }
0x4249   :  { %v17076_v25 = vpop.eup %17075  ;;  %v11347_v44 = vsel %vm515_vm10, %v17074_v21, 0.0 }
0x424a   :  { %11348 = vadd.xlane.f32.xlu0 %v11347_v44  ;;  %v11344_v27 = vsel %vm515_vm10, %v17076_v25, 0.0 }
0x424b   :  { %11345 = vadd.xlane.f32.xlu1 %v11344_v27 }
0x4258   :  { %v11328_v13 = vpop.xlane.xlu0 %11327 }
0x4259   :  { %v11334_v43 = vsub.f32 %v11318_v46, %v11328_v13 }
0x425b   :  { %v11340_v39 = vmul.f32 1.442695, %v11334_v43 }
0x425c   :  { %16592 = vrot.lane.b32.xlu1 %v18934_v26, %s19813_s27  ;;  %v11331_v57 = vpop.xlane.xlu0 %11330 }
0x425d   :  { %v11335_v53 = vsub.f32 %v11319_v58, %v11331_v57 }
0x425f   :  { %v11342_v12 = vmul.f32 1.442695, %v11335_v53 }
0x4260   :  { %16602 = vrot.lane.b32.xlu1 %v18934_v26, %s19814_s28  ;;  %16597 = vrot.lane.b32.xlu0 %v18946_v7, %s19813_s27 }
0x4261   :  { %17077 = vpow2.f32 %v11342_v12 }
0x4262   :  { %17079 = vpow2.f32 %v11340_v39 }
0x4264   :  { %16607 = vrot.lane.b32.xlu1 %v18946_v7, %s19814_s28  ;;  %s19825_s28 = sld [smem:[#allocation20_spill]] }
0x4268   :  { %11560 = vrot.lane.b32.xlu1 %v18926_v24, %s19815_s2 }
0x426b   :  { %v17078_v15 = vpop.eup %17077 }
0x426c   :  { %v11353_v28 = vsel %vm515_vm10, %v17078_v15, 0.0  ;;  %v17080_v4 = vpop.eup %17079 }
0x426d   :  { %v11350_v23 = vsel %vm515_vm10, %v17080_v4, 0.0 }
0x427f   :  { %11354 = vadd.xlane.f32.xlu0 %v11353_v28 }
0x428c   :  { %11351 = vadd.xlane.f32.xlu1 %v11350_v23 }
0x4295   :  { %11558 = vrot.lane.b32.xlu0 %v18928_v60, %s19815_s2 }
0x4299   :  { %11649 = vrot.lane.b32.xlu0 %v18940_v40, %s19815_s2 }
0x429d   :  { %11651 = vrot.lane.b32.xlu1 %v18938_v55, %s19815_s2 }
0x42d7   :  { %v11349_v31 = vpop.xlane.xlu0 %11348 }
0x42d8   :  { %17081 = vrcp.f32 %v11349_v31  ;;  %v11346_v35 = vpop.xlane.xlu1 %11345 }
0x42d9   :  { %17083 = vrcp.f32 %v11346_v35 }
0x42db   :  { %v16598_v10 = vpop.permute.xlu0 %16597 }
0x42dc   :  { %v16600_v54 = vunpack.i.h.bf16 %v16598_v10  ;;  %v16599_v32 = vunpack.i.l.bf16 %v16598_v10  ;;  %v16593_v3 = vpop.permute.xlu1 %16592 }
0x42dd   :  { %v16595_v19 = vunpack.i.h.bf16 %v16593_v3  ;;  %v16594_v46 = vunpack.i.l.bf16 %v16593_v3 }
0x42de   :  { %v15981_v58 = vpack.c.bf16 %v16600_v54, %v16599_v32 }
0x42df   :  { %v15977_v22 = vpack.c.bf16 %v16595_v19, %v16594_v46 }
0x42e0   :  { %v16603_v37 = vpop.permute.xlu1 %16602  ;;  %15982 = vmatprep.subr.bf16.mxu0 %v15981_v58 }
0x42e1   :  { %v16605_v34 = vunpack.i.h.bf16 %v16603_v37  ;;  %v16604_v6 = vunpack.i.l.bf16 %v16603_v37  ;;  %15978 = vmatprep.subr.bf16.mxu1 %v15977_v22  ;;  %15984 = vmatpush3.bf16.msra.mxu0 %v15981_v58 }
0x42e2   :  { %v17082_v18 = vpop.eup %17081  ;;  %15980 = vmatpush3.bf16.msra.mxu1 %v15977_v22 }
0x42e3   :  { %v17084_v2 = vpop.eup %17083  ;;  %v15985_v30 = vpack.c.bf16 %v16605_v34, %v16604_v6  ;;  %v11361_v27 = vmul.f32 %v17082_v18, %v17074_v21 }
0x42e4   :  { %v16608_v56 = vpop.permute.xlu1 %16607  ;;  %v11360_v44 = vmul.f32 %v17084_v2, %v17076_v25 }
0x42e5   :  { %v16610_v13 = vunpack.i.h.bf16 %v16608_v56  ;;  %v16609_v57 = vunpack.i.l.bf16 %v16608_v56  ;;  %15987 = vmatprep.subr.msk.bf16.mxu1 %vm17534_vm8, %v15985_v30 }
0x42e6   :  { %15245 = vmatprep.mubr.msk.f32.mxu1 %vm515_vm10, %v11360_v44 }
0x42e7   :  { %v15991_v53 = vpack.c.bf16 %v16610_v13, %v16609_v57  ;;  %15246 = vmatmul.mubr.msk.f32.vlgmr.msra.gmra.mrb[128].mxu1 %vm515_vm10, %v11361_v27 }
0x42e8   :  { %v11561_v25 = vpop.permute.xlu1 %11560 }
0x42e9   :  { %15993 = vmatprep.subr.msk.bf16.mxu0 %vm17534_vm8, %v15991_v53 }
0x42eb   :  { %15990 = vmatpush3.bf16.xpose.msk.msra.mxu1 %vm17534_vm8, %v15985_v30 }
0x430c   :  { %v11355_v12 = vpop.xlane.xlu0 %11354 }
0x430d   :  { %17085 = vrcp.f32 %v11355_v12 }
0x4310   :  { %v11559_v43 = vpop.permute.xlu0 %11558 }
0x4311   :  { %15259 = vmatprep.mubr.msk.f32.mxu1 %vm334_vm7, %v11559_v43 }
0x4312   :  { %15260 = vmatmul.mubr.msk.f32.vlgmr.msra.gmra.mrb[130].mxu1 %vm334_vm7, %v11561_v25 }
0x4314   :  { %v11650_v35 = vpop.permute.xlu0 %11649 }
0x4317   :  { %v17086_v39 = vpop.eup %17085 }
0x4318   :  { %v11363_v31 = vmul.f32 %v17086_v39, %v17078_v15 }
0x4319   :  { %v11352_v21 = vpop.xlane.xlu1 %11351 }
0x431a   :  { %17087 = vrcp.f32 %v11352_v21 }
0x431d   :  { %v11652_v10 = vpop.permute.xlu1 %11651 }
0x4324   :  { %v17088_v28 = vpop.eup %17087 }
0x4325   :  { %v11362_v23 = vmul.f32 %v17088_v28, %v17080_v4 }
0x4327   :  { %15252 = vmatprep.mubr.msk.f32.mxu0 %vm515_vm10, %v11362_v23 }
0x4328   :  { %15253 = vmatmul.mubr.msk.f32.vlgmr.msra.gmra.mrb[130].mxu0 %vm515_vm10, %v11363_v31 }
0x4329   :  { %15996 = vmatpush3.bf16.xpose.msk.msra.mxu0 %vm17534_vm8, %v15991_v53  ;;  %15266 = vmatprep.mubr.msk.f32.mxu0 %vm334_vm7, %v11650_v35 }
0x4330   :  { %15267 = vmatmul.mubr.msk.f32.vlgmr.msra.gmra.mrb[132].mxu0 %vm334_vm7, %v11652_v10 }
0x43ba   :  { %v19262_v54 = vpop.f32.mrb[128].mxu1 }
0x43bb   :  { %v19264_v32 = vpop.f32.mrb[129].mxu1 }
0x43e5   :  { %v15261_v3 = vpop.f32.mrb[130].mxu1 }
0x43e6   :  { %v11741_v4 = vmul.f32 0.5, %v15261_v3  ;;  %v11640_v15 = vpop.f32.mrb[131].mxu1 }
0x43e7   :  { %v11740_v19 = vmul.f32 0.5, %v11640_v15 }
0x43e8   :  { %v11745_v46 = vadd.f32 %v11741_v4, %v17551_v47 }
0x43e9   :  { %v11744_v58 = vadd.f32 %v11740_v19, %v17551_v47 }
0x43ea   :  { %v11751_v22 = vsel %vm515_vm10, %v11745_v46, -inf }
0x43eb   :  { %11752 = vmax.xlane.f32.xlu1 %v11751_v22  ;;  %v11748_v37 = vsel %vm515_vm10, %v11744_v58, -inf }
0x43ec   :  { %11749 = vmax.xlane.f32.xlu0 %v11748_v37 }
0x43fb   :  { %v19270_v34 = vpop.f32.mrb[130].mxu0 }
0x43fc   :  { %v19272_v6 = vpop.f32.mrb[131].mxu0 }
0x4403   :  { %v15268_v18 = vpop.f32.mrb[132].mxu0 }
0x4404   :  { %v11731_v2 = vpop.f32.mrb[133].mxu0  ;;  %v11743_v30 = vmul.f32 0.5, %v15268_v18 }
0x4405   :  { %v11742_v56 = vmul.f32 0.5, %v11731_v2 }
0x4406   :  { %v11747_v27 = vadd.f32 %v11743_v30, %v17551_v47 }
0x4407   :  { %v11746_v44 = vadd.f32 %v11742_v56, %v17551_v47 }
0x4408   :  { %v11757_v57 = vsel %vm515_vm10, %v11747_v27, -inf }
0x4409   :  { %v11754_v13 = vsel %vm515_vm10, %v11746_v44, -inf }
0x440a   :  { %11755 = vmax.xlane.f32.xlu0 %v11754_v13 }
0x440e   :  { %11758 = vmax.xlane.f32.xlu0 %v11757_v57 }
0x4478   :  { %v11753_v53 = vpop.xlane.xlu1 %11752 }
0x4479   :  { %v11761_v12 = vsub.f32 %v11745_v46, %v11753_v53  ;;  %v11750_v43 = vpop.xlane.xlu0 %11749 }
0x447a   :  { %v11760_v25 = vsub.f32 %v11744_v58, %v11750_v43 }
0x447b   :  { %v11766_v21 = vmul.f32 1.442695, %v11761_v12 }
0x447c   :  { %v11764_v39 = vmul.f32 1.442695, %v11760_v25 }
0x447d   :  { %17089 = vpow2.f32 %v11766_v21 }
0x447e   :  { %17091 = vpow2.f32 %v11764_v39 }
0x4487   :  { %v17090_v28 = vpop.eup %17089 }
0x4488   :  { %v17092_v23 = vpop.eup %17091  ;;  %v11775_v31 = vsel %vm515_vm10, %v17090_v28, 0.0 }
0x4489   :  { %11776 = vadd.xlane.f32.xlu0 %v11775_v31  ;;  %v11772_v35 = vsel %vm515_vm10, %v17092_v23, 0.0 }
0x448a   :  { %11773 = vadd.xlane.f32.xlu1 %v11772_v35 }
0x4497   :  { %v11756_v10 = vpop.xlane.xlu0 %11755 }
0x4498   :  { %v11762_v19 = vsub.f32 %v11746_v44, %v11756_v10 }
0x449a   :  { %v11768_v46 = vmul.f32 1.442695, %v11762_v19 }
0x449b   :  { %16612 = vrot.lane.b32.xlu1 %v18934_v26, %s19816_s14  ;;  %v11759_v3 = vpop.xlane.xlu0 %11758 }
0x449c   :  { %v11763_v4 = vsub.f32 %v11747_v27, %v11759_v3 }
0x449e   :  { %v11770_v15 = vmul.f32 1.442695, %v11763_v4 }
0x449f   :  { %16622 = vrot.lane.b32.xlu1 %v18934_v26, %s19817_s25  ;;  %16617 = vrot.lane.b32.xlu0 %v18946_v7, %s19816_s14 }
0x44a0   :  { %17093 = vpow2.f32 %v11770_v15 }
0x44a1   :  { %17095 = vpow2.f32 %v11768_v46 }
0x44a3   :  { %16627 = vrot.lane.b32.xlu1 %v18946_v7, %s19817_s25 }
0x44a7   :  { %11988 = vrot.lane.b32.xlu1 %v18926_v24, %s19818_s5 }
0x44aa   :  { %v17094_v58 = vpop.eup %17093 }
0x44ab   :  { %v11781_v22 = vsel %vm515_vm10, %v17094_v58, 0.0  ;;  %v17096_v37 = vpop.eup %17095 }
0x44ac   :  { %v11778_v18 = vsel %vm515_vm10, %v17096_v37, 0.0 }
0x44be   :  { %11782 = vadd.xlane.f32.xlu0 %v11781_v22 }
0x44cb   :  { %11779 = vadd.xlane.f32.xlu1 %v11778_v18 }
0x44d4   :  { %11986 = vrot.lane.b32.xlu0 %v18928_v60, %s19818_s5 }
0x44d8   :  { %12077 = vrot.lane.b32.xlu0 %v18940_v40, %s19818_s5 }
0x44dc   :  { %12079 = vrot.lane.b32.xlu1 %v18938_v55, %s19818_s5 }
0x4516   :  { %v11777_v24 = vpop.xlane.xlu0 %11776 }
0x4517   :  { %17097 = vrcp.f32 %v11777_v24  ;;  %v11774_v2 = vpop.xlane.xlu1 %11773 }
0x4518   :  { %17099 = vrcp.f32 %v11774_v2 }
0x451a   :  { %v16618_v30 = vpop.permute.xlu0 %16617 }
0x451b   :  { %v16620_v56 = vunpack.i.h.bf16 %v16618_v30  ;;  %v16619_v44 = vunpack.i.l.bf16 %v16618_v30  ;;  %v16613_v27 = vpop.permute.xlu1 %16612 }
0x451c   :  { %v16615_v13 = vunpack.i.h.bf16 %v16613_v27  ;;  %v16614_v57 = vunpack.i.l.bf16 %v16613_v27 }
0x451d   :  { %v16001_v53 = vpack.c.bf16 %v16620_v56, %v16619_v44 }
0x451e   :  { %v15997_v12 = vpack.c.bf16 %v16615_v13, %v16614_v57 }
0x451f   :  { %v16623_v43 = vpop.permute.xlu1 %16622  ;;  %16002 = vmatprep.subr.bf16.mxu0 %v16001_v53 }
0x4520   :  { %v16625_v60 = vunpack.i.h.bf16 %v16623_v43  ;;  %v16624_v25 = vunpack.i.l.bf16 %v16623_v43  ;;  %15998 = vmatprep.subr.bf16.mxu1 %v15997_v12  ;;  %16004 = vmatpush3.bf16.msra.mxu0 %v16001_v53 }
0x4521   :  { %v17098_v40 = vpop.eup %17097  ;;  %16000 = vmatpush3.bf16.msra.mxu1 %v15997_v12 }
0x4522   :  { %v17100_v55 = vpop.eup %17099  ;;  %v16005_v21 = vpack.c.bf16 %v16625_v60, %v16624_v25  ;;  %v11789_v35 = vmul.f32 %v17098_v40, %v17090_v28 }
0x4523   :  { %v16628_v39 = vpop.permute.xlu1 %16627  ;;  %v11788_v31 = vmul.f32 %v17100_v55, %v17092_v23 }
0x4524   :  { %v16630_v10 = vunpack.i.h.bf16 %v16628_v39  ;;  %v16629_v3 = vunpack.i.l.bf16 %v16628_v39  ;;  %16007 = vmatprep.subr.msk.bf16.mxu1 %vm17534_vm8, %v16005_v21 }
0x4525   :  { %15273 = vmatprep.mubr.msk.f32.mxu1 %vm515_vm10, %v11788_v31 }
0x4526   :  { %v16011_v4 = vpack.c.bf16 %v16630_v10, %v16629_v3  ;;  %15274 = vmatmul.mubr.msk.f32.vlgmr.msra.gmra.mrb[132].mxu1 %vm515_vm10, %v11789_v35 }
0x4527   :  { %v11989_v23 = vpop.permute.xlu1 %11988 }
0x4528   :  { %16013 = vmatprep.subr.msk.bf16.mxu0 %vm17534_vm8, %v16011_v4 }
0x452a   :  { %16010 = vmatpush3.bf16.xpose.msk.msra.mxu1 %vm17534_vm8, %v16005_v21 }
0x454b   :  { %v11783_v15 = vpop.xlane.xlu0 %11782 }
0x454c   :  { %17101 = vrcp.f32 %v11783_v15 }
0x454f   :  { %v11987_v19 = vpop.permute.xlu0 %11986 }
0x4550   :  { %15287 = vmatprep.mubr.msk.f32.mxu1 %vm334_vm7, %v11987_v19 }
0x4551   :  { %15288 = vmatmul.mubr.msk.f32.vlgmr.msra.gmra.mrb[134].mxu1 %vm334_vm7, %v11989_v23 }
0x4553   :  { %v12078_v2 = vpop.permute.xlu0 %12077 }
0x4556   :  { %v17102_v46 = vpop.eup %17101 }
0x4557   :  { %v11791_v24 = vmul.f32 %v17102_v46, %v17094_v58 }
0x4558   :  { %v11780_v28 = vpop.xlane.xlu1 %11779 }
0x4559   :  { %17103 = vrcp.f32 %v11780_v28 }
0x455c   :  { %v12080_v30 = vpop.permute.xlu1 %12079 }
0x4563   :  { %v17104_v22 = vpop.eup %17103 }
0x4564   :  { %v11790_v18 = vmul.f32 %v17104_v22, %v17096_v37 }
0x4566   :  { %15280 = vmatprep.mubr.msk.f32.mxu0 %vm515_vm10, %v11790_v18 }
0x4567   :  { %15281 = vmatmul.mubr.msk.f32.vlgmr.msra.gmra.mrb[134].mxu0 %vm515_vm10, %v11791_v24 }
0x4568   :  { %16016 = vmatpush3.bf16.xpose.msk.msra.mxu0 %vm17534_vm8, %v16011_v4  ;;  %15294 = vmatprep.mubr.msk.f32.mxu0 %vm334_vm7, %v12078_v2 }
0x456f   :  { %15295 = vmatmul.mubr.msk.f32.vlgmr.msra.gmra.mrb[136].mxu0 %vm334_vm7, %v12080_v30 }
0x45f9   :  { %v19314_v56 = vpop.f32.mrb[132].mxu1 }
0x45fa   :  { %v19316_v44 = vpop.f32.mrb[133].mxu1 }
0x4624   :  { %v15289_v27 = vpop.f32.mrb[134].mxu1 }
0x4625   :  { %v12169_v37 = vmul.f32 0.5, %v15289_v27  ;;  %v12068_v58 = vpop.f32.mrb[135].mxu1 }
0x4626   :  { %v12168_v13 = vmul.f32 0.5, %v12068_v58 }
0x4627   :  { %v12173_v57 = vadd.f32 %v12169_v37, %v17551_v47 }
0x4628   :  { %v12172_v53 = vadd.f32 %v12168_v13, %v17551_v47 }
0x4629   :  { %v12179_v36 = vsel %vm515_vm10, %v12173_v57, -inf }
0x462a   :  { %12180 = vmax.xlane.f32.xlu1 %v12179_v36  ;;  %v12176_v12 = vsel %vm515_vm10, %v12172_v53, -inf }
0x462b   :  { %12177 = vmax.xlane.f32.xlu0 %v12176_v12 }
0x463a   :  { %v19322_v43 = vpop.f32.mrb[134].mxu0 }
0x463b   :  { %v19324_v60 = vpop.f32.mrb[135].mxu0 }
0x4642   :  { %v15296_v25 = vpop.f32.mrb[136].mxu0 }
0x4643   :  { %v12159_v40 = vpop.f32.mrb[137].mxu0  ;;  %v12171_v55 = vmul.f32 0.5, %v15296_v25 }
0x4644   :  { %v12170_v21 = vmul.f32 0.5, %v12159_v40 }
0x4645   :  { %v12175_v31 = vadd.f32 %v12171_v55, %v17551_v47 }
0x4646   :  { %v12174_v39 = vadd.f32 %v12170_v21, %v17551_v47 }
0x4647   :  { %v12185_v10 = vsel %vm515_vm10, %v12175_v31, -inf }
0x4648   :  { %v12182_v35 = vsel %vm515_vm10, %v12174_v39, -inf }
0x4649   :  { %12183 = vmax.xlane.f32.xlu0 %v12182_v35 }
0x464d   :  { %12186 = vmax.xlane.f32.xlu0 %v12185_v10 }
0x46b7   :  { %v12181_v3 = vpop.xlane.xlu1 %12180 }
0x46b8   :  { %v12189_v4 = vsub.f32 %v12173_v57, %v12181_v3  ;;  %v12178_v15 = vpop.xlane.xlu0 %12177 }
0x46b9   :  { %v12188_v19 = vsub.f32 %v12172_v53, %v12178_v15 }
0x46ba   :  { %v12194_v23 = vmul.f32 1.442695, %v12189_v4 }
0x46bb   :  { %v12192_v28 = vmul.f32 1.442695, %v12188_v19 }
0x46bc   :  { %17105 = vpow2.f32 %v12194_v23 }
0x46bd   :  { %17107 = vpow2.f32 %v12192_v28 }
0x46c6   :  { %v19330_v46 = vpop.eup %17105 }
0x46c7   :  { %v17108_v22 = vpop.eup %17107  ;;  %v12203_v47 = vsel %vm515_vm10, %v19330_v46, 0.0 }
0x46c8   :  { %12204 = vadd.xlane.f32.xlu0 %v12203_v47  ;;  %v12200_v18 = vsel %vm515_vm10, %v17108_v22, 0.0 }
0x46c9   :  { %12201 = vadd.xlane.f32.xlu1 %v12200_v18  ;;  %v13818_v18 = vld [vmem:[%s19662_s6 + $0x40] sm:$0xff] }
0x46d6   :  { %v12184_v24 = vpop.xlane.xlu0 %12183 }
0x46d7   :  { %v12190_v2 = vsub.f32 %v12174_v39, %v12184_v24  ;;  %v13819_v24 = vld [vmem:[%s19662_s6 + $0x48] sm:$0xff] }
0x46d9   :  { %v12196_v30 = vmul.f32 1.442695, %v12190_v2  ;;  %v16025_v2 = vpack.c.bf16 %v13819_v24, %v13818_v18  ;;  %v12612_v18 = vld [vmem:[#allocation4 + $0x118] sm:$0xff] }
0x46da   :  { %v12187_v27 = vpop.xlane.xlu0 %12186 }
0x46db   :  { %17109 = vpow2.f32 %v12196_v30  ;;  %v12191_v37 = vsub.f32 %v12175_v31, %v12187_v27  ;;  %v13820_v30 = vld [vmem:[%s19662_s6 + $0x50] sm:$0xff]  ;;  %v13821_v27 = vld [vmem:[%s19662_s6 + $0x58] sm:$0xff] }
0x46dd   :  { %v12198_v58 = vmul.f32 1.442695, %v12191_v37  ;;  %v16029_v37 = vpack.c.bf16 %v13821_v27, %v13820_v30  ;;  %v12609_v30 = vld [vmem:[#allocation4 + $0x100] sm:$0xff] }
0x46de   :  { %v12613_v27 = vld [vmem:[#allocation4 + $0x120] sm:$0xff] }
0x46df   :  { %17111 = vpow2.f32 %v12198_v58 }
0x46e5   :  { %v17110_v13 = vpop.eup %17109 }
0x46e6   :  { %v12206_v57 = vsel %vm515_vm10, %v17110_v13, 0.0 }
0x46e7   :  { %12207 = vadd.xlane.f32.xlu1 %v12206_v57 }
0x46e9   :  { %v19336_v53 = vpop.eup %17111 }
0x46ea   :  { %v12209_v36 = vsel %vm515_vm10, %v19336_v53, 0.0 }
0x46eb   :  { %12210 = vadd.xlane.f32.xlu0 %v12209_v36 }
0x46f8   :  { %16632 = vrot.lane.b32.xlu1 %v18934_v26, %s19819_s1 }
0x46fc   :  { %9830 = vrot.lane.b32.xlu1 %v19056_v20, %s19820_s23 }
0x4700   :  { %9832 = vrot.lane.b32.xlu1 %v19054_v33, %s19820_s23 }
0x4701   :  { %16637 = vrot.lane.b32.xlu0 %v18946_v7, %s19819_s1  ;;  %s19826_s1 = sld [smem:[#allocation21_spill]] }
0x4704   :  { %10260 = vrot.lane.b32.xlu1 %v19106_v9, %s19821_s24 }
0x4705   :  { %10258 = vrot.lane.b32.xlu0 %v19108_v0, %s19821_s24 }
0x4708   :  { %10688 = vrot.lane.b32.xlu1 %v19158_v45, %s19822_s12 }
0x4709   :  { %10686 = vrot.lane.b32.xlu0 %v19160_v38, %s19822_s12 }
0x470c   :  { %11116 = vrot.lane.b32.xlu1 %v19210_v8, %s19823_s19 }
0x470d   :  { %11114 = vrot.lane.b32.xlu0 %v19212_v50, %s19823_s19 }
0x4710   :  { %11544 = vrot.lane.b32.xlu1 %v19262_v54, %s19824_s20 }
0x4711   :  { %11542 = vrot.lane.b32.xlu0 %v19264_v32, %s19824_s20 }
0x4714   :  { %11972 = vrot.lane.b32.xlu1 %v19314_v56, %s19807_s16 }
0x4715   :  { %11970 = vrot.lane.b32.xlu0 %v19316_v44, %s19807_s16 }
0x4718   :  { %9836 = vrot.lane.b32.xlu1 %v19062_v61, %s19820_s23 }
0x4719   :  { %9834 = vrot.lane.b32.xlu0 %v19064_v59, %s19820_s23 }
0x471c   :  { %10264 = vrot.lane.b32.xlu1 %v19114_v29, %s19821_s24 }
0x471d   :  { %10262 = vrot.lane.b32.xlu0 %v19116_v14, %s19821_s24 }
0x4720   :  { %10692 = vrot.lane.b32.xlu1 %v19166_v41, %s19822_s12 }
0x4721   :  { %10690 = vrot.lane.b32.xlu0 %v19168_v42, %s19822_s12  ;;  %s19827_s12 = sld [smem:[#allocation22_spill]] }
0x4724   :  { %11120 = vrot.lane.b32.xlu1 %v19218_v48, %s19823_s19 }
0x4725   :  { %11118 = vrot.lane.b32.xlu0 %v19220_v5, %s19823_s19  ;;  %s17314_s19 = smov [#allocation10]  }
0x4728   :  { %11548 = vrot.lane.b32.xlu1 %v19270_v34, %s19824_s20 }
0x4729   :  { %11546 = vrot.lane.b32.xlu0 %v19272_v6, %s19824_s20  ;;  %s13441_s20 = sshll.u32 %s17314_s19, 4  ;;  %s13442_s20 = int_to_ptr.vmem [resolvable:$true] %s13441_s20 }
0x472a   :  { %s17247_s15 = scalar_lea.vmem %s13442_s20, 32  ;;  %p17252_p11 = scmp.lt.s32.totalorder %s13442_s20, %s13442_s20 }
0x472b   :  { %p17248_p10 = scmp.ne.s32.totalorder %s13442_s20, %s17247_s15  ;;  %p17253_p12 = scmp.lt.s32.totalorder %s17247_s15, %s17247_s15 }
0x472d   :  { %p17254_p13 = por %p17253_p12, %p17252_p11 }
0x472f   :  { %p17255_p0 = pnand %p17254_p13, %p17248_p10 }
0x4755   :  { %v12205_v20 = vpop.xlane.xlu0 %12204 }
0x4756   :  { %v12202_v26 = vpop.xlane.xlu1 %12201 }
0x4757   :  { %17113 = vrcp.f32 %v12202_v26 }
0x4758   :  { %17115 = vrcp.f32 %v12205_v20 }
0x4761   :  { %v17114_v7 = vpop.eup %17113 }
0x4762   :  { %v12216_v33 = vmul.f32 %v17114_v7, %v17108_v22  ;;  %v17116_v45 = vpop.eup %17115 }
0x4763   :  { %v12217_v48 = vmul.f32 %v17116_v45, %v19330_v46 }
0x4764   :  { %15301 = vmatprep.mubr.msk.f32.mxu1 %vm515_vm10, %v12216_v33 }
0x4774   :  { %v12208_v61 = vpop.xlane.xlu1 %12207 }
0x4775   :  { %17117 = vrcp.f32 %v12208_v61 }
0x4778   :  { %v16633_v59 = vpop.permute.xlu1 %16632  ;;  %v12211_v9 = vpop.xlane.xlu0 %12210 }
0x4779   :  { %v16635_v0 = vunpack.i.h.bf16 %v16633_v59  ;;  %v16634_v29 = vunpack.i.l.bf16 %v16633_v59  ;;  %17119 = vrcp.f32 %v12211_v9 }
0x477b   :  { %v16017_v14 = vpack.c.bf16 %v16635_v0, %v16634_v29  ;;  %v13823_v0 = vld [vmem:[%s19663_s7 + $0x2] ss:$0 sm:$0xff] }
0x477c   :  { %v9831_v38 = vpop.permute.xlu1 %9830  ;;  %v16638_v41 = vpop.permute.xlu0 %16637 }
0x477d   :  { %9842 = vst.msk [vmem:[#allocation3] sm:$0xff] %vm1162_vm11, %v9831_v38  ;;  %v16640_v42 = vunpack.i.h.bf16 %v16638_v41  ;;  %v16639_v8 = vunpack.i.l.bf16 %v16638_v41  ;;  %16018 = vmatprep.subr.bf16.mxu1 %v16017_v14 }
0x477e   :  { %16020 = vmatpush3.bf16.msra.mxu1 %v16017_v14 }
0x477f   :  { %v17118_v50 = vpop.eup %17117  ;;  %v16021_v5 = vpack.c.bf16 %v16640_v42, %v16639_v8  ;;  %16026 = vmatprep.subr.bf16.mxu1 %v16025_v2 }
0x4780   :  { %v9833_v54 = vpop.permute.xlu1 %9832  ;;  %v10259_v32 = vpop.permute.xlu0 %10258  ;;  %v12218_v34 = vmul.f32 %v17118_v50, %v17110_v13 }
0x4781   :  { %9843 = vst.msk [vmem:[#allocation3 + $0x8] sm:$0xff] %vm1162_vm11, %v9833_v54  ;;  %15302 = vmatmul.mubr.msk.f32.vlgmr.msra.gmra.mrb[136].mxu1 %vm515_vm10, %v12217_v48  ;;  %16022 = vmatprep.subr.bf16.mxu0 %v16021_v5 }
0x4782   :  { %10270 = vst.msk [vmem:[#allocation3] sm:$0xff] %vm1591_vm12, %v10259_v32  ;;  %16024 = vmatpush3.bf16.msra.mxu0 %v16021_v5  ;;  %15308 = vmatprep.mubr.msk.f32.mxu0 %vm515_vm10, %v12218_v34 }
0x4783   :  { %v17120_v6 = vpop.eup %17119  ;;  %16028 = vmatpush3.bf16.msra.mxu1 %v16025_v2  ;;  %v12616_v2 = vld [vmem:[#allocation4 + $0x138] sm:$0xff] }
0x4784   :  { %v12219_v56 = vmul.f32 %v17120_v6, %v19336_v53  ;;  %v10261_v44 = vpop.permute.xlu1 %10260  ;;  %v10687_v12 = vpop.permute.xlu0 %10686  ;;  %16030 = vmatprep.subr.bf16.mxu1 %v16029_v37 }
0x4785   :  { %10271 = vst.msk [vmem:[#allocation3 + $0x8] sm:$0xff] %vm1591_vm12, %v10261_v44 }
0x4786   :  { %10698 = vst.msk [vmem:[#allocation3] sm:$0xff] %vm2020_vm13, %v10687_v12  ;;  %15309 = vmatmul.mubr.msk.f32.vlgmr.msra.gmra.mrb[138].mxu0 %vm515_vm10, %v12219_v56 }
0x4787   :  { %12724 = vmatprep.mubr.f32.mxu0 %v17283_v11  ;;  %16032 = vmatpush3.bf16.msra.mxu1 %v16029_v37  ;;  %v16041_v37 = vpack.c.bf16 %v12616_v2, %v12612_v18 }
0x4788   :  { %v10689_v25 = vpop.permute.xlu1 %10688  ;;  %v11115_v40 = vpop.permute.xlu0 %11114 }
0x4789   :  { %10699 = vst.msk [vmem:[#allocation3 + $0x8] sm:$0xff] %vm2020_vm13, %v10689_v25  ;;  %16042 = vmatprep.subr.bf16.mxu1 %v16041_v37 }
0x478a   :  { %11126 = vst.msk [vmem:[#allocation3] sm:$0xff] %vm2449_vm14, %v11115_v40 }
0x478c   :  { %v11117_v55 = vpop.permute.xlu1 %11116  ;;  %v11543_v21 = vpop.permute.xlu0 %11542 }
0x478d   :  { %11127 = vst.msk [vmem:[#allocation3 + $0x8] sm:$0xff] %vm2449_vm14, %v11117_v55 }
0x478e   :  { %11554 = vst.msk [vmem:[#allocation3] sm:$0xff] %vm2878_vm15, %v11543_v21 }
0x4790   :  { %v11545_v39 = vpop.permute.xlu1 %11544  ;;  %v11971_v31 = vpop.permute.xlu0 %11970 }
0x4791   :  { %11555 = vst.msk [vmem:[#allocation3 + $0x8] sm:$0xff] %vm2878_vm15, %v11545_v39 }
0x4792   :  { %11982 = vst.msk [vmem:[#allocation3] sm:$0xff] %vm3307_vm0, %v11971_v31 }
0x4794   :  { %v11973_v35 = vpop.permute.xlu1 %11972  ;;  %v9835_v10 = vpop.permute.xlu0 %9834 }
0x4795   :  { %11983 = vst.msk [vmem:[#allocation3 + $0x8] sm:$0xff] %vm3307_vm0, %v11973_v35 }
0x4796   :  { %9844 = vst.msk [vmem:[#allocation3 + $0x10] sm:$0xff] %vm1162_vm11, %v9835_v10 }
0x4798   :  { %v9837_v3 = vpop.permute.xlu1 %9836  ;;  %v10263_v4 = vpop.permute.xlu0 %10262 }
0x4799   :  { %9845 = vst.msk [vmem:[#allocation3 + $0x18] sm:$0xff] %vm1162_vm11, %v9837_v3 }
0x479a   :  { %10272 = vst.msk [vmem:[#allocation3 + $0x10] sm:$0xff] %vm1591_vm12, %v10263_v4 }
0x479c   :  { %v10265_v15 = vpop.permute.xlu1 %10264  ;;  %v10691_v19 = vpop.permute.xlu0 %10690 }
0x479d   :  { %10273 = vst.msk [vmem:[#allocation3 + $0x18] sm:$0xff] %vm1591_vm12, %v10265_v15 }
0x479e   :  { %10700 = vst.msk [vmem:[#allocation3 + $0x10] sm:$0xff] %vm2020_vm13, %v10691_v19 }
0x47a0   :  { %v10693_v23 = vpop.permute.xlu1 %10692  ;;  %v11119_v28 = vpop.permute.xlu0 %11118 }
0x47a1   :  { %10701 = vst.msk [vmem:[#allocation3 + $0x18] sm:$0xff] %vm2020_vm13, %v10693_v23 }
0x47a2   :  { %11128 = vst.msk [vmem:[#allocation3 + $0x10] sm:$0xff] %vm2449_vm14, %v11119_v28 }
0x47a4   :  { %v11121_v46 = vpop.permute.xlu1 %11120  ;;  %v11547_v22 = vpop.permute.xlu0 %11546 }
0x47a5   :  { %11129 = vst.msk [vmem:[#allocation3 + $0x18] sm:$0xff] %vm2449_vm14, %v11121_v46 }
0x47a6   :  { %11556 = vst.msk [vmem:[#allocation3 + $0x10] sm:$0xff] %vm2878_vm15, %v11547_v22  ;;  %v12610_v22 = vld [vmem:[#allocation4 + $0x108] sm:$0xff] }
0x47a8   :  { %v11549_v47 = vpop.permute.xlu1 %11548 }
0x47a9   :  { %11557 = vst.msk [vmem:[#allocation3 + $0x18] sm:$0xff] %vm2878_vm15, %v11549_v47  ;;  %v12614_v47 = vld [vmem:[#allocation4 + $0x128] sm:$0xff] }
0x47aa   :  { %v16033_v24 = vpack.c.bf16 %v12614_v47, %v12610_v22  ;;  %v12969_v22 = vld [vmem:[#allocation7 + $0x590] sm:$0xff]  ;;  %v12970_v47 = vld [vmem:[#allocation7 + $0x598] sm:$0xff] }
0x47ab   :  { %v16085_v37 = vpack.c.bf16 %v12970_v47, %v12969_v22  ;;  %v12946_v22 = vld [vmem:[#allocation7 + $0x4d8] sm:$0xff]  ;;  %v12977_v47 = vld [vmem:[#allocation7 + $0x5d0] sm:$0xff] }
0x47ac   :  { %16034 = vmatprep.subr.bf16.mxu0 %v16033_v24 }
0x4854   :  { %v15303_v58 = vpop.f32.mrb[136].mxu1 }
0x4855   :  { %12400 = vrot.lane.b32.xlu1 %v15303_v58, %s19808_s21  ;;  %v12298_v13 = vpop.f32.mrb[137].mxu1  ;;  %v16035_v58 = vpack.c.bf16 %v12613_v27, %v12609_v30  ;;  %v12921_v30 = vld [vmem:[#allocation7 + $0x410] sm:$0xff] }
0x4856   :  { %12398 = vrot.lane.b32.xlu0 %v12298_v13, %s19808_s21  ;;  %v12611_v13 = vld [vmem:[#allocation4 + $0x110] sm:$0xff] }
0x4857   :  { %16036 = vmatpush1.bf16.msra.mxu0 %v16035_v58  ;;  %v12953_v58 = vld [vmem:[#allocation7 + $0x510] sm:$0xff] }
0x4859   :  { %11976 = vrot.lane.b32.xlu1 %v19322_v43, %s19807_s16  ;;  %v15310_v57 = vpop.f32.mrb[138].mxu0 }
0x485a   :  { %11974 = vrot.lane.b32.xlu0 %v19324_v60, %s19807_s16  ;;  %v12385_v53 = vpop.f32.mrb[139].mxu0 }
0x485d   :  { %12404 = vrot.lane.b32.xlu1 %v15310_v57, %s19808_s21  ;;  %v12615_v57 = vld [vmem:[#allocation4 + $0x130] sm:$0xff] }
0x485e   :  { %12402 = vrot.lane.b32.xlu0 %v12385_v53, %s19808_s21  ;;  %v16043_v53 = vpack.c.bf16 %v12615_v57, %v12611_v13  ;;  %v12954_v13 = vld [vmem:[#allocation7 + $0x518] sm:$0xff]  ;;  %v12939_v57 = vld [vmem:[#allocation7 + $0x4a0] sm:$0xff] }
0x48c7   :  { %v12401_v36 = vpop.permute.xlu1 %12400 }
0x48c8   :  { %12411 = vst.msk [vmem:[#allocation3 + $0x8] sm:$0xff] %vm3736_vm1, %v12401_v36  ;;  %v12399_v26 = vpop.permute.xlu0 %12398  ;;  %v12618_v36 = vld [vmem:[#allocation4 + $0x148] sm:$0xff] }
0x48c9   :  { %12410 = vst.msk [vmem:[#allocation3] sm:$0xff] %vm3736_vm1, %v12399_v26  ;;  %v12622_v26 = vld [vmem:[#allocation4 + $0x168] sm:$0xff] }
0x48cb   :  { %v11977_v7 = vpop.permute.xlu1 %11976 }
0x48cc   :  { %11985 = vst.msk [vmem:[#allocation3 + $0x18] sm:$0xff] %vm3307_vm0, %v11977_v7  ;;  %v11975_v33 = vpop.permute.xlu0 %11974  ;;  %v12620_v7 = vld [vmem:[#allocation4 + $0x158] sm:$0xff] }
0x48cd   :  { %11984 = vst.msk [vmem:[#allocation3 + $0x10] sm:$0xff] %vm3307_vm0, %v11975_v33  ;;  %v16037_v33 = vpack.c.bf16 %v12622_v26, %v12618_v36  ;;  %v12971_v36 = vld [vmem:[#allocation7 + $0x5a0] sm:$0xff]  ;;  %v12972_v26 = vld [vmem:[#allocation7 + $0x5a8] sm:$0xff] }
0x48cf   :  { %v12405_v43 = vpop.permute.xlu1 %12404  ;;  %v12415_v61 = vld [vmem:[#allocation3 + $0x8] sm:$0xff]  ;;  %16038 = vmatprep.subr.bf16.mxu0 %v16037_v33 }
0x48d0   :  { %12413 = vst.msk [vmem:[#allocation3 + $0x18] sm:$0xff] %vm3736_vm1, %v12405_v43  ;;  %v12403_v60 = vpop.permute.xlu0 %12402  ;;  %v12414_v20 = vld [vmem:[#allocation3] sm:$0xff]  ;;  %v12624_v43 = vld [vmem:[#allocation4 + $0x178] sm:$0xff] }
0x48d1   :  { %12412 = vst.msk [vmem:[#allocation3 + $0x10] sm:$0xff] %vm3736_vm1, %v12403_v60  ;;  %15319 = vmatprep.mubr.msk.f32.mxu1 %vm206_vm6, %v12414_v20  ;;  %v12617_v60 = vld [vmem:[#allocation4 + $0x140] sm:$0xff] }
0x48d2   :  { %15320 = vmatmul.mubr.msk.f32.vlgmr.msra.gmra.mrb[138].mxu1 %vm206_vm6, %v12415_v61  ;;  %v12621_v20 = vld [vmem:[#allocation4 + $0x160] sm:$0xff]  ;;  %v16045_v61 = vpack.c.bf16 %v12624_v43, %v12620_v7 }
0x48d3   :  { %16044 = vmatpush1.bf16.msra.mxu1 %v16043_v53  ;;  %v12940_v53 = vld [vmem:[#allocation7 + $0x4a8] sm:$0xff] }
0x48d4   :  { %16046 = vmatprep.subr.bf16.mxu1 %v16045_v61  ;;  %v12923_v61 = vld [vmem:[#allocation7 + $0x420] sm:$0xff] }
0x48d7   :  { %v12417_v9 = vld [vmem:[#allocation3 + $0x18] sm:$0xff] }
0x48d8   :  { %v12416_v59 = vld [vmem:[#allocation3 + $0x10] sm:$0xff] }
0x48d9   :  { %15322 = vmatprep.mubr.msk.f32.mxu1 %vm206_vm6, %v12416_v59  ;;  %v16039_v59 = vpack.c.bf16 %v12621_v20, %v12617_v60  ;;  %v16087_v20 = vpack.c.bf16 %v12954_v13, %v12953_v58  ;;  %v12962_v58 = vld [vmem:[#allocation7 + $0x558] sm:$0xff] }
0x48da   :  { %15323 = vmatmul.mubr.msk.f32.gmra.mrb[140].mxu1 %vm206_vm6, %v12417_v9  ;;  %v12619_v9 = vld [vmem:[#allocation4 + $0x150] sm:$0xff] }
0x48db   :  { %12813 = vmatprep.mubr.f32.mxu1 %v17283_v11  ;;  %16040 = vmatpush1.bf16.msra.mxu0 %v16039_v59  ;;  %v12924_v59 = vld [vmem:[#allocation7 + $0x428] sm:$0xff] }
0x49a5   :  { %v15321_v29 = vpop.f32.mrb[138].mxu1 }
0x49a6   :  { %v12515_v14 = vadd.f32 %v15321_v29, %v13823_v0  ;;  %v12509_v45 = vpop.f32.mrb[139].mxu1 }
0x49a7   :  { %v12510_v38 = vadd.f32 %v13823_v0, %v12509_v45  ;;  %v12936_v45 = vld [vmem:[#allocation7 + $0x488] sm:$0xff] }
0x49a8   :  { %v12529_v41 = vadd.f32 %v12515_v14, %v18911_v1  ;;  %v12935_v14 = vld [vmem:[#allocation7 + $0x480] sm:$0xff] }
0x49a9   :  { %v12528_v42 = vadd.f32 %v12510_v38, %v18907_v16  ;;  %v12967_v38 = vld [vmem:[#allocation7 + $0x580] sm:$0xff] }
0x49aa   :  { %v12539_v8 = vsel %vm206_vm6, %v12529_v41, 0.0 }
0x49ab   :  { %12540 = vadd.xlane.f32.xlu1 %v12539_v8  ;;  %v12536_v50 = vsel %vm206_vm6, %v12528_v42, 0.0 }
0x49ac   :  { %12537 = vadd.xlane.f32.xlu0 %v12536_v50 }
0x49ad   :  { %v15324_v48 = vpop.f32.mrb[140].mxu1 }
0x49ae   :  { %v12519_v5 = vpop.f32.mrb[141].mxu1  ;;  %v12525_v54 = vadd.f32 %v15324_v48, %v13823_v0 }
0x49af   :  { %v12520_v32 = vadd.f32 %v13823_v0, %v12519_v5  ;;  %v12623_v0 = vld [vmem:[#allocation4 + $0x170] sm:$0xff] }
0x49b0   :  { %v12531_v6 = vadd.f32 %v12525_v54, %v18919_v17  ;;  %v16047_v29 = vpack.c.bf16 %v12623_v0, %v12619_v9  ;;  %v16057_v9 = vpack.c.bf16 %v12940_v53, %v12939_v57  ;;  %v16089_v0 = vpack.c.bf16 %v12972_v26, %v12971_v36  ;;  %v12947_v57 = vld [vmem:[#allocation7 + $0x4e0] sm:$0xff]  ;;  %v12948_v53 = vld [vmem:[#allocation7 + $0x4e8] sm:$0xff] }
0x49b1   :  { %v12530_v34 = vadd.f32 %v12520_v32, %v18915_v49  ;;  %v12979_v36 = vld [vmem:[#allocation7 + $0x5e0] sm:$0xff]  ;;  %v16073_v26 = vpack.c.bf16 %v12948_v53, %v12947_v57 }
0x49b2   :  { %v12545_v1 = vsel %vm206_vm6, %v12531_v6, 0.0  ;;  %16048 = vmatpush1.bf16.msra.mxu1 %v16047_v29  ;;  %v12955_v29 = vld [vmem:[#allocation7 + $0x520] sm:$0xff] }
0x49b3   :  { %v12542_v56 = vsel %vm206_vm6, %v12530_v34, 0.0 }
0x49b4   :  { %12543 = vadd.xlane.f32.xlu0 %v12542_v56 }
0x49b8   :  { %12546 = vadd.xlane.f32.xlu0 %v12545_v1 }
0x4a38   :  { %v12541_v16 = vpop.xlane.xlu1 %12540 }
0x4a39   :  { %v12549_v44 = vmul.f32 0.03125, %v12541_v16  ;;  %v12538_v12 = vpop.xlane.xlu0 %12537 }
0x4a3a   :  { %v12548_v25 = vmul.f32 0.03125, %v12538_v12 }
0x4a3b   :  { %v19459_v40 = vsub.f32 %v12529_v41, %v12549_v44  ;;  %v16049_v41 = vpack.c.bf16 %v12936_v45, %v12935_v14  ;;  %v12956_v14 = vld [vmem:[#allocation7 + $0x528] sm:$0xff] }
0x4a3c   :  { %v19461_v55 = vsub.f32 %v12528_v42, %v12548_v25  ;;  %v12968_v42 = vld [vmem:[#allocation7 + $0x588] sm:$0xff] }
0x4a3d   :  { %v12557_v21 = vmul.f32 %v19459_v40, %v19459_v40  ;;  %v16081_v8 = vpack.c.bf16 %v12968_v42, %v12967_v38  ;;  %16050 = vmatprep.subr.bf16.mxu0 %v16049_v41  ;;  %v16059_v38 = vpack.c.bf16 %v12924_v59, %v12923_v61  ;;  %v12963_v59 = vld [vmem:[#allocation7 + $0x560] sm:$0xff] }
0x4a3e   :  { %v12556_v49 = vmul.f32 %v19461_v55, %v19461_v55 }
0x4a3f   :  { %v12563_v17 = vsel %vm206_vm6, %v12557_v21, 0.0  ;;  %16082 = vmatprep.subr.bf16.mxu1 %v16081_v8  ;;  %v16091_v8 = vpack.c.bf16 %v12956_v14, %v12955_v29  ;;  %v12949_v29 = vld [vmem:[#allocation7 + $0x4f0] sm:$0xff]  ;;  %v12950_v14 = vld [vmem:[#allocation7 + $0x4f8] sm:$0xff] }
0x4a40   :  { %12564 = vadd.xlane.f32.xlu0 %v12563_v17  ;;  %v12560_v39 = vsel %vm206_vm6, %v12556_v49, 0.0  ;;  %v19482_v49 = vld [vmem:[%s19664_s8 + $0x2] ss:$0 sm:$0xff] }
0x4a41   :  { %12561 = vadd.xlane.f32.xlu1 %v12560_v39  ;;  %v12544_v31 = vpop.xlane.xlu0 %12543  ;;  %v19488_v39 = vld [vmem:[%s19665_s9 + $0x2] ss:$0 sm:$0xff] }
0x4a42   :  { %v12550_v35 = vmul.f32 0.03125, %v12544_v31 }
0x4a44   :  { %v19469_v10 = vsub.f32 %v12530_v34, %v12550_v35  ;;  %v12919_v35 = vld [vmem:[#allocation7 + $0x400] sm:$0xff] }
0x4a45   :  { %v12547_v3 = vpop.xlane.xlu0 %12546 }
0x4a46   :  { %v12551_v4 = vmul.f32 0.03125, %v12547_v3  ;;  %v12558_v15 = vmul.f32 %v19469_v10, %v19469_v10  ;;  %v12920_v3 = vld [vmem:[#allocation7 + $0x408] sm:$0xff] }
0x4a47   :  { %v16051_v24 = vpack.c.bf16 %v12920_v3, %v12919_v35  ;;  %v12928_v35 = vld [vmem:[#allocation7 + $0x448] sm:$0xff] }
0x4a48   :  { %v19473_v19 = vsub.f32 %v12531_v6, %v12551_v4  ;;  %v12566_v23 = vsel %vm206_vm6, %v12558_v15, 0.0  ;;  %v12951_v4 = vld [vmem:[#allocation7 + $0x500] sm:$0xff]  ;;  %v12952_v15 = vld [vmem:[#allocation7 + $0x508] sm:$0xff] }
0x4a49   :  { %12567 = vadd.xlane.f32.xlu1 %v12566_v23  ;;  %v12937_v23 = vld [vmem:[#allocation7 + $0x490] sm:$0xff]  ;;  %v16083_v2 = vpack.c.bf16 %v12952_v15, %v12951_v4  ;;  %v12959_v15 = vld [vmem:[#allocation7 + $0x540] sm:$0xff] }
0x4a4a   :  { %v12559_v28 = vmul.f32 %v19473_v19, %v19473_v19 }
0x4a4c   :  { %v12569_v46 = vsel %vm206_vm6, %v12559_v28, 0.0 }
0x4a4d   :  { %12570 = vadd.xlane.f32.xlu0 %v12569_v46  ;;  %v12938_v46 = vld [vmem:[#allocation7 + $0x498] sm:$0xff] }
0x4a4e   :  { %v16053_v27 = vpack.c.bf16 %v12938_v46, %v12937_v23  ;;  %v12960_v23 = vld [vmem:[#allocation7 + $0x548] sm:$0xff]  ;;  %v12945_v46 = vld [vmem:[#allocation7 + $0x4d0] sm:$0xff] }
0x4acd   :  { %v12565_v50 = vpop.xlane.xlu0 %12564 }
0x4ace   :  { %v12573_v48 = vmul.f32 0.03125, %v12565_v50  ;;  %v12562_v5 = vpop.xlane.xlu1 %12561 }
0x4acf   :  { %v12572_v54 = vmul.f32 0.03125, %v12562_v5  ;;  %v12942_v5 = vld [vmem:[#allocation7 + $0x4b8] sm:$0xff] }
0x4ad0   :  { %v12577_v32 = vadd.f32 1e-05, %v12573_v48 }
0x4ad1   :  { %v12576_v34 = vadd.f32 1e-05, %v12572_v54  ;;  %v12973_v54 = vld [vmem:[#allocation7 + $0x5b0] sm:$0xff] }
0x4ad2   :  { %17121 = vrsqrt.f32 %v12577_v32 }
0x4ad3   :  { %17123 = vrsqrt.f32 %v12576_v34  ;;  %v12974_v34 = vld [vmem:[#allocation7 + $0x5b8] sm:$0xff] }
0x4ad6   :  { %v12568_v6 = vpop.xlane.xlu1 %12567 }
0x4ad7   :  { %v12574_v56 = vmul.f32 0.03125, %v12568_v6  ;;  %v12925_v6 = vld [vmem:[#allocation7 + $0x430] sm:$0xff] }
0x4ad9   :  { %v12578_v1 = vadd.f32 1e-05, %v12574_v56  ;;  %v12926_v56 = vld [vmem:[#allocation7 + $0x438] sm:$0xff] }
0x4ada   :  { %v12571_v16 = vpop.xlane.xlu0 %12570 }
0x4adb   :  { %17125 = vrsqrt.f32 %v12578_v1  ;;  %v12575_v44 = vmul.f32 0.03125, %v12571_v16  ;;  %v16093_v1 = vpack.c.bf16 %v12974_v34, %v12973_v54  ;;  %v12957_v16 = vld [vmem:[#allocation7 + $0x530] sm:$0xff]  ;;  %v12966_v54 = vld [vmem:[#allocation7 + $0x578] sm:$0xff]  ;;  %v13832_v34 = vld [vmem:[%s19669_s13 + $0x8] sm:$0xf] }
0x4adc   :  { %v17122_v12 = vpop.eup %17121 }
0x4add   :  { %v17124_v25 = vpop.eup %17123  ;;  %v12579_v21 = vadd.f32 1e-05, %v12575_v44  ;;  %v12585_v31 = vmul.f32 %v17122_v12, %v19459_v40  ;;  %v12922_v40 = vld [vmem:[#allocation7 + $0x418] sm:$0xff] }
0x4ade   :  { %v12584_v17 = vmul.f32 %v17124_v25, %v19461_v55  ;;  %v16055_v33 = vpack.c.bf16 %v12922_v40, %v12921_v30  ;;  %v12958_v44 = vld [vmem:[#allocation7 + $0x538] sm:$0xff]  ;;  %v12943_v25 = vld [vmem:[#allocation7 + $0x4c0] sm:$0xff] }
0x4adf   :  { %17127 = vrsqrt.f32 %v12579_v21  ;;  %v12595_v18 = vmul.f32 %v19482_v49, %v12585_v31  ;;  %v16095_v12 = vpack.c.bf16 %v12958_v44, %v12957_v16  ;;  %v12944_v21 = vld [vmem:[#allocation7 + $0x4c8] sm:$0xff]  ;;  %v12927_v31 = vld [vmem:[#allocation7 + $0x440] sm:$0xff]  ;;  %v12930_v30 = vld [vmem:[#allocation7 + $0x458] sm:$0xff] }
0x4ae0   :  { %v12594_v28 = vmul.f32 %v19482_v49, %v12584_v17  ;;  %v16065_v17 = vpack.c.bf16 %v12944_v21, %v12943_v25  ;;  %v16067_v4 = vpack.c.bf16 %v12928_v35, %v12927_v31 }
0x4ae1   :  { %v19503_v43 = vadd.f32 %v19488_v39, %v12595_v18  ;;  %v16069_v18 = vpack.c.bf16 %v12946_v22, %v12945_v46 }
0x4ae2   :  { %v19493_v55 = vadd.f32 %v19488_v39, %v12594_v28  ;;  %v16099_v28 = vpack.c.bf16 %v12960_v23, %v12959_v15 }
0x4ae4   :  { %13833 = vmatmul.mubr.msk.f32.vlgmr.msra.gmra.mrb[140].mxu0 %vm206_vm6, %v19493_v55  ;;  %13837 = vmatmul.mubr.msk.f32.vlgmr.msra.gmra.mrb[142].mxu1 %vm206_vm6, %v19493_v55 }
0x4ae5   :  { %v17126_v7 = vpop.eup %17125  ;;  %12730 = vmatprep.mubr.f32.mxu0 %v17283_v11  ;;  %12819 = vmatprep.mubr.f32.mxu1 %v17283_v11 }
0x4ae6   :  { %v12586_v60 = vmul.f32 %v17126_v7, %v19469_v10  ;;  %16052 = vmatpush3.bf16.msra.mxu0 %v16051_v24  ;;  %16084 = vmatpush3.bf16.msra.mxu1 %v16083_v2  ;;  %v12978_v24 = vld [vmem:[#allocation7 + $0x5d8] sm:$0xff]  ;;  %v12929_v2 = vld [vmem:[#allocation7 + $0x450] sm:$0xff]  ;;  %v12980_v7 = vld [vmem:[#allocation7 + $0x5e8] sm:$0xff] }
0x4ae7   :  { %16054 = vmatprep.subr.bf16.mxu0 %v16053_v27  ;;  %16086 = vmatprep.subr.bf16.mxu1 %v16085_v37  ;;  %v16101_v40 = vpack.c.bf16 %v12978_v24, %v12977_v47  ;;  %v16071_v27 = vpack.c.bf16 %v12930_v30, %v12929_v2  ;;  %v12961_v37 = vld [vmem:[#allocation7 + $0x550] sm:$0xff] }
0x4ae8   :  { %13834 = vmatmul.mubr.msk.f32.gmra.mrb[142].mxu0 %vm206_vm6, %v19503_v43  ;;  %13838 = vmatmul.mubr.msk.f32.gmra.mrb[144].mxu1 %vm206_vm6, %v19503_v43  ;;  %v12596_v45 = vmul.f32 %v19482_v49, %v12586_v60  ;;  %v16103_v13 = vpack.c.bf16 %v12962_v58, %v12961_v37  ;;  %v12932_v60 = vld [vmem:[#allocation7 + $0x468] sm:$0xff] }
0x4ae9   :  { %v17128_v10 = vpop.eup %17127  ;;  %12736 = vmatprep.mubr.f32.mxu0 %v17283_v11  ;;  %12825 = vmatprep.mubr.f32.mxu1 %v17283_v11 }
0x4aea   :  { %v19514_v41 = vadd.f32 %v19488_v39, %v12596_v45  ;;  %v12587_v42 = vmul.f32 %v17128_v10, %v19473_v19  ;;  %16056 = vmatpush3.bf16.msra.mxu0 %v16055_v33  ;;  %16088 = vmatpush3.bf16.msra.mxu1 %v16087_v20  ;;  %v12941_v19 = vld [vmem:[#allocation7 + $0x4b0] sm:$0xff]  ;;  %v12931_v33 = vld [vmem:[#allocation7 + $0x460] sm:$0xff]  ;;  %v16105_v20 = vpack.c.bf16 %v12980_v7, %v12979_v36 }
0x4aeb   :  { %16058 = vmatprep.subr.bf16.mxu0 %v16057_v9  ;;  %16090 = vmatprep.subr.bf16.mxu1 %v16089_v0  ;;  %v16061_v32 = vpack.c.bf16 %v12942_v5, %v12941_v19  ;;  %v16075_v61 = vpack.c.bf16 %v12932_v60, %v12931_v33  ;;  %v12964_v9 = vld [vmem:[#allocation7 + $0x568] sm:$0xff]  ;;  %v12981_v45 = vld [vmem:[#allocation7 + $0x5f0] sm:$0xff]  ;;  %v16077_v10 = vpack.c.bf16 %v12950_v14, %v12949_v29 }
0x4aec   :  { %13835 = vmatmul.mubr.msk.f32.gmra.mrb[144].mxu0 %vm206_vm6, %v19514_v41  ;;  %13839 = vmatmul.mubr.msk.f32.gmra.mrb[146].mxu1 %vm206_vm6, %v19514_v41  ;;  %v12597_v50 = vmul.f32 %v19482_v49, %v12587_v42  ;;  %v12975_v49 = vld [vmem:[#allocation7 + $0x5c0] sm:$0xff]  ;;  %v16107_v0 = vpack.c.bf16 %v12964_v9, %v12963_v59  ;;  %v12933_v42 = vld [vmem:[#allocation7 + $0x470] sm:$0xff] }
0x4aed   :  { %12742 = vmatprep.mubr.f32.mxu0 %v17283_v11  ;;  %12831 = vmatprep.mubr.f32.mxu1 %v17283_v11  ;;  %v16063_v11 = vpack.c.bf16 %v12926_v56, %v12925_v6  ;;  %v12965_v5 = vld [vmem:[#allocation7 + $0x570] sm:$0xff]  ;;  %v12631_v6 = vrot.slane %v13832_v34, %v18119_v51  ;;  %v12639_v56 = vrot.slane %v13832_v34, %v18121_v52 }
0x4aee   :  { %v19525_v48 = vadd.f32 %v19488_v39, %v12597_v50  ;;  %16060 = vmatpush3.bf16.msra.mxu0 %v16059_v38  ;;  %16092 = vmatpush3.bf16.msra.mxu1 %v16091_v8  ;;  %v12976_v39 = vld [vmem:[#allocation7 + $0x5c8] sm:$0xff]  ;;  %v12982_v38 = vld [vmem:[#allocation7 + $0x5f8] sm:$0xff] }
0x4aef   :  { %16062 = vmatprep.subr.bf16.mxu0 %v16061_v32  ;;  %16094 = vmatprep.subr.bf16.mxu1 %v16093_v1  ;;  %v16097_v3 = vpack.c.bf16 %v12976_v39, %v12975_v49  ;;  %v12934_v8 = vld [vmem:[#allocation7 + $0x478] sm:$0xff]  ;;  %v16109_v50 = vpack.c.bf16 %v12982_v38, %v12981_v45  ;;  %v16111_v32 = vpack.c.bf16 %v12966_v54, %v12965_v5 }
0x4af0   :  { %13836 = vmatmul.mubr.msk.f32.gmra.mrb[146].mxu0 %vm206_vm6, %v19525_v48  ;;  %13840 = vmatmul.mubr.msk.f32.gmra.mrb[148].mxu1 %vm206_vm6, %v19525_v48  ;;  %v16079_v19 = vpack.c.bf16 %v12934_v8, %v12933_v42  ;;  %v12635_v1 = vrot.slane %v13832_v34, %v18126_v62 }
0x4af2   :  { %16064 = vmatpush3.bf16.msra.mxu0 %v16063_v11  ;;  %16096 = vmatpush3.bf16.msra.mxu1 %v16095_v12  ;;  %v12643_v11 = vrot.slane %v13832_v34, %v18128_v63 }
0x4af3   :  { %16066 = vmatprep.subr.bf16.mxu0 %v16065_v17  ;;  %16098 = vmatprep.subr.bf16.mxu1 %v16097_v3 }
0x4af6   :  { %16068 = vmatpush3.bf16.msra.mxu0 %v16067_v4  ;;  %16100 = vmatpush3.bf16.msra.mxu1 %v16099_v28 }
0x4af7   :  { %16070 = vmatprep.subr.bf16.mxu0 %v16069_v18  ;;  %16102 = vmatprep.subr.bf16.mxu1 %v16101_v40 }
0x4afa   :  { %16072 = vmatpush3.bf16.msra.mxu0 %v16071_v27  ;;  %16104 = vmatpush3.bf16.msra.mxu1 %v16103_v13 }
0x4afb   :  { %16074 = vmatprep.subr.bf16.mxu0 %v16073_v26  ;;  %16106 = vmatprep.subr.bf16.mxu1 %v16105_v20 }
0x4afe   :  { %16076 = vmatpush3.bf16.msra.mxu0 %v16075_v61  ;;  %16108 = vmatpush3.bf16.msra.mxu1 %v16107_v0 }
0x4aff   :  { %16078 = vmatprep.subr.bf16.mxu0 %v16077_v10  ;;  %16110 = vmatprep.subr.bf16.mxu1 %v16109_v50 }
0x4b02   :  { %16080 = vmatpush3.bf16.msra.mxu0 %v16079_v19  ;;  %16112 = vmatpush3.bf16.msra.mxu1 %v16111_v32 }
0x4bb7   :  { %v12726_v16 = vpop.f32.mrb[140].mxu0  ;;  %v12815_v44 = vpop.f32.mrb[142].mxu1 }
0x4bb8   :  { %v12727_v12 = vadd.f32 %v12726_v16, %v12631_v6  ;;  %v19538_v25 = vadd.f32 %v12815_v44, %v12639_v56  ;;  %v12728_v21 = vpop.f32.mrb[141].mxu0  ;;  %v12817_v49 = vpop.f32.mrb[143].mxu1 }
0x4bb9   :  { %v12729_v17 = vadd.f32 %v12728_v21, %v12635_v1  ;;  %v12818_v39 = vadd.f32 %v12817_v49, %v12643_v11 }
0x4bba   :  { %v12854_v31 = vmul.f32 0.70710677, %v12727_v12  ;;  %v12856_v35 = vmul.f32 0.70710677, %v19538_v25  ;;  %v12838_v42 = vmul.f32 0.5, %v12727_v12 }
0x4bbb   :  { %v12855_v3 = vmul.f32 0.70710677, %v12729_v17  ;;  %v12857_v51 = vmul.f32 0.70710677, %v12818_v39  ;;  %v12732_v52 = vpop.f32.mrb[142].mxu0  ;;  %v12821_v4 = vpop.f32.mrb[144].mxu1 }
0x4bbc   :  { %17129 = verf.f32 %v12854_v31  ;;  %v19541_v62 = vadd.f32 %v12732_v52, %v12631_v6  ;;  %v19543_v63 = vadd.f32 %v12821_v4, %v12639_v56  ;;  %v12734_v15 = vpop.f32.mrb[143].mxu0  ;;  %v12823_v23 = vpop.f32.mrb[145].mxu1  ;;  %v12839_v54 = vmul.f32 0.5, %v12729_v17 }
0x4bbd   :  { %17131 = verf.f32 %v12856_v35  ;;  %v19545_v28 = vadd.f32 %v12734_v15, %v12635_v1  ;;  %v19547_v46 = vadd.f32 %v12823_v23, %v12643_v11  ;;  %v12841_v34 = vmul.f32 0.5, %v12818_v39 }
0x4bbe   :  { %17133 = verf.f32 %v12855_v3  ;;  %v12858_v22 = vmul.f32 0.70710677, %v19541_v62  ;;  %v12860_v24 = vmul.f32 0.70710677, %v19543_v63  ;;  %v12842_v4 = vmul.f32 0.5, %v19541_v62 }
0x4bbf   :  { %17135 = verf.f32 %v12857_v51  ;;  %v12738_v47 = vpop.f32.mrb[144].mxu0  ;;  %v12827_v18 = vpop.f32.mrb[146].mxu1  ;;  %v12859_v2 = vmul.f32 0.70710677, %v19545_v28  ;;  %v12861_v30 = vmul.f32 0.70710677, %v19547_v46 }
0x4bc0   :  { %17137 = verf.f32 %v12858_v22  ;;  %v19553_v40 = vadd.f32 %v12738_v47, %v12631_v6  ;;  %v19555_v27 = vadd.f32 %v12827_v18, %v12639_v56  ;;  %v12740_v37 = vpop.f32.mrb[145].mxu0  ;;  %v12829_v58 = vpop.f32.mrb[147].mxu1  ;;  %v12843_v51 = vmul.f32 0.5, %v19545_v28 }
0x4bc1   :  { %17139 = verf.f32 %v12860_v24  ;;  %v19557_v13 = vadd.f32 %v12740_v37, %v12635_v1  ;;  %v19559_v57 = vadd.f32 %v12829_v58, %v12643_v11  ;;  %v12845_v15 = vmul.f32 0.5, %v19547_v46 }
0x4bc2   :  { %17141 = verf.f32 %v12859_v2  ;;  %v12862_v53 = vmul.f32 0.70710677, %v19553_v40  ;;  %v12864_v7 = vmul.f32 0.70710677, %v19555_v27  ;;  %v12844_v47 = vmul.f32 0.5, %v19543_v63 }
0x4bc3   :  { %v12744_v36 = vpop.f32.mrb[146].mxu0  ;;  %v12833_v26 = vpop.f32.mrb[148].mxu1  ;;  %17143 = verf.f32 %v12861_v30  ;;  %v12863_v33 = vmul.f32 0.70710677, %v19557_v13  ;;  %v12865_v20 = vmul.f32 0.70710677, %v19559_v57 }
0x4bc4   :  { %v12746_v60 = vpop.f32.mrb[147].mxu0  ;;  %17145 = verf.f32 %v12862_v53  ;;  %v19565_v61 = vadd.f32 %v12744_v36, %v12631_v6  ;;  %v12835_v59 = vpop.f32.mrb[149].mxu1  ;;  %v19567_v0 = vadd.f32 %v12833_v26, %v12639_v56  ;;  %v12847_v53 = vmul.f32 0.5, %v19557_v13 }
0x4bc5   :  { %17147 = verf.f32 %v12864_v7  ;;  %v19569_v29 = vadd.f32 %v12746_v60, %v12635_v1  ;;  %v19572_v10 = vadd.f32 %v12835_v59, %v12643_v11  ;;  %v12840_v11 = vmul.f32 0.5, %v19538_v25 }
0x4bc6   :  { %v17130_v9 = vpop.eup %17129  ;;  %17149 = verf.f32 %v12863_v33  ;;  %v12866_v45 = vmul.f32 0.70710677, %v19565_v61  ;;  %v12868_v50 = vmul.f32 0.70710677, %v19567_v0  ;;  %v12846_v46 = vmul.f32 0.5, %v19553_v40 }
0x4bc7   :  { %v17132_v14 = vpop.eup %17131  ;;  %v12886_v8 = vadd.f32 1.0, %v17130_v9  ;;  %17151 = verf.f32 %v12865_v20  ;;  %v12867_v56 = vmul.f32 0.70710677, %v19569_v29  ;;  %v12869_v16 = vmul.f32 0.70710677, %v19572_v10 }
0x4bc8   :  { %v17134_v38 = vpop.eup %17133  ;;  %v12888_v5 = vadd.f32 1.0, %v17132_v14  ;;  %17153 = verf.f32 %v12866_v45  ;;  %v12849_v7 = vmul.f32 0.5, %v19559_v57  ;;  %v12848_v60 = vmul.f32 0.5, %v19555_v27 }
0x4bc9   :  { %v17136_v19 = vpop.eup %17135  ;;  %v12887_v32 = vadd.f32 1.0, %v17134_v38  ;;  %17155 = verf.f32 %v12868_v50  ;;  %v12902_v21 = vmul.f32 %v12886_v8, %v12838_v42  ;;  %v12851_v40 = vmul.f32 0.5, %v19569_v29 }
0x4bca   :  { %v12889_v6 = vadd.f32 1.0, %v17136_v19  ;;  %v17138_v1 = vpop.eup %17137  ;;  %17157 = verf.f32 %v12867_v56  ;;  %v12904_v35 = vmul.f32 %v12888_v5, %v12840_v11  ;;  %v12850_v57 = vmul.f32 0.5, %v19565_v61  ;;  %v13842_v61 = vld [vmem:[%s19825_s28 + $0x2] ss:$0 sm:$0xff] }
0x4bcb   :  { %v12903_v44 = vmul.f32 %v12887_v32, %v12839_v54  ;;  %v17140_v12 = vpop.eup %17139  ;;  %v12890_v17 = vadd.f32 1.0, %v17138_v1  ;;  %17159 = verf.f32 %v12869_v16  ;;  %v12853_v50 = vmul.f32 0.5, %v19572_v10 }
0x4bcc   :  { %v12905_v49 = vmul.f32 %v12889_v6, %v12841_v34  ;;  %v17142_v31 = vpop.eup %17141  ;;  %v12892_v3 = vadd.f32 1.0, %v17140_v12  ;;  %v12852_v19 = vmul.f32 0.5, %v19567_v0 }
0x4bcd   :  { %13055 = vmatprep.mubr.f32.mxu0 %v12903_v44  ;;  %v17144_v39 = vpop.eup %17143  ;;  %v12891_v52 = vadd.f32 1.0, %v17142_v31  ;;  %v12906_v37 = vmul.f32 %v12890_v17, %v12842_v4 }
0x4bce   :  { %13140 = vmatprep.mubr.f32.mxu1 %v12905_v49  ;;  %13056 = vmatmul.mubr.f32.vlgmr.msra.gmra.mrb[148].mxu0 %v12902_v21  ;;  %v17146_v25 = vpop.eup %17145  ;;  %v12893_v23 = vadd.f32 1.0, %v17144_v39  ;;  %v12908_v26 = vmul.f32 %v12892_v3, %v12844_v47 }
0x4bcf   :  { %13141 = vmatmul.mubr.f32.vlgmr.msra.gmra.mrb[150].mxu1 %v12904_v35  ;;  %v17148_v22 = vpop.eup %17147  ;;  %v12907_v18 = vmul.f32 %v12891_v52, %v12843_v51  ;;  %v12894_v2 = vadd.f32 1.0, %v17146_v25 }
0x4bd0   :  { %v17150_v24 = vpop.eup %17149  ;;  %v12909_v30 = vmul.f32 %v12893_v23, %v12845_v15  ;;  %v12896_v28 = vadd.f32 1.0, %v17148_v22 }
0x4bd1   :  { %v17152_v58 = vpop.eup %17151  ;;  %v12895_v36 = vadd.f32 1.0, %v17150_v24  ;;  %13060 = vmatprep.mubr.f32.mxu0 %v12907_v18  ;;  %v12910_v9 = vmul.f32 %v12894_v2, %v12846_v46 }
0x4bd2   :  { %v17154_v62 = vpop.eup %17153  ;;  %v12897_v33 = vadd.f32 1.0, %v17152_v58  ;;  %13145 = vmatprep.mubr.f32.mxu1 %v12909_v30  ;;  %13061 = vmatmul.mubr.f32.gmra.mrb[150].mxu0 %v12906_v37  ;;  %v12912_v45 = vmul.f32 %v12896_v28, %v12848_v60 }
0x4bd3   :  { %v17156_v63 = vpop.eup %17155  ;;  %13146 = vmatmul.mubr.f32.gmra.mrb[152].mxu1 %v12908_v26  ;;  %v12911_v20 = vmul.f32 %v12895_v36, %v12847_v53  ;;  %v12898_v13 = vadd.f32 1.0, %v17154_v62 }
0x4bd4   :  { %v12913_v59 = vmul.f32 %v12897_v33, %v12849_v7  ;;  %v17158_v14 = vpop.eup %17157  ;;  %v12900_v42 = vadd.f32 1.0, %v17156_v63 }
0x4bd5   :  { %13065 = vmatprep.mubr.f32.mxu0 %v12911_v20  ;;  %v17160_v38 = vpop.eup %17159  ;;  %v12899_v8 = vadd.f32 1.0, %v17158_v14  ;;  %v12914_v32 = vmul.f32 %v12898_v13, %v12850_v57 }
0x4bd6   :  { %13150 = vmatprep.mubr.f32.mxu1 %v12913_v59  ;;  %13066 = vmatmul.mubr.f32.gmra.mrb[152].mxu0 %v12910_v9  ;;  %v12901_v27 = vadd.f32 1.0, %v17160_v38  ;;  %v12916_v34 = vmul.f32 %v12900_v42, %v12852_v19 }
0x4bd7   :  { %13151 = vmatmul.mubr.f32.gmra.mrb[154].mxu1 %v12912_v45  ;;  %v12915_v5 = vmul.f32 %v12899_v8, %v12851_v40 }
0x4bd8   :  { %v12917_v54 = vmul.f32 %v12901_v27, %v12853_v50 }
0x4bd9   :  { %13070 = vmatprep.mubr.f32.mxu0 %v12915_v5 }
0x4bda   :  { %13155 = vmatprep.mubr.f32.mxu1 %v12917_v54  ;;  %13071 = vmatmul.mubr.f32.gmra.mrb[154].mxu0 %v12914_v32 }
0x4bdb   :  { %13156 = vmatmul.mubr.f32.gmra.mrb[156].mxu1 %v12916_v34 }
0x4ca1   :  { %v14498_v29 = vpop.f32.mrb[148].mxu0 }
0x4ca2   :  { %v14542_v6 = vpop.f32.mrb[150].mxu1  ;;  %v14499_v56 = vpop.f32.mrb[149].mxu0 }
0x4ca3   :  { %v14500_v10 = vadd.f32 %v14499_v56, %v14498_v29  ;;  %v14543_v1 = vpop.f32.mrb[151].mxu1 }
0x4ca4   :  { %v14544_v11 = vadd.f32 %v14543_v1, %v14542_v6 }
0x4ca5   :  { %v13058_v16 = vadd.f32 %v14500_v10, %v13842_v61  ;;  %v14501_v0 = vpop.f32.mrb[150].mxu0 }
0x4ca6   :  { %v14545_v12 = vpop.f32.mrb[152].mxu1  ;;  %v14502_v21 = vpop.f32.mrb[151].mxu0 }
0x4ca7   :  { %v13143_v44 = vadd.f32 %v14544_v11, %v13058_v16  ;;  %v14503_v49 = vadd.f32 %v14502_v21, %v14501_v0  ;;  %v14546_v31 = vpop.f32.mrb[153].mxu1 }
0x4ca8   :  { %v14547_v35 = vadd.f32 %v14546_v31, %v14545_v12 }
0x4ca9   :  { %v13161_v17 = vadd.f32 %v13143_v44, %v19493_v55  ;;  %v13063_v39 = vadd.f32 %v14503_v49, %v13842_v61  ;;  %v14504_v3 = vpop.f32.mrb[152].mxu0  ;;  %v13845_v44 = vld [vmem:[%s19666_s10 + $0x2] ss:$0 sm:$0xff] }
0x4caa   :  { %v14548_v51 = vpop.f32.mrb[154].mxu1  ;;  %v14505_v52 = vpop.f32.mrb[153].mxu0  ;;  %v13846_v49 = vld [vmem:[%s19667_s11 + $0x2] ss:$0 sm:$0xff] }
0x4cab   :  { %v13169_v25 = vsel %vm206_vm6, %v13161_v17, 0.0  ;;  %v13148_v4 = vadd.f32 %v14547_v35, %v13063_v39  ;;  %v14506_v15 = vadd.f32 %v14505_v52, %v14504_v3  ;;  %v14549_v23 = vpop.f32.mrb[155].mxu1 }
0x4cac   :  { %13170 = vadd.xlane.f32.xlu1 %v13169_v25  ;;  %v14550_v22 = vadd.f32 %v14549_v23, %v14548_v51 }
0x4cad   :  { %v13068_v47 = vadd.f32 %v14506_v15, %v13842_v61  ;;  %v13162_v18 = vadd.f32 %v13148_v4, %v19503_v43  ;;  %v14507_v24 = vpop.f32.mrb[154].mxu0 }
0x4cae   :  { %v14551_v30 = vpop.f32.mrb[156].mxu1  ;;  %v14508_v37 = vpop.f32.mrb[155].mxu0 }
0x4caf   :  { %v13153_v2 = vadd.f32 %v14550_v22, %v13068_v47  ;;  %v13172_v55 = vsel %vm206_vm6, %v13162_v18, 0.0  ;;  %v14509_v58 = vadd.f32 %v14508_v37, %v14507_v24  ;;  %v14552_v28 = vpop.f32.mrb[157].mxu1 }
0x4cb0   :  { %13173 = vadd.xlane.f32.xlu0 %v13172_v55  ;;  %v14553_v53 = vadd.f32 %v14552_v28, %v14551_v30 }
0x4cb1   :  { %v13163_v36 = vadd.f32 %v13153_v2, %v19514_v41  ;;  %v13073_v26 = vadd.f32 %v14509_v58, %v13842_v61 }
0x4cb3   :  { %v13175_v62 = vsel %vm206_vm6, %v13163_v36, 0.0  ;;  %v13158_v46 = vadd.f32 %v14553_v53, %v13073_v26 }
0x4cb4   :  { %13176 = vadd.xlane.f32.xlu1 %v13175_v62 }
0x4cb5   :  { %v13164_v7 = vadd.f32 %v13158_v46, %v19525_v48 }
0x4cb7   :  { %v13178_v43 = vsel %vm206_vm6, %v13164_v7, 0.0 }
0x4cb8   :  { %13179 = vadd.xlane.f32.xlu0 %v13178_v43 }
0x4d39   :  { %v13171_v33 = vpop.xlane.xlu1 %13170 }
0x4d3a   :  { %v13181_v63 = vmul.f32 0.03125, %v13171_v33 }
0x4d3c   :  { %v13185_v60 = vsub.f32 %v13161_v17, %v13181_v63 }
0x4d3d   :  { %v13174_v20 = vpop.xlane.xlu0 %13173 }
0x4d3e   :  { %v13189_v59 = vmul.f32 %v13185_v60, %v13185_v60  ;;  %v13182_v9 = vmul.f32 0.03125, %v13174_v20 }
0x4d40   :  { %v13193_v14 = vsel %vm206_vm6, %v13189_v59, 0.0  ;;  %v13186_v13 = vsub.f32 %v13162_v18, %v13182_v9 }
0x4d41   :  { %13194 = vadd.xlane.f32.xlu1 %v13193_v14  ;;  %v13177_v41 = vpop.xlane.xlu1 %13176 }
0x4d42   :  { %v13183_v45 = vmul.f32 0.03125, %v13177_v41  ;;  %v13190_v38 = vmul.f32 %v13186_v13, %v13186_v13 }
0x4d44   :  { %v13187_v42 = vsub.f32 %v13163_v36, %v13183_v45  ;;  %v13196_v40 = vsel %vm206_vm6, %v13190_v38, 0.0  ;;  %v13323_v38 = vld [vmem:[#allocation9] sm:$0xff] }
0x4d45   :  { %13197 = vadd.xlane.f32.xlu0 %v13196_v40  ;;  %v13180_v48 = vpop.xlane.xlu0 %13179 }
0x4d46   :  { %v13191_v8 = vmul.f32 %v13187_v42, %v13187_v42  ;;  %v13184_v57 = vmul.f32 0.03125, %v13180_v48  ;;  %v13325_v48 = vld [vmem:[#allocation9 + $0x10] sm:$0xff] }
0x4d48   :  { %v13199_v50 = vsel %vm206_vm6, %v13191_v8, 0.0  ;;  %v13188_v27 = vsub.f32 %v13164_v7, %v13184_v57  ;;  %v13326_v8 = vld [vmem:[#allocation9 + $0x18] sm:$0xff] }
0x4d49   :  { %13200 = vadd.xlane.f32.xlu1 %v13199_v50  ;;  %v16117_v57 = vpack.c.bf16 %v13326_v8, %v13325_v48 }
0x4d4a   :  { %v13192_v19 = vmul.f32 %v13188_v27, %v13188_v27 }
0x4d4c   :  { %v13202_v5 = vsel %vm206_vm6, %v13192_v19, 0.0 }
0x4d4d   :  { %13203 = vadd.xlane.f32.xlu0 %v13202_v5 }
0x4dce   :  { %v13195_v54 = vpop.xlane.xlu1 %13194 }
0x4dcf   :  { %v13205_v32 = vmul.f32 0.03125, %v13195_v54 }
0x4dd1   :  { %v13209_v34 = vadd.f32 1e-05, %v13205_v32 }
0x4dd2   :  { %v13198_v29 = vpop.xlane.xlu0 %13197 }
0x4dd3   :  { %17161 = vrsqrt.f32 %v13209_v34  ;;  %v13206_v6 = vmul.f32 0.03125, %v13198_v29 }
0x4dd5   :  { %v13210_v61 = vadd.f32 1e-05, %v13206_v6 }
0x4dd6   :  { %v13201_v56 = vpop.xlane.xlu1 %13200 }
0x4dd7   :  { %17163 = vrsqrt.f32 %v13210_v61  ;;  %v13207_v10 = vmul.f32 0.03125, %v13201_v56 }
0x4dd9   :  { %v13211_v1 = vadd.f32 1e-05, %v13207_v10 }
0x4dda   :  { %v13204_v11 = vpop.xlane.xlu0 %13203 }
0x4ddb   :  { %17165 = vrsqrt.f32 %v13211_v1  ;;  %v13208_v0 = vmul.f32 0.03125, %v13204_v11  ;;  %v13847_v1 = vld [vmem:[%s19826_s1] ss:$0 sm:$0xff] }
0x4ddd   :  { %v17162_v16 = vpop.eup %17161  ;;  %v13212_v21 = vadd.f32 1e-05, %v13208_v0  ;;  %v13848_v0 = vld [vmem:[%s19827_s12] ss:$0 sm:$0xff] }
0x4dde   :  { %v13217_v12 = vmul.f32 %v17162_v16, %v13185_v60 }
0x4ddf   :  { %17167 = vrsqrt.f32 %v13212_v21 }
0x4de0   :  { %v13227_v31 = vmul.f32 %v13845_v44, %v13217_v12 }
0x4de1   :  { %v17164_v35 = vpop.eup %17163 }
0x4de2   :  { %v13237_v17 = vadd.f32 %v13846_v49, %v13227_v31  ;;  %v13218_v39 = vmul.f32 %v17164_v35, %v13186_v13 }
0x4de4   :  { %v13243_v3 = vsel %vm206_vm6, %v13237_v17, 0.0  ;;  %v13228_v51 = vmul.f32 %v13845_v44, %v13218_v39 }
0x4de5   :  { %13244 = vadd.xlane.f32.xlu1 %v13243_v3  ;;  %v17166_v52 = vpop.eup %17165 }
0x4de6   :  { %v13238_v25 = vadd.f32 %v13846_v49, %v13228_v51  ;;  %v13219_v4 = vmul.f32 %v17166_v52, %v13187_v42  ;;  %v13324_v42 = vld [vmem:[#allocation9 + $0x8] sm:$0xff] }
0x4de7   :  { %v16113_v40 = vpack.c.bf16 %v13324_v42, %v13323_v38 }
0x4de8   :  { %v13246_v15 = vsel %vm206_vm6, %v13238_v25, 0.0  ;;  %v13229_v23 = vmul.f32 %v13845_v44, %v13219_v4 }
0x4de9   :  { %13247 = vadd.xlane.f32.xlu0 %v13246_v15  ;;  %v17168_v22 = vpop.eup %17167  ;;  %16114 = vmatprep.subr.bf16.mxu0 %v16113_v40 }
0x4dea   :  { %v13239_v47 = vadd.f32 %v13846_v49, %v13229_v23  ;;  %v13220_v18 = vmul.f32 %v17168_v22, %v13188_v27  ;;  %16116 = vmatpush3.bf16.msra.mxu0 %v16113_v40 }
0x4deb   :  { %16118 = vmatprep.subr.bf16.mxu0 %v16117_v57 }
0x4dec   :  { %v13249_v24 = vsel %vm206_vm6, %v13239_v47, 0.0  ;;  %v13230_v2 = vmul.f32 %v13845_v44, %v13220_v18 }
0x4ded   :  { %13250 = vadd.xlane.f32.xlu1 %v13249_v24 }
0x4dee   :  { %v13240_v30 = vadd.f32 %v13846_v49, %v13230_v2  ;;  %16120 = vmatpush3.bf16.msra.mxu0 %v16117_v57 }
0x4df0   :  { %v13252_v37 = vsel %vm206_vm6, %v13240_v30, 0.0 }
0x4df1   :  { %13253 = vadd.xlane.f32.xlu0 %v13252_v37 }
0x4e72   :  { %v13245_v55 = vpop.xlane.xlu1 %13244 }
0x4e73   :  { %v13255_v58 = vmul.f32 0.03125, %v13245_v55 }
0x4e75   :  { %v13259_v28 = vsub.f32 %v13237_v17, %v13255_v58 }
0x4e76   :  { %v13248_v53 = vpop.xlane.xlu0 %13247 }
0x4e77   :  { %v13263_v36 = vmul.f32 %v13259_v28, %v13259_v28  ;;  %v13256_v26 = vmul.f32 0.03125, %v13248_v53 }
0x4e79   :  { %v13267_v62 = vsel %vm206_vm6, %v13263_v36, 0.0  ;;  %v13260_v46 = vsub.f32 %v13238_v25, %v13256_v26 }
0x4e7a   :  { %13268 = vadd.xlane.f32.xlu1 %v13267_v62  ;;  %v13251_v7 = vpop.xlane.xlu1 %13250 }
0x4e7b   :  { %v13257_v43 = vmul.f32 0.03125, %v13251_v7  ;;  %v13264_v33 = vmul.f32 %v13260_v46, %v13260_v46 }
0x4e7d   :  { %v13261_v63 = vsub.f32 %v13239_v47, %v13257_v43  ;;  %v13270_v60 = vsel %vm206_vm6, %v13264_v33, 0.0 }
0x4e7e   :  { %13271 = vadd.xlane.f32.xlu0 %v13270_v60  ;;  %v13254_v20 = vpop.xlane.xlu0 %13253 }
0x4e7f   :  { %v13265_v59 = vmul.f32 %v13261_v63, %v13261_v63  ;;  %v13258_v9 = vmul.f32 0.03125, %v13254_v20 }
0x4e81   :  { %v13273_v14 = vsel %vm206_vm6, %v13265_v59, 0.0  ;;  %v13262_v13 = vsub.f32 %v13240_v30, %v13258_v9 }
0x4e82   :  { %13274 = vadd.xlane.f32.xlu1 %v13273_v14 }
0x4e83   :  { %v13266_v41 = vmul.f32 %v13262_v13, %v13262_v13 }
0x4e85   :  { %v13276_v45 = vsel %vm206_vm6, %v13266_v41, 0.0 }
0x4e86   :  { %13277 = vadd.xlane.f32.xlu0 %v13276_v45 }
0x4f07   :  { %v13269_v50 = vpop.xlane.xlu1 %13268 }
0x4f08   :  { %v13279_v27 = vmul.f32 0.03125, %v13269_v50 }
0x4f0a   :  { %v13283_v19 = vadd.f32 1e-05, %v13279_v27 }
0x4f0b   :  { %v13272_v5 = vpop.xlane.xlu0 %13271 }
0x4f0c   :  { %17169 = vrsqrt.f32 %v13283_v19  ;;  %v13280_v54 = vmul.f32 0.03125, %v13272_v5 }
0x4f0e   :  { %v13284_v32 = vadd.f32 1e-05, %v13280_v54 }
0x4f0f   :  { %v13275_v34 = vpop.xlane.xlu1 %13274 }
0x4f10   :  { %17171 = vrsqrt.f32 %v13284_v32  ;;  %v13281_v29 = vmul.f32 0.03125, %v13275_v34 }
0x4f12   :  { %v13285_v6 = vadd.f32 1e-05, %v13281_v29 }
0x4f13   :  { %v13278_v61 = vpop.xlane.xlu0 %13277 }
0x4f14   :  { %17173 = vrsqrt.f32 %v13285_v6  ;;  %v13282_v10 = vmul.f32 0.03125, %v13278_v61 }
0x4f16   :  { %v17170_v56 = vpop.eup %17169  ;;  %v13286_v16 = vadd.f32 1e-05, %v13282_v10 }
0x4f17   :  { %v13291_v11 = vmul.f32 %v17170_v56, %v13259_v28 }
0x4f18   :  { %17175 = vrsqrt.f32 %v13286_v16 }
0x4f19   :  { %v13301_v44 = vmul.f32 %v13847_v1, %v13291_v11 }
0x4f1a   :  { %v17172_v12 = vpop.eup %17171 }
0x4f1b   :  { %v13311_v21 = vadd.f32 %v13848_v0, %v13301_v44  ;;  %v13292_v49 = vmul.f32 %v17172_v12, %v13260_v46 }
0x4f1d   :  { %15333 = vmatprep.mubr.msk.f32.mxu0 %vm206_vm6, %v13311_v21  ;;  %v13302_v31 = vmul.f32 %v13847_v1, %v13292_v49 }
0x4f1e   :  { %v17174_v35 = vpop.eup %17173 }
0x4f1f   :  { %v13312_v17 = vadd.f32 %v13848_v0, %v13302_v31  ;;  %v13293_v39 = vmul.f32 %v17174_v35, %v13261_v63 }
0x4f21   :  { %15334 = vmatmul.mubr.msk.f32.vlgmr.msra.gmra.mrb[156].mxu0 %vm206_vm6, %v13312_v17  ;;  %v13303_v3 = vmul.f32 %v13847_v1, %v13293_v39 }
0x4f22   :  { %v17176_v51 = vpop.eup %17175 }
0x4f23   :  { %v13313_v52 = vadd.f32 %v13848_v0, %v13303_v3  ;;  %v13294_v25 = vmul.f32 %v17176_v51, %v13262_v13 }
0x4f25   :  { %15336 = vmatprep.mubr.msk.f32.mxu0 %vm206_vm6, %v13313_v52  ;;  %v13317_v4 = vrot.slane %v13313_v52, 7  ;;  %v13304_v15 = vmul.f32 %v13847_v1, %v13294_v25 }
0x4f27   :  { %v13319_v23 = vsel %vm13318_vm2, %v13317_v4, %v13311_v21  ;;  %v13314_v22 = vadd.f32 %v13848_v0, %v13304_v15 }
0x4f28   :  { %13322 = vst.msk [vmem:[#allocation10] sm:$0x3] %vm13321_vm3, %v13319_v23 }
0x4f29   :  { %15337 = vmatmul.mubr.msk.f32.gmra.mrb[158].mxu0 %vm206_vm6, %v13314_v22 }
0x4f2a   :  { %17258 = shalt.err (!%p17255_p0)
}
0x4f2b   :  { %s19828_s3 = sld [smem:[#allocation24_spill]] }
0x4f31   :  { %s17259_s18 = scalar_lea.hbm %s19828_s3, 32 }
0x4f32   :  { %p17260_p1 = scmp.ne.s32.totalorder %s19828_s3, %s17259_s18  ;;  %p17263_p2 = scmp.lt.u32.totalorder %s17259_s18, %s19828_s3 }
0x4f34   :  { %p17265_p3 = pnand %p17263_p2, %p17260_p1 }
0x4f36   :  { %17268 = shalt.err (!%p17265_p3)
}
0x4f37   :  { %13444 = dma.vmem_to_hbm [thread:$0]  %s13442_s20, 32, %s19828_s3, [#allocation6]   ;;  %vm13431_vm4 = vcmask 24576   ;;  %vm13429_vm5 = vcmask 31745  }
0x4f38   :  { %s19829_s30 = sld [smem:[#allocation23_spill]]  ;;  %s19830_s13 = sld [smem:[#allocation25_spill]] }
0x4f3e   :  { %v13849_v47 = vld [vmem:[%s19829_s30] ss:$0 sm:$0xff] }
0x4ff4   :  { %v15335_v18 = vpop.f32.mrb[156].mxu0 }
0x4ff5   :  { %v13416_v24 = vadd.f32 %v15335_v18, %v13849_v47  ;;  %v13410_v2 = vpop.f32.mrb[157].mxu0 }
0x4ff6   :  { %v13411_v30 = vadd.f32 %v13849_v47, %v13410_v2 }
0x4ff7   :  { %13432 = vst.msk [vmem:[%s19830_s13 + $0x7] sm:$0x1] %vm13431_vm4, %v13416_v24 }
0x4ff8   :  { %13430 = vst.msk [vmem:[%s19830_s13 - $0x1] sm:$0xfe] %vm13429_vm5, %v13411_v30 }
0x4ffc   :  { %v15338_v37 = vpop.f32.mrb[158].mxu0 }
0x4ffd   :  { %v13426_v55 = vadd.f32 %v15338_v37, %v13849_v47  ;;  %v13420_v58 = vpop.f32.mrb[159].mxu0 }
0x4ffe   :  { %v13421_v28 = vadd.f32 %v13849_v47, %v13420_v58 }
0x4fff   :  { %13434 = vst.msk [vmem:[%s19830_s13 + $0xf] sm:$0x1] %vm13431_vm4, %v13426_v55 }
0x5000   :  { %13433 = vst.msk [vmem:[%s19830_s13 + $0x7] sm:$0xfe] %vm13429_vm5, %v13421_v28 }
0x5001   :  { %17273 = dma.done.wait [#allocation6], 32  }
0x5002   :  { %17274 = vsyncadd [#allocation6], 4294967264 }
0x5003   :  { %13452 = vsyncpa [#allocation5], 1 }
0x5004   :  { %13453 = vsyncpa [#allocation8], 1 }
0x5005   :  { %13454 = vsyncpa [#allocation6], 1 }

</bundles_post_ra>
